<compile_context>
chip_gen: v5e
topology: v5e:2x2
jax: 0.10.0
libtpu: 0.0.40
codegen_flags: <defaults>
</compile_context>

<pallas_src>
import functools

import jax
import jax.numpy as jnp
import numpy as np
from jax.experimental import pallas as pl
from jax.experimental.pallas import tpu as pltpu


# ---------------------------------------------------------------------------
# Fused Pallas kernel (one grid step = one block of `block_batch` images)
# ---------------------------------------------------------------------------
def fused_net_kernel(x_ref, wb1_ref, b1r_ref, sel1_ref, wb2_ref, b2r_ref,
                     wfc1_ref, bfc1_ref, wfc2_ref, bfc2_ref, out_ref,
                     *, block_batch):
    f32 = jnp.float32
    rows = block_batch * 32          # 32 padded rows per image in this block

    def shift_rows(a, k):
        # out[r, :] = a[r + k, :] (cyclic).  Wrapped rows only ever land on
        # junk rows (each sample owns 32 rows and never reads past row 27 of
        # its own slab), so the wrap is harmless.
        # TODO(synk): replace with pltpu.roll(a, rows - k, axis=0) (XLU slot).
        if k == 0:
            return a
        return jnp.concatenate([a[k:, :], a[:k, :]], axis=0)

    x = x_ref[...]                                           # (rows, 28)

    # ---- conv1 (5x5 VALID, 1 -> 10) as 5 banded matmuls ---------------------
    # valid rows: n*32 + i, i in [0,24); lanes: j*10 + oc
    y1 = jnp.dot(x, wb1_ref[0], preferred_element_type=f32) + b1r_ref[...]
    for di in range(1, 5):
        y1 = y1 + jnp.dot(shift_rows(x, di), wb1_ref[di],
                          preferred_element_type=f32)

    # ---- 2x2 max-pool + ReLU -------------------------------------------------
    mw = jnp.maximum(y1[:, 0:230], y1[:, 10:240])            # width-pair max
    ms = jnp.dot(mw, sel1_ref[...], preferred_element_type=f32)  # keep even cols
    p1 = jnp.maximum(jnp.maximum(ms, shift_rows(ms, 1)), 0.0)
    # p1 valid rows: n*32 + 2*i, i in [0,12); lanes: jp*10 + c

    # ---- conv2 (5x5 VALID, 10 -> 20) as 5 banded matmuls --------------------
    # TODO(synk): nn.Dropout2d after conv2 is inference-mode identity here.
    y2 = jnp.dot(p1, wb2_ref[0], preferred_element_type=f32) + b2r_ref[...]
    for di in range(1, 5):
        y2 = y2 + jnp.dot(shift_rows(p1, 2 * di), wb2_ref[di],
                          preferred_element_type=f32)
    # y2 valid rows: n*32 + 2*i2, i2 in [0,8); lanes: j*20 + oc

    # ---- 2x2 max-pool + ReLU -------------------------------------------------
    mw2 = jnp.maximum(y2[:, 0:140], y2[:, 20:160])           # width-pair max
    mh2 = jnp.maximum(jnp.maximum(mw2, shift_rows(mw2, 2)), 0.0)
    # mh2 valid rows: n*32 + 4*ip, ip in [0,4); valid lanes: 40*jp + oc

    # ---- fc1 + ReLU (batched over the whole block) ---------------------------
    # TODO(synk): F.dropout before fc2 is inference-mode identity here.
    h = jnp.dot(mh2, wfc1_ref[0], preferred_element_type=f32) + bfc1_ref[...]
    for ip in range(1, 4):
        h = h + jnp.dot(shift_rows(mh2, 4 * ip), wfc1_ref[ip],
                        preferred_element_type=f32)
    h = jnp.maximum(h, 0.0)                                   # valid rows: n*32

    # ---- fc2 + log_softmax (batched) -----------------------------------------
    logits = jnp.dot(h, wfc2_ref[...], preferred_element_type=f32) + bfc2_ref[...]
    m = jnp.max(logits, axis=-1, keepdims=True)
    s = logits - m
    lse = jnp.log(jnp.sum(jnp.exp(s), axis=-1, keepdims=True))
    out_ref[...] = s - lse                                    # (rows, 10)


# ---------------------------------------------------------------------------
# One-time host-side weight packing (batch-size independent)
# ---------------------------------------------------------------------------
def pack_params(p):
    w1 = np.asarray(p["w1"], np.float32)      # (10, 1, 5, 5)
    b1 = np.asarray(p["b1"], np.float32)
    w2 = np.asarray(p["w2"], np.float32)      # (20, 10, 5, 5)
    b2 = np.asarray(p["b2"], np.float32)
    fw1 = np.asarray(p["fw1"], np.float32)    # (50, 320)
    fb1 = np.asarray(p["fb1"], np.float32)
    fw2 = np.asarray(p["fw2"], np.float32)    # (10, 50)
    fb2 = np.asarray(p["fb2"], np.float32)

    # conv1 band: wb1[di, w, j*10+oc] = w1[oc, 0, di, w-j] for 0 <= w-j < 5.
    wb1 = np.zeros((5, 28, 24, 10), np.float32)
    for di in range(5):
        for dj in range(5):
            for j in range(24):
                wb1[di, j + dj, j, :] = w1[:, 0, di, dj]
    wb1 = wb1.reshape(5, 28, 240)
    b1row = np.tile(b1, 24).reshape(1, 240)

    # pool1 lane selector: keep the channel group of every even output column.
    sel1 = np.zeros((230, 120), np.float32)
    for jp in range(12):
        for c in range(10):
            sel1[20 * jp + c, 10 * jp + c] = 1.0

    # conv2 band: wb2[di, jj*10+c, j*20+oc] = w2[oc, c, di, jj-j] for 0 <= jj-j < 5.
    wb2 = np.zeros((5, 12, 10, 8, 20), np.float32)
    for di in range(5):
        for dj in range(5):
            for j in range(8):
                wb2[di, j + dj, :, j, :] = w2[:, :, di, dj].T      # (c, oc)
    wb2 = wb2.reshape(5, 120, 160)
    b2row = np.tile(b2, 8).reshape(1, 160)

    # fc1 packed to consume pooled conv2 lanes (40*jp + oc) directly; folds
    # torch's NCHW x.view(-1, 320) ordering into the weights; junk lanes are 0.
    wfc1 = np.zeros((4, 7, 20, 50), np.float32)
    for ip in range(4):
        for jp in range(4):
            for oc in range(20):
                wfc1[ip, 2 * jp, oc, :] = fw1[:, oc * 16 + ip * 4 + jp]
    wfc1 = wfc1.reshape(4, 140, 50)
    bfc1 = fb1.reshape(1, 50)

    wfc2 = np.ascontiguousarray(fw2.T)        # (50, 10)
    bfc2 = fb2.reshape(1, 10)

    packed = (wb1, b1row, sel1, wb2, b2row, wfc1, bfc1, wfc2, bfc2)
    return tuple(jnp.asarray(a) for a in packed)


# ---------------------------------------------------------------------------
# Wrapper: batch grid + resident weights
# ---------------------------------------------------------------------------
def net_forward(x_nchw, packed, *, block_batch=8):
    n = x_nchw.shape[0]
    assert x_nchw.shape[1:] == (1, 28, 28), x_nchw.shape
    npad = pl.cdiv(n, block_batch) * block_batch

    # Pad each image to 32 rows (sublane-tile aligned) and pad the batch to a
    # multiple of the block size; padding is zeros and its outputs are dropped.
    x = x_nchw.astype(jnp.float32).reshape(n, 28, 28)
    x = jnp.pad(x, ((0, npad - n), (0, 4), (0, 0)))
    x2d = x.reshape(npad * 32, 28)

    rows = block_batch * 32
    kernel = functools.partial(fused_net_kernel, block_batch=block_batch)

    def const_spec(arr):  # whole weight resident in VMEM across the grid
        return pl.BlockSpec(arr.shape, lambda i, _nd=arr.ndim: (0,) * _nd)

    out_full = pl.pallas_call(
        kernel,
        out_shape=jax.ShapeDtypeStruct((npad * 32, 10), jnp.float32),
        grid=(npad // block_batch,),
        in_specs=[pl.BlockSpec((rows, 28), lambda i: (i, 0))]
                 + [const_spec(w) for w in packed],
        out_specs=pl.BlockSpec((rows, 10), lambda i: (i, 0)),
        compiler_params=pltpu.CompilerParams(
            dimension_semantics=("parallel",),
            vmem_limit_bytes=32 * 1024 * 1024),
    )(x2d, *packed)

    # Valid logits live on row n*32 of each sample slab; picking them is a
    # free strided slice outside the kernel.
    return out_full.reshape(npad, 32, 10)[:n, 0, :]


# ---------------------------------------------------------------------------
# Params + pure-JAX reference
# ---------------------------------------------------------------------------
def init_params():
    ks = jax.random.split(jax.random.PRNGKey(0), 8)
    return dict(
        w1=0.1 * jax.random.normal(ks[0], (10, 1, 5, 5), jnp.float32),
        b1=0.1 * jax.random.normal(ks[1], (10,), jnp.float32),
        w2=0.1 * jax.random.normal(ks[2], (20, 10, 5, 5), jnp.float32),
        b2=0.1 * jax.random.normal(ks[3], (20,), jnp.float32),
        fw1=0.1 * jax.random.normal(ks[4], (50, 320), jnp.float32),
        fb1=0.1 * jax.random.normal(ks[5], (50,), jnp.float32),
        fw2=0.1 * jax.random.normal(ks[6], (10, 50), jnp.float32),
        fb2=0.1 * jax.random.normal(ks[7], (10,), jnp.float32),
    )


def reference_forward(x_nchw, p):
    """Pure-JAX (non-Pallas) reference, NCHW like PyTorch (eval mode)."""
    def conv(x, w, b):
        y = jax.lax.conv_general_dilated(
            x, w, (1, 1), "VALID",
            dimension_numbers=("NCHW", "OIHW", "NCHW"))
        return y + b[None, :, None, None]

    def pool2(x):
        n, c, h, w = x.shape
        return x.reshape(n, c, h // 2, 2, w // 2, 2).max(axis=(3, 5))

    x = x_nchw.astype(jnp.float32)
    y = jnp.maximum(pool2(conv(x, p["w1"], p["b1"])), 0.0)
    y = jnp.maximum(pool2(conv(y, p["w2"], p["b2"])), 0.0)
    flat = y.reshape(y.shape[0], -1)
    h = jnp.maximum(flat @ p["fw1"].T + p["fb1"], 0.0)
    logits = h @ p["fw2"].T + p["fb2"]
    return jax.nn.log_softmax(logits, axis=-1)


if __name__ == "__main__":
    N, B = 16, 8  # MNIST-style 1x28x28 input (the 320-feature flatten requires it)
    params = init_params()
    packed = pack_params(params)
    x = jax.random.normal(jax.random.PRNGKey(0), (N, 1, 28, 28), jnp.float32)

    fwd = jax.jit(functools.partial(net_forward, block_batch=B))
    out = jax.block_until_ready(fwd(x, packed))

    ref = reference_forward(x, params)
    assert out.shape == (N, 10), out.shape
    assert jnp.allclose(out, ref, atol=1e-3, rtol=1e-3), (out, ref)
    print("KERNEL_OK")
</pallas_src>

<mosaic_0001>
module attributes {stable_mosaic.version = 11 : i64} {
  func.func @fused_net_kernel(%arg0: i32, %arg1: memref<256x28xf32, #tpu.memory_space<vmem>>, %arg2: memref<5x28x240xf32, #tpu.memory_space<vmem>>, %arg3: memref<1x240xf32, #tpu.memory_space<vmem>>, %arg4: memref<230x120xf32, #tpu.memory_space<vmem>>, %arg5: memref<5x120x160xf32, #tpu.memory_space<vmem>>, %arg6: memref<1x160xf32, #tpu.memory_space<vmem>>, %arg7: memref<4x140x50xf32, #tpu.memory_space<vmem>>, %arg8: memref<1x50xf32, #tpu.memory_space<vmem>>, %arg9: memref<50x10xf32, #tpu.memory_space<vmem>>, %arg10: memref<1x10xf32, #tpu.memory_space<vmem>>, %arg11: memref<256x10xf32, #tpu.memory_space<vmem>>) attributes {dimension_semantics = [#tpu.dimension_semantics<parallel>], iteration_bounds = array<i64: 2>, scalar_prefetch = 0 : i64, scratch_operands = 0 : i64, tpu.core_type = #tpu.core_type<tc>, window_params = [{transform_indices = @transform_0, window_bounds = array<i64: 256, 28>}, {pipeline_mode = #tpu.pipeline_mode<synchronous>, transform_indices = @transform_1, window_bounds = array<i64: 5, 28, 240>}, {pipeline_mode = #tpu.pipeline_mode<synchronous>, transform_indices = @transform_2, window_bounds = array<i64: 1, 240>}, {pipeline_mode = #tpu.pipeline_mode<synchronous>, transform_indices = @transform_3, window_bounds = array<i64: 230, 120>}, {pipeline_mode = #tpu.pipeline_mode<synchronous>, transform_indices = @transform_4, window_bounds = array<i64: 5, 120, 160>}, {pipeline_mode = #tpu.pipeline_mode<synchronous>, transform_indices = @transform_5, window_bounds = array<i64: 1, 160>}, {pipeline_mode = #tpu.pipeline_mode<synchronous>, transform_indices = @transform_6, window_bounds = array<i64: 4, 140, 50>}, {pipeline_mode = #tpu.pipeline_mode<synchronous>, transform_indices = @transform_7, window_bounds = array<i64: 1, 50>}, {pipeline_mode = #tpu.pipeline_mode<synchronous>, transform_indices = @transform_8, window_bounds = array<i64: 50, 10>}, {pipeline_mode = #tpu.pipeline_mode<synchronous>, transform_indices = @transform_9, window_bounds = array<i64: 1, 10>}, {transform_indices = @transform_10, window_bounds = array<i64: 256, 10>}]} {
    %c0 = arith.constant 0 : index
    %c0_0 = arith.constant 0 : index
    %0 = vector.load %arg1[%c0, %c0_0] : memref<256x28xf32, #tpu.memory_space<vmem>>, vector<256x28xf32>
    %c0_1 = arith.constant 0 : index
    %c0_2 = arith.constant 0 : index
    %c0_3 = arith.constant 0 : index
    %1 = vector.load %arg2[%c0_1, %c0_2, %c0_3] : memref<5x28x240xf32, #tpu.memory_space<vmem>>, vector<1x28x240xf32>
    %2 = vector.shape_cast %1 : vector<1x28x240xf32> to vector<28x240xf32>
    %cst = arith.constant dense<0.000000e+00> : vector<256x240xf32>
    %3 = tpu.matmul %0, %2, %cst {dimension_numbers = #tpu.dot_dimension_numbers<[1], [0], [0], [1], [0, 0, 1, 1], [], []>} : vector<256x28xf32>, vector<28x240xf32>, vector<256x240xf32> -> vector<256x240xf32>
    %c0_4 = arith.constant 0 : index
    %c0_5 = arith.constant 0 : index
    %4 = vector.load %arg3[%c0_4, %c0_5] : memref<1x240xf32, #tpu.memory_space<vmem>>, vector<1x240xf32>
    %5 = vector.broadcast %4 : vector<1x240xf32> to vector<256x240xf32>
    %6 = arith.addf %3, %5 : vector<256x240xf32>
    %7 = vector.extract_strided_slice %0 {offsets = [1, 0], sizes = [255, 28], strides = [1, 1]} : vector<256x28xf32> to vector<255x28xf32>
    %8 = vector.extract_strided_slice %0 {offsets = [0, 0], sizes = [1, 28], strides = [1, 1]} : vector<256x28xf32> to vector<1x28xf32>
    %9 = tpu.concatenate %7, %8 in 0 : vector<255x28xf32>, vector<1x28xf32> -> vector<256x28xf32>
    %c1 = arith.constant 1 : index
    %c0_6 = arith.constant 0 : index
    %c0_7 = arith.constant 0 : index
    %10 = vector.load %arg2[%c1, %c0_6, %c0_7] : memref<5x28x240xf32, #tpu.memory_space<vmem>>, vector<1x28x240xf32>
    %11 = vector.shape_cast %10 : vector<1x28x240xf32> to vector<28x240xf32>
    %cst_8 = arith.constant dense<0.000000e+00> : vector<256x240xf32>
    %12 = tpu.matmul %9, %11, %cst_8 {dimension_numbers = #tpu.dot_dimension_numbers<[1], [0], [0], [1], [0, 0, 1, 1], [], []>} : vector<256x28xf32>, vector<28x240xf32>, vector<256x240xf32> -> vector<256x240xf32>
    %13 = arith.addf %6, %12 : vector<256x240xf32>
    %14 = vector.extract_strided_slice %0 {offsets = [2, 0], sizes = [254, 28], strides = [1, 1]} : vector<256x28xf32> to vector<254x28xf32>
    %15 = vector.extract_strided_slice %0 {offsets = [0, 0], sizes = [2, 28], strides = [1, 1]} : vector<256x28xf32> to vector<2x28xf32>
    %16 = tpu.concatenate %14, %15 in 0 : vector<254x28xf32>, vector<2x28xf32> -> vector<256x28xf32>
    %c2 = arith.constant 2 : index
    %c0_9 = arith.constant 0 : index
    %c0_10 = arith.constant 0 : index
    %17 = vector.load %arg2[%c2, %c0_9, %c0_10] : memref<5x28x240xf32, #tpu.memory_space<vmem>>, vector<1x28x240xf32>
    %18 = vector.shape_cast %17 : vector<1x28x240xf32> to vector<28x240xf32>
    %cst_11 = arith.constant dense<0.000000e+00> : vector<256x240xf32>
    %19 = tpu.matmul %16, %18, %cst_11 {dimension_numbers = #tpu.dot_dimension_numbers<[1], [0], [0], [1], [0, 0, 1, 1], [], []>} : vector<256x28xf32>, vector<28x240xf32>, vector<256x240xf32> -> vector<256x240xf32>
    %20 = arith.addf %13, %19 : vector<256x240xf32>
    %21 = vector.extract_strided_slice %0 {offsets = [3, 0], sizes = [253, 28], strides = [1, 1]} : vector<256x28xf32> to vector<253x28xf32>
    %22 = vector.extract_strided_slice %0 {offsets = [0, 0], sizes = [3, 28], strides = [1, 1]} : vector<256x28xf32> to vector<3x28xf32>
    %23 = tpu.concatenate %21, %22 in 0 : vector<253x28xf32>, vector<3x28xf32> -> vector<256x28xf32>
    %c3 = arith.constant 3 : index
    %c0_12 = arith.constant 0 : index
    %c0_13 = arith.constant 0 : index
    %24 = vector.load %arg2[%c3, %c0_12, %c0_13] : memref<5x28x240xf32, #tpu.memory_space<vmem>>, vector<1x28x240xf32>
    %25 = vector.shape_cast %24 : vector<1x28x240xf32> to vector<28x240xf32>
    %cst_14 = arith.constant dense<0.000000e+00> : vector<256x240xf32>
    %26 = tpu.matmul %23, %25, %cst_14 {dimension_numbers = #tpu.dot_dimension_numbers<[1], [0], [0], [1], [0, 0, 1, 1], [], []>} : vector<256x28xf32>, vector<28x240xf32>, vector<256x240xf32> -> vector<256x240xf32>
    %27 = arith.addf %20, %26 : vector<256x240xf32>
    %28 = vector.extract_strided_slice %0 {offsets = [4, 0], sizes = [252, 28], strides = [1, 1]} : vector<256x28xf32> to vector<252x28xf32>
    %29 = vector.extract_strided_slice %0 {offsets = [0, 0], sizes = [4, 28], strides = [1, 1]} : vector<256x28xf32> to vector<4x28xf32>
    %30 = tpu.concatenate %28, %29 in 0 : vector<252x28xf32>, vector<4x28xf32> -> vector<256x28xf32>
    %c4 = arith.constant 4 : index
    %c0_15 = arith.constant 0 : index
    %c0_16 = arith.constant 0 : index
    %31 = vector.load %arg2[%c4, %c0_15, %c0_16] : memref<5x28x240xf32, #tpu.memory_space<vmem>>, vector<1x28x240xf32>
    %32 = vector.shape_cast %31 : vector<1x28x240xf32> to vector<28x240xf32>
    %cst_17 = arith.constant dense<0.000000e+00> : vector<256x240xf32>
    %33 = tpu.matmul %30, %32, %cst_17 {dimension_numbers = #tpu.dot_dimension_numbers<[1], [0], [0], [1], [0, 0, 1, 1], [], []>} : vector<256x28xf32>, vector<28x240xf32>, vector<256x240xf32> -> vector<256x240xf32>
    %34 = arith.addf %27, %33 : vector<256x240xf32>
    %35 = vector.extract_strided_slice %34 {offsets = [0, 0], sizes = [256, 230], strides = [1, 1]} : vector<256x240xf32> to vector<256x230xf32>
    %36 = vector.extract_strided_slice %34 {offsets = [0, 10], sizes = [256, 230], strides = [1, 1]} : vector<256x240xf32> to vector<256x230xf32>
    %37 = arith.maximumf %35, %36 : vector<256x230xf32>
    %c0_18 = arith.constant 0 : index
    %c0_19 = arith.constant 0 : index
    %38 = vector.load %arg4[%c0_18, %c0_19] : memref<230x120xf32, #tpu.memory_space<vmem>>, vector<230x120xf32>
    %cst_20 = arith.constant dense<0.000000e+00> : vector<256x120xf32>
    %39 = tpu.matmul %37, %38, %cst_20 {dimension_numbers = #tpu.dot_dimension_numbers<[1], [0], [0], [1], [0, 0, 1, 1], [], []>} : vector<256x230xf32>, vector<230x120xf32>, vector<256x120xf32> -> vector<256x120xf32>
    %40 = vector.extract_strided_slice %39 {offsets = [1, 0], sizes = [255, 120], strides = [1, 1]} : vector<256x120xf32> to vector<255x120xf32>
    %41 = vector.extract_strided_slice %39 {offsets = [0, 0], sizes = [1, 120], strides = [1, 1]} : vector<256x120xf32> to vector<1x120xf32>
    %42 = tpu.concatenate %40, %41 in 0 : vector<255x120xf32>, vector<1x120xf32> -> vector<256x120xf32>
    %43 = arith.maximumf %39, %42 : vector<256x120xf32>
    %cst_21 = arith.constant 0.000000e+00 : f32
    %44 = vector.broadcast %cst_21 : f32 to vector<256x120xf32>
    %45 = arith.maximumf %43, %44 : vector<256x120xf32>
    %c0_22 = arith.constant 0 : index
    %c0_23 = arith.constant 0 : index
    %c0_24 = arith.constant 0 : index
    %46 = vector.load %arg5[%c0_22, %c0_23, %c0_24] : memref<5x120x160xf32, #tpu.memory_space<vmem>>, vector<1x120x160xf32>
    %47 = vector.shape_cast %46 : vector<1x120x160xf32> to vector<120x160xf32>
    %cst_25 = arith.constant dense<0.000000e+00> : vector<256x160xf32>
    %48 = tpu.matmul %45, %47, %cst_25 {dimension_numbers = #tpu.dot_dimension_numbers<[1], [0], [0], [1], [0, 0, 1, 1], [], []>} : vector<256x120xf32>, vector<120x160xf32>, vector<256x160xf32> -> vector<256x160xf32>
    %c0_26 = arith.constant 0 : index
    %c0_27 = arith.constant 0 : index
    %49 = vector.load %arg6[%c0_26, %c0_27] : memref<1x160xf32, #tpu.memory_space<vmem>>, vector<1x160xf32>
    %50 = vector.broadcast %49 : vector<1x160xf32> to vector<256x160xf32>
    %51 = arith.addf %48, %50 : vector<256x160xf32>
    %52 = vector.extract_strided_slice %45 {offsets = [2, 0], sizes = [254, 120], strides = [1, 1]} : vector<256x120xf32> to vector<254x120xf32>
    %53 = vector.extract_strided_slice %45 {offsets = [0, 0], sizes = [2, 120], strides = [1, 1]} : vector<256x120xf32> to vector<2x120xf32>
    %54 = tpu.concatenate %52, %53 in 0 : vector<254x120xf32>, vector<2x120xf32> -> vector<256x120xf32>
    %c1_28 = arith.constant 1 : index
    %c0_29 = arith.constant 0 : index
    %c0_30 = arith.constant 0 : index
    %55 = vector.load %arg5[%c1_28, %c0_29, %c0_30] : memref<5x120x160xf32, #tpu.memory_space<vmem>>, vector<1x120x160xf32>
    %56 = vector.shape_cast %55 : vector<1x120x160xf32> to vector<120x160xf32>
    %cst_31 = arith.constant dense<0.000000e+00> : vector<256x160xf32>
    %57 = tpu.matmul %54, %56, %cst_31 {dimension_numbers = #tpu.dot_dimension_numbers<[1], [0], [0], [1], [0, 0, 1, 1], [], []>} : vector<256x120xf32>, vector<120x160xf32>, vector<256x160xf32> -> vector<256x160xf32>
    %58 = arith.addf %51, %57 : vector<256x160xf32>
    %59 = vector.extract_strided_slice %45 {offsets = [4, 0], sizes = [252, 120], strides = [1, 1]} : vector<256x120xf32> to vector<252x120xf32>
    %60 = vector.extract_strided_slice %45 {offsets = [0, 0], sizes = [4, 120], strides = [1, 1]} : vector<256x120xf32> to vector<4x120xf32>
    %61 = tpu.concatenate %59, %60 in 0 : vector<252x120xf32>, vector<4x120xf32> -> vector<256x120xf32>
    %c2_32 = arith.constant 2 : index
    %c0_33 = arith.constant 0 : index
    %c0_34 = arith.constant 0 : index
    %62 = vector.load %arg5[%c2_32, %c0_33, %c0_34] : memref<5x120x160xf32, #tpu.memory_space<vmem>>, vector<1x120x160xf32>
    %63 = vector.shape_cast %62 : vector<1x120x160xf32> to vector<120x160xf32>
    %cst_35 = arith.constant dense<0.000000e+00> : vector<256x160xf32>
    %64 = tpu.matmul %61, %63, %cst_35 {dimension_numbers = #tpu.dot_dimension_numbers<[1], [0], [0], [1], [0, 0, 1, 1], [], []>} : vector<256x120xf32>, vector<120x160xf32>, vector<256x160xf32> -> vector<256x160xf32>
    %65 = arith.addf %58, %64 : vector<256x160xf32>
    %66 = vector.extract_strided_slice %45 {offsets = [6, 0], sizes = [250, 120], strides = [1, 1]} : vector<256x120xf32> to vector<250x120xf32>
    %67 = vector.extract_strided_slice %45 {offsets = [0, 0], sizes = [6, 120], strides = [1, 1]} : vector<256x120xf32> to vector<6x120xf32>
    %68 = tpu.concatenate %66, %67 in 0 : vector<250x120xf32>, vector<6x120xf32> -> vector<256x120xf32>
    %c3_36 = arith.constant 3 : index
    %c0_37 = arith.constant 0 : index
    %c0_38 = arith.constant 0 : index
    %69 = vector.load %arg5[%c3_36, %c0_37, %c0_38] : memref<5x120x160xf32, #tpu.memory_space<vmem>>, vector<1x120x160xf32>
    %70 = vector.shape_cast %69 : vector<1x120x160xf32> to vector<120x160xf32>
    %cst_39 = arith.constant dense<0.000000e+00> : vector<256x160xf32>
    %71 = tpu.matmul %68, %70, %cst_39 {dimension_numbers = #tpu.dot_dimension_numbers<[1], [0], [0], [1], [0, 0, 1, 1], [], []>} : vector<256x120xf32>, vector<120x160xf32>, vector<256x160xf32> -> vector<256x160xf32>
    %72 = arith.addf %65, %71 : vector<256x160xf32>
    %73 = vector.extract_strided_slice %45 {offsets = [8, 0], sizes = [248, 120], strides = [1, 1]} : vector<256x120xf32> to vector<248x120xf32>
    %74 = vector.extract_strided_slice %45 {offsets = [0, 0], sizes = [8, 120], strides = [1, 1]} : vector<256x120xf32> to vector<8x120xf32>
    %75 = tpu.concatenate %73, %74 in 0 : vector<248x120xf32>, vector<8x120xf32> -> vector<256x120xf32>
    %c4_40 = arith.constant 4 : index
    %c0_41 = arith.constant 0 : index
    %c0_42 = arith.constant 0 : index
    %76 = vector.load %arg5[%c4_40, %c0_41, %c0_42] : memref<5x120x160xf32, #tpu.memory_space<vmem>>, vector<1x120x160xf32>
    %77 = vector.shape_cast %76 : vector<1x120x160xf32> to vector<120x160xf32>
    %cst_43 = arith.constant dense<0.000000e+00> : vector<256x160xf32>
    %78 = tpu.matmul %75, %77, %cst_43 {dimension_numbers = #tpu.dot_dimension_numbers<[1], [0], [0], [1], [0, 0, 1, 1], [], []>} : vector<256x120xf32>, vector<120x160xf32>, vector<256x160xf32> -> vector<256x160xf32>
    %79 = arith.addf %72, %78 : vector<256x160xf32>
    %80 = vector.extract_strided_slice %79 {offsets = [0, 0], sizes = [256, 140], strides = [1, 1]} : vector<256x160xf32> to vector<256x140xf32>
    %81 = vector.extract_strided_slice %79 {offsets = [0, 20], sizes = [256, 140], strides = [1, 1]} : vector<256x160xf32> to vector<256x140xf32>
    %82 = arith.maximumf %80, %81 : vector<256x140xf32>
    %83 = vector.extract_strided_slice %82 {offsets = [2, 0], sizes = [254, 140], strides = [1, 1]} : vector<256x140xf32> to vector<254x140xf32>
    %84 = vector.extract_strided_slice %82 {offsets = [0, 0], sizes = [2, 140], strides = [1, 1]} : vector<256x140xf32> to vector<2x140xf32>
    %85 = tpu.concatenate %83, %84 in 0 : vector<254x140xf32>, vector<2x140xf32> -> vector<256x140xf32>
    %86 = arith.maximumf %82, %85 : vector<256x140xf32>
    %cst_44 = arith.constant 0.000000e+00 : f32
    %87 = vector.broadcast %cst_44 : f32 to vector<256x140xf32>
    %88 = arith.maximumf %86, %87 : vector<256x140xf32>
    %c0_45 = arith.constant 0 : index
    %c0_46 = arith.constant 0 : index
    %c0_47 = arith.constant 0 : index
    %89 = vector.load %arg7[%c0_45, %c0_46, %c0_47] : memref<4x140x50xf32, #tpu.memory_space<vmem>>, vector<1x140x50xf32>
    %90 = vector.shape_cast %89 : vector<1x140x50xf32> to vector<140x50xf32>
    %cst_48 = arith.constant dense<0.000000e+00> : vector<256x50xf32>
    %91 = tpu.matmul %88, %90, %cst_48 {dimension_numbers = #tpu.dot_dimension_numbers<[1], [0], [0], [1], [0, 0, 1, 1], [], []>} : vector<256x140xf32>, vector<140x50xf32>, vector<256x50xf32> -> vector<256x50xf32>
    %c0_49 = arith.constant 0 : index
    %c0_50 = arith.constant 0 : index
    %92 = vector.load %arg8[%c0_49, %c0_50] : memref<1x50xf32, #tpu.memory_space<vmem>>, vector<1x50xf32>
    %93 = vector.broadcast %92 : vector<1x50xf32> to vector<256x50xf32>
    %94 = arith.addf %91, %93 : vector<256x50xf32>
    %95 = vector.extract_strided_slice %88 {offsets = [4, 0], sizes = [252, 140], strides = [1, 1]} : vector<256x140xf32> to vector<252x140xf32>
    %96 = vector.extract_strided_slice %88 {offsets = [0, 0], sizes = [4, 140], strides = [1, 1]} : vector<256x140xf32> to vector<4x140xf32>
    %97 = tpu.concatenate %95, %96 in 0 : vector<252x140xf32>, vector<4x140xf32> -> vector<256x140xf32>
    %c1_51 = arith.constant 1 : index
    %c0_52 = arith.constant 0 : index
    %c0_53 = arith.constant 0 : index
    %98 = vector.load %arg7[%c1_51, %c0_52, %c0_53] : memref<4x140x50xf32, #tpu.memory_space<vmem>>, vector<1x140x50xf32>
    %99 = vector.shape_cast %98 : vector<1x140x50xf32> to vector<140x50xf32>
    %cst_54 = arith.constant dense<0.000000e+00> : vector<256x50xf32>
    %100 = tpu.matmul %97, %99, %cst_54 {dimension_numbers = #tpu.dot_dimension_numbers<[1], [0], [0], [1], [0, 0, 1, 1], [], []>} : vector<256x140xf32>, vector<140x50xf32>, vector<256x50xf32> -> vector<256x50xf32>
    %101 = arith.addf %94, %100 : vector<256x50xf32>
    %102 = vector.extract_strided_slice %88 {offsets = [8, 0], sizes = [248, 140], strides = [1, 1]} : vector<256x140xf32> to vector<248x140xf32>
    %103 = vector.extract_strided_slice %88 {offsets = [0, 0], sizes = [8, 140], strides = [1, 1]} : vector<256x140xf32> to vector<8x140xf32>
    %104 = tpu.concatenate %102, %103 in 0 : vector<248x140xf32>, vector<8x140xf32> -> vector<256x140xf32>
    %c2_55 = arith.constant 2 : index
    %c0_56 = arith.constant 0 : index
    %c0_57 = arith.constant 0 : index
    %105 = vector.load %arg7[%c2_55, %c0_56, %c0_57] : memref<4x140x50xf32, #tpu.memory_space<vmem>>, vector<1x140x50xf32>
    %106 = vector.shape_cast %105 : vector<1x140x50xf32> to vector<140x50xf32>
    %cst_58 = arith.constant dense<0.000000e+00> : vector<256x50xf32>
    %107 = tpu.matmul %104, %106, %cst_58 {dimension_numbers = #tpu.dot_dimension_numbers<[1], [0], [0], [1], [0, 0, 1, 1], [], []>} : vector<256x140xf32>, vector<140x50xf32>, vector<256x50xf32> -> vector<256x50xf32>
    %108 = arith.addf %101, %107 : vector<256x50xf32>
    %109 = vector.extract_strided_slice %88 {offsets = [12, 0], sizes = [244, 140], strides = [1, 1]} : vector<256x140xf32> to vector<244x140xf32>
    %110 = vector.extract_strided_slice %88 {offsets = [0, 0], sizes = [12, 140], strides = [1, 1]} : vector<256x140xf32> to vector<12x140xf32>
    %111 = tpu.concatenate %109, %110 in 0 : vector<244x140xf32>, vector<12x140xf32> -> vector<256x140xf32>
    %c3_59 = arith.constant 3 : index
    %c0_60 = arith.constant 0 : index
    %c0_61 = arith.constant 0 : index
    %112 = vector.load %arg7[%c3_59, %c0_60, %c0_61] : memref<4x140x50xf32, #tpu.memory_space<vmem>>, vector<1x140x50xf32>
    %113 = vector.shape_cast %112 : vector<1x140x50xf32> to vector<140x50xf32>
    %cst_62 = arith.constant dense<0.000000e+00> : vector<256x50xf32>
    %114 = tpu.matmul %111, %113, %cst_62 {dimension_numbers = #tpu.dot_dimension_numbers<[1], [0], [0], [1], [0, 0, 1, 1], [], []>} : vector<256x140xf32>, vector<140x50xf32>, vector<256x50xf32> -> vector<256x50xf32>
    %115 = arith.addf %108, %114 : vector<256x50xf32>
    %cst_63 = arith.constant 0.000000e+00 : f32
    %116 = vector.broadcast %cst_63 : f32 to vector<256x50xf32>
    %117 = arith.maximumf %115, %116 : vector<256x50xf32>
    %c0_64 = arith.constant 0 : index
    %c0_65 = arith.constant 0 : index
    %118 = vector.load %arg9[%c0_64, %c0_65] : memref<50x10xf32, #tpu.memory_space<vmem>>, vector<50x10xf32>
    %cst_66 = arith.constant dense<0.000000e+00> : vector<256x10xf32>
    %119 = tpu.matmul %117, %118, %cst_66 {dimension_numbers = #tpu.dot_dimension_numbers<[1], [0], [0], [1], [0, 0, 1, 1], [], []>} : vector<256x50xf32>, vector<50x10xf32>, vector<256x10xf32> -> vector<256x10xf32>
    %c0_67 = arith.constant 0 : index
    %c0_68 = arith.constant 0 : index
    %120 = vector.load %arg10[%c0_67, %c0_68] : memref<1x10xf32, #tpu.memory_space<vmem>>, vector<1x10xf32>
    %121 = vector.broadcast %120 : vector<1x10xf32> to vector<256x10xf32>
    %122 = arith.addf %119, %121 : vector<256x10xf32>
    %cst_69 = arith.constant dense<0xFF800000> : vector<256xf32>
    %123 = vector.multi_reduction <maximumf>, %122, %cst_69 [1] : vector<256x10xf32> to vector<256xf32>
    %124 = vector.shape_cast %123 : vector<256xf32> to vector<256x1xf32>
    %125 = vector.broadcast %124 : vector<256x1xf32> to vector<256x10xf32>
    %126 = arith.subf %122, %125 : vector<256x10xf32>
    %127 = math.exp %126 : vector<256x10xf32>
    %cst_70 = arith.constant dense<0.000000e+00> : vector<256xf32>
    %128 = vector.multi_reduction <add>, %127, %cst_70 [1] : vector<256x10xf32> to vector<256xf32>
    %129 = vector.shape_cast %128 : vector<256xf32> to vector<256x1xf32>
    %130 = math.log %129 : vector<256x1xf32>
    %131 = vector.broadcast %130 : vector<256x1xf32> to vector<256x10xf32>
    %132 = arith.subf %126, %131 : vector<256x10xf32>
    %c0_71 = arith.constant 0 : index
    %c0_72 = arith.constant 0 : index
    %133 = vector.load %arg11[%c0_71, %c0_72] : memref<256x10xf32, #tpu.memory_space<vmem>>, vector<256x10xf32>
    tpu.vector_store %arg11[%c0_71, %c0_72], %132 {strides = array<i32>} : memref<256x10xf32, #tpu.memory_space<vmem>>, vector<256x10xf32>,
    return
  }
  func.func @transform_0(%arg0: i32) -> (i32, i32) {
    %c0_i32 = arith.constant 0 : i32
    %c0_i32_0 = arith.constant 0 : i32
    return %arg0, %c0_i32 : i32, i32
  }
  func.func @transform_1(%arg0: i32) -> (i32, i32, i32) {
    %c0_i32 = arith.constant 0 : i32
    %c0_i32_0 = arith.constant 0 : i32
    %c0_i32_1 = arith.constant 0 : i32
    %c0_i32_2 = arith.constant 0 : i32
    return %c0_i32, %c0_i32_0, %c0_i32_1 : i32, i32, i32
  }
  func.func @transform_2(%arg0: i32) -> (i32, i32) {
    %c0_i32 = arith.constant 0 : i32
    %c0_i32_0 = arith.constant 0 : i32
    %c0_i32_1 = arith.constant 0 : i32
    return %c0_i32, %c0_i32_0 : i32, i32
  }
  func.func @transform_3(%arg0: i32) -> (i32, i32) {
    %c0_i32 = arith.constant 0 : i32
    %c0_i32_0 = arith.constant 0 : i32
    %c0_i32_1 = arith.constant 0 : i32
    return %c0_i32, %c0_i32_0 : i32, i32
  }
  func.func @transform_4(%arg0: i32) -> (i32, i32, i32) {
    %c0_i32 = arith.constant 0 : i32
    %c0_i32_0 = arith.constant 0 : i32
    %c0_i32_1 = arith.constant 0 : i32
    %c0_i32_2 = arith.constant 0 : i32
    return %c0_i32, %c0_i32_0, %c0_i32_1 : i32, i32, i32
  }
  func.func @transform_5(%arg0: i32) -> (i32, i32) {
    %c0_i32 = arith.constant 0 : i32
    %c0_i32_0 = arith.constant 0 : i32
    %c0_i32_1 = arith.constant 0 : i32
    return %c0_i32, %c0_i32_0 : i32, i32
  }
  func.func @transform_6(%arg0: i32) -> (i32, i32, i32) {
    %c0_i32 = arith.constant 0 : i32
    %c0_i32_0 = arith.constant 0 : i32
    %c0_i32_1 = arith.constant 0 : i32
    %c0_i32_2 = arith.constant 0 : i32
    return %c0_i32, %c0_i32_0, %c0_i32_1 : i32, i32, i32
  }
  func.func @transform_7(%arg0: i32) -> (i32, i32) {
    %c0_i32 = arith.constant 0 : i32
    %c0_i32_0 = arith.constant 0 : i32
    %c0_i32_1 = arith.constant 0 : i32
    return %c0_i32, %c0_i32_0 : i32, i32
  }
  func.func @transform_8(%arg0: i32) -> (i32, i32) {
    %c0_i32 = arith.constant 0 : i32
    %c0_i32_0 = arith.constant 0 : i32
    %c0_i32_1 = arith.constant 0 : i32
    return %c0_i32, %c0_i32_0 : i32, i32
  }
  func.func @transform_9(%arg0: i32) -> (i32, i32) {
    %c0_i32 = arith.constant 0 : i32
    %c0_i32_0 = arith.constant 0 : i32
    %c0_i32_1 = arith.constant 0 : i32
    return %c0_i32, %c0_i32_0 : i32, i32
  }
  func.func @transform_10(%arg0: i32) -> (i32, i32) {
    %c0_i32 = arith.constant 0 : i32
    %c0_i32_0 = arith.constant 0 : i32
    return %arg0, %c0_i32 : i32, i32
  }
}

</mosaic_0001>

<bundles_post_ra>
// kernel: net_forward.1
= control target key start
LH: loop header
LB: loop body
LE: loop exit
PB: predicated region body
PF: predicated region fallthrough
CT: control target
= control target key end

     0   :  { %s9660_s13 = smov 0   ;;  %s16521_s0 = inlined_call_operand.vmem [shape: f32[512,28], index: 0, kind: input, shape index: {}]   ;;  %s16522_s1 = inlined_call_operand.vmem [shape: f32[5,28,240], index: 1, kind: input, shape index: {}]   ;;  %s16523_s2 = inlined_call_operand.vmem [shape: f32[1,240], index: 2, kind: input, shape index: {}]   ;;  %s16524_s3 = inlined_call_operand.vmem [shape: f32[230,120], index: 3, kind: input, shape index: {}]   ;;  %s16525_s4 = inlined_call_operand.vmem [shape: f32[5,120,160], index: 4, kind: input, shape index: {}]   ;;  %s16526_s5 = inlined_call_operand.vmem [shape: f32[1,160], index: 5, kind: input, shape index: {}]   ;;  %s16527_s6 = inlined_call_operand.vmem [shape: f32[4,140,50], index: 6, kind: input, shape index: {}]   ;;  %s16528_s7 = inlined_call_operand.vmem [shape: f32[1,50], index: 7, kind: input, shape index: {}]   ;;  %s16529_s8 = inlined_call_operand.vmem [shape: f32[50,10], index: 8, kind: input, shape index: {}]   ;;  %s16530_s9 = inlined_call_operand.vmem [shape: f32[1,10], index: 9, kind: input, shape index: {}]   ;;  %s16531_s10 = inlined_call_operand.vmem [shape: f32[512,10], index: 10, kind: output, shape index: {}]  }
   0x1 LB: > { %s8340_s14 = sadd.s32 4294967295, %s9601_s13   ;;  %p8344_p0 = scmp.ge.s32.totalorder %s9601_s13, 1  ;;  %s9601_s13 = sphi %s9660_s13, %s20_s13  }
   0x2   : > { %p313_p1 = scmp.lt.s32.totalorder %s9601_s13, 3 }
   0x4   : > { %p314_p2 = pnand %p8344_p0, %p313_p1 }
   0x6   : > { %317 = sbr.rel (%p314_p2) target bundleno = 2802 (0xaf2), region = 60 }
   0xb   : > { %v401_v0 = vld [vmem:[%s16522_s1 + $0x30] sm:$0xf]  ;;  %vm506_vm0 = vcmask 1043456   ;;  %v399_v1 = vld [vmem:[%s16522_s1 + $0x20] sm:$0xff]  ;;  %s8345_s23 = sshll.u32 %s8340_s14, 5  ;;  %v400_v7 = vld [vmem:[%s16522_s1 + $0x28] sm:$0xff] }
   0xc   : > { %v8421_v2 = vld [vmem:[%s16522_s1 + $0x70] sm:$0xf]  ;;  %8349 = vmatpush.msk.msra.mxu0 %vm506_vm0, %v401_v0  ;;  %9405 = vmatpush.msk.msra.mxu3 %vm506_vm0, %v401_v0  ;;  %v8419_v3 = vld [vmem:[%s16522_s1 + $0x60] sm:$0xff]  ;;  %p352_p3 = scmp.lt.s32.totalorder %s8345_s23, 63  ;;  %v402_v5 = vld [vmem:[%s16522_s1 + $0x38] sm:$0xf] }
   0xd   : > { %8423 = vmatpush.msk.msra.mxu2 %vm506_vm0, %v8421_v2  ;;  %v397_v4 = vld [vmem:[%s16522_s1 + $0x10] sm:$0xff]  ;;  %v395_v8 = vld [vmem:[%s16522_s1] sm:$0xff]  ;;  %8382 = vmatpush.msk.msra.mxu1 %vm506_vm0, %v402_v5  ;;  %vm409_vm1 = vcmask 228352   ;;  %v398_v11 = vld [vmem:[%s16522_s1 + $0x18] sm:$0xff]  ;;  %vm739_vm2 = vcmask 1046528   ;;  %vm1176_vm3 = vcmask 1045504  }
   0xe   : > { %526 = vmatpush.msra.mxu0 %v399_v1  ;;  %9406 = vmatpush.msra.mxu3 %v399_v1  ;;  %v8417_v6 = vld [vmem:[%s16522_s1 + $0x50] sm:$0xff]  ;;  %s17668_s23 = smov (!%p352_p3, %s8345_s23), 63  ;;  %v8415_v9 = vld [vmem:[%s16522_s1 + $0x40] sm:$0xff]  ;;  %v396_v17 = vld [vmem:[%s16522_s1 + $0x8] sm:$0xff]  ;;  %vm1613_vm4 = vcmask 1044480   ;;  %s9603_s12 = smov 118  }
   0xf   : > { %899 = vmatpush.msra.mxu2 %v8419_v3  ;;  %s8346_s17 = sshll.u32 %s17668_s23, 3  ;;  %639 = vmatpush.msra.mxu1 %v400_v7  ;;  %v8495_v10 = vld [vmem:[%s16522_s1 + $0xb0] sm:$0xf]  ;;  %v8496_v20 = vld [vmem:[%s16522_s1 + $0xb8] sm:$0xf]  ;;  %v8493_v28 = vld [vmem:[%s16522_s1 + $0xa0] sm:$0xff] }
  0x10   : > { %527 = vmatpush.msra.mxu0 %v397_v4  ;;  %9407 = vmatpush.msra.mxu3 %v397_v4  ;;  %s9710_s20 = scalar_lea.vmem %s16521_s0, %s8346_s17  ;;  %v8494_v33 = vld [vmem:[%s16522_s1 + $0xa8] sm:$0xff]  ;;  %v8491_v53 = vld [vmem:[%s16522_s1 + $0x90] sm:$0xff]  ;;  %v8492_v57 = vld [vmem:[%s16522_s1 + $0x98] sm:$0xff]  ;;  %vm2678_vm5 = vcmask 965632   ;;  %vm2868_vm6 = vcmask 834560   ;;  %vm3423_vm7 = vcmask 982016  }
  0x11   : > { %900 = vmatpush.msra.mxu2 %v8417_v6  ;;  %v9719_v12 = vld [vmem:[%s9710_s20] sm:$0xff]  ;;  %v9726_v14 = vld [vmem:[%s9710_s20 + $0x8] sm:$0xff]  ;;  %640 = vmatpush.msra.mxu1 %v398_v11  ;;  %v9739_v18 = vld [vmem:[%s9710_s20 + $0x10] sm:$0xff]  ;;  %vm4650_vm8 = vcmask 1041408   ;;  %s9604_s25 = smov 108   ;;  %vm5616_vm9 = vcmask 883712  }
  0x12   : > { %528 = vmatpush.msra.mxu0 %v395_v8  ;;  %9408 = vmatpush.msra.mxu3 %v395_v8  ;;  %16715 = vst [vmem:[#allocation2_spill] sm:$0xff] %v9719_v12  ;;  %v9722_v13 = vld [vmem:[%s9710_s20 + $0xc0] sm:$0xff]  ;;  %v16533_v15 = vrot.slane %v9719_v12, 1  ;;  %v741_v16 = vrot.slane %v9726_v14, 1  ;;  %v743_v21 = vrot.slane %v9739_v18, 1  ;;  %v9755_v22 = vld [vmem:[%s9710_s20 + $0xc8] sm:$0xff] }
  0x13   : > { %901 = vmatpush.msra.mxu2 %v8415_v9  ;;  %8350 = vmatmul.msk.f32.vlgmr.msra.gmra.mxu0 %vm409_vm1, %v9719_v12  ;;  %v9767_v24 = vld [vmem:[%s9710_s20 + $0x18] sm:$0xff]  ;;  %v9775_v26 = vld [vmem:[%s9710_s20 + $0xd0] sm:$0xff]  ;;  %v9788_v29 = vld [vmem:[%s9710_s20 + $0x20] sm:$0xff]  ;;  %vm6185_vm10 = vcmask 97280   ;;  %vm7654_vm11 = vcmask 408576   ;;  %vm7867_vm12 = vcmask 80896  }
  0x14   : > { %9409 = vmatpush.msk.msrb.mxu3 %vm506_vm0, %v402_v5  ;;  %8497 = vmatpush.msk.msrb.mxu0 %vm506_vm0, %v8495_v10  ;;  %v9744_v19 = vsel %vm739_vm2, %v16533_v15, %v741_v16  ;;  %v9764_v23 = vsel %vm739_vm2, %v741_v16, %v743_v21  ;;  %v745_v25 = vrot.slane %v9767_v24, 1  ;;  %v747_v30 = vrot.slane %v9788_v29, 1  ;;  %v9796_v31 = vld [vmem:[%s9710_s20 + $0xd8] sm:$0xff]  ;;  %v9809_v34 = vld [vmem:[%s9710_s20 + $0x28] sm:$0xff]  ;;  %v9817_v36 = vld [vmem:[%s9710_s20 + $0xe0] sm:$0xff] }
  0x15   : > { %8374 = vmatmul.msk.f32.vlgmr.msra.gmra.mxu3 %vm409_vm1, %v9722_v13  ;;  %8424 = vmatmul.msk.f32.vlgmr.msra.gmra.mxu2 %vm409_vm1, %v9744_v19  ;;  %v749_v35 = vrot.slane %v9809_v34, 1  ;;  %v9827_v38 = vld [vmem:[%s9710_s20 + $0x30] sm:$0xff]  ;;  %v9835_v40 = vld [vmem:[%s9710_s20 + $0xe8] sm:$0xff]  ;;  %v9845_v42 = vld [vmem:[%s9710_s20 + $0x38] sm:$0xff] }
  0x16   : > { %9410 = vmatpush.msrb.mxu3 %v400_v7  ;;  %641 = vmatpush.msra.mxu1 %v396_v17  ;;  %v9782_v27 = vsel %vm739_vm2, %v743_v21, %v745_v25  ;;  %v9803_v32 = vsel %vm739_vm2, %v745_v25, %v747_v30  ;;  %v751_v39 = vrot.slane %v9827_v38, 1  ;;  %v753_v43 = vrot.slane %v9845_v42, 1  ;;  %v9853_v44 = vld [vmem:[%s9710_s20 + $0xf0] sm:$0xff]  ;;  %v9863_v46 = vld [vmem:[%s9710_s20 + $0x40] sm:$0xff]  ;;  %v9871_v48 = vld [vmem:[%s9710_s20 + $0xf8] sm:$0xff] }
  0x17   : > { %8383 = vmatmul.msk.f32.vlgmr.msra.gmra.mxu1 %vm409_vm1, %v9719_v12  ;;  %1336 = vmatpush.msrb.mxu0 %v8493_v28  ;;  %v9824_v37 = vsel %vm739_vm2, %v747_v30, %v749_v35  ;;  %v755_v47 = vrot.slane %v9863_v46, 1  ;;  %v9881_v50 = vld [vmem:[%s9710_s20 + $0x48] sm:$0xff]  ;;  %v9899_v54 = vld [vmem:[%s9710_s20 + $0x50] sm:$0xff]  ;;  %v9917_v58 = vld [vmem:[%s9710_s20 + $0x58] sm:$0xff]  ;;  %v16532_v25 = vrot.slane %v9722_v13, 1  ;;  %v789_v28 = vrot.slane %v9755_v22, 1 }
  0x18   : > { %9411 = vmatpush.msrb.mxu3 %v398_v11  ;;  %8530 = vmatpush.msk.msrb.mxu1 %vm506_vm0, %v8496_v20  ;;  %v9842_v41 = vsel %vm739_vm2, %v749_v35, %v751_v39  ;;  %v9860_v45 = vsel %vm739_vm2, %v751_v39, %v753_v43  ;;  %v757_v51 = vrot.slane %v9881_v50, 1  ;;  %v759_v55 = vrot.slane %v9899_v54, 1  ;;  %v9932_v61 = vld [vmem:[%s9710_s20 + $0x60] sm:$0xff]  ;;  %v9947_v0 = vld [vmem:[%s9710_s20 + $0x68] sm:$0xff]  ;;  %v9965_v4 = vld [vmem:[%s9710_s20 + $0x70] sm:$0xff] }
  0x19   : > { %v9878_v49 = vsel %vm739_vm2, %v753_v43, %v755_v47  ;;  %1337 = vmatpush.msrb.mxu0 %v8491_v53  ;;  %v761_v59 = vrot.slane %v9917_v58, 1  ;;  %v763_v62 = vrot.slane %v9932_v61, 1  ;;  %v765_v1 = vrot.slane %v9947_v0, 1  ;;  %v9981_v7 = vld [vmem:[%s9710_s20 + $0x78] sm:$0xff]  ;;  %v8420_v10 = vld [vmem:[%s16522_s1 + $0x68] sm:$0xff]  ;;  %v8489_v11 = vld [vmem:[%s16522_s1 + $0x80] sm:$0xff] }
  0x1a   : > { %9412 = vmatpush.msrb.mxu3 %v396_v17  ;;  %1449 = vmatpush.msrb.mxu1 %v8494_v33  ;;  %v9893_v52 = vsel %vm739_vm2, %v755_v47, %v757_v51  ;;  %v9911_v56 = vsel %vm739_vm2, %v757_v51, %v759_v55  ;;  %v767_v5 = vrot.slane %v9965_v4, 1  ;;  %v769_v8 = vrot.slane %v9981_v7, 1  ;;  %v10002_v16 = vld [vmem:[%s9710_s20 + $0x80] sm:$0xff]  ;;  %v8490_v21 = vld [vmem:[%s16522_s1 + $0x88] sm:$0xff]  ;;  %v8418_v43 = vld [vmem:[%s16522_s1 + $0x58] sm:$0xff] }
  0x1b   : > { %8351 = vmatmul.msk.f32.gmra.mxu0 %vm409_vm1, %v9726_v14  ;;  %v9929_v60 = vsel %vm739_vm2, %v759_v55, %v761_v59  ;;  %v9944_v63 = vsel %vm739_vm2, %v761_v59, %v763_v62  ;;  %v771_v17 = vrot.slane %v10002_v16, 1  ;;  %v10022_v30 = vld [vmem:[%s9710_s20 + $0x88] sm:$0xff]  ;;  %v10034_v39 = vsel %vm739_vm2, %v16532_v25, %v789_v28  ;;  %v10050_v53 = vld [vmem:[%s9710_s20 + $0x90] sm:$0xff]  ;;  %v10107_v25 = vld [vmem:[%s9710_s20 + $0xa0] sm:$0xff] }
  0x1c   : > { %9413 = vmatpush.msk.msra.mxu3 %vm506_vm0, %v8421_v2  ;;  %1450 = vmatpush.msrb.mxu1 %v8492_v57  ;;  %v9959_v2 = vsel %vm739_vm2, %v763_v62, %v765_v1  ;;  %v773_v33 = vrot.slane %v10022_v30, 1  ;;  %16716 = vst [vmem:[#allocation3_spill] sm:$0xff] %v10034_v39  ;;  %v791_v51 = vrot.slane %v9775_v26, 1  ;;  %v775_v57 = vrot.slane %v10050_v53, 1 }
  0x1d   : > { %8375 = vmatmul.msk.f32.gmra.mxu3 %vm409_vm1, %v9755_v22  ;;  %8425 = vmatmul.msk.f32.gmra.mxu2 %vm409_vm1, %v9764_v23  ;;  %v10014_v20 = vsel %vm739_vm2, %v769_v8, %v771_v17 }
  0x1e   : > { %9414 = vmatpush.msra.mxu3 %v8419_v3  ;;  %v8422_v3 = vld [vmem:[%s16522_s1 + $0x78] sm:$0xf]  ;;  %1338 = vmatpush.msrb.mxu0 %v8489_v11  ;;  %v10062_v62 = vsel %vm739_vm2, %v789_v28, %v791_v51 }
  0x1f   : > { %8384 = vmatmul.msk.f32.gmra.mxu1 %vm409_vm1, %v9726_v14  ;;  %16717 = vst [vmem:[#allocation4_spill] sm:$0xff] %v10062_v62 }
  0x20   : > { %9415 = vmatpush.msra.mxu3 %v8417_v6  ;;  %v9978_v6 = vsel %vm739_vm2, %v765_v1, %v767_v5  ;;  %1451 = vmatpush.msrb.mxu1 %v8490_v21 }
  0x22   : > { %9416 = vmatpush.msra.mxu3 %v8415_v9  ;;  %v9993_v9 = vsel %vm739_vm2, %v767_v5, %v769_v8  ;;  %v793_v5 = vrot.slane %v9796_v31, 1  ;;  %v10077_v8 = vld [vmem:[%s9710_s20 + $0x98] sm:$0xff] }
  0x23   : > { %8352 = vmatmul.msk.f32.gmra.mxu0 %vm409_vm1, %v9739_v18  ;;  %v777_v11 = vrot.slane %v10077_v8, 1 }
  0x24   : > { %v10089_v21 = vsel %vm739_vm2, %v791_v51, %v793_v5  ;;  %v795_v51 = vrot.slane %v9817_v36, 1 }
  0x25   : > { %8376 = vmatmul.msk.f32.gmra.mxu3 %vm409_vm1, %v9775_v26  ;;  %8426 = vmatmul.msk.f32.gmra.mxu2 %vm409_vm1, %v9782_v27  ;;  %16719 = vst [vmem:[#allocation6_spill] sm:$0xff] %v10089_v21 }
  0x27   : > { %8385 = vmatmul.msk.f32.gmra.mxu1 %vm409_vm1, %v9739_v18 }
  0x2b   : > { %8353 = vmatmul.msk.f32.gmra.mxu0 %vm409_vm1, %v9767_v24 }
  0x2d   : > { %8377 = vmatmul.msk.f32.gmra.mxu3 %vm409_vm1, %v9796_v31  ;;  %8427 = vmatmul.msk.f32.gmra.mxu2 %vm409_vm1, %v9803_v32 }
  0x2f   : > { %8386 = vmatmul.msk.f32.gmra.mxu1 %vm409_vm1, %v9767_v24 }
  0x33   : > { %8354 = vmatmul.msk.f32.gmra.mxu0 %vm409_vm1, %v9788_v29 }
  0x35   : > { %8378 = vmatmul.msk.f32.gmra.mxu3 %vm409_vm1, %v9817_v36  ;;  %8428 = vmatmul.msk.f32.gmra.mxu2 %vm409_vm1, %v9824_v37 }
  0x37   : > { %8387 = vmatmul.msk.f32.gmra.mxu1 %vm409_vm1, %v9788_v29 }
  0x3b   : > { %8355 = vmatmul.msk.f32.gmra.mxu0 %vm409_vm1, %v9809_v34 }
  0x3d   : > { %8379 = vmatmul.msk.f32.gmra.mxu3 %vm409_vm1, %v9835_v40  ;;  %8429 = vmatmul.msk.f32.gmra.mxu2 %vm409_vm1, %v9842_v41 }
  0x3f   : > { %8388 = vmatmul.msk.f32.gmra.mxu1 %vm409_vm1, %v9809_v34 }
  0x43   : > { %8356 = vmatmul.msk.f32.gmra.mxu0 %vm409_vm1, %v9827_v38 }
  0x45   : > { %8380 = vmatmul.msk.f32.gmra.mxu3 %vm409_vm1, %v9853_v44  ;;  %8430 = vmatmul.msk.f32.gmra.mxu2 %vm409_vm1, %v9860_v45 }
  0x47   : > { %8389 = vmatmul.msk.f32.gmra.mxu1 %vm409_vm1, %v9827_v38 }
  0x4b   : > { %8357 = vmatmul.msk.f32.gmra.mxu0 %vm409_vm1, %v9845_v42 }
  0x4d   : > { %8381 = vmatmul.msk.f32.gmra.mxu3 %vm409_vm1, %v9871_v48  ;;  %8431 = vmatmul.msk.f32.gmra.mxu2 %vm409_vm1, %v9878_v49 }
  0x4f   : > { %8390 = vmatmul.msk.f32.gmra.mxu1 %vm409_vm1, %v9845_v42 }
  0x53   : > { %8358 = vmatmul.msk.f32.gmra.mxu0 %vm409_vm1, %v9863_v46 }
  0x55   : > { %8407 = vmatmul.msk.f32.vlgmr.msrb.gmra.mxu3 %vm409_vm1, %v9722_v13  ;;  %8432 = vmatmul.msk.f32.gmra.mxu2 %vm409_vm1, %v9893_v52 }
  0x56   : > { %8456 = vmatpush.msk.msrb.mxu3 %vm506_vm0, %v8422_v3 }
  0x57   : > { %8391 = vmatmul.msk.f32.gmra.mxu1 %vm409_vm1, %v9863_v46 }
  0x58   : > { %1012 = vmatpush.msrb.mxu3 %v8420_v10 }
  0x5a   : > { %1013 = vmatpush.msrb.mxu3 %v8418_v43 }
  0x5b   : > { %8359 = vmatmul.msk.f32.gmra.mxu0 %vm409_vm1, %v9881_v50 }
  0x5d   : > { %8408 = vmatmul.msk.f32.gmra.mxu3 %vm409_vm1, %v9755_v22  ;;  %8433 = vmatmul.msk.f32.gmra.mxu2 %vm409_vm1, %v9911_v56  ;;  %v10041_v22 = vsel %vm739_vm2, %v771_v17, %v773_v33 }
  0x5f   : > { %8392 = vmatmul.msk.f32.gmra.mxu1 %vm409_vm1, %v9881_v50 }
  0x63   : > { %8360 = vmatmul.msk.f32.gmra.mxu0 %vm409_vm1, %v9899_v54 }
  0x65   : > { %8409 = vmatmul.msk.f32.gmra.mxu3 %vm409_vm1, %v9775_v26  ;;  %8434 = vmatmul.msk.f32.gmra.mxu2 %vm409_vm1, %v9929_v60  ;;  %v10071_v26 = vsel %vm739_vm2, %v773_v33, %v775_v57  ;;  %v8416_v33 = vld [vmem:[%s16522_s1 + $0x48] sm:$0xff] }
  0x66   : > { %1014 = vmatpush.msrb.mxu3 %v8416_v33 }
  0x67   : > { %8393 = vmatmul.msk.f32.gmra.mxu1 %vm409_vm1, %v9899_v54 }
  0x6b   : > { %8361 = vmatmul.msk.f32.gmra.mxu0 %vm409_vm1, %v9917_v58 }
  0x6d   : > { %8410 = vmatmul.msk.f32.gmra.mxu3 %vm409_vm1, %v9796_v31  ;;  %8435 = vmatmul.msk.f32.gmra.mxu2 %vm409_vm1, %v9944_v63  ;;  %v10098_v31 = vsel %vm739_vm2, %v775_v57, %v777_v11  ;;  %v779_v57 = vrot.slane %v10107_v25, 1 }
  0x6e   : > { %16720 = vst [vmem:[#allocation7_spill] sm:$0xff] %v10098_v31 }
  0x6f   : > { %8394 = vmatmul.msk.f32.gmra.mxu1 %vm409_vm1, %v9917_v58 }
  0x73   : > { %8362 = vmatmul.msk.f32.gmra.mxu0 %vm409_vm1, %v9932_v61 }
  0x75   : > { %8411 = vmatmul.msk.f32.gmra.mxu3 %vm409_vm1, %v9817_v36  ;;  %8436 = vmatmul.msk.f32.gmra.mxu2 %vm409_vm1, %v9959_v2  ;;  %v10128_v36 = vsel %vm739_vm2, %v777_v11, %v779_v57 }
  0x76   : > { %16725 = vst [vmem:[#allocation12_spill] sm:$0xff] %v10128_v36 }
  0x77   : > { %8395 = vmatmul.msk.f32.gmra.mxu1 %vm409_vm1, %v9932_v61 }
  0x7b   : > { %8363 = vmatmul.msk.f32.gmra.mxu0 %vm409_vm1, %v9947_v0 }
  0x7d   : > { %8412 = vmatmul.msk.f32.gmra.mxu3 %vm409_vm1, %v9835_v40  ;;  %8437 = vmatmul.msk.f32.gmra.mxu2 %vm409_vm1, %v9978_v6 }
  0x7f   : > { %8396 = vmatmul.msk.f32.gmra.mxu1 %vm409_vm1, %v9947_v0 }
  0x83   : > { %8364 = vmatmul.msk.f32.gmra.mxu0 %vm409_vm1, %v9965_v4 }
  0x85   : > { %8413 = vmatmul.msk.f32.gmra.mxu3 %vm409_vm1, %v9853_v44  ;;  %8438 = vmatmul.msk.f32.gmra.mxu2 %vm409_vm1, %v9993_v9 }
  0x87   : > { %8397 = vmatmul.msk.f32.gmra.mxu1 %vm409_vm1, %v9965_v4 }
  0x8b   : > { %8365 = vmatmul.msk.f32.gmra.mxu0 %vm409_vm1, %v9981_v7 }
  0x8d   : > { %8414 = vmatmul.msk.f32.gmra.mxu3 %vm409_vm1, %v9871_v48  ;;  %8439 = vmatmul.msk.f32.gmra.mxu2 %vm409_vm1, %v10014_v20 }
  0x8f   : > { %8398 = vmatmul.msk.f32.gmra.mxu1 %vm409_vm1, %v9981_v7 }
  0x90   : > { %v10029_v35 = vpop.f32.mrf.mxu0 }
  0x93   : > { %8366 = vmatmul.msk.f32.gmra.mxu0 %vm409_vm1, %v10002_v16 }
  0x94   : > { %v10046_v47 = vpop.f32.mrf.mxu1 }
  0x95   : > { %8448 = vmatmul.msk.f32.vlgmr.msra.gmra.mxu3 %vm409_vm1, %v10034_v39  ;;  %8440 = vmatmul.msk.f32.gmra.mxu2 %vm409_vm1, %v10041_v22 }
  0x97   : > { %8399 = vmatmul.msk.f32.gmra.mxu1 %vm409_vm1, %v10002_v16 }
  0x98   : > { %v10052_v55 = vpop.f32.mrf.mxu3  ;;  %v10059_v59 = vpop.f32.mrf.mxu0 }
  0x99   : > { %v10064_v1 = vpop.f32.mrf.mxu2 }
  0x9b   : > { %8367 = vmatmul.msk.f32.gmra.mxu0 %vm409_vm1, %v10022_v30 }
  0x9c   : > { %v10073_v3 = vpop.f32.mrf.mxu1 }
  0x9d   : > { %8449 = vmatmul.msk.f32.gmra.mxu3 %vm409_vm1, %v10062_v62  ;;  %8441 = vmatmul.msk.f32.gmra.mxu2 %vm409_vm1, %v10071_v26  ;;  %v10119_v62 = vsel %vm739_vm2, %v793_v5, %v795_v51  ;;  %v8569_v5 = vld [vmem:[%s16522_s1 + $0xf0] sm:$0xf] }
  0x9e   : > { %16723 = vst [vmem:[#allocation10_spill] sm:$0xff] %v10119_v62  ;;  %8571 = vmatpush.msk.msrb.mxu2 %vm506_vm0, %v8569_v5  ;;  %v8570_v5 = vld [vmem:[%s16522_s1 + $0xf8] sm:$0xf] }
  0x9f   : > { %8400 = vmatmul.msk.f32.gmra.mxu1 %vm409_vm1, %v10022_v30  ;;  %8604 = vmatpush.msk.msra.mxu3 %vm506_vm0, %v8570_v5 }
  0xa0   : > { %v10079_v10 = vpop.f32.mrf.mxu3  ;;  %v10086_v17 = vpop.f32.mrf.mxu0 }
  0xa1   : > { %16718 = vst [vmem:[#allocation5_spill] sm:$0xff] %v10086_v17  ;;  %v10091_v28 = vpop.f32.mrf.mxu2  ;;  %v10134_v17 = vld [vmem:[%s9710_s20 + $0xa8] sm:$0xff] }
  0xa2   : > { %16727 = vst [vmem:[#allocation14_spill] sm:$0xff] %v10134_v17  ;;  %v781_v11 = vrot.slane %v10134_v17, 1 }
  0xa3   : > { %8368 = vmatmul.msk.f32.gmra.mxu0 %vm409_vm1, %v10050_v53 }
  0xa4   : > { %v10103_v43 = vpop.f32.mrf.mxu1 }
  0xa5   : > { %8450 = vmatmul.msk.f32.gmra.mxu3 %vm409_vm1, %v10089_v21  ;;  %16721 = vst [vmem:[#allocation8_spill] sm:$0xff] %v10103_v43  ;;  %8442 = vmatmul.msk.f32.gmra.mxu2 %vm409_vm1, %v10098_v31  ;;  %v797_v43 = vrot.slane %v9835_v40, 1  ;;  %v10177_v31 = vld [vmem:[%s9710_s20 + $0xb0] sm:$0xff] }
  0xa7   : > { %8401 = vmatmul.msk.f32.gmra.mxu1 %vm409_vm1, %v10050_v53 }
  0xa8   : > { %v10109_v15 = vpop.f32.mrf.mxu3  ;;  %v10116_v21 = vpop.f32.mrf.mxu0 }
  0xa9   : > { %16722 = vst [vmem:[#allocation9_spill] sm:$0xff] %v10116_v21  ;;  %v10121_v39 = vpop.f32.mrf.mxu2 }
  0xaa   : > { %16724 = vst [vmem:[#allocation11_spill] sm:$0xff] %v10121_v39  ;;  %v8565_v39 = vld [vmem:[%s16522_s1 + $0xd0] sm:$0xff] }
  0xab   : > { %8369 = vmatmul.msk.f32.gmra.mxu0 %vm409_vm1, %v10077_v8 }
  0xac   : > { %v10130_v33 = vpop.f32.mrf.mxu1 }
  0xad   : > { %8451 = vmatmul.msk.f32.gmra.mxu3 %vm409_vm1, %v10119_v62  ;;  %16726 = vst [vmem:[#allocation13_spill] sm:$0xff] %v10130_v33  ;;  %8443 = vmatmul.msk.f32.gmra.mxu2 %vm409_vm1, %v10128_v36  ;;  %v10150_v62 = vsel %vm739_vm2, %v795_v51, %v797_v43  ;;  %v8567_v33 = vld [vmem:[%s16522_s1 + $0xe0] sm:$0xff]  ;;  %v10165_v51 = vsel %vm739_vm2, %v779_v57, %v781_v11 }
  0xae   : > { %16729 = vst [vmem:[#allocation16_spill] sm:$0xff] %v10150_v62  ;;  %1773 = vmatpush.msrb.mxu2 %v8567_v33  ;;  %v8643_v33 = vld [vmem:[%s16522_s1 + $0x130] sm:$0xf]  ;;  %v8563_v57 = vld [vmem:[%s16522_s1 + $0xc0] sm:$0xff] }
  0xaf   : > { %8402 = vmatmul.msk.f32.gmra.mxu1 %vm409_vm1, %v10077_v8  ;;  %16731 = vst [vmem:[#allocation18_spill] sm:$0xff] %v10165_v51  ;;  %8645 = vmatpush.msk.msra.mxu0 %vm506_vm0, %v8643_v33 }
  0xb0   : > { %v10136_v21 = vpop.f32.mrf.mxu3  ;;  %v10147_v40 = vpop.f32.mrf.mxu0  ;;  %1774 = vmatpush.msrb.mxu2 %v8565_v39 }
  0xb1   : > { %16728 = vst [vmem:[#allocation15_spill] sm:$0xff] %v10147_v40  ;;  %v10155_v36 = vpop.f32.mrf.mxu2 }
  0xb2   : > { %16730 = vst [vmem:[#allocation17_spill] sm:$0xff] %v10155_v36  ;;  %v799_v36 = vrot.slane %v9853_v44, 1  ;;  %v783_v44 = vrot.slane %v10177_v31, 1  ;;  %1775 = vmatpush.msrb.mxu2 %v8563_v57  ;;  %v8644_v57 = vld [vmem:[%s16522_s1 + $0x138] sm:$0xf] }
  0xb3   : > { %8370 = vmatmul.msk.f32.gmra.mxu0 %vm409_vm1, %v10107_v25  ;;  %8678 = vmatpush.msk.msra.mxu1 %vm506_vm0, %v8644_v57 }
  0xb4   : > { %v10173_v40 = vpop.f32.mrf.mxu1  ;;  %v10194_v5 = vsel %vm739_vm2, %v797_v43, %v799_v36  ;;  %v10203_v33 = vsel %vm739_vm2, %v781_v11, %v783_v44  ;;  %v801_v43 = vrot.slane %v9871_v48, 1 }
  0xb5   : > { %8452 = vmatmul.msk.f32.gmra.mxu3 %vm409_vm1, %v10150_v62  ;;  %16732 = vst [vmem:[#allocation19_spill] sm:$0xff] %v10173_v40  ;;  %8444 = vmatmul.msk.f32.gmra.mxu2 %vm409_vm1, %v10165_v51 }
  0xb6   : > { %16734 = vst [vmem:[#allocation21_spill] sm:$0xff] %v10194_v5 }
  0xb7   : > { %8403 = vmatmul.msk.f32.gmra.mxu1 %vm409_vm1, %v10107_v25  ;;  %16736 = vst [vmem:[#allocation23_spill] sm:$0xff] %v10203_v33 }
  0xb8   : > { %v10184_v62 = vpop.f32.mrf.mxu3  ;;  %v10191_v39 = vpop.f32.mrf.mxu0 }
  0xb9   : > { %16733 = vst [vmem:[#allocation20_spill] sm:$0xff] %v10191_v39  ;;  %v10196_v40 = vpop.f32.mrf.mxu2  ;;  %v10212_v39 = vld [vmem:[%s9710_s20 + $0xb8] sm:$0xff] }
  0xba   : > { %16735 = vst [vmem:[#allocation22_spill] sm:$0xff] %v10196_v40  ;;  %v785_v11 = vrot.slane %v10212_v39, 1 }
  0xbb   : > { %8371 = vmatmul.msk.f32.gmra.mxu0 %vm409_vm1, %v10134_v17 }
  0xbc   : > { %v10208_v51 = vpop.f32.mrf.mxu1  ;;  %v10234_v57 = vsel %vm739_vm2, %v783_v44, %v785_v11  ;;  %v16747_v44 = vrot.slane %v9722_v13, 1  ;;  %v16553_v13 = vrot.slane %v9719_v12, 3 }
  0xbd   : > { %8453 = vmatmul.msk.f32.gmra.mxu3 %vm409_vm1, %v10194_v5  ;;  %16737 = vst [vmem:[#allocation24_spill] sm:$0xff] %v10208_v51  ;;  %8445 = vmatmul.msk.f32.gmra.mxu2 %vm409_vm1, %v10203_v33  ;;  %v10225_v51 = vsel %vm739_vm2, %v799_v36, %v801_v43 }
  0xbe   : > { %16739 = vst [vmem:[#allocation26_spill] sm:$0xff] %v10225_v51 }
  0xbf   : > { %8404 = vmatmul.msk.f32.gmra.mxu1 %vm409_vm1, %v10134_v17  ;;  %16741 = vst [vmem:[#allocation28_spill] sm:$0xff] %v10234_v57 }
  0xc0   : > { %v10215_v40 = vpop.f32.mrf.mxu3  ;;  %v10222_v5 = vpop.f32.mrf.mxu0 }
  0xc1   : > { %16738 = vst [vmem:[#allocation25_spill] sm:$0xff] %v10222_v5  ;;  %v10227_v48 = vpop.f32.mrf.mxu2  ;;  %v16744_v5 = vrot.slane %v9719_v12, 1 }
  0xc2   : > { %16740 = vst [vmem:[#allocation27_spill] sm:$0xff] %v10227_v48 }
  0xc3   : > { %8372 = vmatmul.msk.f32.gmra.mxu0 %vm409_vm1, %v10177_v31  ;;  %v10249_v48 = vsel %vm739_vm2, %v801_v43, %v16744_v5  ;;  %v1178_v5 = vrot.slane %v9726_v14, 2 }
  0xc4   : > { %v10236_v33 = vpop.f32.mrf.mxu1  ;;  %16745 = vst [vmem:[#allocation31_spill] sm:$0xff] %v10249_v48 }
  0xc5   : > { %8454 = vmatmul.msk.f32.gmra.mxu3 %vm409_vm1, %v10225_v51  ;;  %16742 = vst [vmem:[#allocation29_spill] sm:$0xff] %v10236_v33  ;;  %8446 = vmatmul.msk.f32.gmra.mxu2 %vm409_vm1, %v10234_v57  ;;  %v10260_v33 = vsel %vm739_vm2, %v785_v11, %v16747_v44  ;;  %v1615_v11 = vrot.slane %v9726_v14, 3 }
  0xc6   : > { %16748 = vst [vmem:[#allocation33_spill] sm:$0xff] %v10260_v33 }
  0xc7   : > { %8405 = vmatmul.msk.f32.gmra.mxu1 %vm409_vm1, %v10177_v31 }
  0xc8   : > { %v10238_v17 = vpop.f32.mrf.mxu3  ;;  %v10244_v36 = vpop.f32.mrf.mxu0 }
  0xc9   : > { %16743 = vst [vmem:[#allocation30_spill] sm:$0xff] %v10244_v36  ;;  %v10251_v51 = vpop.f32.mrf.mxu2  ;;  %v16550_v36 = vrot.slane %v9719_v12, 2 }
  0xca   : > { %16746 = vst [vmem:[#allocation32_spill] sm:$0xff] %v10251_v51 }
  0xcb   : > { %8373 = vmatmul.msk.f32.gmra.mxu0 %vm409_vm1, %v10212_v39 }
  0xcc   : > { %v10262_v57 = vpop.f32.mrf.mxu1 }
  0xcd   : > { %8455 = vmatmul.msk.f32.gmra.mxu3 %vm409_vm1, %v10249_v48  ;;  %16749 = vst [vmem:[#allocation34_spill] sm:$0xff] %v10262_v57  ;;  %8447 = vmatmul.msk.f32.gmra.mxu2 %vm409_vm1, %v10260_v33  ;;  %v1179_v48 = vsel %vm1176_vm3, %v16550_v36, %v1178_v5  ;;  %v10287_v33 = vsel %vm1613_vm4, %v16553_v13, %v1615_v11 }
  0xce   : > { %16752 = vst [vmem:[#allocation37_spill] sm:$0xff] %v10287_v33 }
  0xcf   : > { %8406 = vmatmul.msk.f32.gmra.mxu1 %vm409_vm1, %v10212_v39 }
  0xd0   : > { %v10266_v43 = vpop.f32.mrf.mxu3  ;;  %v10274_v44 = vpop.f32.mrf.mxu0 }
  0xd1   : > { %16750 = vst [vmem:[#allocation35_spill] sm:$0xff] %v10274_v44  ;;  %v10279_v57 = vpop.f32.mrf.mxu2  ;;  %v1180_v44 = vrot.slane %v9739_v18, 2 }
  0xd2   : > { %16751 = vst [vmem:[#allocation36_spill] sm:$0xff] %v10279_v57 }
  0xd3   : > { %8498 = vmatmul.msk.f32.vlgmr.msrb.gmra.mxu0 %vm409_vm1, %v1179_v48  ;;  %v1181_v12 = vsel %vm1176_vm3, %v1178_v5, %v1180_v44 }
  0xd4   : > { %v10289_v14 = vpop.f32.mrf.mxu1 }
  0xd5   : > { %8457 = vmatmul.msk.f32.vlgmr.msrb.gmra.mxu3 %vm409_vm1, %v9744_v19  ;;  %8572 = vmatmul.msk.f32.vlgmr.msrb.gmra.mxu2 %vm409_vm1, %v10287_v33  ;;  %v1617_v19 = vrot.slane %v9739_v18, 3  ;;  %v1619_v18 = vrot.slane %v9767_v24, 3 }
  0xd7   : > { %8531 = vmatmul.msk.f32.vlgmr.msrb.gmra.mxu1 %vm409_vm1, %v1179_v48  ;;  %v10307_v13 = vsel %vm1613_vm4, %v1615_v11, %v1617_v19  ;;  %v1182_v48 = vrot.slane %v9767_v24, 2  ;;  %v10327_v11 = vsel %vm1613_vm4, %v1617_v19, %v1619_v18  ;;  %v1621_v24 = vrot.slane %v9788_v29, 3 }
  0xd8   : > { %v10292_v51 = vpop.f32.mrf.mxu3  ;;  %v10298_v36 = vpop.f32.mrf.mxu0 }
  0xd9   : > { %16753 = vst [vmem:[#allocation38_spill] sm:$0xff] %v10292_v51  ;;  %v10301_v57 = vpop.f32.mrf.mxu2  ;;  %v10347_v19 = vsel %vm1613_vm4, %v1619_v18, %v1621_v24 }
  0xda   : > { %16754 = vst [vmem:[#allocation39_spill] sm:$0xff] %v10298_v36 }
  0xdb   : > { %16755 = vst [vmem:[#allocation40_spill] sm:$0xff] %v10301_v57  ;;  %8499 = vmatmul.msk.f32.gmra.mxu0 %vm409_vm1, %v1181_v12 }
  0xdc   : > { %v10309_v51 = vpop.f32.mrf.mxu1 }
  0xdd   : > { %8458 = vmatmul.msk.f32.gmra.mxu3 %vm409_vm1, %v9764_v23  ;;  %8573 = vmatmul.msk.f32.gmra.mxu2 %vm409_vm1, %v10307_v13  ;;  %v1183_v23 = vsel %vm1176_vm3, %v1180_v44, %v1182_v48 }
  0xdf   : > { %8532 = vmatmul.msk.f32.gmra.mxu1 %vm409_vm1, %v1181_v12  ;;  %v1184_v12 = vrot.slane %v9788_v29, 2  ;;  %v1623_v29 = vrot.slane %v9809_v34, 3 }
  0xe0   : > { %v10312_v33 = vpop.f32.mrf.mxu3  ;;  %v10318_v5 = vpop.f32.mrf.mxu0 }
  0xe1   : > { %16756 = vst [vmem:[#allocation41_spill] sm:$0xff] %v10312_v33  ;;  %v10321_v36 = vpop.f32.mrf.mxu2  ;;  %v10367_v18 = vsel %vm1613_vm4, %v1621_v24, %v1623_v29  ;;  %v1625_v24 = vrot.slane %v9827_v38, 3 }
  0xe2   : > { %16757 = vst [vmem:[#allocation42_spill] sm:$0xff] %v10318_v5 }
  0xe3   : > { %16758 = vst [vmem:[#allocation43_spill] sm:$0xff] %v10321_v36  ;;  %8500 = vmatmul.msk.f32.gmra.mxu0 %vm409_vm1, %v1183_v23 }
  0xe4   : > { %v10329_v57 = vpop.f32.mrf.mxu1 }
  0xe5   : > { %8459 = vmatmul.msk.f32.gmra.mxu3 %vm409_vm1, %v9782_v27  ;;  %8574 = vmatmul.msk.f32.gmra.mxu2 %vm409_vm1, %v10327_v11  ;;  %v1185_v27 = vsel %vm1176_vm3, %v1182_v48, %v1184_v12 }
  0xe7   : > { %8533 = vmatmul.msk.f32.gmra.mxu1 %vm409_vm1, %v1183_v23  ;;  %v1186_v23 = vrot.slane %v9809_v34, 2  ;;  %v8641_v34 = vld [vmem:[%s16522_s1 + $0x120] sm:$0xff] }
  0xe8   : > { %v10332_v33 = vpop.f32.mrf.mxu3  ;;  %v10338_v44 = vpop.f32.mrf.mxu0  ;;  %2209 = vmatpush.msra.mxu0 %v8641_v34 }
  0xe9   : > { %16759 = vst [vmem:[#allocation44_spill] sm:$0xff] %v10332_v33  ;;  %v10341_v5 = vpop.f32.mrf.mxu2 }
  0xea   : > { %16760 = vst [vmem:[#allocation45_spill] sm:$0xff] %v10338_v44 }
  0xeb   : > { %16761 = vst [vmem:[#allocation46_spill] sm:$0xff] %v10341_v5  ;;  %8501 = vmatmul.msk.f32.gmra.mxu0 %vm409_vm1, %v1185_v27 }
  0xec   : > { %v10349_v36 = vpop.f32.mrf.mxu1 }
  0xed   : > { %8460 = vmatmul.msk.f32.gmra.mxu3 %vm409_vm1, %v9803_v32  ;;  %8575 = vmatmul.msk.f32.gmra.mxu2 %vm409_vm1, %v10347_v19  ;;  %v1187_v32 = vsel %vm1176_vm3, %v1184_v12, %v1186_v23  ;;  %v1188_v12 = vrot.slane %v9827_v38, 2  ;;  %v1190_v38 = vrot.slane %v9845_v42, 2 }
  0xef   : > { %8534 = vmatmul.msk.f32.gmra.mxu1 %vm409_vm1, %v1185_v27  ;;  %v8568_v27 = vld [vmem:[%s16522_s1 + $0xe8] sm:$0xff]  ;;  %v1189_v5 = vsel %vm1176_vm3, %v1186_v23, %v1188_v12 }
  0xf0   : > { %v10352_v33 = vpop.f32.mrf.mxu3  ;;  %v10358_v48 = vpop.f32.mrf.mxu0  ;;  %1886 = vmatpush.msra.mxu3 %v8568_v27  ;;  %v10393_v27 = vsel %vm1613_vm4, %v1623_v29, %v1625_v24 }
  0xf1   : > { %16762 = vst [vmem:[#allocation47_spill] sm:$0xff] %v10352_v33  ;;  %v10361_v44 = vpop.f32.mrf.mxu2 }
  0xf2   : > { %16763 = vst [vmem:[#allocation48_spill] sm:$0xff] %v10358_v48 }
  0xf3   : > { %16764 = vst [vmem:[#allocation49_spill] sm:$0xff] %v10361_v44  ;;  %8502 = vmatmul.msk.f32.gmra.mxu0 %vm409_vm1, %v1187_v32 }
  0xf4   : > { %v10375_v48 = vpop.f32.mrf.mxu1 }
  0xf5   : > { %8461 = vmatmul.msk.f32.gmra.mxu3 %vm409_vm1, %v9824_v37  ;;  %8576 = vmatmul.msk.f32.gmra.mxu2 %vm409_vm1, %v10367_v18 }
  0xf7   : > { %8535 = vmatmul.msk.f32.gmra.mxu1 %vm409_vm1, %v1187_v32  ;;  %v8642_v32 = vld [vmem:[%s16522_s1 + $0x128] sm:$0xff] }
  0xf8   : > { %v10378_v37 = vpop.f32.mrf.mxu3  ;;  %v10384_v44 = vpop.f32.mrf.mxu0  ;;  %2322 = vmatpush.msra.mxu1 %v8642_v32 }
  0xf9   : > { %16765 = vst [vmem:[#allocation50_spill] sm:$0xff] %v10378_v37  ;;  %v10387_v33 = vpop.f32.mrf.mxu2 }
  0xfa   : > { %16766 = vst [vmem:[#allocation51_spill] sm:$0xff] %v10384_v44  ;;  %v1191_v44 = vsel %vm1176_vm3, %v1188_v12, %v1190_v38 }
  0xfb   : > { %16767 = vst [vmem:[#allocation52_spill] sm:$0xff] %v10387_v33  ;;  %8503 = vmatmul.msk.f32.gmra.mxu0 %vm409_vm1, %v1189_v5 }
  0xfc   : > { %v10398_v34 = vpop.f32.mrf.mxu1 }
  0xfd   : > { %8462 = vmatmul.msk.f32.gmra.mxu3 %vm409_vm1, %v9842_v41  ;;  %8577 = vmatmul.msk.f32.gmra.mxu2 %vm409_vm1, %v10393_v27  ;;  %v1627_v41 = vrot.slane %v9845_v42, 3  ;;  %v1629_v42 = vrot.slane %v9863_v46, 3 }
  0xff   : > { %8536 = vmatmul.msk.f32.gmra.mxu1 %vm409_vm1, %v1189_v5  ;;  %v10416_v32 = vsel %vm1613_vm4, %v1625_v24, %v1627_v41  ;;  %v1192_v5 = vrot.slane %v9863_v46, 2  ;;  %v10436_v24 = vsel %vm1613_vm4, %v1627_v41, %v1629_v42  ;;  %v1631_v46 = vrot.slane %v9881_v50, 3 }
 0x100   : > { %v10401_v23 = vpop.f32.mrf.mxu3  ;;  %v10407_v29 = vpop.f32.mrf.mxu0  ;;  %16771 = vst [vmem:[#allocation56_spill] sm:$0xff] %v10416_v32 }
 0x101   : > { %16768 = vst [vmem:[#allocation53_spill] sm:$0xff] %v10401_v23  ;;  %v10410_v33 = vpop.f32.mrf.mxu2 }
 0x102   : > { %16769 = vst [vmem:[#allocation54_spill] sm:$0xff] %v10407_v29 }
 0x103   : > { %16770 = vst [vmem:[#allocation55_spill] sm:$0xff] %v10410_v33  ;;  %8504 = vmatmul.msk.f32.gmra.mxu0 %vm409_vm1, %v1191_v44 }
 0x104   : > { %v10418_v23 = vpop.f32.mrf.mxu1  ;;  %16775 = vst [vmem:[#allocation60_spill] sm:$0xff] %v10436_v24 }
 0x105   : > { %8463 = vmatmul.msk.f32.gmra.mxu3 %vm409_vm1, %v9860_v45  ;;  %8578 = vmatmul.msk.f32.gmra.mxu2 %vm409_vm1, %v10416_v32  ;;  %v1193_v45 = vsel %vm1176_vm3, %v1190_v38, %v1192_v5 }
 0x107   : > { %8537 = vmatmul.msk.f32.gmra.mxu1 %vm409_vm1, %v1191_v44  ;;  %v1194_v44 = vrot.slane %v9881_v50, 2  ;;  %v10464_v50 = vsel %vm1613_vm4, %v1629_v42, %v1631_v46 }
 0x108   : > { %v10421_v37 = vpop.f32.mrf.mxu3  ;;  %v10427_v12 = vpop.f32.mrf.mxu0 }
 0x109   : > { %16772 = vst [vmem:[#allocation57_spill] sm:$0xff] %v10421_v37  ;;  %v10430_v29 = vpop.f32.mrf.mxu2  ;;  %v1195_v41 = vsel %vm1176_vm3, %v1192_v5, %v1194_v44 }
 0x10a   : > { %16773 = vst [vmem:[#allocation58_spill] sm:$0xff] %v10427_v12 }
 0x10b   : > { %16774 = vst [vmem:[#allocation59_spill] sm:$0xff] %v10430_v29  ;;  %8505 = vmatmul.msk.f32.gmra.mxu0 %vm409_vm1, %v1193_v45 }
 0x10c   : > { %v10438_v33 = vpop.f32.mrf.mxu1 }
 0x10d   : > { %8464 = vmatmul.msk.f32.gmra.mxu3 %vm409_vm1, %v9878_v49  ;;  %8579 = vmatmul.msk.f32.gmra.mxu2 %vm409_vm1, %v10436_v24  ;;  %v10450_v49 = vld [vmem:[%s16523_s2] sm:$0x3] }
 0x10e   : > { %v10458_v29 = vperm.slane %v10450_v49, 0 }
 0x10f   : > { %8538 = vmatmul.msk.f32.gmra.mxu1 %vm409_vm1, %v1193_v45 }
 0x110   : > { %v10441_v37 = vpop.f32.mrf.mxu3  ;;  %v10452_v38 = vpop.f32.mrf.mxu0  ;;  %16779 = vst [vmem:[#allocation64_spill] sm:$0xff] %v10458_v29  ;;  %v603_v5 = vadd.f32 %v10052_v55, %v10458_v29 }
 0x111   : > { %16776 = vst [vmem:[#allocation61_spill] sm:$0xff] %v10441_v37  ;;  %v10455_v12 = vpop.f32.mrf.mxu2  ;;  %v1196_v37 = vrot.slane %v9899_v54, 2 }
 0x112   : > { %16777 = vst [vmem:[#allocation62_spill] sm:$0xff] %v10452_v38 }
 0x113   : > { %16778 = vst [vmem:[#allocation63_spill] sm:$0xff] %v10455_v12  ;;  %8506 = vmatmul.msk.f32.gmra.mxu0 %vm409_vm1, %v1195_v41  ;;  %v1197_v42 = vsel %vm1176_vm3, %v1194_v44, %v1196_v37 }
 0x114   : > { %v10466_v45 = vpop.f32.mrf.mxu1 }
 0x115   : > { %8465 = vmatmul.msk.f32.gmra.mxu3 %vm409_vm1, %v9893_v52  ;;  %8580 = vmatmul.msk.f32.gmra.mxu2 %vm409_vm1, %v10464_v50  ;;  %v1633_v52 = vrot.slane %v9899_v54, 3  ;;  %v606_v54 = vadd.f32 %v10079_v10, %v10458_v29 }
 0x117   : > { %8539 = vmatmul.msk.f32.gmra.mxu1 %vm409_vm1, %v1195_v41  ;;  %v10486_v55 = vsel %vm1613_vm4, %v1631_v46, %v1633_v52  ;;  %v1198_v41 = vrot.slane %v9917_v58, 2 }
 0x118   : > { %v975_v38 = vpop.f32.mrf.mxu3  ;;  %v10477_v24 = vpop.f32.mrf.mxu0 }
 0x119   : > { %v10473_v12 = vadd.f32 %v975_v38, %v603_v5  ;;  %16781 = vst [vmem:[#allocation66_spill] sm:$0xff] %v10477_v24  ;;  %v10480_v32 = vpop.f32.mrf.mxu2  ;;  %v1199_v46 = vsel %vm1176_vm3, %v1196_v37, %v1198_v41 }
 0x11a   : > { %16782 = vst [vmem:[#allocation67_spill] sm:$0xff] %v10480_v32 }
 0x11b   : > { %16780 = vst [vmem:[#allocation65_spill] sm:$0xff] %v10473_v12  ;;  %8507 = vmatmul.msk.f32.gmra.mxu0 %vm409_vm1, %v1197_v42 }
 0x11c   : > { %v10488_v38 = vpop.f32.mrf.mxu1 }
 0x11d   : > { %8466 = vmatmul.msk.f32.gmra.mxu3 %vm409_vm1, %v9911_v56  ;;  %8581 = vmatmul.msk.f32.gmra.mxu2 %vm409_vm1, %v10486_v55  ;;  %v1635_v56 = vrot.slane %v9917_v58, 3  ;;  %v609_v58 = vadd.f32 %v10109_v15, %v10458_v29 }
 0x11f   : > { %8540 = vmatmul.msk.f32.gmra.mxu1 %vm409_vm1, %v1197_v42  ;;  %v10508_v10 = vsel %vm1613_vm4, %v1633_v52, %v1635_v56  ;;  %v1200_v42 = vrot.slane %v9932_v61, 2 }
 0x120   : > { %v978_v5 = vpop.f32.mrf.mxu3  ;;  %v10499_v12 = vpop.f32.mrf.mxu0 }
 0x121   : > { %v10495_v44 = vadd.f32 %v978_v5, %v606_v54  ;;  %16784 = vst [vmem:[#allocation69_spill] sm:$0xff] %v10499_v12  ;;  %v10502_v24 = vpop.f32.mrf.mxu2  ;;  %v1201_v52 = vsel %vm1176_vm3, %v1198_v41, %v1200_v42 }
 0x122   : > { %16785 = vst [vmem:[#allocation70_spill] sm:$0xff] %v10502_v24 }
 0x123   : > { %16783 = vst [vmem:[#allocation68_spill] sm:$0xff] %v10495_v44  ;;  %8508 = vmatmul.msk.f32.gmra.mxu0 %vm409_vm1, %v1199_v46 }
 0x124   : > { %v10510_v54 = vpop.f32.mrf.mxu1 }
 0x125   : > { %8467 = vmatmul.msk.f32.gmra.mxu3 %vm409_vm1, %v9929_v60  ;;  %8582 = vmatmul.msk.f32.gmra.mxu2 %vm409_vm1, %v10508_v10  ;;  %v1637_v60 = vrot.slane %v9932_v61, 3  ;;  %v612_v61 = vadd.f32 %v10136_v21, %v10458_v29 }
 0x127   : > { %8541 = vmatmul.msk.f32.gmra.mxu1 %vm409_vm1, %v1199_v46  ;;  %v10530_v15 = vsel %vm1613_vm4, %v1635_v56, %v1637_v60  ;;  %v1202_v46 = vrot.slane %v9947_v0, 2 }
 0x128   : > { %v981_v5 = vpop.f32.mrf.mxu3  ;;  %v10521_v44 = vpop.f32.mrf.mxu0 }
 0x129   : > { %v10517_v37 = vadd.f32 %v981_v5, %v609_v58  ;;  %16787 = vst [vmem:[#allocation72_spill] sm:$0xff] %v10521_v44  ;;  %v10524_v12 = vpop.f32.mrf.mxu2  ;;  %v1203_v56 = vsel %vm1176_vm3, %v1200_v42, %v1202_v46  ;;  %v1204_v42 = vrot.slane %v9965_v4, 2 }
 0x12a   : > { %16788 = vst [vmem:[#allocation73_spill] sm:$0xff] %v10524_v12 }
 0x12b   : > { %16786 = vst [vmem:[#allocation71_spill] sm:$0xff] %v10517_v37  ;;  %8509 = vmatmul.msk.f32.gmra.mxu0 %vm409_vm1, %v1201_v52 }
 0x12c   : > { %v10532_v58 = vpop.f32.mrf.mxu1 }
 0x12d   : > { %8468 = vmatmul.msk.f32.gmra.mxu3 %vm409_vm1, %v9944_v63  ;;  %8583 = vmatmul.msk.f32.gmra.mxu2 %vm409_vm1, %v10530_v15  ;;  %v1639_v63 = vrot.slane %v9947_v0, 3  ;;  %v8639_v0 = vld [vmem:[%s16522_s1 + $0x110] sm:$0xff] }
 0x12e   : > { %2210 = vmatpush.msra.mxu0 %v8639_v0 }
 0x12f   : > { %8542 = vmatmul.msk.f32.gmra.mxu1 %vm409_vm1, %v1201_v52  ;;  %v10552_v21 = vsel %vm1613_vm4, %v1637_v60, %v1639_v63  ;;  %v8566_v52 = vld [vmem:[%s16522_s1 + $0xd8] sm:$0xff] }
 0x130   : > { %v984_v5 = vpop.f32.mrf.mxu3  ;;  %v10543_v37 = vpop.f32.mrf.mxu0  ;;  %1887 = vmatpush.msra.mxu3 %v8566_v52 }
 0x131   : > { %v10539_v41 = vadd.f32 %v984_v5, %v612_v61  ;;  %16790 = vst [vmem:[#allocation75_spill] sm:$0xff] %v10543_v37  ;;  %v10546_v44 = vpop.f32.mrf.mxu2 }
 0x132   : > { %16791 = vst [vmem:[#allocation76_spill] sm:$0xff] %v10546_v44  ;;  %v1205_v44 = vsel %vm1176_vm3, %v1202_v46, %v1204_v42  ;;  %v618_v46 = vadd.f32 %v10215_v40, %v10458_v29 }
 0x133   : > { %16789 = vst [vmem:[#allocation74_spill] sm:$0xff] %v10539_v41  ;;  %8510 = vmatmul.msk.f32.gmra.mxu0 %vm409_vm1, %v1203_v56  ;;  %v1641_v41 = vrot.slane %v9965_v4, 3  ;;  %v1206_v4 = vrot.slane %v9981_v7, 2 }
 0x134   : > { %v10560_v61 = vpop.f32.mrf.mxu1 }
 0x135   : > { %8469 = vmatmul.msk.f32.gmra.mxu3 %vm409_vm1, %v9959_v2  ;;  %v615_v2 = vadd.f32 %v10184_v62, %v10458_v29  ;;  %8584 = vmatmul.msk.f32.gmra.mxu2 %vm409_vm1, %v10552_v21  ;;  %v10580_v62 = vsel %vm1613_vm4, %v1639_v63, %v1641_v41  ;;  %v1643_v63 = vrot.slane %v9981_v7, 3  ;;  %v621_v7 = vadd.f32 %v10238_v17, %v10458_v29 }
 0x137   : > { %8543 = vmatmul.msk.f32.gmra.mxu1 %vm409_vm1, %v1203_v56  ;;  %v8640_v56 = vld [vmem:[%s16522_s1 + $0x118] sm:$0xff]  ;;  %v10605_v40 = vsel %vm1613_vm4, %v1641_v41, %v1643_v63 }
 0x138   : > { %v987_v5 = vpop.f32.mrf.mxu3  ;;  %v10571_v37 = vpop.f32.mrf.mxu0  ;;  %2323 = vmatpush.msra.mxu1 %v8640_v56 }
 0x139   : > { %v10567_v60 = vadd.f32 %v987_v5, %v615_v2  ;;  %16793 = vst [vmem:[#allocation78_spill] sm:$0xff] %v10571_v37  ;;  %v10574_v12 = vpop.f32.mrf.mxu2  ;;  %v1207_v5 = vsel %vm1176_vm3, %v1204_v42, %v1206_v4 }
 0x13a   : > { %16794 = vst [vmem:[#allocation79_spill] sm:$0xff] %v10574_v12 }
 0x13b   : > { %16792 = vst [vmem:[#allocation77_spill] sm:$0xff] %v10567_v60  ;;  %8511 = vmatmul.msk.f32.gmra.mxu0 %vm409_vm1, %v1205_v44 }
 0x13c   : > { %v10585_v52 = vpop.f32.mrf.mxu1 }
 0x13d   : > { %8470 = vmatmul.msk.f32.gmra.mxu3 %vm409_vm1, %v9978_v6  ;;  %8585 = vmatmul.msk.f32.gmra.mxu2 %vm409_vm1, %v10580_v62 }
 0x13f   : > { %8544 = vmatmul.msk.f32.gmra.mxu1 %vm409_vm1, %v1205_v44  ;;  %v1208_v44 = vrot.slane %v10002_v16, 2 }
 0x140   : > { %v990_v0 = vpop.f32.mrf.mxu3  ;;  %v10596_v2 = vpop.f32.mrf.mxu0 }
 0x141   : > { %v10592_v6 = vadd.f32 %v990_v0, %v618_v46  ;;  %16796 = vst [vmem:[#allocation81_spill] sm:$0xff] %v10596_v2  ;;  %v10599_v60 = vpop.f32.mrf.mxu2  ;;  %v1209_v41 = vsel %vm1176_vm3, %v1206_v4, %v1208_v44 }
 0x142   : > { %16797 = vst [vmem:[#allocation82_spill] sm:$0xff] %v10599_v60 }
 0x143   : > { %16795 = vst [vmem:[#allocation80_spill] sm:$0xff] %v10592_v6  ;;  %8512 = vmatmul.msk.f32.gmra.mxu0 %vm409_vm1, %v1207_v5 }
 0x144   : > { %v10607_v56 = vpop.f32.mrf.mxu1 }
 0x145   : > { %8471 = vmatmul.msk.f32.gmra.mxu3 %vm409_vm1, %v9993_v9  ;;  %8586 = vmatmul.msk.f32.gmra.mxu2 %vm409_vm1, %v10605_v40  ;;  %v1645_v9 = vrot.slane %v10002_v16, 3  ;;  %v624_v16 = vadd.f32 %v10266_v43, %v10458_v29 }
 0x147   : > { %8545 = vmatmul.msk.f32.gmra.mxu1 %vm409_vm1, %v1207_v5  ;;  %v10627_v17 = vsel %vm1613_vm4, %v1643_v63, %v1645_v9  ;;  %v1210_v5 = vrot.slane %v10022_v30, 2 }
 0x148   : > { %v993_v46 = vpop.f32.mrf.mxu3  ;;  %v10618_v0 = vpop.f32.mrf.mxu0 }
 0x149   : > { %v10614_v42 = vadd.f32 %v993_v46, %v621_v7  ;;  %16799 = vst [vmem:[#allocation84_spill] sm:$0xff] %v10618_v0  ;;  %v10621_v6 = vpop.f32.mrf.mxu2  ;;  %v1211_v63 = vsel %vm1176_vm3, %v1208_v44, %v1210_v5  ;;  %v10642_v0 = vperm.slane %v10450_v49, 1 }
 0x14a   : > { %16800 = vst [vmem:[#allocation85_spill] sm:$0xff] %v10621_v6 }
 0x14b   : > { %16798 = vst [vmem:[#allocation83_spill] sm:$0xff] %v10614_v42  ;;  %8513 = vmatmul.msk.f32.gmra.mxu0 %vm409_vm1, %v1209_v41  ;;  %v644_v49 = vadd.f32 %v10046_v47, %v10642_v0 }
 0x14c   : > { %v10629_v7 = vpop.f32.mrf.mxu1 }
 0x14d   : > { %8472 = vmatmul.msk.f32.gmra.mxu3 %vm409_vm1, %v10014_v20  ;;  %8587 = vmatmul.msk.f32.gmra.mxu2 %vm409_vm1, %v10627_v17  ;;  %v1647_v20 = vrot.slane %v10022_v30, 3 }
 0x14f   : > { %8546 = vmatmul.msk.f32.gmra.mxu1 %vm409_vm1, %v1209_v41  ;;  %v10650_v43 = vsel %vm1613_vm4, %v1645_v9, %v1647_v20  ;;  %v531_v41 = vadd.f32 %v10029_v35, %v10458_v29  ;;  %v1649_v9 = vrot.slane %v10050_v53, 3 }
 0x150   : > { %v996_v46 = vpop.f32.mrf.mxu3  ;;  %v1340_v42 = vpop.f32.mrf.mxu0 }
 0x151   : > { %v10636_v4 = vadd.f32 %v996_v46, %v624_v16  ;;  %v10644_v6 = vpop.f32.mrf.mxu2  ;;  %v1212_v16 = vrot.slane %v10050_v53, 2  ;;  %v1112_v44 = vadd.f32 %v10064_v1, %v531_v41  ;;  %v10671_v47 = vsel %vm1613_vm4, %v1647_v20, %v1649_v9 }
 0x152   : > { %16802 = vst [vmem:[#allocation87_spill] sm:$0xff] %v10644_v6  ;;  %v534_v53 = vadd.f32 %v10059_v59, %v10458_v29  ;;  %v1651_v20 = vrot.slane %v10077_v8, 3 }
 0x153   : > { %16801 = vst [vmem:[#allocation86_spill] sm:$0xff] %v10636_v4  ;;  %8514 = vmatmul.msk.f32.gmra.mxu0 %vm409_vm1, %v1211_v63  ;;  %v1549_v4 = vadd.f32 %v1340_v42, %v1112_v44  ;;  %v1213_v35 = vsel %vm1176_vm3, %v1210_v5, %v1212_v16  ;;  %v1214_v42 = vrot.slane %v10077_v8, 2  ;;  %v647_v5 = vadd.f32 %v10073_v3, %v10642_v0  ;;  %v16803_v3 = vld [vmem:[#allocation7_spill] sm:$0xff] }
 0x154   : > { %v1453_v30 = vpop.f32.mrf.mxu1 }
 0x155   : > { %8473 = vmatmul.msk.f32.gmra.mxu3 %vm409_vm1, %v10041_v22  ;;  %8588 = vmatmul.msk.f32.gmra.mxu2 %vm409_vm1, %v10650_v43  ;;  %v1215_v59 = vsel %vm1176_vm3, %v1212_v16, %v1214_v42  ;;  %v16805_v16 = vld [vmem:[#allocation8_spill] sm:$0xff] }
 0x157   : > { %8547 = vmatmul.msk.f32.gmra.mxu1 %vm409_vm1, %v1211_v63 }
 0x158   : > { %v1016_v46 = vpop.f32.mrf.mxu3  ;;  %v1343_v6 = vpop.f32.mrf.mxu0 }
 0x159   : > { %v1113_v22 = vadd.f32 %v1016_v46, %v644_v49  ;;  %v1777_v60 = vpop.f32.mrf.mxu2  ;;  %v16804_v46 = vld [vmem:[#allocation5_spill] sm:$0xff] }
 0x15a   : > { %v10665_v37 = vadd.f32 %v1777_v60, %v1549_v4  ;;  %v1114_v60 = vadd.f32 %v10091_v28, %v534_v53  ;;  %v10692_v28 = vsel %vm1613_vm4, %v1649_v9, %v1651_v20  ;;  %v537_v8 = vadd.f32 %v16804_v46, %v10458_v29  ;;  %v16806_v53 = vld [vmem:[#allocation11_spill] sm:$0xff] }
 0x15b   : > { %v10663_v2 = vadd.f32 %v1453_v30, %v1113_v22  ;;  %8515 = vmatmul.msk.f32.gmra.mxu0 %vm409_vm1, %v1213_v35  ;;  %v1216_v22 = vrot.slane %v10107_v25, 2  ;;  %v1653_v9 = vrot.slane %v10107_v25, 3 }
 0x15c   : > { %v1456_v1 = vpop.f32.mrf.mxu1  ;;  %v1551_v63 = vadd.f32 %v1343_v6, %v1114_v60 }
 0x15d   : > { %8474 = vmatmul.msk.f32.gmra.mxu3 %vm409_vm1, %v10071_v26  ;;  %8589 = vmatmul.msk.f32.gmra.mxu2 %vm409_vm1, %v10671_v47 }
 0x15f   : > { %8548 = vmatmul.msk.f32.gmra.mxu1 %vm409_vm1, %v1213_v35  ;;  %v650_v35 = vadd.f32 %v16805_v16, %v10642_v0  ;;  %v16807_v16 = vld [vmem:[#allocation12_spill] sm:$0xff] }
 0x160   : > { %v1019_v4 = vpop.f32.mrf.mxu3  ;;  %v1346_v41 = vpop.f32.mrf.mxu0 }
 0x161   : > { %v1115_v26 = vadd.f32 %v1019_v4, %v647_v5  ;;  %v1780_v49 = vpop.f32.mrf.mxu2 }
 0x162   : > { %v10686_v44 = vadd.f32 %v1780_v49, %v1551_v63  ;;  %v1217_v63 = vsel %vm1176_vm3, %v1214_v42, %v1216_v22  ;;  %v16811_v42 = vld [vmem:[#allocation13_spill] sm:$0xff] }
 0x163   : > { %v10684_v30 = vadd.f32 %v1456_v1, %v1115_v26  ;;  %8516 = vmatmul.msk.f32.gmra.mxu0 %vm409_vm1, %v1215_v59  ;;  %v1116_v1 = vadd.f32 %v16806_v53, %v537_v8  ;;  %v10713_v8 = vsel %vm1613_vm4, %v1651_v20, %v1653_v9 }
 0x164   : > { %v1459_v6 = vpop.f32.mrf.mxu1  ;;  %16808 = vst [vmem:[#allocation7_spill] sm:$0xff] %v10713_v8 }
 0x165   : > { %8475 = vmatmul.msk.f32.gmra.mxu3 %vm409_vm1, %v16803_v3  ;;  %8590 = vmatmul.msk.f32.gmra.mxu2 %vm409_vm1, %v10692_v28  ;;  %v1553_v4 = vadd.f32 %v1346_v41, %v1116_v1  ;;  %v16812_v1 = vld [vmem:[#allocation17_spill] sm:$0xff] }
 0x167   : > { %8549 = vmatmul.msk.f32.gmra.mxu1 %vm409_vm1, %v1215_v59  ;;  %v16809_v59 = vld [vmem:[#allocation9_spill] sm:$0xff] }
 0x168   : > { %v1022_v5 = vpop.f32.mrf.mxu3  ;;  %v1349_v26 = vpop.f32.mrf.mxu0  ;;  %v540_v25 = vadd.f32 %v16809_v59, %v10458_v29 }
 0x169   : > { %v1117_v60 = vadd.f32 %v1022_v5, %v650_v35  ;;  %v1783_v3 = vpop.f32.mrf.mxu2  ;;  %v16810_v35 = vld [vmem:[#allocation14_spill] sm:$0xff] }
 0x16a   : > { %v10707_v46 = vadd.f32 %v1783_v3, %v1553_v4  ;;  %v1218_v53 = vrot.slane %v16810_v35, 2  ;;  %v1118_v5 = vadd.f32 %v16812_v1, %v540_v25  ;;  %v1655_v20 = vrot.slane %v16810_v35, 3  ;;  %v16817_v1 = vld [vmem:[#allocation22_spill] sm:$0xff] }
 0x16b   : > { %v10705_v49 = vadd.f32 %v1459_v6, %v1117_v60  ;;  %8517 = vmatmul.msk.f32.gmra.mxu0 %vm409_vm1, %v1217_v63  ;;  %v653_v6 = vadd.f32 %v16811_v42, %v10642_v0  ;;  %v16814_v42 = vld [vmem:[#allocation18_spill] sm:$0xff]  ;;  %v1220_v35 = vrot.slane %v10177_v31, 2 }
 0x16c   : > { %v1462_v41 = vpop.f32.mrf.mxu1  ;;  %v1555_v3 = vadd.f32 %v1349_v26, %v1118_v5  ;;  %v1219_v59 = vsel %vm1176_vm3, %v1216_v22, %v1218_v53  ;;  %v10734_v25 = vsel %vm1613_vm4, %v1653_v9, %v1655_v20  ;;  %v8564_v26 = vld [vmem:[%s16522_s1 + $0xc8] sm:$0xff]  ;;  %v8637_v22 = vld [vmem:[%s16522_s1 + $0x100] sm:$0xff] }
 0x16d   : > { %8476 = vmatmul.msk.f32.gmra.mxu3 %vm409_vm1, %v16807_v16  ;;  %8591 = vmatmul.msk.f32.gmra.mxu2 %vm409_vm1, %v10713_v8 }
 0x16e   : > { %1888 = vmatpush.msra.mxu3 %v8564_v26  ;;  %2211 = vmatpush.msra.mxu0 %v8637_v22 }
 0x16f   : > { %8550 = vmatmul.msk.f32.gmra.mxu1 %vm409_vm1, %v1217_v63  ;;  %v16815_v63 = vld [vmem:[#allocation15_spill] sm:$0xff] }
 0x170   : > { %v1025_v60 = vpop.f32.mrf.mxu3  ;;  %v1352_v16 = vpop.f32.mrf.mxu0 }
 0x171   : > { %v1119_v4 = vadd.f32 %v1025_v60, %v653_v6  ;;  %v1786_v24 = vpop.f32.mrf.mxu2  ;;  %v16816_v6 = vld [vmem:[#allocation19_spill] sm:$0xff] }
 0x172   : > { %v10728_v32 = vadd.f32 %v1786_v24, %v1555_v3  ;;  %v543_v24 = vadd.f32 %v16815_v63, %v10458_v29  ;;  %v656_v9 = vadd.f32 %v16816_v6, %v10642_v0  ;;  %v1657_v3 = vrot.slane %v10177_v31, 3  ;;  %v16819_v6 = vld [vmem:[#allocation23_spill] sm:$0xff] }
 0x173   : > { %v10726_v12 = vadd.f32 %v1462_v41, %v1119_v4  ;;  %8518 = vmatmul.msk.f32.gmra.mxu0 %vm409_vm1, %v1219_v59  ;;  %v8638_v31 = vld [vmem:[%s16522_s1 + $0x108] sm:$0xff] }
 0x174   : > { %v1465_v41 = vpop.f32.mrf.mxu1  ;;  %v1120_v5 = vadd.f32 %v16817_v1, %v543_v24  ;;  %v10761_v24 = vsel %vm1613_vm4, %v1655_v20, %v1657_v3  ;;  %2324 = vmatpush.msra.mxu1 %v8638_v31 }
 0x175   : > { %16813 = vst [vmem:[#allocation5_spill] sm:$0xff] %v10726_v12  ;;  %8477 = vmatmul.msk.f32.gmra.mxu3 %vm409_vm1, %v16814_v42  ;;  %8592 = vmatmul.msk.f32.gmra.mxu2 %vm409_vm1, %v10734_v25  ;;  %v1221_v12 = vsel %vm1176_vm3, %v1218_v53, %v1220_v35 }
 0x176   : > { %v1557_v42 = vadd.f32 %v1352_v16, %v1120_v5  ;;  %16820 = vst [vmem:[#allocation11_spill] sm:$0xff] %v10761_v24  ;;  %v16821_v16 = vld [vmem:[#allocation20_spill] sm:$0xff]  ;;  %v16823_v5 = vld [vmem:[#allocation27_spill] sm:$0xff] }
 0x177   : > { %8551 = vmatmul.msk.f32.gmra.mxu1 %vm409_vm1, %v1219_v59  ;;  %v546_v53 = vadd.f32 %v16821_v16, %v10458_v29 }
 0x178   : > { %v1028_v60 = vpop.f32.mrf.mxu3  ;;  %v1355_v63 = vpop.f32.mrf.mxu0 }
 0x179   : > { %v1121_v4 = vadd.f32 %v1028_v60, %v656_v9  ;;  %v1789_v22 = vpop.f32.mrf.mxu2  ;;  %v16822_v9 = vld [vmem:[#allocation24_spill] sm:$0xff]  ;;  %v1122_v60 = vadd.f32 %v16823_v5, %v546_v53  ;;  %v10790_v5 = vld [vmem:[%s9710_s20 + $0xc0] sm:$0xff] }
 0x17a   : > { %v10755_v8 = vadd.f32 %v1789_v22, %v1557_v42  ;;  %v659_v1 = vadd.f32 %v16822_v9, %v10642_v0  ;;  %v1659_v42 = vrot.slane %v10212_v39, 3  ;;  %v16826_v53 = vld [vmem:[#allocation28_spill] sm:$0xff]  ;;  %16829 = vst [vmem:[#allocation13_spill] sm:$0xff] %v10790_v5 }
 0x17b   : > { %v10753_v26 = vadd.f32 %v1465_v41, %v1121_v4  ;;  %8519 = vmatmul.msk.f32.gmra.mxu0 %vm409_vm1, %v1221_v12  ;;  %v1222_v41 = vrot.slane %v10212_v39, 2  ;;  %v1559_v22 = vadd.f32 %v1355_v63, %v1122_v60  ;;  %v16831_v60 = vld [vmem:[#allocation32_spill] sm:$0xff] }
 0x17c   : > { %v1468_v59 = vpop.f32.mrf.mxu1 }
 0x17d   : > { %16818 = vst [vmem:[#allocation8_spill] sm:$0xff] %v10753_v26  ;;  %8478 = vmatmul.msk.f32.gmra.mxu3 %vm409_vm1, %v16819_v6  ;;  %8593 = vmatmul.msk.f32.gmra.mxu2 %vm409_vm1, %v10761_v24  ;;  %v1223_v16 = vsel %vm1176_vm3, %v1220_v35, %v1222_v41  ;;  %v1224_v35 = vrot.slane %v10790_v5, 2 }
 0x17f   : > { %8552 = vmatmul.msk.f32.gmra.mxu1 %vm409_vm1, %v1221_v12  ;;  %v16828_v12 = vld [vmem:[#allocation25_spill] sm:$0xff] }
 0x180   : > { %v1031_v4 = vpop.f32.mrf.mxu3  ;;  %v1358_v6 = vpop.f32.mrf.mxu0  ;;  %v549_v39 = vadd.f32 %v16828_v12, %v10458_v29 }
 0x181   : > { %v1123_v20 = vadd.f32 %v1031_v4, %v659_v1  ;;  %v1792_v26 = vpop.f32.mrf.mxu2  ;;  %v10785_v1 = vsel %vm1613_vm4, %v1657_v3, %v1659_v42 }
 0x182   : > { %v10779_v9 = vadd.f32 %v1792_v26, %v1559_v22  ;;  %16827 = vst [vmem:[#allocation14_spill] sm:$0xff] %v10785_v1  ;;  %v1124_v4 = vadd.f32 %v16831_v60, %v549_v39  ;;  %v1661_v22 = vrot.slane %v10790_v5, 3  ;;  %v16833_v39 = vld [vmem:[#allocation33_spill] sm:$0xff] }
 0x183   : > { %v10777_v31 = vadd.f32 %v1468_v59, %v1123_v20  ;;  %8520 = vmatmul.msk.f32.gmra.mxu0 %vm409_vm1, %v1223_v16  ;;  %v16830_v59 = vld [vmem:[#allocation29_spill] sm:$0xff] }
 0x184   : > { %16825 = vst [vmem:[#allocation9_spill] sm:$0xff] %v10779_v9  ;;  %v1471_v63 = vpop.f32.mrf.mxu1  ;;  %v662_v26 = vadd.f32 %v16830_v59, %v10642_v0 }
 0x185   : > { %16824 = vst [vmem:[#allocation12_spill] sm:$0xff] %v10777_v31  ;;  %8479 = vmatmul.msk.f32.gmra.mxu3 %vm409_vm1, %v16826_v53  ;;  %8594 = vmatmul.msk.f32.gmra.mxu2 %vm409_vm1, %v10785_v1  ;;  %v1561_v53 = vadd.f32 %v1358_v6, %v1124_v4  ;;  %v1225_v31 = vsel %vm1176_vm3, %v1222_v41, %v1224_v35  ;;  %v10814_v4 = vld [vmem:[%s9710_s20 + $0xc8] sm:$0xff] }
 0x186   : > { %v1226_v41 = vrot.slane %v10814_v4, 2 }
 0x187   : > { %8553 = vmatmul.msk.f32.gmra.mxu1 %vm409_vm1, %v1223_v16  ;;  %v16834_v16 = vld [vmem:[#allocation30_spill] sm:$0xff] }
 0x188   : > { %v1034_v20 = vpop.f32.mrf.mxu3  ;;  %v1361_v12 = vpop.f32.mrf.mxu0  ;;  %v552_v60 = vadd.f32 %v16834_v16, %v10458_v29 }
 0x189   : > { %v1125_v3 = vadd.f32 %v1034_v20, %v662_v26  ;;  %v1795_v9 = vpop.f32.mrf.mxu2  ;;  %v10809_v26 = vsel %vm1613_vm4, %v1659_v42, %v1661_v22  ;;  %v16836_v20 = vld [vmem:[#allocation36_spill] sm:$0xff] }
 0x18a   : > { %v10803_v59 = vadd.f32 %v1795_v9, %v1561_v53 }
 0x18b   : > { %v10801_v24 = vadd.f32 %v1471_v63, %v1125_v3  ;;  %8521 = vmatmul.msk.f32.gmra.mxu0 %vm409_vm1, %v1225_v31  ;;  %v16835_v63 = vld [vmem:[#allocation34_spill] sm:$0xff]  ;;  %v1126_v3 = vadd.f32 %v16836_v20, %v552_v60  ;;  %v16837_v60 = vld [vmem:[#allocation3_spill] sm:$0xff] }
 0x18c   : > { %v1474_v6 = vpop.f32.mrf.mxu1  ;;  %v665_v9 = vadd.f32 %v16835_v63, %v10642_v0 }
 0x18d   : > { %16832 = vst [vmem:[#allocation17_spill] sm:$0xff] %v10801_v24  ;;  %8480 = vmatmul.msk.f32.gmra.mxu3 %vm409_vm1, %v16833_v39  ;;  %8595 = vmatmul.msk.f32.gmra.mxu2 %vm409_vm1, %v10809_v26  ;;  %v1663_v39 = vrot.slane %v10814_v4, 3  ;;  %v1563_v16 = vadd.f32 %v1361_v12, %v1126_v3  ;;  %v1227_v24 = vsel %vm1176_vm3, %v1224_v35, %v1226_v41  ;;  %v10838_v12 = vld [vmem:[%s9710_s20 + $0xd0] sm:$0xff] }
 0x18e   : > { %v1228_v20 = vrot.slane %v10838_v12, 2  ;;  %v668_v35 = vadd.f32 %v10289_v14, %v10642_v0 }
 0x18f   : > { %8554 = vmatmul.msk.f32.gmra.mxu1 %vm409_vm1, %v1225_v31 }
 0x190   : > { %v1037_v53 = vpop.f32.mrf.mxu3  ;;  %v10824_v29 = vpop.f32.mrf.mxu0 }
 0x191   : > { %v1127_v42 = vadd.f32 %v1037_v53, %v665_v9  ;;  %v1798_v63 = vpop.f32.mrf.mxu2  ;;  %v10835_v9 = vsel %vm1613_vm4, %v1661_v22, %v1663_v39  ;;  %v1665_v53 = vrot.slane %v10838_v12, 3 }
 0x192   : > { %v10829_v1 = vadd.f32 %v1798_v63, %v1563_v16  ;;  %v16840_v63 = vld [vmem:[#allocation4_spill] sm:$0xff] }
 0x193   : > { %v10827_v5 = vadd.f32 %v1474_v6, %v1127_v42  ;;  %8522 = vmatmul.msk.f32.gmra.mxu0 %vm409_vm1, %v1227_v24  ;;  %v1229_v42 = vsel %vm1176_vm3, %v1226_v41, %v1228_v20  ;;  %v10856_v14 = vsel %vm1613_vm4, %v1663_v39, %v1665_v53 }
 0x194   : > { %v1477_v31 = vpop.f32.mrf.mxu1  ;;  %16841 = vst [vmem:[#allocation19_spill] sm:$0xff] %v10856_v14 }
 0x195   : > { %8481 = vmatmul.msk.f32.gmra.mxu3 %vm409_vm1, %v16837_v60  ;;  %8596 = vmatmul.msk.f32.gmra.mxu2 %vm409_vm1, %v10835_v9 }
 0x197   : > { %8555 = vmatmul.msk.f32.gmra.mxu1 %vm409_vm1, %v1227_v24 }
 0x198   : > { %v1040_v6 = vpop.f32.mrf.mxu3  ;;  %v10847_v22 = vpop.f32.mrf.mxu0 }
 0x199   : > { %v1129_v3 = vadd.f32 %v1040_v6, %v668_v35  ;;  %16838 = vst [vmem:[#allocation18_spill] sm:$0xff] %v10847_v22  ;;  %v10859_v35 = vld [vmem:[%s9710_s20 + $0xd8] sm:$0xff]  ;;  %v671_v6 = vadd.f32 %v10309_v51, %v10642_v0  ;;  %v16844_v22 = vld [vmem:[#allocation6_spill] sm:$0xff] }
 0x19a   : > { %v1230_v24 = vrot.slane %v10859_v35, 2 }
 0x19b   : > { %v10850_v16 = vadd.f32 %v1477_v31, %v1129_v3  ;;  %8523 = vmatmul.msk.f32.gmra.mxu0 %vm409_vm1, %v1229_v42  ;;  %v1667_v3 = vrot.slane %v10859_v35, 3 }
 0x19c   : > { %v1480_v60 = vpop.f32.mrf.mxu1 }
 0x19d   : > { %16839 = vst [vmem:[#allocation15_spill] sm:$0xff] %v10850_v16  ;;  %8482 = vmatmul.msk.f32.gmra.mxu3 %vm409_vm1, %v16840_v63  ;;  %8597 = vmatmul.msk.f32.gmra.mxu2 %vm409_vm1, %v10856_v14  ;;  %v1231_v63 = vsel %vm1176_vm3, %v1228_v20, %v1230_v24  ;;  %v10877_v51 = vsel %vm1613_vm4, %v1665_v53, %v1667_v3 }
 0x19e   : > { %16845 = vst [vmem:[#allocation20_spill] sm:$0xff] %v10877_v51 }
 0x19f   : > { %8556 = vmatmul.msk.f32.gmra.mxu1 %vm409_vm1, %v1229_v42 }
 0x1a0   : > { %v1043_v41 = vpop.f32.mrf.mxu3  ;;  %v10868_v39 = vpop.f32.mrf.mxu0 }
 0x1a1   : > { %v1131_v31 = vadd.f32 %v1043_v41, %v671_v6  ;;  %16842 = vst [vmem:[#allocation22_spill] sm:$0xff] %v10868_v39  ;;  %v10880_v6 = vld [vmem:[%s9710_s20 + $0xe0] sm:$0xff]  ;;  %v674_v41 = vadd.f32 %v10329_v57, %v10642_v0 }
 0x1a2   : > { %v1232_v42 = vrot.slane %v10880_v6, 2  ;;  %v16848_v39 = vld [vmem:[#allocation10_spill] sm:$0xff] }
 0x1a3   : > { %v10871_v16 = vadd.f32 %v1480_v60, %v1131_v31  ;;  %8524 = vmatmul.msk.f32.gmra.mxu0 %vm409_vm1, %v1231_v63 }
 0x1a4   : > { %v1483_v14 = vpop.f32.mrf.mxu1  ;;  %v1233_v31 = vsel %vm1176_vm3, %v1230_v24, %v1232_v42 }
 0x1a5   : > { %16843 = vst [vmem:[#allocation23_spill] sm:$0xff] %v10871_v16  ;;  %8483 = vmatmul.msk.f32.gmra.mxu3 %vm409_vm1, %v16844_v22  ;;  %8598 = vmatmul.msk.f32.gmra.mxu2 %vm409_vm1, %v10877_v51  ;;  %v1669_v22 = vrot.slane %v10880_v6, 3 }
 0x1a7   : > { %8557 = vmatmul.msk.f32.gmra.mxu1 %vm409_vm1, %v1231_v63  ;;  %v10898_v57 = vsel %vm1613_vm4, %v1667_v3, %v1669_v22 }
 0x1a8   : > { %v1046_v20 = vpop.f32.mrf.mxu3  ;;  %v10889_v53 = vpop.f32.mrf.mxu0  ;;  %16849 = vst [vmem:[#allocation28_spill] sm:$0xff] %v10898_v57 }
 0x1a9   : > { %v1133_v60 = vadd.f32 %v1046_v20, %v674_v41  ;;  %16846 = vst [vmem:[#allocation24_spill] sm:$0xff] %v10889_v53  ;;  %v10901_v41 = vld [vmem:[%s9710_s20 + $0xe8] sm:$0xff]  ;;  %v677_v20 = vadd.f32 %v10349_v36, %v10642_v0  ;;  %v16853_v53 = vld [vmem:[#allocation16_spill] sm:$0xff] }
 0x1aa   : > { %16850 = vst [vmem:[#allocation25_spill] sm:$0xff] %v10901_v41  ;;  %v1234_v63 = vrot.slane %v10901_v41, 2 }
 0x1ab   : > { %v10892_v16 = vadd.f32 %v1483_v14, %v1133_v60  ;;  %8525 = vmatmul.msk.f32.gmra.mxu0 %vm409_vm1, %v1233_v31 }
 0x1ac   : > { %v1486_v51 = vpop.f32.mrf.mxu1  ;;  %v1235_v60 = vsel %vm1176_vm3, %v1232_v42, %v1234_v63  ;;  %v10928_v42 = vld [vmem:[%s9710_s20 + $0xf0] sm:$0xff] }
 0x1ad   : > { %16847 = vst [vmem:[#allocation27_spill] sm:$0xff] %v10892_v16  ;;  %8484 = vmatmul.msk.f32.gmra.mxu3 %vm409_vm1, %v16848_v39  ;;  %8599 = vmatmul.msk.f32.gmra.mxu2 %vm409_vm1, %v10898_v57  ;;  %v1671_v39 = vrot.slane %v10901_v41, 3 }
 0x1af   : > { %8558 = vmatmul.msk.f32.gmra.mxu1 %vm409_vm1, %v1233_v31  ;;  %v10919_v36 = vsel %vm1613_vm4, %v1669_v22, %v1671_v39  ;;  %v2854_v31 = vld [vmem:[%s16524_s3 + $0x78] sm:$0xff]  ;;  %v680_v22 = vadd.f32 %v10375_v48, %v10642_v0 }
 0x1b0   : > { %v1049_v24 = vpop.f32.mrf.mxu3  ;;  %v10910_v3 = vpop.f32.mrf.mxu0  ;;  %2968 = vmatpush.msra.mxu2 %v2854_v31  ;;  %v16856_v31 = vld [vmem:[#allocation21_spill] sm:$0xff] }
 0x1b1   : > { %v1135_v14 = vadd.f32 %v1049_v24, %v677_v20  ;;  %16851 = vst [vmem:[#allocation29_spill] sm:$0xff] %v10910_v3  ;;  %v2867_v20 = vld [vmem:[%s16524_s3 + $0xe0] sm:$0x3f] }
 0x1b2   : > { %8711 = vmatpush.msk.msrb.mxu3 %vm1176_vm3, %v2867_v20 }
 0x1b3   : > { %v10913_v16 = vadd.f32 %v1486_v51, %v1135_v14  ;;  %8526 = vmatmul.msk.f32.gmra.mxu0 %vm409_vm1, %v1235_v60  ;;  %v1236_v51 = vrot.slane %v10928_v42, 2 }
 0x1b4   : > { %v1489_v24 = vpop.f32.mrf.mxu1 }
 0x1b5   : > { %16852 = vst [vmem:[#allocation32_spill] sm:$0xff] %v10913_v16  ;;  %8485 = vmatmul.msk.f32.gmra.mxu3 %vm409_vm1, %v16853_v53  ;;  %8600 = vmatmul.msk.f32.gmra.mxu2 %vm409_vm1, %v10919_v36  ;;  %v1673_v16 = vrot.slane %v10928_v42, 3  ;;  %v1237_v41 = vsel %vm1176_vm3, %v1234_v63, %v1236_v51 }
 0x1b7   : > { %8559 = vmatmul.msk.f32.gmra.mxu1 %vm409_vm1, %v1235_v60  ;;  %v10947_v48 = vsel %vm1613_vm4, %v1671_v39, %v1673_v16 }
 0x1b8   : > { %v1052_v53 = vpop.f32.mrf.mxu3  ;;  %v10938_v3 = vpop.f32.mrf.mxu0 }
 0x1b9   : > { %v1137_v14 = vadd.f32 %v1052_v53, %v680_v22  ;;  %16854 = vst [vmem:[#allocation33_spill] sm:$0xff] %v10938_v3  ;;  %v10950_v22 = vld [vmem:[%s9710_s20 + $0xf8] sm:$0xff]  ;;  %v683_v53 = vadd.f32 %v10398_v34, %v10642_v0 }
 0x1ba   : > { %v1238_v60 = vrot.slane %v10950_v22, 2 }
 0x1bb   : > { %v10941_v57 = vadd.f32 %v1489_v24, %v1137_v14  ;;  %8527 = vmatmul.msk.f32.gmra.mxu0 %vm409_vm1, %v1237_v41  ;;  %v1675_v24 = vrot.slane %v10950_v22, 3 }
 0x1bc   : > { %v1492_v20 = vpop.f32.mrf.mxu1  ;;  %v1239_v39 = vsel %vm1176_vm3, %v1236_v51, %v1238_v60  ;;  %v686_v51 = vadd.f32 %v10418_v23, %v10642_v0 }
 0x1bd   : > { %16855 = vst [vmem:[#allocation30_spill] sm:$0xff] %v10941_v57  ;;  %8486 = vmatmul.msk.f32.gmra.mxu3 %vm409_vm1, %v16856_v31  ;;  %8601 = vmatmul.msk.f32.gmra.mxu2 %vm409_vm1, %v10947_v48  ;;  %v16859_v57 = vld [vmem:[#allocation26_spill] sm:$0xff]  ;;  %v10968_v34 = vsel %vm1613_vm4, %v1673_v16, %v1675_v24  ;;  %v2866_v16 = vld [vmem:[%s16524_s3 + $0xd8] sm:$0xff] }
 0x1be   : > { %16860 = vst [vmem:[#allocation3_spill] sm:$0xff] %v10968_v34  ;;  %3085 = vmatpush.msrb.mxu3 %v2866_v16 }
 0x1bf   : > { %8560 = vmatmul.msk.f32.gmra.mxu1 %vm409_vm1, %v1237_v41  ;;  %v2853_v41 = vld [vmem:[%s16524_s3 + $0x70] sm:$0xff] }
 0x1c0   : > { %v1055_v3 = vpop.f32.mrf.mxu3  ;;  %v10959_v14 = vpop.f32.mrf.mxu0  ;;  %2969 = vmatpush.msra.mxu2 %v2853_v41 }
 0x1c1   : > { %v1139_v63 = vadd.f32 %v1055_v3, %v683_v53  ;;  %16857 = vst [vmem:[#allocation34_spill] sm:$0xff] %v10959_v14  ;;  %v16864_v14 = vld [vmem:[#allocation31_spill] sm:$0xff] }
 0x1c3   : > { %v10962_v31 = vadd.f32 %v1492_v20, %v1139_v63  ;;  %8528 = vmatmul.msk.f32.gmra.mxu0 %vm409_vm1, %v1239_v39  ;;  %v16862_v63 = vld [vmem:[#allocation2_spill] sm:$0xff] }
 0x1c4   : > { %v1495_v3 = vpop.f32.mrf.mxu1 }
 0x1c5   : > { %16858 = vst [vmem:[#allocation36_spill] sm:$0xff] %v10962_v31  ;;  %8487 = vmatmul.msk.f32.gmra.mxu3 %vm409_vm1, %v16859_v57  ;;  %8602 = vmatmul.msk.f32.gmra.mxu2 %vm409_vm1, %v10968_v34  ;;  %v16863_v31 = vrot.slane %v16862_v63, 2  ;;  %v10997_v34 = vld [vmem:[%s9710_s20] sm:$0xff] }
 0x1c7   : > { %8561 = vmatmul.msk.f32.gmra.mxu1 %vm409_vm1, %v1239_v39  ;;  %v1242_v41 = vsel %vm1176_vm3, %v1238_v60, %v16863_v31  ;;  %v16865_v39 = vrot.slane %v16862_v63, 3  ;;  %v9571_v60 = vld [vmem:[%s9710_s20 + $0x8] sm:$0xff] }
 0x1c8   : > { %v1058_v20 = vpop.f32.mrf.mxu3  ;;  %v10981_v53 = vpop.f32.mrf.mxu0  ;;  %v2051_v31 = vrot.slane %v9571_v60, 4 }
 0x1c9   : > { %v1141_v57 = vadd.f32 %v1058_v20, %v686_v51  ;;  %16861 = vst [vmem:[#allocation4_spill] sm:$0xff] %v10981_v53  ;;  %v10994_v51 = vsel %vm1613_vm4, %v1675_v24, %v16865_v39  ;;  %v16568_v53 = vrot.slane %v10997_v34, 4  ;;  %v16867_v39 = vld [vmem:[#allocation37_spill] sm:$0xff] }
 0x1cb   : > { %v10986_v23 = vadd.f32 %v1495_v3, %v1141_v57  ;;  %8529 = vmatmul.msk.f32.gmra.mxu0 %vm409_vm1, %v1242_v41  ;;  %v689_v3 = vadd.f32 %v10438_v33, %v10642_v0  ;;  %v2052_v16 = vsel %vm506_vm0, %v16568_v53, %v2051_v31  ;;  %v2852_v33 = vld [vmem:[%s16524_s3 + $0x68] sm:$0xff] }
 0x1cc   : > { %v1498_v20 = vpop.f32.mrf.mxu1  ;;  %2970 = vmatpush.msra.mxu2 %v2852_v33  ;;  %v2865_v33 = vld [vmem:[%s16524_s3 + $0xd0] sm:$0xff] }
 0x1cd   : > { %8488 = vmatmul.msk.f32.gmra.mxu3 %vm409_vm1, %v16864_v14  ;;  %8603 = vmatmul.msk.f32.gmra.mxu2 %vm409_vm1, %v10994_v51 }
 0x1ce   : > { %3086 = vmatpush.msrb.mxu3 %v2865_v33 }
 0x1cf   : > { %8562 = vmatmul.msk.f32.gmra.mxu1 %vm409_vm1, %v1242_v41  ;;  %v9572_v41 = vld [vmem:[%s9710_s20 + $0x10] sm:$0xff] }
 0x1d0   : > { %v1061_v57 = vpop.f32.mrf.mxu3  ;;  %v11006_v24 = vpop.f32.mrf.mxu0 }
 0x1d1   : > { %v1143_v14 = vadd.f32 %v1061_v57, %v689_v3  ;;  %v2053_v3 = vrot.slane %v9572_v41, 4  ;;  %v692_v57 = vadd.f32 %v10466_v45, %v10642_v0 }
 0x1d3   : > { %v11011_v63 = vadd.f32 %v1498_v20, %v1143_v14  ;;  %8646 = vmatmul.msk.f32.vlgmr.msra.gmra.mxu0 %vm409_vm1, %v2052_v16 }
 0x1d4   : > { %v1501_v60 = vpop.f32.mrf.mxu1 }
 0x1d5   : > { %16866 = vst [vmem:[#allocation6_spill] sm:$0xff] %v11011_v63  ;;  %8605 = vmatmul.msk.f32.vlgmr.msra.gmra.mxu3 %vm409_vm1, %v16867_v39  ;;  %v2054_v39 = vsel %vm506_vm0, %v2051_v31, %v2053_v3 }
 0x1d7   : > { %8679 = vmatmul.msk.f32.vlgmr.msra.gmra.mxu1 %vm409_vm1, %v2052_v16  ;;  %v695_v16 = vadd.f32 %v10488_v38, %v10642_v0  ;;  %v2851_v38 = vld [vmem:[%s16524_s3 + $0x60] sm:$0xff] }
 0x1d8   : > { %v1064_v53 = vpop.f32.mrf.mxu3  ;;  %v11023_v14 = vpop.f32.mrf.mxu0  ;;  %2971 = vmatpush.msra.mxu2 %v2851_v38  ;;  %v9575_v38 = vld [vmem:[%s9710_s20 + $0x28] sm:$0xff] }
 0x1d9   : > { %v1145_v20 = vadd.f32 %v1064_v53, %v692_v57  ;;  %v9573_v53 = vld [vmem:[%s9710_s20 + $0x18] sm:$0xff] }
 0x1da   : > { %v2055_v41 = vrot.slane %v9573_v53, 4  ;;  %v9574_v53 = vld [vmem:[%s9710_s20 + $0x20] sm:$0xff] }
 0x1db   : > { %v11026_v63 = vadd.f32 %v1501_v60, %v1145_v20  ;;  %8647 = vmatmul.msk.f32.gmra.mxu0 %vm409_vm1, %v2054_v39 }
 0x1dc   : > { %v1504_v45 = vpop.f32.mrf.mxu1 }
 0x1dd   : > { %8606 = vmatmul.msk.f32.gmra.mxu3 %vm409_vm1, %v10307_v13  ;;  %v2056_v13 = vsel %vm506_vm0, %v2053_v3, %v2055_v41 }
 0x1df   : > { %8680 = vmatmul.msk.f32.gmra.mxu1 %vm409_vm1, %v2054_v39  ;;  %v698_v39 = vadd.f32 %v10510_v54, %v10642_v0  ;;  %v701_v54 = vadd.f32 %v10532_v58, %v10642_v0  ;;  %v2850_v58 = vld [vmem:[%s16524_s3 + $0x58] sm:$0xff] }
 0x1e0   : > { %v1067_v31 = vpop.f32.mrf.mxu3  ;;  %v11038_v57 = vpop.f32.mrf.mxu0  ;;  %2972 = vmatpush.msra.mxu2 %v2850_v58  ;;  %v9577_v58 = vld [vmem:[%s9710_s20 + $0x38] sm:$0xff] }
 0x1e1   : > { %v1147_v60 = vadd.f32 %v1067_v31, %v695_v16  ;;  %v2057_v16 = vrot.slane %v9574_v53, 4 }
 0x1e3   : > { %v11041_v20 = vadd.f32 %v1504_v45, %v1147_v60  ;;  %8648 = vmatmul.msk.f32.gmra.mxu0 %vm409_vm1, %v2056_v13 }
 0x1e4   : > { %v1507_v33 = vpop.f32.mrf.mxu1 }
 0x1e5   : > { %16868 = vst [vmem:[#allocation10_spill] sm:$0xff] %v11041_v20  ;;  %8607 = vmatmul.msk.f32.gmra.mxu3 %vm409_vm1, %v10327_v11  ;;  %v2058_v11 = vsel %vm506_vm0, %v2055_v41, %v2057_v16  ;;  %v2059_v20 = vrot.slane %v9575_v38, 4  ;;  %v2864_v41 = vld [vmem:[%s16524_s3 + $0xc8] sm:$0xff] }
 0x1e6   : > { %3087 = vmatpush.msrb.mxu3 %v2864_v41 }
 0x1e7   : > { %8681 = vmatmul.msk.f32.gmra.mxu1 %vm409_vm1, %v2056_v13 }
 0x1e8   : > { %v1070_v3 = vpop.f32.mrf.mxu3  ;;  %v11053_v31 = vpop.f32.mrf.mxu0 }
 0x1e9   : > { %v1149_v45 = vadd.f32 %v1070_v3, %v698_v39 }
 0x1eb   : > { %v11056_v60 = vadd.f32 %v1507_v33, %v1149_v45  ;;  %8649 = vmatmul.msk.f32.gmra.mxu0 %vm409_vm1, %v2058_v11 }
 0x1ec   : > { %v1510_v53 = vpop.f32.mrf.mxu1 }
 0x1ed   : > { %8608 = vmatmul.msk.f32.gmra.mxu3 %vm409_vm1, %v10347_v19  ;;  %v2060_v19 = vsel %vm506_vm0, %v2057_v16, %v2059_v20  ;;  %v704_v16 = vadd.f32 %v10560_v61, %v10642_v0  ;;  %v707_v61 = vadd.f32 %v10585_v52, %v10642_v0  ;;  %v2849_v52 = vld [vmem:[%s16524_s3 + $0x50] sm:$0xff] }
 0x1ee   : > { %2973 = vmatpush.msra.mxu2 %v2849_v52  ;;  %v9579_v52 = vld [vmem:[%s9710_s20 + $0x48] sm:$0xff] }
 0x1ef   : > { %8682 = vmatmul.msk.f32.gmra.mxu1 %vm409_vm1, %v2058_v11  ;;  %v9576_v11 = vld [vmem:[%s9710_s20 + $0x30] sm:$0xff] }
 0x1f0   : > { %v1073_v39 = vpop.f32.mrf.mxu3  ;;  %v11068_v33 = vpop.f32.mrf.mxu0  ;;  %v2061_v38 = vrot.slane %v9576_v11, 4  ;;  %v2063_v11 = vrot.slane %v9577_v58, 4  ;;  %v9578_v58 = vld [vmem:[%s9710_s20 + $0x40] sm:$0xff] }
 0x1f1   : > { %v1151_v13 = vadd.f32 %v1073_v39, %v701_v54 }
 0x1f3   : > { %v11071_v3 = vadd.f32 %v1510_v53, %v1151_v13  ;;  %8650 = vmatmul.msk.f32.gmra.mxu0 %vm409_vm1, %v2060_v19 }
 0x1f4   : > { %v1513_v45 = vpop.f32.mrf.mxu1 }
 0x1f5   : > { %8609 = vmatmul.msk.f32.gmra.mxu3 %vm409_vm1, %v10367_v18  ;;  %v2062_v18 = vsel %vm506_vm0, %v2059_v20, %v2061_v38  ;;  %v2064_v20 = vsel %vm506_vm0, %v2061_v38, %v2063_v11  ;;  %v710_v38 = vadd.f32 %v10607_v56, %v10642_v0  ;;  %v713_v56 = vadd.f32 %v10629_v7, %v10642_v0 }
 0x1f7   : > { %8683 = vmatmul.msk.f32.gmra.mxu1 %vm409_vm1, %v2060_v19 }
 0x1f8   : > { %v1076_v54 = vpop.f32.mrf.mxu3  ;;  %v11083_v39 = vpop.f32.mrf.mxu0 }
 0x1f9   : > { %v1153_v53 = vadd.f32 %v1076_v54, %v704_v16 }
 0x1fb   : > { %v11086_v13 = vadd.f32 %v1513_v45, %v1153_v53  ;;  %8651 = vmatmul.msk.f32.gmra.mxu0 %vm409_vm1, %v2062_v18  ;;  %v16871_v53 = vld [vmem:[#allocation56_spill] sm:$0xff] }
 0x1fc   : > { %v1516_v41 = vpop.f32.mrf.mxu1 }
 0x1fd   : > { %8610 = vmatmul.msk.f32.gmra.mxu3 %vm409_vm1, %v10393_v27  ;;  %v2863_v27 = vld [vmem:[%s16524_s3 + $0xc0] sm:$0xff] }
 0x1fe   : > { %3088 = vmatpush.msrb.mxu3 %v2863_v27 }
 0x1ff   : > { %8684 = vmatmul.msk.f32.gmra.mxu1 %vm409_vm1, %v2062_v18 }
 0x200   : > { %v1079_v16 = vpop.f32.mrf.mxu3  ;;  %v11095_v54 = vpop.f32.mrf.mxu0 }
 0x201   : > { %v1155_v19 = vadd.f32 %v1079_v16, %v707_v61  ;;  %16869 = vst [vmem:[#allocation16_spill] sm:$0xff] %v11095_v54  ;;  %v2065_v61 = vrot.slane %v9578_v58, 4  ;;  %v16872_v54 = vld [vmem:[#allocation60_spill] sm:$0xff]  ;;  %v2067_v58 = vrot.slane %v9579_v52, 4 }
 0x203   : > { %v11098_v45 = vadd.f32 %v1516_v41, %v1155_v19  ;;  %8652 = vmatmul.msk.f32.gmra.mxu0 %vm409_vm1, %v2064_v20 }
 0x204   : > { %v1519_v18 = vpop.f32.mrf.mxu1 }
 0x205   : > { %16870 = vst [vmem:[#allocation21_spill] sm:$0xff] %v11098_v45  ;;  %8611 = vmatmul.msk.f32.gmra.mxu3 %vm409_vm1, %v16871_v53  ;;  %v2066_v53 = vsel %vm506_vm0, %v2063_v11, %v2065_v61  ;;  %v2068_v11 = vsel %vm506_vm0, %v2065_v61, %v2067_v58 }
 0x207   : > { %8685 = vmatmul.msk.f32.gmra.mxu1 %vm409_vm1, %v2064_v20 }
 0x208   : > { %v1082_v41 = vpop.f32.mrf.mxu3  ;;  %v11113_v19 = vpop.f32.mrf.mxu0 }
 0x209   : > { %v1157_v16 = vadd.f32 %v1082_v41, %v710_v38 }
 0x20b   : > { %v11116_v45 = vadd.f32 %v1519_v18, %v1157_v16  ;;  %8653 = vmatmul.msk.f32.gmra.mxu0 %vm409_vm1, %v2066_v53  ;;  %v9580_v16 = vld [vmem:[%s9710_s20 + $0x50] sm:$0xff] }
 0x20c   : > { %v1522_v27 = vpop.f32.mrf.mxu1  ;;  %v2069_v52 = vrot.slane %v9580_v16, 4  ;;  %v9581_v16 = vld [vmem:[%s9710_s20 + $0x58] sm:$0xff] }
 0x20d   : > { %8612 = vmatmul.msk.f32.gmra.mxu3 %vm409_vm1, %v16872_v54  ;;  %v2848_v54 = vld [vmem:[%s16524_s3 + $0x48] sm:$0xff] }
 0x20e   : > { %2974 = vmatpush.msra.mxu2 %v2848_v54 }
 0x20f   : > { %8686 = vmatmul.msk.f32.gmra.mxu1 %vm409_vm1, %v2066_v53  ;;  %v16875_v53 = vld [vmem:[#allocation38_spill] sm:$0xff] }
 0x210   : > { %v1085_v38 = vpop.f32.mrf.mxu3  ;;  %v11125_v41 = vpop.f32.mrf.mxu0 }
 0x211   : > { %v1159_v20 = vadd.f32 %v1085_v38, %v713_v56  ;;  %16873 = vst [vmem:[#allocation26_spill] sm:$0xff] %v11125_v41  ;;  %v716_v56 = vadd.f32 %v16875_v53, %v10642_v0  ;;  %v16877_v53 = vld [vmem:[#allocation41_spill] sm:$0xff] }
 0x213   : > { %v11128_v18 = vadd.f32 %v1522_v27, %v1159_v20  ;;  %8654 = vmatmul.msk.f32.gmra.mxu0 %vm409_vm1, %v2068_v11  ;;  %v2070_v20 = vsel %vm506_vm0, %v2067_v58, %v2069_v52 }
 0x214   : > { %v1525_v7 = vpop.f32.mrf.mxu1 }
 0x215   : > { %16874 = vst [vmem:[#allocation2_spill] sm:$0xff] %v11128_v18  ;;  %8613 = vmatmul.msk.f32.gmra.mxu3 %vm409_vm1, %v10464_v50  ;;  %v2862_v50 = vld [vmem:[%s16524_s3 + $0xb8] sm:$0xff] }
 0x216   : > { %3089 = vmatpush.msrb.mxu3 %v2862_v50 }
 0x217   : > { %8687 = vmatmul.msk.f32.gmra.mxu1 %vm409_vm1, %v2068_v11  ;;  %v2071_v11 = vrot.slane %v9581_v16, 4  ;;  %v9582_v16 = vld [vmem:[%s9710_s20 + $0x60] sm:$0xff] }
 0x218   : > { %v1088_v61 = vpop.f32.mrf.mxu3  ;;  %v11143_v38 = vpop.f32.mrf.mxu0 }
 0x219   : > { %v1161_v27 = vadd.f32 %v1088_v61, %v716_v56  ;;  %v719_v56 = vadd.f32 %v16877_v53, %v10642_v0  ;;  %v2073_v53 = vrot.slane %v9582_v16, 4  ;;  %v9583_v16 = vld [vmem:[%s9710_s20 + $0x68] sm:$0xff] }
 0x21b   : > { %v11146_v18 = vadd.f32 %v1525_v7, %v1161_v27  ;;  %8655 = vmatmul.msk.f32.gmra.mxu0 %vm409_vm1, %v2070_v20  ;;  %v2072_v7 = vsel %vm506_vm0, %v2069_v52, %v2071_v11 }
 0x21c   : > { %v1528_v54 = vpop.f32.mrf.mxu1 }
 0x21d   : > { %16876 = vst [vmem:[#allocation31_spill] sm:$0xff] %v11146_v18  ;;  %8614 = vmatmul.msk.f32.gmra.mxu3 %vm409_vm1, %v10486_v55  ;;  %v2847_v55 = vld [vmem:[%s16524_s3 + $0x40] sm:$0xff] }
 0x21e   : > { %2975 = vmatpush.msra.mxu2 %v2847_v55 }
 0x21f   : > { %8688 = vmatmul.msk.f32.gmra.mxu1 %vm409_vm1, %v2070_v20  ;;  %v16880_v20 = vld [vmem:[#allocation44_spill] sm:$0xff] }
 0x220   : > { %v1091_v61 = vpop.f32.mrf.mxu3  ;;  %v11155_v58 = vpop.f32.mrf.mxu0 }
 0x221   : > { %v1163_v41 = vadd.f32 %v1091_v61, %v719_v56  ;;  %16878 = vst [vmem:[#allocation37_spill] sm:$0xff] %v11155_v58  ;;  %v722_v56 = vadd.f32 %v16880_v20, %v10642_v0  ;;  %v2075_v20 = vrot.slane %v9583_v16, 4  ;;  %v9584_v16 = vld [vmem:[%s9710_s20 + $0x70] sm:$0xff] }
 0x223   : > { %v11158_v27 = vadd.f32 %v1528_v54, %v1163_v41  ;;  %8656 = vmatmul.msk.f32.gmra.mxu0 %vm409_vm1, %v2072_v7 }
 0x224   : > { %v1531_v50 = vpop.f32.mrf.mxu1 }
 0x225   : > { %16879 = vst [vmem:[#allocation56_spill] sm:$0xff] %v11158_v27  ;;  %8615 = vmatmul.msk.f32.gmra.mxu3 %vm409_vm1, %v10508_v10  ;;  %v2074_v10 = vsel %vm506_vm0, %v2071_v11, %v2073_v53  ;;  %v2861_v27 = vld [vmem:[%s16524_s3 + $0xb0] sm:$0xff] }
 0x226   : > { %3090 = vmatpush.msrb.mxu3 %v2861_v27 }
 0x227   : > { %8689 = vmatmul.msk.f32.gmra.mxu1 %vm409_vm1, %v2072_v7  ;;  %v16883_v7 = vld [vmem:[#allocation47_spill] sm:$0xff] }
 0x228   : > { %v1094_v52 = vpop.f32.mrf.mxu3  ;;  %v11170_v54 = vpop.f32.mrf.mxu0 }
 0x229   : > { %v1165_v41 = vadd.f32 %v1094_v52, %v722_v56  ;;  %16881 = vst [vmem:[#allocation60_spill] sm:$0xff] %v11170_v54  ;;  %v725_v56 = vadd.f32 %v16883_v7, %v10642_v0  ;;  %v2077_v7 = vrot.slane %v9584_v16, 4 }
 0x22b   : > { %v11173_v61 = vadd.f32 %v1531_v50, %v1165_v41  ;;  %8657 = vmatmul.msk.f32.gmra.mxu0 %vm409_vm1, %v2074_v10  ;;  %v2076_v41 = vsel %vm506_vm0, %v2073_v53, %v2075_v20 }
 0x22c   : > { %v1534_v55 = vpop.f32.mrf.mxu1 }
 0x22d   : > { %16882 = vst [vmem:[#allocation38_spill] sm:$0xff] %v11173_v61  ;;  %8616 = vmatmul.msk.f32.gmra.mxu3 %vm409_vm1, %v10530_v15  ;;  %v2846_v15 = vld [vmem:[%s16524_s3 + $0x38] sm:$0xff] }
 0x22e   : > { %2976 = vmatpush.msra.mxu2 %v2846_v15  ;;  %v9585_v15 = vld [vmem:[%s9710_s20 + $0x78] sm:$0xff] }
 0x22f   : > { %8690 = vmatmul.msk.f32.gmra.mxu1 %vm409_vm1, %v2074_v10  ;;  %v16886_v10 = vld [vmem:[#allocation50_spill] sm:$0xff] }
 0x230   : > { %v1097_v11 = vpop.f32.mrf.mxu3  ;;  %v11185_v52 = vpop.f32.mrf.mxu0 }
 0x231   : > { %v1167_v50 = vadd.f32 %v1097_v11, %v725_v56  ;;  %16884 = vst [vmem:[#allocation41_spill] sm:$0xff] %v11185_v52  ;;  %v728_v56 = vadd.f32 %v16886_v10, %v10642_v0  ;;  %v2860_v10 = vld [vmem:[%s16524_s3 + $0xa8] sm:$0xff] }
 0x232   : > { %3091 = vmatpush.msrb.mxu3 %v2860_v10 }
 0x233   : > { %v11188_v61 = vadd.f32 %v1534_v55, %v1167_v50  ;;  %8658 = vmatmul.msk.f32.gmra.mxu0 %vm409_vm1, %v2076_v41 }
 0x234   : > { %v1537_v27 = vpop.f32.mrf.mxu1 }
 0x235   : > { %16885 = vst [vmem:[#allocation44_spill] sm:$0xff] %v11188_v61  ;;  %8617 = vmatmul.msk.f32.gmra.mxu3 %vm409_vm1, %v10552_v21  ;;  %v2078_v21 = vsel %vm506_vm0, %v2075_v20, %v2077_v7  ;;  %v2079_v61 = vrot.slane %v9585_v15, 4  ;;  %v2845_v15 = vld [vmem:[%s16524_s3 + $0x30] sm:$0xff] }
 0x236   : > { %2977 = vmatpush.msra.mxu2 %v2845_v15 }
 0x237   : > { %8691 = vmatmul.msk.f32.gmra.mxu1 %vm409_vm1, %v2076_v41  ;;  %v16889_v41 = vld [vmem:[#allocation53_spill] sm:$0xff] }
 0x238   : > { %v1100_v53 = vpop.f32.mrf.mxu3  ;;  %v11200_v11 = vpop.f32.mrf.mxu0 }
 0x239   : > { %v1169_v55 = vadd.f32 %v1100_v53, %v728_v56  ;;  %16887 = vst [vmem:[#allocation47_spill] sm:$0xff] %v11200_v11  ;;  %v731_v56 = vadd.f32 %v16889_v41, %v10642_v0  ;;  %v9586_v41 = vld [vmem:[%s9710_s20 + $0x80] sm:$0xff]  ;;  %v16907_v11 = vld [vmem:[#allocation35_spill] sm:$0xff] }
 0x23b   : > { %v11203_v50 = vadd.f32 %v1537_v27, %v1169_v55  ;;  %8659 = vmatmul.msk.f32.gmra.mxu0 %vm409_vm1, %v2078_v21 }
 0x23c   : > { %v1540_v16 = vpop.f32.mrf.mxu1 }
 0x23d   : > { %16888 = vst [vmem:[#allocation50_spill] sm:$0xff] %v11203_v50  ;;  %8618 = vmatmul.msk.f32.gmra.mxu3 %vm409_vm1, %v10580_v62  ;;  %v2080_v62 = vsel %vm506_vm0, %v2077_v7, %v2079_v61  ;;  %v16903_v50 = vld [vmem:[#allocation14_spill] sm:$0xff] }
 0x23f   : > { %8692 = vmatmul.msk.f32.gmra.mxu1 %vm409_vm1, %v2078_v21  ;;  %v16892_v21 = vld [vmem:[#allocation57_spill] sm:$0xff] }
 0x240   : > { %v1103_v20 = vpop.f32.mrf.mxu3  ;;  %v11215_v53 = vpop.f32.mrf.mxu0 }
 0x241   : > { %v1171_v27 = vadd.f32 %v1103_v20, %v731_v56  ;;  %16890 = vst [vmem:[#allocation53_spill] sm:$0xff] %v11215_v53  ;;  %v2081_v56 = vrot.slane %v9586_v41, 4  ;;  %v734_v20 = vadd.f32 %v16892_v21, %v10642_v0  ;;  %v3415_v53 = vld [vmem:[%s16525_s4 + $0xe0] sm:$0xff]  ;;  %v9587_v41 = vld [vmem:[%s9710_s20 + $0x88] sm:$0xff] }
 0x242   : > { %3521 = vmatpush.msrb.mxu0 %v3415_v53  ;;  %v2083_v21 = vrot.slane %v9587_v41, 4 }
 0x243   : > { %v11218_v55 = vadd.f32 %v1540_v16, %v1171_v27  ;;  %8660 = vmatmul.msk.f32.gmra.mxu0 %vm409_vm1, %v2080_v62 }
 0x244   : > { %v1543_v10 = vpop.f32.mrf.mxu1 }
 0x245   : > { %16891 = vst [vmem:[#allocation88_spill] sm:$0xff] %v11218_v55  ;;  %8619 = vmatmul.msk.f32.gmra.mxu3 %vm409_vm1, %v10605_v40  ;;  %v2082_v40 = vsel %vm506_vm0, %v2079_v61, %v2081_v56  ;;  %v16895_v61 = vld [vmem:[#allocation61_spill] sm:$0xff] }
 0x247   : > { %8693 = vmatmul.msk.f32.gmra.mxu1 %vm409_vm1, %v2080_v62  ;;  %v3416_v62 = vld [vmem:[%s16525_s4 + $0xe8] sm:$0xff] }
 0x248   : > { %v1106_v7 = vpop.f32.mrf.mxu3  ;;  %v11230_v27 = vpop.f32.mrf.mxu0  ;;  %3634 = vmatpush.msrb.mxu1 %v3416_v62 }
 0x249   : > { %v1173_v16 = vadd.f32 %v1106_v7, %v734_v20  ;;  %16893 = vst [vmem:[#allocation57_spill] sm:$0xff] %v11230_v27 }
 0x24b   : > { %v11233_v55 = vadd.f32 %v1543_v10, %v1173_v16  ;;  %8661 = vmatmul.msk.f32.gmra.mxu0 %vm409_vm1, %v2082_v40  ;;  %v737_v10 = vadd.f32 %v16895_v61, %v10642_v0  ;;  %v2844_v0 = vld [vmem:[%s16524_s3 + $0x28] sm:$0xff] }
 0x24c   : > { %v1546_v15 = vpop.f32.mrf.mxu1  ;;  %2978 = vmatpush.msra.mxu2 %v2844_v0 }
 0x24d   : > { %16894 = vst [vmem:[#allocation89_spill] sm:$0xff] %v11233_v55  ;;  %8620 = vmatmul.msk.f32.gmra.mxu3 %vm409_vm1, %v10627_v17  ;;  %v2084_v17 = vsel %vm506_vm0, %v2081_v56, %v2083_v21  ;;  %v2859_v55 = vld [vmem:[%s16524_s3 + $0xa0] sm:$0xff]  ;;  %v9588_v56 = vld [vmem:[%s9710_s20 + $0x90] sm:$0xff] }
 0x24e   : > { %3092 = vmatpush.msrb.mxu3 %v2859_v55 }
 0x24f   : > { %8694 = vmatmul.msk.f32.gmra.mxu1 %vm409_vm1, %v2082_v40  ;;  %v2085_v40 = vrot.slane %v9588_v56, 4 }
 0x250   : > { %v1109_v20 = vpop.f32.mrf.mxu3  ;;  %v2213_v53 = vpop.f32.mrf.mxu0 }
 0x251   : > { %v1175_v7 = vadd.f32 %v1109_v20, %v737_v10  ;;  %v11252_v41 = vadd.f32 %v2213_v53, %v10665_v37  ;;  %v2086_v62 = vsel %vm506_vm0, %v2083_v21, %v2085_v40  ;;  %v3413_v20 = vld [vmem:[%s16525_s4 + $0xd0] sm:$0xff]  ;;  %v9589_v21 = vld [vmem:[%s9710_s20 + $0x98] sm:$0xff] }
 0x252   : > { %3522 = vmatpush.msrb.mxu0 %v3413_v20 }
 0x253   : > { %v11249_v16 = vadd.f32 %v1546_v15, %v1175_v7  ;;  %8662 = vmatmul.msk.f32.gmra.mxu0 %vm409_vm1, %v2084_v17  ;;  %2550 = vrot.lane.b32.xlu0 %v11252_v41, %s9603_s12  ;;  %v11285_v7 = vpop.f32.mrf.mxu2 }
 0x254   : > { %v2326_v37 = vpop.f32.mrf.mxu1 }
 0x255   : > { %16896 = vst [vmem:[#allocation61_spill] sm:$0xff] %v11249_v16  ;;  %8621 = vmatmul.msk.f32.gmra.mxu3 %vm409_vm1, %v10650_v43  ;;  %v2857_v16 = vld [vmem:[%s16524_s3 + $0x90] sm:$0xff] }
 0x257   : > { %8695 = vmatmul.msk.f32.gmra.mxu1 %vm409_vm1, %v2084_v17 }
 0x258   : > { %v1890_v15 = vpop.f32.mrf.mxu3  ;;  %v2216_v43 = vpop.f32.mrf.mxu0 }
 0x259   : > { %v1987_v55 = vadd.f32 %v1890_v15, %v10663_v2  ;;  %v11272_v10 = vadd.f32 %v2216_v43, %v10686_v44  ;;  %v2087_v44 = vrot.slane %v9589_v21, 4 }
 0x25b   : > { %v11269_v61 = vadd.f32 %v2326_v37, %v1987_v55  ;;  %8663 = vmatmul.msk.f32.gmra.mxu0 %vm409_vm1, %v2086_v62  ;;  %2554 = vrot.lane.b32.xlu1 %v11272_v10, %s9603_s12  ;;  %v2088_v37 = vsel %vm506_vm0, %v2085_v40, %v2087_v44  ;;  %v9590_v55 = vld [vmem:[%s9710_s20 + $0xa0] sm:$0xff] }
 0x25c   : > { %v2329_v2 = vpop.f32.mrf.mxu1  ;;  %v2089_v43 = vrot.slane %v9590_v55, 4  ;;  %v3412_v55 = vld [vmem:[%s16525_s4 + $0xc8] sm:$0xff] }
 0x25d   : > { %8622 = vmatmul.msk.f32.gmra.mxu3 %vm409_vm1, %v10671_v47  ;;  %2552 = vrot.lane.b32.xlu0 %v11269_v61, %s9603_s12  ;;  %v3414_v47 = vld [vmem:[%s16525_s4 + $0xd8] sm:$0xff] }
 0x25e   : > { %3635 = vmatpush.msrb.mxu1 %v3414_v47  ;;  %v2090_v21 = vsel %vm506_vm0, %v2087_v44, %v2089_v43  ;;  %v16897_v47 = vld [vmem:[#allocation7_spill] sm:$0xff] }
 0x25f   : > { %8696 = vmatmul.msk.f32.gmra.mxu1 %vm409_vm1, %v2086_v62  ;;  %v11312_v62 = vpop.f32.mrf.mxu2 }
 0x260   : > { %v1893_v53 = vpop.f32.mrf.mxu3  ;;  %v2219_v0 = vpop.f32.mrf.mxu0  ;;  %3636 = vmatpush.msrb.mxu1 %v3412_v55 }
 0x261   : > { %v1989_v17 = vadd.f32 %v1893_v53, %v10684_v30  ;;  %v11296_v15 = vadd.f32 %v2219_v0, %v10707_v46  ;;  %v2843_v30 = vld [vmem:[%s16524_s3 + $0x20] sm:$0xff]  ;;  %v2858_v46 = vld [vmem:[%s16524_s3 + $0x98] sm:$0xff] }
 0x262   : > { %2979 = vmatpush.msra.mxu2 %v2843_v30  ;;  %3093 = vmatpush.msrb.mxu3 %v2858_v46  ;;  %v3411_v0 = vld [vmem:[%s16525_s4 + $0xc0] sm:$0xff]  ;;  %v16898_v30 = vld [vmem:[#allocation5_spill] sm:$0xff] }
 0x263   : > { %v11293_v56 = vadd.f32 %v2329_v2, %v1989_v17  ;;  %8664 = vmatmul.msk.f32.gmra.mxu0 %vm409_vm1, %v2088_v37  ;;  %2558 = vrot.lane.b32.xlu2 %v11296_v15, %s9603_s12 }
 0x264   : > { %v2332_v40 = vpop.f32.mrf.mxu1  ;;  %3523 = vmatpush.msrb.mxu0 %v3411_v0  ;;  %3094 = vmatpush.msrb.mxu3 %v2857_v16  ;;  %v3409_v16 = vld [vmem:[%s16525_s4 + $0xb0] sm:$0xff] }
 0x265   : > { %8623 = vmatmul.msk.f32.gmra.mxu3 %vm409_vm1, %v10692_v28  ;;  %2556 = vrot.lane.b32.xlu1 %v11293_v56, %s9603_s12 }
 0x266   : > { %3524 = vmatpush.msrb.mxu0 %v3409_v16 }
 0x267   : > { %8697 = vmatmul.msk.f32.gmra.mxu1 %vm409_vm1, %v2088_v37 }
 0x268   : > { %v1896_v28 = vpop.f32.mrf.mxu3  ;;  %v2222_v2 = vpop.f32.mrf.mxu0 }
 0x269   : > { %v1991_v20 = vadd.f32 %v1896_v28, %v10705_v49  ;;  %v11318_v53 = vadd.f32 %v2222_v2, %v10728_v32  ;;  %v9591_v32 = vld [vmem:[%s9710_s20 + $0xa8] sm:$0xff] }
 0x26a   : > { %v2091_v44 = vrot.slane %v9591_v32, 4  ;;  %v16899_v32 = vld [vmem:[#allocation8_spill] sm:$0xff] }
 0x26b   : > { %v11320_v17 = vadd.f32 %v2332_v40, %v1991_v20  ;;  %8665 = vmatmul.msk.f32.gmra.mxu0 %vm409_vm1, %v2090_v21  ;;  %2562 = vrot.lane.b32.xlu0 %v11318_v53, %s9603_s12  ;;  %v11339_v20 = vpop.f32.mrf.mxu2 }
 0x26c   : > { %v2335_v49 = vpop.f32.mrf.mxu1  ;;  %v2092_v28 = vsel %vm506_vm0, %v2089_v43, %v2091_v44 }
 0x26d   : > { %8624 = vmatmul.msk.f32.gmra.mxu3 %vm409_vm1, %v16897_v47  ;;  %2560 = vrot.lane.b32.xlu2 %v11320_v17, %s9603_s12 }
 0x26f   : > { %8698 = vmatmul.msk.f32.gmra.mxu1 %vm409_vm1, %v2090_v21  ;;  %v2842_v21 = vld [vmem:[%s16524_s3 + $0x18] sm:$0xff] }
 0x270   : > { %v1899_v37 = vpop.f32.mrf.mxu3  ;;  %v2225_v46 = vpop.f32.mrf.mxu0  ;;  %2980 = vmatpush.msra.mxu2 %v2842_v21 }
 0x271   : > { %v1993_v40 = vadd.f32 %v1899_v37, %v16898_v30  ;;  %v11342_v2 = vadd.f32 %v2225_v46, %v10755_v8  ;;  %v9592_v8 = vld [vmem:[%s9710_s20 + $0xb0] sm:$0xff] }
 0x272   : > { %v2093_v0 = vrot.slane %v9592_v8, 4  ;;  %v16901_v8 = vld [vmem:[#allocation11_spill] sm:$0xff] }
 0x273   : > { %v11344_v47 = vadd.f32 %v2335_v49, %v1993_v40  ;;  %8666 = vmatmul.msk.f32.gmra.mxu0 %vm409_vm1, %v2092_v28  ;;  %v16900_v40 = vld [vmem:[#allocation9_spill] sm:$0xff]  ;;  %v11368_v21 = vpop.f32.mrf.mxu2 }
 0x274   : > { %v2338_v43 = vpop.f32.mrf.mxu1  ;;  %v2094_v30 = vsel %vm506_vm0, %v2091_v44, %v2093_v0 }
 0x275   : > { %8625 = vmatmul.msk.f32.gmra.mxu3 %vm409_vm1, %v10734_v25  ;;  %2566 = vrot.lane.b32.xlu2 %v11342_v2, %s9603_s12 }
 0x276   : > { %2564 = vrot.lane.b32.xlu1 %v11344_v47, %s9603_s12 }
 0x277   : > { %8699 = vmatmul.msk.f32.gmra.mxu1 %vm409_vm1, %v2092_v28  ;;  %v9593_v28 = vld [vmem:[%s9710_s20 + $0xb8] sm:$0xff] }
 0x278   : > { %v1902_v49 = vpop.f32.mrf.mxu3  ;;  %v2228_v37 = vpop.f32.mrf.mxu0 }
 0x279   : > { %v1995_v25 = vadd.f32 %v1902_v49, %v16899_v32  ;;  %v11361_v55 = vadd.f32 %v2228_v37, %v16900_v40  ;;  %v16902_v32 = vld [vmem:[#allocation12_spill] sm:$0xff] }
 0x27b   : > { %v11363_v46 = vadd.f32 %v2338_v43, %v1995_v25  ;;  %8667 = vmatmul.msk.f32.gmra.mxu0 %vm409_vm1, %v2094_v30  ;;  %v2095_v43 = vrot.slane %v9593_v28, 4  ;;  %v3410_v28 = vld [vmem:[%s16525_s4 + $0xb8] sm:$0xff]  ;;  %v11403_v16 = vpop.f32.mrf.mxu2 }
 0x27c   : > { %v2341_v44 = vpop.f32.mrf.mxu1  ;;  %3637 = vmatpush.msrb.mxu1 %v3410_v28  ;;  %v16906_v28 = vld [vmem:[#allocation64_spill] sm:$0xff] }
 0x27d   : > { %8626 = vmatmul.msk.f32.gmra.mxu3 %vm409_vm1, %v16901_v8  ;;  %2568 = vrot.lane.b32.xlu0 %v11363_v46, %s9603_s12  ;;  %v2096_v40 = vsel %vm506_vm0, %v2093_v0, %v2095_v43  ;;  %v16904_v0 = vld [vmem:[#allocation13_spill] sm:$0xff]  ;;  %v555_v52 = vadd.f32 %v16907_v11, %v16906_v28  ;;  %v2099_v11 = vrot.slane %v10814_v4, 4 }
 0x27e   : > { %2570 = vrot.lane.b32.xlu1 %v11361_v55, %s9603_s12 }
 0x27f   : > { %8700 = vmatmul.msk.f32.gmra.mxu1 %vm409_vm1, %v2094_v30  ;;  %v2841_v30 = vld [vmem:[%s16524_s3 + $0x10] sm:$0xff] }
 0x280   : > { %v1905_v49 = vpop.f32.mrf.mxu3  ;;  %v2231_v37 = vpop.f32.mrf.mxu0  ;;  %2981 = vmatpush.msra.mxu2 %v2841_v30 }
 0x281   : > { %v1997_v25 = vadd.f32 %v1905_v49, %v16902_v32  ;;  %v11385_v8 = vadd.f32 %v2231_v37, %v10803_v59 }
 0x283   : > { %v11387_v27 = vadd.f32 %v2341_v44, %v1997_v25  ;;  %8668 = vmatmul.msk.f32.gmra.mxu0 %vm409_vm1, %v2096_v40  ;;  %v2097_v44 = vrot.slane %v16904_v0, 4  ;;  %v16908_v0 = vld [vmem:[#allocation40_spill] sm:$0xff] }
 0x284   : > { %v2344_v59 = vpop.f32.mrf.mxu1  ;;  %v1128_v18 = vadd.f32 %v16908_v0, %v555_v52  ;;  %v3407_v52 = vld [vmem:[%s16525_s4 + $0xa0] sm:$0xff] }
 0x285   : > { %8627 = vmatmul.msk.f32.gmra.mxu3 %vm409_vm1, %v16903_v50  ;;  %2572 = vrot.lane.b32.xlu2 %v11387_v27, %s9603_s12  ;;  %v16905_v50 = vld [vmem:[#allocation17_spill] sm:$0xff]  ;;  %v2098_v37 = vsel %vm506_vm0, %v2095_v43, %v2097_v44 }
 0x286   : > { %2574 = vrot.lane.b32.xlu0 %v11385_v8, %s9603_s12  ;;  %3525 = vmatpush.msrb.mxu0 %v3407_v52 }
 0x287   : > { %8701 = vmatmul.msk.f32.gmra.mxu1 %vm409_vm1, %v2096_v40 }
 0x288   : > { %v1908_v49 = vpop.f32.mrf.mxu3  ;;  %v2234_v25 = vpop.f32.mrf.mxu0 }
 0x289   : > { %v1999_v32 = vadd.f32 %v1908_v49, %v16905_v50  ;;  %v11411_v54 = vadd.f32 %v2234_v25, %v10829_v1  ;;  %v2856_v1 = vld [vmem:[%s16524_s3 + $0x88] sm:$0xff]  ;;  %v2100_v50 = vsel %vm506_vm0, %v2097_v44, %v2099_v11 }
 0x28a   : > { %3095 = vmatpush.msrb.mxu3 %v2856_v1 }
 0x28b   : > { %v11413_v58 = vadd.f32 %v2344_v59, %v1999_v32  ;;  %8669 = vmatmul.msk.f32.gmra.mxu0 %vm409_vm1, %v2098_v37  ;;  %v11432_v59 = vpop.f32.mrf.mxu2  ;;  %v16909_v32 = vld [vmem:[#allocation39_spill] sm:$0xff] }
 0x28c   : > { %v2347_v43 = vpop.f32.mrf.mxu1  ;;  %v558_v25 = vadd.f32 %v16909_v32, %v16906_v28  ;;  %v16913_v32 = vld [vmem:[#allocation42_spill] sm:$0xff] }
 0x28d   : > { %8628 = vmatmul.msk.f32.gmra.mxu3 %vm409_vm1, %v10809_v26  ;;  %2578 = vrot.lane.b32.xlu2 %v11411_v54, %s9603_s12  ;;  %v1565_v26 = vadd.f32 %v10824_v29, %v1128_v18  ;;  %v3408_v18 = vld [vmem:[%s16525_s4 + $0xa8] sm:$0xff] }
 0x28e   : > { %2576 = vrot.lane.b32.xlu1 %v11413_v58, %s9603_s12  ;;  %3638 = vmatpush.msrb.mxu1 %v3408_v18 }
 0x28f   : > { %v2002_v30 = vadd.f32 %v11285_v7, %v1565_v26  ;;  %8702 = vmatmul.msk.f32.gmra.mxu1 %vm409_vm1, %v2098_v37  ;;  %v16910_v7 = vld [vmem:[#allocation43_spill] sm:$0xff]  ;;  %v2101_v37 = vrot.slane %v10838_v12, 4 }
 0x290   : > { %v1911_v40 = vpop.f32.mrf.mxu3  ;;  %v2237_v4 = vpop.f32.mrf.mxu0  ;;  %v1130_v1 = vadd.f32 %v16910_v7, %v558_v25  ;;  %v561_v25 = vadd.f32 %v16913_v32, %v16906_v28 }
 0x291   : > { %v2001_v49 = vadd.f32 %v1911_v40, %v10827_v5  ;;  %v11439_v0 = vadd.f32 %v2237_v4, %v2002_v30  ;;  %v2840_v5 = vld [vmem:[%s16524_s3 + $0x8] sm:$0xff]  ;;  %v2102_v4 = vsel %vm506_vm0, %v2099_v11, %v2101_v37  ;;  %v2103_v11 = vrot.slane %v10859_v35, 4 }
 0x292   : > { %2982 = vmatpush.msra.mxu2 %v2840_v5  ;;  %v16912_v40 = vld [vmem:[#allocation15_spill] sm:$0xff] }
 0x293   : > { %v11441_v29 = vadd.f32 %v2347_v43, %v2001_v49  ;;  %8670 = vmatmul.msk.f32.gmra.mxu0 %vm409_vm1, %v2100_v50  ;;  %v16911_v43 = vld [vmem:[#allocation18_spill] sm:$0xff]  ;;  %v11465_v18 = vpop.f32.mrf.mxu2  ;;  %v2104_v32 = vsel %vm506_vm0, %v2101_v37, %v2103_v11 }
 0x294   : > { %v2350_v44 = vpop.f32.mrf.mxu1  ;;  %v1567_v52 = vadd.f32 %v16911_v43, %v1130_v1  ;;  %v16914_v1 = vld [vmem:[#allocation46_spill] sm:$0xff]  ;;  %v16915_v43 = vld [vmem:[#allocation19_spill] sm:$0xff] }
 0x295   : > { %8629 = vmatmul.msk.f32.gmra.mxu3 %vm409_vm1, %v10835_v9  ;;  %2580 = vrot.lane.b32.xlu0 %v11441_v29, %s9603_s12  ;;  %v1132_v5 = vadd.f32 %v16914_v1, %v561_v25  ;;  %v16918_v25 = vld [vmem:[#allocation45_spill] sm:$0xff] }
 0x296   : > { %2582 = vrot.lane.b32.xlu1 %v11439_v0, %s9603_s12  ;;  %v2004_v9 = vadd.f32 %v11312_v62, %v1567_v52  ;;  %v564_v35 = vadd.f32 %v16918_v25, %v16906_v28  ;;  %v16924_v25 = vld [vmem:[#allocation27_spill] sm:$0xff] }
 0x297   : > { %8703 = vmatmul.msk.f32.gmra.mxu1 %vm409_vm1, %v2100_v50  ;;  %v16916_v50 = vld [vmem:[#allocation22_spill] sm:$0xff] }
 0x298   : > { %v1914_v26 = vpop.f32.mrf.mxu3  ;;  %v2240_v49 = vpop.f32.mrf.mxu0  ;;  %v1569_v52 = vadd.f32 %v16916_v50, %v1132_v5 }
 0x299   : > { %v2003_v30 = vadd.f32 %v1914_v26, %v16912_v40  ;;  %v11467_v7 = vadd.f32 %v2240_v49, %v2004_v9  ;;  %v16917_v9 = vld [vmem:[#allocation23_spill] sm:$0xff] }
 0x29a   : > { %v2006_v26 = vadd.f32 %v11339_v20, %v1569_v52  ;;  %v2855_v20 = vld [vmem:[%s16524_s3 + $0x80] sm:$0xff]  ;;  %v16922_v52 = vld [vmem:[#allocation20_spill] sm:$0xff] }
 0x29b   : > { %v11469_v12 = vadd.f32 %v2350_v44, %v2003_v30  ;;  %8671 = vmatmul.msk.f32.gmra.mxu0 %vm409_vm1, %v2102_v4  ;;  %v3405_v30 = vld [vmem:[%s16525_s4 + $0x90] sm:$0xff]  ;;  %3096 = vmatpush.msrb.mxu3 %v2855_v20  ;;  %v11501_v50 = vpop.f32.mrf.mxu2 }
 0x29c   : > { %v2353_v62 = vpop.f32.mrf.mxu1  ;;  %3526 = vmatpush.msrb.mxu0 %v3405_v30 }
 0x29d   : > { %8630 = vmatmul.msk.f32.gmra.mxu3 %vm409_vm1, %v16915_v43  ;;  %2584 = vrot.lane.b32.xlu2 %v11469_v12, %s9603_s12  ;;  %v16921_v43 = vld [vmem:[#allocation49_spill] sm:$0xff] }
 0x29e   : > { %2586 = vrot.lane.b32.xlu0 %v11467_v7, %s9603_s12  ;;  %v1134_v37 = vadd.f32 %v16921_v43, %v564_v35  ;;  %v16925_v43 = vld [vmem:[#allocation48_spill] sm:$0xff] }
 0x29f   : > { %8704 = vmatmul.msk.f32.gmra.mxu1 %vm409_vm1, %v2102_v4  ;;  %v3406_v4 = vld [vmem:[%s16525_s4 + $0x98] sm:$0xff] }
 0x2a0   : > { %v1917_v44 = vpop.f32.mrf.mxu3  ;;  %v2243_v49 = vpop.f32.mrf.mxu0  ;;  %3639 = vmatpush.msrb.mxu1 %v3406_v4 }
 0x2a1   : > { %v2005_v40 = vadd.f32 %v1917_v44, %v16917_v9  ;;  %v11490_v1 = vadd.f32 %v2243_v49, %v2006_v26  ;;  %v2105_v26 = vrot.slane %v10880_v6, 4  ;;  %v16923_v9 = vld [vmem:[#allocation24_spill] sm:$0xff] }
 0x2a2   : > { %v16926_v6 = vld [vmem:[#allocation52_spill] sm:$0xff] }
 0x2a3   : > { %16919 = vst [vmem:[#allocation7_spill] sm:$0xff] %v11490_v1  ;;  %v11492_v5 = vadd.f32 %v2353_v62, %v2005_v40  ;;  %8672 = vmatmul.msk.f32.gmra.mxu0 %vm409_vm1, %v2104_v32  ;;  %v2839_v62 = vld [vmem:[%s16524_s3] sm:$0xff]  ;;  %v1571_v40 = vadd.f32 %v16923_v9, %v1134_v37  ;;  %v2106_v4 = vsel %vm506_vm0, %v2103_v11, %v2105_v26  ;;  %v16928_v11 = vld [vmem:[#allocation25_spill] sm:$0xff] }
 0x2a4   : > { %v2356_v44 = vpop.f32.mrf.mxu1  ;;  %2983 = vmatpush.msra.mxu2 %v2839_v62  ;;  %v16927_v62 = vld [vmem:[#allocation28_spill] sm:$0xff]  ;;  %v16929_v9 = vld [vmem:[#allocation29_spill] sm:$0xff] }
 0x2a5   : > { %16920 = vst [vmem:[#allocation5_spill] sm:$0xff] %v11492_v5  ;;  %8631 = vmatmul.msk.f32.gmra.mxu3 %vm409_vm1, %v16922_v52  ;;  %2590 = vrot.lane.b32.xlu2 %v11490_v1, %s9603_s12  ;;  %v2008_v49 = vadd.f32 %v11368_v21, %v1571_v40  ;;  %v567_v52 = vadd.f32 %v16925_v43, %v16906_v28 }
 0x2a6   : > { %2588 = vrot.lane.b32.xlu1 %v11492_v5, %s9603_s12 }
 0x2a7   : > { %8705 = vmatmul.msk.f32.gmra.mxu1 %vm409_vm1, %v2104_v32  ;;  %v1136_v37 = vadd.f32 %v16926_v6, %v567_v52  ;;  %v2107_v32 = vrot.slane %v16928_v11, 4  ;;  %v16931_v52 = vld [vmem:[#allocation51_spill] sm:$0xff] }
 0x2a8   : > { %v1920_v30 = vpop.f32.mrf.mxu3  ;;  %v2246_v20 = vpop.f32.mrf.mxu0  ;;  %v570_v6 = vadd.f32 %v16931_v52, %v16906_v28 }
 0x2a9   : > { %v2007_v35 = vadd.f32 %v1920_v30, %v16924_v25  ;;  %v11521_v1 = vadd.f32 %v2246_v20, %v2008_v49  ;;  %v1573_v40 = vadd.f32 %v16929_v9, %v1136_v37  ;;  %v16930_v25 = vld [vmem:[#allocation32_spill] sm:$0xff]  ;;  %v2108_v43 = vsel %vm506_vm0, %v2105_v26, %v2107_v32  ;;  %v3403_v37 = vld [vmem:[%s16525_s4 + $0x80] sm:$0xff]  ;;  %v3404_v26 = vld [vmem:[%s16525_s4 + $0x88] sm:$0xff] }
 0x2aa   : > { %3527 = vmatpush.msrb.mxu0 %v3403_v37  ;;  %3640 = vmatpush.msrb.mxu1 %v3404_v26  ;;  %v16936_v37 = vld [vmem:[#allocation54_spill] sm:$0xff] }
 0x2ab   : > { %v11523_v5 = vadd.f32 %v2356_v44, %v2007_v35  ;;  %8673 = vmatmul.msk.f32.gmra.mxu0 %vm409_vm1, %v2106_v4  ;;  %v11535_v44 = vpop.f32.mrf.mxu2  ;;  %v2010_v49 = vadd.f32 %v11403_v16, %v1573_v40  ;;  %v16933_v16 = vld [vmem:[#allocation55_spill] sm:$0xff]  ;;  %v16934_v40 = vld [vmem:[#allocation33_spill] sm:$0xff] }
 0x2ac   : > { %v2359_v21 = vpop.f32.mrf.mxu1  ;;  %v1138_v9 = vadd.f32 %v16933_v16, %v570_v6  ;;  %v573_v16 = vadd.f32 %v16936_v37, %v16906_v28 }
 0x2ad   : > { %8632 = vmatmul.msk.f32.gmra.mxu3 %vm409_vm1, %v16927_v62  ;;  %2592 = vrot.lane.b32.xlu0 %v11523_v5, %s9603_s12 }
 0x2ae   : > { %2594 = vrot.lane.b32.xlu1 %v11521_v1, %s9603_s12 }
 0x2af   : > { %8706 = vmatmul.msk.f32.gmra.mxu1 %vm409_vm1, %v2106_v4 }
 0x2b0   : > { %v1923_v30 = vpop.f32.mrf.mxu3  ;;  %v2249_v20 = vpop.f32.mrf.mxu0 }
 0x2b1   : > { %v2009_v35 = vadd.f32 %v1923_v30, %v16930_v25  ;;  %v11543_v62 = vadd.f32 %v2249_v20, %v2010_v49  ;;  %v1575_v30 = vadd.f32 %v16934_v40, %v1138_v9  ;;  %v16937_v9 = vld [vmem:[#allocation59_spill] sm:$0xff] }
 0x2b2   : > { %v1140_v26 = vadd.f32 %v16937_v9, %v573_v16  ;;  %v16942_v9 = vld [vmem:[#allocation63_spill] sm:$0xff] }
 0x2b3   : > { %16932 = vst [vmem:[#allocation8_spill] sm:$0xff] %v11543_v62  ;;  %v11545_v11 = vadd.f32 %v2359_v21, %v2009_v35  ;;  %8674 = vmatmul.msk.f32.gmra.mxu0 %vm409_vm1, %v2108_v43  ;;  %v2109_v21 = vrot.slane %v10928_v42, 4  ;;  %v11564_v25 = vpop.f32.mrf.mxu2  ;;  %v16935_v35 = vld [vmem:[#allocation30_spill] sm:$0xff] }
 0x2b4   : > { %v2362_v4 = vpop.f32.mrf.mxu1 }
 0x2b5   : > { %8633 = vmatmul.msk.f32.gmra.mxu3 %vm409_vm1, %v10919_v36  ;;  %2596 = vrot.lane.b32.xlu2 %v11545_v11, %s9603_s12  ;;  %v2012_v36 = vadd.f32 %v11432_v59, %v1575_v30  ;;  %v2110_v6 = vsel %vm506_vm0, %v2107_v32, %v2109_v21  ;;  %v2111_v32 = vrot.slane %v10950_v22, 4 }
 0x2b6   : > { %2598 = vrot.lane.b32.xlu0 %v11543_v62, %s9603_s12 }
 0x2b7   : > { %8707 = vmatmul.msk.f32.gmra.mxu1 %vm409_vm1, %v2108_v43  ;;  %v16938_v43 = vld [vmem:[#allocation34_spill] sm:$0xff] }
 0x2b8   : > { %v1926_v49 = vpop.f32.mrf.mxu3  ;;  %v2252_v52 = vpop.f32.mrf.mxu0  ;;  %v1577_v40 = vadd.f32 %v16938_v43, %v1140_v26  ;;  %v16943_v43 = vld [vmem:[#allocation3_spill] sm:$0xff] }
 0x2b9   : > { %v2011_v20 = vadd.f32 %v1926_v49, %v16935_v35  ;;  %v11571_v62 = vadd.f32 %v2252_v52, %v2012_v36  ;;  %v16939_v49 = vld [vmem:[#allocation36_spill] sm:$0xff]  ;;  %v2112_v35 = vsel %vm506_vm0, %v2109_v21, %v2111_v32 }
 0x2ba   : > { %v2014_v30 = vadd.f32 %v11465_v18, %v1577_v40  ;;  %v3401_v18 = vld [vmem:[%s16525_s4 + $0x70] sm:$0xff] }
 0x2bb   : > { %v11573_v42 = vadd.f32 %v2362_v4, %v2011_v20  ;;  %8675 = vmatmul.msk.f32.gmra.mxu0 %vm409_vm1, %v2110_v6  ;;  %v16940_v20 = vld [vmem:[#allocation58_spill] sm:$0xff]  ;;  %v11591_v37 = vpop.f32.mrf.mxu2 }
 0x2bc   : > { %v2365_v59 = vpop.f32.mrf.mxu1  ;;  %v576_v52 = vadd.f32 %v16940_v20, %v16906_v28  ;;  %3528 = vmatpush.msrb.mxu0 %v3401_v18  ;;  %v16945_v20 = vrot.slane %v10997_v34, 4 }
 0x2bd   : > { %8634 = vmatmul.msk.f32.gmra.mxu3 %vm409_vm1, %v10947_v48  ;;  %2602 = vrot.lane.b32.xlu2 %v11571_v62, %s9603_s12 }
 0x2be   : > { %2600 = vrot.lane.b32.xlu1 %v11573_v42, %s9603_s12  ;;  %v1142_v26 = vadd.f32 %v16942_v9, %v576_v52  ;;  %v2115_v52 = vsel %vm506_vm0, %v2111_v32, %v16945_v20  ;;  %v16946_v9 = vld [vmem:[#allocation62_spill] sm:$0xff]  ;;  %v2559_v20 = vpop.permute.xlu2 %2558 }
 0x2bf   : > { %8708 = vmatmul.msk.f32.gmra.mxu1 %vm409_vm1, %v2110_v6  ;;  %v3402_v6 = vld [vmem:[%s16525_s4 + $0x78] sm:$0xff] }
 0x2c0   : > { %v1929_v4 = vpop.f32.mrf.mxu3  ;;  %v2255_v48 = vpop.f32.mrf.mxu0  ;;  %3641 = vmatpush.msrb.mxu1 %v3402_v6 }
 0x2c1   : > { %v2013_v36 = vadd.f32 %v1929_v4, %v16939_v49  ;;  %v11593_v16 = vadd.f32 %v2255_v48, %v2014_v30 }
 0x2c3   : > { %16941 = vst [vmem:[#allocation9_spill] sm:$0xff] %v11593_v16  ;;  %v11595_v22 = vadd.f32 %v2365_v59, %v2013_v36  ;;  %8676 = vmatmul.msk.f32.gmra.mxu0 %vm409_vm1, %v2112_v35  ;;  %v16944_v59 = vld [vmem:[#allocation4_spill] sm:$0xff] }
 0x2c4   : > { %v2368_v21 = vpop.f32.mrf.mxu1  ;;  %v1579_v40 = vadd.f32 %v16944_v59, %v1142_v26  ;;  %v16947_v26 = vld [vmem:[#allocation67_spill] sm:$0xff] }
 0x2c5   : > { %8635 = vmatmul.msk.f32.gmra.mxu3 %vm409_vm1, %v16943_v43  ;;  %2604 = vrot.lane.b32.xlu0 %v11595_v22, %s9603_s12  ;;  %v2551_v4 = vpop.permute.xlu0 %2550  ;;  %v579_v43 = vadd.f32 %v16946_v9, %v16906_v28 }
 0x2c6   : > { %2606 = vrot.lane.b32.xlu1 %v11593_v16, %s9603_s12  ;;  %v2016_v30 = vadd.f32 %v11501_v50, %v1579_v40  ;;  %v11625_v50 = vpop.f32.mrf.mxu2  ;;  %v16948_v40 = vld [vmem:[#allocation6_spill] sm:$0xff] }
 0x2c7   : > { %8709 = vmatmul.msk.f32.gmra.mxu1 %vm409_vm1, %v2112_v35  ;;  %v1144_v6 = vadd.f32 %v16947_v26, %v579_v43  ;;  %v16950_v26 = vld [vmem:[#allocation70_spill] sm:$0xff] }
 0x2c8   : > { %v1932_v49 = vpop.f32.mrf.mxu3  ;;  %v2258_v48 = vpop.f32.mrf.mxu0 }
 0x2c9   : > { %v2015_v36 = vadd.f32 %v1932_v49, %v10986_v23  ;;  %v11620_v16 = vadd.f32 %v2258_v48, %v2016_v30  ;;  %v1581_v23 = vadd.f32 %v11006_v24, %v1144_v6 }
 0x2cb   : > { %v11622_v18 = vadd.f32 %v2368_v21, %v2015_v36  ;;  %8677 = vmatmul.msk.f32.gmra.mxu0 %vm409_vm1, %v2115_v52  ;;  %v2018_v35 = vadd.f32 %v11535_v44, %v1581_v23  ;;  %v16949_v36 = vld [vmem:[#allocation66_spill] sm:$0xff] }
 0x2cc   : > { %v2371_v34 = vpop.f32.mrf.mxu1  ;;  %v582_v48 = vadd.f32 %v16949_v36, %v16906_v28 }
 0x2cd   : > { %8636 = vmatmul.msk.f32.gmra.mxu3 %vm409_vm1, %v10994_v51  ;;  %2608 = vrot.lane.b32.xlu2 %v11622_v18, %s9603_s12  ;;  %v2555_v32 = vpop.permute.xlu1 %2554 }
 0x2ce   : > { %2610 = vrot.lane.b32.xlu0 %v11620_v16, %s9603_s12 }
 0x2cf   : > { %v2553_v21 = vpop.permute.xlu0 %2552  ;;  %8710 = vmatmul.msk.f32.gmra.mxu1 %vm409_vm1, %v2115_v52  ;;  %v1146_v52 = vadd.f32 %v16950_v26, %v582_v48 }
 0x2d0   : > { %v1935_v59 = vpop.f32.mrf.mxu3  ;;  %v2679_v51 = vsel %vm2678_vm5, %v2551_v4, %v2553_v21  ;;  %v2261_v49 = vpop.f32.mrf.mxu0  ;;  %v2776_v9 = vmax.f32 %v11269_v61, %v2553_v21  ;;  %v3399_v4 = vld [vmem:[%s16525_s4 + $0x60] sm:$0xff]  ;;  %v3400_v61 = vld [vmem:[%s16525_s4 + $0x68] sm:$0xff] }
 0x2d1   : > { %v2017_v30 = vadd.f32 %v1935_v59, %v16948_v40  ;;  %v2775_v24 = vmax.f32 %v11252_v41, %v2679_v51  ;;  %v11643_v44 = vadd.f32 %v2261_v49, %v2018_v35  ;;  %v1583_v6 = vadd.f32 %v11023_v14, %v1146_v52  ;;  %3529 = vmatpush.msrb.mxu0 %v3399_v4  ;;  %v16951_v49 = vld [vmem:[#allocation69_spill] sm:$0xff] }
 0x2d2   : > { %3642 = vmatpush.msrb.mxu1 %v3400_v61  ;;  %v585_v36 = vadd.f32 %v16951_v49, %v16906_v28 }
 0x2d3   : > { %v11645_v43 = vadd.f32 %v2371_v34, %v2017_v30  ;;  %2984 = vmatmul.f32.vlgmr.msra.gmra.mxu2 %v2775_v24  ;;  %v11660_v34 = vpop.f32.mrf.mxu2  ;;  %v2020_v35 = vadd.f32 %v11564_v25, %v1583_v6  ;;  %v2561_v25 = vpop.permute.xlu2 %2560 }
 0x2d4   : > { %v2374_v41 = vpop.f32.mrf.mxu1 }
 0x2d5   : > { %8712 = vmatmul.msk.f32.vlgmr.msrb.gmra.mxu3 %vm2868_vm6, %v2776_v9  ;;  %2614 = vrot.lane.b32.xlu2 %v11643_v44, %s9603_s12  ;;  %v16952_v9 = vld [vmem:[#allocation73_spill] sm:$0xff] }
 0x2d6   : > { %2612 = vrot.lane.b32.xlu1 %v11645_v43, %s9603_s12  ;;  %v1148_v26 = vadd.f32 %v16952_v9, %v585_v36 }
 0x2d7   : > { %v2557_v23 = vpop.permute.xlu1 %2556 }
 0x2d8   : > { %v2680_v21 = vsel %vm2678_vm5, %v2555_v32, %v2557_v23  ;;  %v1938_v59 = vpop.f32.mrf.mxu3  ;;  %v2264_v40 = vpop.f32.mrf.mxu0  ;;  %v2778_v14 = vmax.f32 %v11293_v56, %v2557_v23  ;;  %v2681_v56 = vsel %vm2678_vm5, %v2559_v20, %v2561_v25  ;;  %v16954_v23 = vld [vmem:[#allocation72_spill] sm:$0xff] }
 0x2d9   : > { %v2019_v51 = vadd.f32 %v1938_v59, %v11026_v63  ;;  %v2777_v30 = vmax.f32 %v11272_v10, %v2680_v21  ;;  %v11669_v48 = vadd.f32 %v2264_v40, %v2020_v35  ;;  %v1585_v10 = vadd.f32 %v11038_v57, %v1148_v26  ;;  %v16955_v20 = vld [vmem:[#allocation76_spill] sm:$0xff] }
 0x2da   : > { %v588_v35 = vadd.f32 %v16954_v23, %v16906_v28  ;;  %v2780_v21 = vmax.f32 %v11320_v17, %v2561_v25 }
 0x2db   : > { %v11671_v24 = vadd.f32 %v2374_v41, %v2019_v51  ;;  %2987 = vmatmul.f32.gmra.mxu2 %v2777_v30  ;;  %v2022_v32 = vadd.f32 %v11591_v37, %v1585_v10  ;;  %v11682_v52 = vpop.f32.mrf.mxu2  ;;  %v16953_v41 = vld [vmem:[#allocation10_spill] sm:$0xff]  ;;  %v2779_v51 = vmax.f32 %v11296_v15, %v2681_v56  ;;  %v3397_v37 = vld [vmem:[%s16525_s4 + $0x50] sm:$0xff]  ;;  %v3398_v10 = vld [vmem:[%s16525_s4 + $0x58] sm:$0xff] }
 0x2dc   : > { %v2377_v63 = vpop.f32.mrf.mxu1  ;;  %v1150_v40 = vadd.f32 %v16955_v20, %v588_v35  ;;  %3530 = vmatpush.msrb.mxu0 %v3397_v37  ;;  %v16956_v56 = vld [vmem:[#allocation75_spill] sm:$0xff]  ;;  %3643 = vmatpush.msrb.mxu1 %v3398_v10 }
 0x2dd   : > { %8713 = vmatmul.msk.f32.gmra.mxu3 %vm2868_vm6, %v2778_v14  ;;  %2616 = vrot.lane.b32.xlu0 %v11671_v24, %s9603_s12  ;;  %v2563_v30 = vpop.permute.xlu0 %2562 }
 0x2de   : > { %2618 = vrot.lane.b32.xlu1 %v11669_v48, %s9603_s12  ;;  %v1587_v15 = vadd.f32 %v11053_v31, %v1150_v40  ;;  %v591_v31 = vadd.f32 %v16956_v56, %v16906_v28 }
 0x2e0   : > { %v1941_v4 = vpop.f32.mrf.mxu3  ;;  %v2267_v6 = vpop.f32.mrf.mxu0  ;;  %v2024_v36 = vadd.f32 %v11625_v50, %v1587_v15 }
 0x2e1   : > { %v2021_v61 = vadd.f32 %v1941_v4, %v16953_v41  ;;  %v11688_v59 = vadd.f32 %v2267_v6, %v2022_v32 }
 0x2e3   : > { %v11691_v57 = vadd.f32 %v2377_v63, %v2021_v61  ;;  %2990 = vmatmul.f32.gmra.mxu2 %v2779_v51  ;;  %v1843_v32 = vpop.f32.mrf.mxu2  ;;  %v16957_v61 = vld [vmem:[#allocation79_spill] sm:$0xff] }
 0x2e4   : > { %v2380_v17 = vpop.f32.mrf.mxu1 }
 0x2e5   : > { %8714 = vmatmul.msk.f32.gmra.mxu3 %vm2868_vm6, %v2780_v21  ;;  %2620 = vrot.lane.b32.xlu2 %v11691_v57, %s9603_s12 }
 0x2e6   : > { %2622 = vrot.lane.b32.xlu0 %v11688_v59, %s9603_s12 }
 0x2e8   : > { %v2565_v49 = vpop.permute.xlu1 %2564  ;;  %v1944_v9 = vpop.f32.mrf.mxu3 }
 0x2e9   : > { %v2682_v14 = vsel %vm2678_vm5, %v2563_v30, %v2565_v49  ;;  %v2023_v26 = vadd.f32 %v1944_v9, %v11056_v60  ;;  %v2270_v25 = vpop.f32.mrf.mxu0  ;;  %v2782_v4 = vmax.f32 %v11344_v47, %v2565_v49  ;;  %v1152_v60 = vadd.f32 %v16957_v61, %v591_v31  ;;  %v2567_v47 = vpop.permute.xlu2 %2566  ;;  %v16960_v61 = vld [vmem:[#allocation81_spill] sm:$0xff] }
 0x2ea   : > { %v2781_v63 = vmax.f32 %v11318_v53, %v2682_v14  ;;  %v11713_v41 = vadd.f32 %v2270_v25, %v2024_v36  ;;  %v16959_v36 = vld [vmem:[#allocation82_spill] sm:$0xff] }
 0x2eb   : > { %v11715_v50 = vadd.f32 %v2380_v17, %v2023_v26  ;;  %v1589_v6 = vadd.f32 %v11068_v33, %v1152_v60  ;;  %v16958_v17 = vld [vmem:[#allocation78_spill] sm:$0xff]  ;;  %v597_v60 = vadd.f32 %v16960_v61, %v16906_v28 }
 0x2ec   : > { %2993 = vmatmul.f32.gmra.mxu2 %v2781_v63  ;;  %v2383_v53 = vpop.f32.mrf.mxu1  ;;  %v594_v15 = vadd.f32 %v16958_v17, %v16906_v28  ;;  %v16963_v17 = vld [vmem:[#allocation21_spill] sm:$0xff] }
 0x2ed   : > { %8715 = vmatmul.msk.f32.gmra.mxu3 %vm2868_vm6, %v2782_v4  ;;  %2626 = vrot.lane.b32.xlu2 %v11713_v41, %s9603_s12  ;;  %v2026_v35 = vadd.f32 %v11660_v34, %v1589_v6  ;;  %v1846_v34 = vpop.f32.mrf.mxu2  ;;  %v3396_v4 = vld [vmem:[%s16525_s4 + $0x48] sm:$0xff] }
 0x2ee   : > { %2624 = vrot.lane.b32.xlu1 %v11715_v50, %s9603_s12  ;;  %v1154_v14 = vadd.f32 %v16959_v36, %v594_v15  ;;  %3644 = vmatpush.msrb.mxu1 %v3396_v4 }
 0x2ef   : > { %v2569_v23 = vpop.permute.xlu0 %2568 }
 0x2f0   : > { %v2683_v21 = vsel %vm2678_vm5, %v2567_v47, %v2569_v23  ;;  %v1947_v51 = vpop.f32.mrf.mxu3  ;;  %v2784_v30 = vmax.f32 %v11363_v46, %v2569_v23  ;;  %v2571_v9 = vpop.permute.xlu1 %2570  ;;  %v1591_v46 = vadd.f32 %v11083_v39, %v1154_v14  ;;  %v16964_v14 = vld [vmem:[#allocation84_spill] sm:$0xff] }
 0x2f1   : > { %v2025_v20 = vadd.f32 %v1947_v51, %v11071_v3  ;;  %v2273_v40 = vpop.f32.mrf.mxu0  ;;  %v2783_v37 = vmax.f32 %v11342_v2, %v2683_v21  ;;  %v3395_v3 = vld [vmem:[%s16525_s4 + $0x40] sm:$0xff]  ;;  %v2573_v26 = vpop.permute.xlu2 %2572 }
 0x2f2   : > { %v11731_v49 = vadd.f32 %v2273_v40, %v2026_v35  ;;  %3531 = vmatpush.msrb.mxu0 %v3395_v3  ;;  %v2684_v25 = vsel %vm2678_vm5, %v2571_v9, %v2573_v26  ;;  %v2028_v63 = vadd.f32 %v11682_v52, %v1591_v46  ;;  %v16961_v52 = vld [vmem:[#allocation85_spill] sm:$0xff]  ;;  %v600_v9 = vadd.f32 %v16964_v14, %v16906_v28 }
 0x2f3   : > { %v11733_v33 = vadd.f32 %v2383_v53, %v2025_v20  ;;  %v2786_v53 = vmax.f32 %v11387_v27, %v2573_v26  ;;  %v2785_v39 = vmax.f32 %v11361_v55, %v2684_v25  ;;  %v1156_v23 = vadd.f32 %v16961_v52, %v597_v60  ;;  %v16962_v27 = vld [vmem:[#allocation16_spill] sm:$0xff]  ;;  %v16965_v26 = vld [vmem:[#allocation87_spill] sm:$0xff] }
 0x2f4   : > { %2996 = vmatmul.f32.gmra.mxu2 %v2783_v37  ;;  %v2386_v2 = vpop.f32.mrf.mxu1  ;;  %v1158_v25 = vadd.f32 %v16965_v26, %v600_v9 }
 0x2f5   : > { %8716 = vmatmul.msk.f32.gmra.mxu3 %vm2868_vm6, %v2784_v30  ;;  %2628 = vrot.lane.b32.xlu0 %v11733_v33, %s9603_s12  ;;  %v1593_v35 = vadd.f32 %v16962_v27, %v1156_v23  ;;  %v1849_v55 = vpop.f32.mrf.mxu2 }
 0x2f6   : > { %2630 = vrot.lane.b32.xlu1 %v11731_v49, %s9603_s12  ;;  %v1595_v28 = vadd.f32 %v11113_v19, %v1158_v25  ;;  %v3394_v19 = vld [vmem:[%s16525_s4 + $0x38] sm:$0xff] }
 0x2f7   : > { %v2030_v20 = vadd.f32 %v1843_v32, %v1593_v35  ;;  %3645 = vmatpush.msrb.mxu1 %v3394_v19 }
 0x2f8   : > { %v1950_v10 = vpop.f32.mrf.mxu3  ;;  %v2575_v21 = vpop.permute.xlu0 %2574 }
 0x2f9   : > { %v2027_v56 = vadd.f32 %v1950_v10, %v11086_v13  ;;  %v2276_v31 = vpop.f32.mrf.mxu0  ;;  %v2579_v32 = vpop.permute.xlu2 %2578  ;;  %v2032_v10 = vadd.f32 %v1846_v34, %v1595_v28  ;;  %v16970_v28 = vld [vmem:[#allocation31_spill] sm:$0xff] }
 0x2fa   : > { %v11755_v6 = vadd.f32 %v2276_v31, %v2028_v63 }
 0x2fb   : > { %v11757_v47 = vadd.f32 %v2386_v2, %v2027_v56 }
 0x2fc   : > { %2999 = vmatmul.f32.gmra.mxu2 %v2785_v39  ;;  %v2389_v13 = vpop.f32.mrf.mxu1 }
 0x2fd   : > { %8717 = vmatmul.msk.f32.gmra.mxu3 %vm2868_vm6, %v2786_v53  ;;  %2632 = vrot.lane.b32.xlu2 %v11757_v47, %s9603_s12  ;;  %v1852_v4 = vpop.f32.mrf.mxu2 }
 0x2fe   : > { %2634 = vrot.lane.b32.xlu0 %v11755_v6, %s9603_s12 }
 0x300   : > { %v2577_v51 = vpop.permute.xlu1 %2576  ;;  %v1953_v37 = vpop.f32.mrf.mxu3 }
 0x301   : > { %v2685_v40 = vsel %vm2678_vm5, %v2575_v21, %v2577_v51  ;;  %v2029_v15 = vadd.f32 %v1953_v37, %v16963_v17  ;;  %v2279_v30 = vpop.f32.mrf.mxu0  ;;  %v2788_v3 = vmax.f32 %v11413_v58, %v2577_v51  ;;  %v3393_v58 = vld [vmem:[%s16525_s4 + $0x30] sm:$0xff]  ;;  %v2585_v27 = vpop.permute.xlu2 %2584 }
 0x302   : > { %v2787_v36 = vmax.f32 %v11385_v8, %v2685_v40  ;;  %v11772_v2 = vadd.f32 %v2279_v30, %v2030_v20  ;;  %3532 = vmatpush.msrb.mxu0 %v3393_v58  ;;  %v16968_v20 = vld [vmem:[#allocation2_spill] sm:$0xff]  ;;  %v2792_v17 = vmax.f32 %v11469_v12, %v2585_v27 }
 0x303   : > { %v11774_v46 = vadd.f32 %v2389_v13, %v2029_v15  ;;  %v3391_v12 = vld [vmem:[%s16525_s4 + $0x20] sm:$0xff] }
 0x304   : > { %3002 = vmatmul.f32.gmra.mxu2 %v2787_v36  ;;  %v2392_v8 = vpop.f32.mrf.mxu1  ;;  %3533 = vmatpush.msrb.mxu0 %v3391_v12  ;;  %v16977_v12 = vld [vmem:[#allocation60_spill] sm:$0xff] }
 0x305   : > { %8718 = vmatmul.msk.f32.gmra.mxu3 %vm2868_vm6, %v2788_v3  ;;  %2638 = vrot.lane.b32.xlu2 %v11772_v2, %s9603_s12  ;;  %v1855_v36 = vpop.f32.mrf.mxu2 }
 0x306   : > { %2636 = vrot.lane.b32.xlu1 %v11774_v46, %s9603_s12 }
 0x307   : > { %v2581_v63 = vpop.permute.xlu0 %2580 }
 0x308   : > { %v2686_v56 = vsel %vm2678_vm5, %v2579_v32, %v2581_v63  ;;  %v1956_v31 = vpop.f32.mrf.mxu3  ;;  %v2790_v39 = vmax.f32 %v11441_v29, %v2581_v63  ;;  %v2583_v34 = vpop.permute.xlu1 %2582  ;;  %v16967_v29 = vld [vmem:[#allocation26_spill] sm:$0xff] }
 0x309   : > { %v2031_v61 = vadd.f32 %v1956_v31, %v11116_v45  ;;  %v2282_v60 = vpop.f32.mrf.mxu0  ;;  %v2789_v53 = vmax.f32 %v11411_v54, %v2686_v56  ;;  %v16966_v54 = vld [vmem:[#allocation65_spill] sm:$0xff]  ;;  %v2687_v35 = vsel %vm2678_vm5, %v2583_v34, %v2585_v27  ;;  %v2591_v34 = vpop.permute.xlu2 %2590  ;;  %v16974_v27 = vld [vmem:[#allocation56_spill] sm:$0xff] }
 0x30a   : > { %v11790_v52 = vadd.f32 %v2282_v60, %v2032_v10  ;;  %v1597_v13 = vadd.f32 %v16967_v29, %v16966_v54  ;;  %v2791_v15 = vmax.f32 %v11439_v0, %v2687_v35  ;;  %v16969_v0 = vld [vmem:[#allocation68_spill] sm:$0xff]  ;;  %v16971_v56 = vld [vmem:[#allocation5_spill] sm:$0xff] }
 0x30b   : > { %v11792_v23 = vadd.f32 %v2392_v8, %v2031_v61  ;;  %v1599_v9 = vadd.f32 %v11143_v38, %v16969_v0  ;;  %v3392_v38 = vld [vmem:[%s16525_s4 + $0x28] sm:$0xff] }
 0x30c   : > { %3005 = vmatmul.f32.gmra.mxu2 %v2789_v53  ;;  %v2395_v45 = vpop.f32.mrf.mxu1  ;;  %v2034_v21 = vadd.f32 %v1849_v55, %v1597_v13  ;;  %v16972_v53 = vld [vmem:[#allocation71_spill] sm:$0xff]  ;;  %3646 = vmatpush.msrb.mxu1 %v3392_v38  ;;  %v3390_v38 = vld [vmem:[%s16525_s4 + $0x18] sm:$0xff] }
 0x30d   : > { %8719 = vmatmul.msk.f32.gmra.mxu3 %vm2868_vm6, %v2790_v39  ;;  %2640 = vrot.lane.b32.xlu0 %v11792_v23, %s9603_s12  ;;  %v2036_v25 = vadd.f32 %v1852_v4, %v1599_v9  ;;  %v1858_v4 = vpop.f32.mrf.mxu2  ;;  %v16973_v39 = vld [vmem:[#allocation37_spill] sm:$0xff] }
 0x30e   : > { %2642 = vrot.lane.b32.xlu1 %v11790_v52, %s9603_s12  ;;  %v1601_v19 = vadd.f32 %v16973_v39, %v16972_v53  ;;  %3647 = vmatpush.msrb.mxu1 %v3390_v38  ;;  %v3387_v38 = vld [vmem:[%s16525_s4] sm:$0xff] }
 0x310   : > { %v1959_v51 = vpop.f32.mrf.mxu3  ;;  %v2587_v3 = vpop.permute.xlu0 %2586  ;;  %v2038_v54 = vadd.f32 %v1855_v36, %v1601_v19 }
 0x311   : > { %v2033_v40 = vadd.f32 %v1959_v51, %v16968_v20  ;;  %v2285_v37 = vpop.f32.mrf.mxu0  ;;  %v16975_v51 = vld [vmem:[#allocation7_spill] sm:$0xff]  ;;  %v2597_v9 = vpop.permute.xlu2 %2596 }
 0x312   : > { %v11808_v30 = vadd.f32 %v2285_v37, %v2034_v21 }
 0x313   : > { %v11810_v14 = vadd.f32 %v2395_v45, %v2033_v40 }
 0x314   : > { %3008 = vmatmul.f32.gmra.mxu2 %v2791_v15  ;;  %v2398_v55 = vpop.f32.mrf.mxu1 }
 0x315   : > { %8720 = vmatmul.msk.f32.gmra.mxu3 %vm2868_vm6, %v2792_v17  ;;  %2644 = vrot.lane.b32.xlu2 %v11810_v14, %s9603_s12 }
 0x316   : > { %2646 = vrot.lane.b32.xlu0 %v11808_v30, %s9603_s12 }
 0x318   : > { %v2589_v26 = vpop.permute.xlu1 %2588  ;;  %v1962_v58 = vpop.f32.mrf.mxu3 }
 0x319   : > { %v2688_v8 = vsel %vm2678_vm5, %v2587_v3, %v2589_v26  ;;  %v2035_v32 = vadd.f32 %v1962_v58, %v16970_v28  ;;  %v2288_v63 = vpop.f32.mrf.mxu0  ;;  %v2794_v31 = vmax.f32 %v16971_v56, %v2589_v26 }
 0x31a   : > { %v2793_v10 = vmax.f32 %v11467_v7, %v2688_v8  ;;  %v11826_v61 = vadd.f32 %v2288_v63, %v2036_v25  ;;  %v16978_v8 = vld [vmem:[#allocation38_spill] sm:$0xff]  ;;  %v2798_v63 = vmax.f32 %v11545_v11, %v2597_v9 }
 0x31b   : > { %v11828_v60 = vadd.f32 %v2398_v55, %v2035_v32  ;;  %v16976_v55 = vld [vmem:[#allocation74_spill] sm:$0xff]  ;;  %v3389_v32 = vld [vmem:[%s16525_s4 + $0x10] sm:$0xff] }
 0x31c   : > { %3011 = vmatmul.f32.gmra.mxu2 %v2793_v10  ;;  %v2401_v7 = vpop.f32.mrf.mxu1  ;;  %v1603_v0 = vadd.f32 %v16977_v12, %v16976_v55  ;;  %3534 = vmatpush.msrb.mxu0 %v3389_v32  ;;  %v16984_v55 = vld [vmem:[#allocation47_spill] sm:$0xff] }
 0x31d   : > { %8721 = vmatmul.msk.f32.gmra.mxu3 %vm2868_vm6, %v2794_v31  ;;  %2650 = vrot.lane.b32.xlu2 %v11826_v61, %s9603_s12 }
 0x31e   : > { %2648 = vrot.lane.b32.xlu1 %v11828_v60, %s9603_s12  ;;  %v2040_v26 = vadd.f32 %v1858_v4, %v1603_v0  ;;  %v16980_v4 = vld [vmem:[#allocation41_spill] sm:$0xff]  ;;  %v2603_v0 = vpop.permute.xlu2 %2602  ;;  %3535 = vmatpush.msrb.mxu0 %v3387_v38 }
 0x31f   : > { %v2593_v45 = vpop.permute.xlu0 %2592 }
 0x320   : > { %v2689_v29 = vsel %vm2678_vm5, %v2591_v34, %v2593_v45  ;;  %v1965_v13 = vpop.f32.mrf.mxu3  ;;  %v2796_v40 = vmax.f32 %v11523_v5, %v2593_v45  ;;  %v2595_v15 = vpop.permute.xlu1 %2594 }
 0x321   : > { %v2037_v35 = vadd.f32 %v1965_v13, %v16974_v27  ;;  %v2291_v21 = vpop.f32.mrf.mxu0  ;;  %v2795_v20 = vmax.f32 %v16975_v51, %v2689_v29  ;;  %v1861_v5 = vpop.f32.mrf.mxu2  ;;  %v2690_v3 = vsel %vm2678_vm5, %v2595_v15, %v2597_v9  ;;  %v16981_v29 = vld [vmem:[#allocation44_spill] sm:$0xff] }
 0x322   : > { %v11844_v37 = vadd.f32 %v2291_v21, %v2038_v54  ;;  %v2797_v10 = vmax.f32 %v11521_v1, %v2690_v3  ;;  %v16979_v1 = vld [vmem:[#allocation77_spill] sm:$0xff] }
 0x323   : > { %v11846_v17 = vadd.f32 %v2401_v7, %v2037_v35  ;;  %v1605_v7 = vadd.f32 %v16980_v4, %v16979_v1  ;;  %v16982_v35 = vld [vmem:[#allocation8_spill] sm:$0xff]  ;;  %v3388_v1 = vld [vmem:[%s16525_s4 + $0x8] sm:$0xff]  ;;  %v16987_v4 = vld [vmem:[#allocation53_spill] sm:$0xff] }
 0x324   : > { %3014 = vmatmul.f32.gmra.mxu2 %v2795_v20  ;;  %v2404_v36 = vpop.f32.mrf.mxu1  ;;  %3648 = vmatpush.msrb.mxu1 %v3388_v1 }
 0x325   : > { %8722 = vmatmul.msk.f32.gmra.mxu3 %vm2868_vm6, %v2796_v40  ;;  %2652 = vrot.lane.b32.xlu0 %v11846_v17, %s9603_s12  ;;  %v2042_v19 = vadd.f32 %v1861_v5, %v1605_v7 }
 0x326   : > { %2654 = vrot.lane.b32.xlu1 %v11844_v37, %s9603_s12 }
 0x328   : > { %v1968_v25 = vpop.f32.mrf.mxu3  ;;  %v2599_v53 = vpop.permute.xlu0 %2598 }
 0x329   : > { %v2039_v58 = vadd.f32 %v1968_v25, %v16978_v8  ;;  %v2294_v28 = vpop.f32.mrf.mxu0  ;;  %v1864_v54 = vpop.f32.mrf.mxu2 }
 0x32a   : > { %v11862_v56 = vadd.f32 %v2294_v28, %v2040_v26  ;;  %v16985_v26 = vld [vmem:[#allocation50_spill] sm:$0xff] }
 0x32b   : > { %v11864_v31 = vadd.f32 %v2404_v36, %v2039_v58  ;;  %v16983_v36 = vld [vmem:[#allocation80_spill] sm:$0xff] }
 0x32c   : > { %3017 = vmatmul.f32.gmra.mxu2 %v2797_v10  ;;  %v2407_v11 = vpop.f32.mrf.mxu1  ;;  %v1607_v12 = vadd.f32 %v16984_v55, %v16983_v36  ;;  %v16990_v36 = vld [vmem:[#allocation86_spill] sm:$0xff]  ;;  %v16991_v55 = vld [vmem:[#allocation57_spill] sm:$0xff] }
 0x32d   : > { %8723 = vmatmul.msk.f32.gmra.mxu3 %vm2868_vm6, %v2798_v63  ;;  %2656 = vrot.lane.b32.xlu2 %v11864_v31, %s9603_s12 }
 0x32e   : > { %2658 = vrot.lane.b32.xlu0 %v11862_v56, %s9603_s12 }
 0x330   : > { %v2601_v39 = vpop.permute.xlu1 %2600  ;;  %v1971_v45 = vpop.f32.mrf.mxu3 }
 0x331   : > { %v2691_v34 = vsel %vm2678_vm5, %v2599_v53, %v2601_v39  ;;  %v2041_v13 = vadd.f32 %v1971_v45, %v16981_v29  ;;  %v2297_v27 = vpop.f32.mrf.mxu0  ;;  %v2800_v51 = vmax.f32 %v11573_v42, %v2601_v39  ;;  %v2044_v42 = vadd.f32 %v1864_v54, %v1607_v12  ;;  %v1867_v63 = vpop.f32.mrf.mxu2  ;;  %v16988_v45 = vld [vmem:[#allocation88_spill] sm:$0xff] }
 0x332   : > { %v2799_v21 = vmax.f32 %v16982_v35, %v2691_v34  ;;  %v11880_v20 = vadd.f32 %v2297_v27, %v2042_v19  ;;  %v2609_v53 = vpop.permute.xlu2 %2608  ;;  %v16989_v27 = vld [vmem:[#allocation9_spill] sm:$0xff]  ;;  %v1611_v12 = vadd.f32 %v16991_v55, %v16990_v36 }
 0x333   : > { %v11882_v40 = vadd.f32 %v2407_v11, %v2041_v13  ;;  %v2804_v13 = vmax.f32 %v11622_v18, %v2609_v53 }
 0x334   : > { %3020 = vmatmul.f32.gmra.mxu2 %v2799_v21  ;;  %v2410_v15 = vpop.f32.mrf.mxu1 }
 0x335   : > { %8724 = vmatmul.msk.f32.gmra.mxu3 %vm2868_vm6, %v2800_v51  ;;  %2662 = vrot.lane.b32.xlu2 %v11880_v20, %s9603_s12 }
 0x336   : > { %2660 = vrot.lane.b32.xlu1 %v11882_v40, %s9603_s12 }
 0x337   : > { %v2605_v9 = vpop.permute.xlu0 %2604 }
 0x338   : > { %v2692_v5 = vsel %vm2678_vm5, %v2603_v0, %v2605_v9  ;;  %v1974_v3 = vpop.f32.mrf.mxu3  ;;  %v2802_v28 = vmax.f32 %v11595_v22, %v2605_v9  ;;  %v2607_v11 = vpop.permute.xlu1 %2606  ;;  %v16986_v22 = vld [vmem:[#allocation83_spill] sm:$0xff] }
 0x339   : > { %v2043_v25 = vadd.f32 %v1974_v3, %v16985_v26  ;;  %v2300_v8 = vpop.f32.mrf.mxu0  ;;  %v2801_v58 = vmax.f32 %v11571_v62, %v2692_v5  ;;  %v1609_v7 = vadd.f32 %v16987_v4, %v16986_v22  ;;  %v2693_v39 = vsel %vm2678_vm5, %v2607_v11, %v2609_v53  ;;  %v8836_v26 = vld [vmem:[%s16525_s4 + $0x1d0] sm:$0xff]  ;;  %v8931_v53 = vld [vmem:[%s16525_s4 + $0x2c8] sm:$0xff] }
 0x33a   : > { %v11895_v32 = vadd.f32 %v2300_v8, %v2044_v42  ;;  %v2803_v35 = vmax.f32 %v16989_v27, %v2693_v39  ;;  %v16992_v8 = vld [vmem:[#allocation89_spill] sm:$0xff]  ;;  %3909 = vmatpush.msrb.mxu2 %v8836_v26  ;;  %4474 = vmatpush.msra.mxu1 %v8931_v53 }
 0x33b   : > { %v11897_v10 = vadd.f32 %v2410_v15, %v2043_v25  ;;  %v2046_v19 = vadd.f32 %v1867_v63, %v1609_v7  ;;  %v1870_v15 = vpop.f32.mrf.mxu2  ;;  %v8837_v25 = vld [vmem:[%s16525_s4 + $0x1d8] sm:$0xff] }
 0x33c   : > { %3023 = vmatmul.f32.gmra.mxu2 %v2801_v58  ;;  %v2413_v62 = vpop.f32.mrf.mxu1  ;;  %v2048_v42 = vadd.f32 %v1870_v15, %v1611_v12  ;;  %4022 = vmatpush.msra.mxu3 %v8837_v25  ;;  %v16993_v39 = vld [vmem:[#allocation61_spill] sm:$0xff] }
 0x33d   : > { %8725 = vmatmul.msk.f32.gmra.mxu3 %vm2868_vm6, %v2802_v28  ;;  %2664 = vrot.lane.b32.xlu0 %v11897_v10, %s9603_s12 }
 0x33e   : > { %2666 = vrot.lane.b32.xlu1 %v11895_v32, %s9603_s12 }
 0x340   : > { %v1977_v34 = vpop.f32.mrf.mxu3  ;;  %v2611_v0 = vpop.permute.xlu0 %2610 }
 0x341   : > { %v2045_v54 = vadd.f32 %v1977_v34, %v16988_v45  ;;  %v2303_v29 = vpop.f32.mrf.mxu0 }
 0x342   : > { %v11916_v21 = vadd.f32 %v2303_v29, %v2046_v19 }
 0x343   : > { %v11918_v51 = vadd.f32 %v2413_v62, %v2045_v54  ;;  %v2615_v62 = vpop.permute.xlu2 %2614 }
 0x344   : > { %3026 = vmatmul.f32.gmra.mxu2 %v2803_v35  ;;  %v2416_v18 = vpop.f32.mrf.mxu1 }
 0x345   : > { %8726 = vmatmul.msk.f32.gmra.mxu3 %vm2868_vm6, %v2804_v13  ;;  %2668 = vrot.lane.b32.xlu2 %v11918_v51, %s9603_s12 }
 0x346   : > { %2670 = vrot.lane.b32.xlu0 %v11916_v21, %s9603_s12 }
 0x348   : > { %v2613_v9 = vpop.permute.xlu1 %2612  ;;  %v1980_v3 = vpop.f32.mrf.mxu3 }
 0x349   : > { %v2694_v5 = vsel %vm2678_vm5, %v2611_v0, %v2613_v9  ;;  %v2047_v58 = vadd.f32 %v1980_v3, %v16992_v8  ;;  %v2306_v28 = vpop.f32.mrf.mxu0  ;;  %v2806_v38 = vmax.f32 %v11645_v43, %v2613_v9  ;;  %v8930_v43 = vld [vmem:[%s16525_s4 + $0x2c0] sm:$0xff] }
 0x34a   : > { %v2805_v63 = vmax.f32 %v11620_v16, %v2694_v5  ;;  %v11937_v11 = vadd.f32 %v2306_v28, %v2048_v42  ;;  %4361 = vmatpush.msra.mxu0 %v8930_v43  ;;  %v8835_v42 = vld [vmem:[%s16525_s4 + $0x1c8] sm:$0xff]  ;;  %v8928_v5 = vld [vmem:[%s16525_s4 + $0x2b0] sm:$0xff] }
 0x34b   : > { %v11939_v1 = vadd.f32 %v2416_v18, %v2047_v58  ;;  %v2621_v13 = vpop.permute.xlu2 %2620  ;;  %4023 = vmatpush.msra.mxu3 %v8835_v42 }
 0x34c   : > { %3029 = vmatmul.f32.gmra.mxu2 %v2805_v63  ;;  %v2419_v7 = vpop.f32.mrf.mxu1  ;;  %4362 = vmatpush.msra.mxu0 %v8928_v5 }
 0x34d   : > { %8727 = vmatmul.msk.f32.gmra.mxu3 %vm2868_vm6, %v2806_v38  ;;  %2674 = vrot.lane.b32.xlu2 %v11937_v11, %s9603_s12 }
 0x34e   : > { %2672 = vrot.lane.b32.xlu1 %v11939_v1, %s9603_s12 }
 0x34f   : > { %v2617_v22 = vpop.permute.xlu0 %2616 }
 0x350   : > { %v2695_v16 = vsel %vm2678_vm5, %v2615_v62, %v2617_v22  ;;  %v1983_v4 = vpop.f32.mrf.mxu3  ;;  %v2808_v45 = vmax.f32 %v11671_v24, %v2617_v22  ;;  %v2619_v29 = vpop.permute.xlu1 %2618  ;;  %v2810_v24 = vmax.f32 %v11691_v57, %v2621_v13 }
 0x351   : > { %v2049_v19 = vadd.f32 %v1983_v4, %v16993_v39  ;;  %v2807_v34 = vmax.f32 %v11643_v44, %v2695_v16  ;;  %v2696_v27 = vsel %vm2678_vm5, %v2619_v29, %v2621_v13  ;;  %v8834_v44 = vld [vmem:[%s16525_s4 + $0x1c0] sm:$0xff]  ;;  %v8929_v16 = vld [vmem:[%s16525_s4 + $0x2b8] sm:$0xff]  ;;  %v8832_v4 = vld [vmem:[%s16525_s4 + $0x1b0] sm:$0xff] }
 0x352   : > { %3910 = vmatpush.msrb.mxu2 %v8834_v44  ;;  %v2809_v36 = vmax.f32 %v11669_v48, %v2696_v27  ;;  %4475 = vmatpush.msra.mxu1 %v8929_v16 }
 0x353   : > { %v11956_v54 = vadd.f32 %v2419_v7, %v2049_v19  ;;  %v2627_v28 = vpop.permute.xlu2 %2626 }
 0x354   : > { %3032 = vmatmul.f32.gmra.mxu2 %v2807_v34 }
 0x355   : > { %8728 = vmatmul.msk.f32.gmra.mxu3 %vm2868_vm6, %v2808_v45  ;;  %2676 = vrot.lane.b32.xlu0 %v11956_v54, %s9603_s12 }
 0x356   : > { %v2985_v35 = vpop.f32.mrf.mxu2  ;;  %3911 = vmatpush.msrb.mxu2 %v8832_v4  ;;  %v8831_v4 = vld [vmem:[%s16525_s4 + $0x1a8] sm:$0xff] }
 0x358   : > { %v3098_v15 = vpop.f32.mrf.mxu3  ;;  %v2623_v55 = vpop.permute.xlu0 %2622 }
 0x359   : > { %v11968_v12 = vadd.f32 %v3098_v15, %v2985_v35  ;;  %v8833_v35 = vld [vmem:[%s16525_s4 + $0x1b8] sm:$0xff]  ;;  %v8926_v15 = vld [vmem:[%s16525_s4 + $0x2a0] sm:$0xff] }
 0x35a   : > { %4024 = vmatpush.msra.mxu3 %v8833_v35  ;;  %4363 = vmatpush.msra.mxu0 %v8926_v15  ;;  %v8925_v35 = vld [vmem:[%s16525_s4 + $0x298] sm:$0xff]  ;;  %v8828_v15 = vld [vmem:[%s16525_s4 + $0x190] sm:$0xff] }
 0x35b   : > { %v16574_v25 = vrot.slane %v11968_v12, 1  ;;  %v2633_v45 = vpop.permute.xlu2 %2632 }
 0x35c   : > { %3035 = vmatmul.f32.gmra.mxu2 %v2809_v36  ;;  %4025 = vmatpush.msra.mxu3 %v8831_v4 }
 0x35d   : > { %8729 = vmatmul.msk.f32.gmra.mxu3 %vm2868_vm6, %v2810_v24  ;;  %v2816_v24 = vmax.f32 %v11757_v47, %v2633_v45 }
 0x35e   : > { %v2988_v18 = vpop.f32.mrf.mxu2 }
 0x360   : > { %v2625_v0 = vpop.permute.xlu1 %2624  ;;  %v3101_v9 = vpop.f32.mrf.mxu3 }
 0x361   : > { %v2697_v57 = vsel %vm2678_vm5, %v2623_v55, %v2625_v0  ;;  %v3102_v48 = vadd.f32 %v3101_v9, %v2988_v18  ;;  %v2812_v3 = vmax.f32 %v11715_v50, %v2625_v0 }
 0x362   : > { %v2811_v26 = vmax.f32 %v11688_v59, %v2697_v57 }
 0x363   : > { %v3227_v8 = vrot.slane %v3102_v48, 1 }
 0x364   : > { %3038 = vmatmul.f32.gmra.mxu2 %v2811_v26 }
 0x365   : > { %8730 = vmatmul.msk.f32.gmra.mxu3 %vm2868_vm6, %v2812_v3  ;;  %v3228_v58 = vsel %vm739_vm2, %v16574_v25, %v3227_v8 }
 0x366   : > { %v3323_v63 = vmax.f32 %v11968_v12, %v3228_v58  ;;  %v2991_v38 = vpop.f32.mrf.mxu2 }
 0x367   : > { %v2629_v62 = vpop.permute.xlu0 %2628 }
 0x368   : > { %v11985_v22 = vmax.f32 %v3323_v63, 0.0  ;;  %v2698_v59 = vsel %vm2678_vm5, %v2627_v28, %v2629_v62  ;;  %v3104_v50 = vpop.f32.mrf.mxu3  ;;  %v2814_v53 = vmax.f32 %v11733_v33, %v2629_v62  ;;  %v2631_v19 = vpop.permute.xlu1 %2630 }
 0x369   : > { %v3105_v7 = vadd.f32 %v3104_v50, %v2991_v38  ;;  %v2813_v43 = vmax.f32 %v11713_v41, %v2698_v59  ;;  %v2699_v41 = vsel %vm2678_vm5, %v2631_v19, %v2633_v45  ;;  %v2639_v38 = vpop.permute.xlu2 %2638 }
 0x36a   : > { %8744 = vmatmul.msk.f32.vlgmr.msrb.gmra.mxu0 %vm3423_vm7, %v11985_v22  ;;  %8776 = vmatmul.msk.f32.vlgmr.msrb.gmra.mxu1 %vm3423_vm7, %v11985_v22  ;;  %v2815_v36 = vmax.f32 %v11731_v49, %v2699_v41  ;;  %v8927_v49 = vld [vmem:[%s16525_s4 + $0x2a8] sm:$0xff] }
 0x36b   : > { %v3229_v39 = vrot.slane %v3105_v7, 1  ;;  %4476 = vmatpush.msra.mxu1 %v8927_v49  ;;  %v8922_v49 = vld [vmem:[%s16525_s4 + $0x280] sm:$0xff] }
 0x36c   : > { %3041 = vmatmul.f32.gmra.mxu2 %v2813_v43 }
 0x36d   : > { %8731 = vmatmul.msk.f32.gmra.mxu3 %vm2868_vm6, %v2814_v53  ;;  %v3230_v34 = vsel %vm739_vm2, %v3227_v8, %v3229_v39  ;;  %4477 = vmatpush.msra.mxu1 %v8925_v35 }
 0x36e   : > { %v3324_v29 = vmax.f32 %v3102_v48, %v3230_v34  ;;  %v8830_v48 = vld [vmem:[%s16525_s4 + $0x1a0] sm:$0xff] }
 0x36f   : > { %v2994_v13 = vpop.f32.mrf.mxu2  ;;  %3912 = vmatpush.msrb.mxu2 %v8830_v48 }
 0x370   : > { %v12003_v27 = vmax.f32 %v3324_v29, 0.0  ;;  %v3107_v33 = vpop.f32.mrf.mxu3  ;;  %v2635_v9 = vpop.permute.xlu0 %2634 }
 0x371   : > { %v3108_v44 = vadd.f32 %v3107_v33, %v2994_v13  ;;  %v2645_v29 = vpop.permute.xlu2 %2644  ;;  %3913 = vmatpush.msrb.mxu2 %v8828_v15  ;;  %v8824_v15 = vld [vmem:[%s16525_s4 + $0x170] sm:$0xff] }
 0x372   : > { %8745 = vmatmul.msk.f32.gmra.mxu0 %vm3423_vm7, %v12003_v27  ;;  %8777 = vmatmul.msk.f32.gmra.mxu1 %vm3423_vm7, %v12003_v27 }
 0x373   : > { %v3231_v55 = vrot.slane %v3108_v44, 1 }
 0x374   : > { %3044 = vmatmul.f32.gmra.mxu2 %v2815_v36 }
 0x375   : > { %8732 = vmatmul.msk.f32.gmra.mxu3 %vm2868_vm6, %v2816_v24  ;;  %v3232_v18 = vsel %vm739_vm2, %v3229_v39, %v3231_v55  ;;  %v2822_v24 = vmax.f32 %v11810_v14, %v2645_v29 }
 0x376   : > { %v3325_v0 = vmax.f32 %v3105_v7, %v3232_v18  ;;  %v8924_v7 = vld [vmem:[%s16525_s4 + $0x290] sm:$0xff] }
 0x377   : > { %v2997_v42 = vpop.f32.mrf.mxu2  ;;  %4364 = vmatpush.msra.mxu0 %v8924_v7 }
 0x378   : > { %v12019_v5 = vmax.f32 %v3325_v0, 0.0  ;;  %v2637_v47 = vpop.permute.xlu1 %2636  ;;  %v3110_v57 = vpop.f32.mrf.mxu3 }
 0x379   : > { %v2700_v3 = vsel %vm2678_vm5, %v2635_v9, %v2637_v47  ;;  %v3111_v26 = vadd.f32 %v3110_v57, %v2997_v42  ;;  %v2818_v58 = vmax.f32 %v11774_v46, %v2637_v47  ;;  %4365 = vmatpush.msra.mxu0 %v8922_v49  ;;  %v8921_v49 = vld [vmem:[%s16525_s4 + $0x278] sm:$0xff] }
 0x37a   : > { %v2817_v8 = vmax.f32 %v11755_v6, %v2700_v3  ;;  %8746 = vmatmul.msk.f32.gmra.mxu0 %vm3423_vm7, %v12019_v5  ;;  %8778 = vmatmul.msk.f32.gmra.mxu1 %vm3423_vm7, %v12019_v5 }
 0x37b   : > { %v3233_v28 = vrot.slane %v3111_v26, 1 }
 0x37c   : > { %3047 = vmatmul.f32.gmra.mxu2 %v2817_v8 }
 0x37d   : > { %8733 = vmatmul.msk.f32.gmra.mxu3 %vm2868_vm6, %v2818_v58  ;;  %v3234_v63 = vsel %vm739_vm2, %v3231_v55, %v3233_v28 }
 0x37e   : > { %v3326_v62 = vmax.f32 %v3108_v44, %v3234_v63  ;;  %v2651_v63 = vpop.permute.xlu2 %2650 }
 0x37f   : > { %v3000_v59 = vpop.f32.mrf.mxu2  ;;  %v2641_v50 = vpop.permute.xlu0 %2640 }
 0x380   : > { %v12036_v16 = vmax.f32 %v3326_v62, 0.0  ;;  %v2701_v6 = vsel %vm2678_vm5, %v2639_v38, %v2641_v50  ;;  %v3113_v46 = vpop.f32.mrf.mxu3  ;;  %v2820_v39 = vmax.f32 %v11792_v23, %v2641_v50  ;;  %v2643_v34 = vpop.permute.xlu1 %2642 }
 0x381   : > { %v2819_v43 = vmax.f32 %v11772_v2, %v2701_v6  ;;  %v3114_v53 = vadd.f32 %v3113_v46, %v3000_v59  ;;  %v2702_v41 = vsel %vm2678_vm5, %v2643_v34, %v2645_v29  ;;  %v8923_v6 = vld [vmem:[%s16525_s4 + $0x288] sm:$0xff] }
 0x382   : > { %16994 = vst [vmem:[#allocation11_spill] sm:$0xff] %v12036_v16  ;;  %8747 = vmatmul.msk.f32.gmra.mxu0 %vm3423_vm7, %v12036_v16  ;;  %8779 = vmatmul.msk.f32.gmra.mxu1 %vm3423_vm7, %v12036_v16  ;;  %v2821_v36 = vmax.f32 %v11790_v52, %v2702_v41  ;;  %v8829_v52 = vld [vmem:[%s16525_s4 + $0x198] sm:$0xff]  ;;  %v8827_v41 = vld [vmem:[%s16525_s4 + $0x188] sm:$0xff] }
 0x383   : > { %v3235_v19 = vrot.slane %v3114_v53, 1  ;;  %4026 = vmatpush.msra.mxu3 %v8829_v52  ;;  %4478 = vmatpush.msra.mxu1 %v8923_v6  ;;  %v8920_v52 = vld [vmem:[%s16525_s4 + $0x270] sm:$0xff] }
 0x384   : > { %3050 = vmatmul.f32.gmra.mxu2 %v2819_v43  ;;  %4366 = vmatpush.msra.mxu0 %v8920_v52  ;;  %v8812_v6 = vld [vmem:[%s16525_s4 + $0x110] sm:$0xff] }
 0x385   : > { %8734 = vmatmul.msk.f32.gmra.mxu3 %vm2868_vm6, %v2820_v39  ;;  %v3236_v45 = vsel %vm739_vm2, %v3233_v28, %v3235_v19  ;;  %4479 = vmatpush.msra.mxu1 %v8921_v49 }
 0x386   : > { %v3327_v2 = vmax.f32 %v3111_v26, %v3236_v45  ;;  %4027 = vmatpush.msra.mxu3 %v8827_v41  ;;  %v8811_v41 = vld [vmem:[%s16525_s4 + $0x108] sm:$0xff] }
 0x387   : > { %v3003_v13 = vpop.f32.mrf.mxu2 }
 0x388   : > { %v12054_v33 = vmax.f32 %v3327_v2, 0.0  ;;  %v3116_v23 = vpop.f32.mrf.mxu3  ;;  %v2647_v9 = vpop.permute.xlu0 %2646  ;;  %v8826_v2 = vld [vmem:[%s16525_s4 + $0x180] sm:$0xff] }
 0x389   : > { %v3117_v44 = vadd.f32 %v3116_v23, %v3003_v13  ;;  %3914 = vmatpush.msrb.mxu2 %v8826_v2  ;;  %v8808_v2 = vld [vmem:[%s16525_s4 + $0xf0] sm:$0xff] }
 0x38a   : > { %16995 = vst [vmem:[#allocation12_spill] sm:$0xff] %v12054_v33  ;;  %8748 = vmatmul.msk.f32.gmra.mxu0 %vm3423_vm7, %v12054_v33  ;;  %8780 = vmatmul.msk.f32.gmra.mxu1 %vm3423_vm7, %v12054_v33 }
 0x38b   : > { %v3237_v55 = vrot.slane %v3117_v44, 1  ;;  %3915 = vmatpush.msrb.mxu2 %v8824_v15 }
 0x38c   : > { %3053 = vmatmul.f32.gmra.mxu2 %v2821_v36 }
 0x38d   : > { %8735 = vmatmul.msk.f32.gmra.mxu3 %vm2868_vm6, %v2822_v24  ;;  %v3238_v18 = vsel %vm739_vm2, %v3235_v19, %v3237_v55  ;;  %v2657_v19 = vpop.permute.xlu2 %2656 }
 0x38e   : > { %v3328_v0 = vmax.f32 %v3114_v53, %v3238_v18  ;;  %v2828_v23 = vmax.f32 %v11864_v31, %v2657_v19  ;;  %v8822_v31 = vld [vmem:[%s16525_s4 + $0x160] sm:$0xff]  ;;  %v8823_v18 = vld [vmem:[%s16525_s4 + $0x168] sm:$0xff] }
 0x38f   : > { %v3006_v42 = vpop.f32.mrf.mxu2  ;;  %3916 = vmatpush.msrb.mxu2 %v8822_v31 }
 0x390   : > { %v12070_v47 = vmax.f32 %v3328_v0, 0.0  ;;  %v2649_v14 = vpop.permute.xlu1 %2648  ;;  %v3119_v57 = vpop.f32.mrf.mxu3 }
 0x391   : > { %v2703_v48 = vsel %vm2678_vm5, %v2647_v9, %v2649_v14  ;;  %v3120_v3 = vadd.f32 %v3119_v57, %v3006_v42  ;;  %v2824_v8 = vmax.f32 %v11828_v60, %v2649_v14 }
 0x392   : > { %16996 = vst [vmem:[#allocation14_spill] sm:$0xff] %v12070_v47  ;;  %v2823_v26 = vmax.f32 %v11808_v30, %v2703_v48  ;;  %8749 = vmatmul.msk.f32.gmra.mxu0 %vm3423_vm7, %v12070_v47  ;;  %8781 = vmatmul.msk.f32.gmra.mxu1 %vm3423_vm7, %v12070_v47  ;;  %v8818_v48 = vld [vmem:[%s16525_s4 + $0x140] sm:$0xff] }
 0x393   : > { %v3239_v58 = vrot.slane %v3120_v3, 1 }
 0x394   : > { %3056 = vmatmul.f32.gmra.mxu2 %v2823_v26 }
 0x395   : > { %8736 = vmatmul.msk.f32.gmra.mxu3 %vm2868_vm6, %v2824_v8  ;;  %v3240_v28 = vsel %vm739_vm2, %v3237_v55, %v3239_v58  ;;  %v8820_v55 = vld [vmem:[%s16525_s4 + $0x150] sm:$0xff]  ;;  %v8821_v8 = vld [vmem:[%s16525_s4 + $0x158] sm:$0xff] }
 0x396   : > { %v3329_v38 = vmax.f32 %v3117_v44, %v3240_v28  ;;  %3917 = vmatpush.msrb.mxu2 %v8820_v55  ;;  %v8919_v55 = vld [vmem:[%s16525_s4 + $0x268] sm:$0xff] }
 0x397   : > { %v3009_v62 = vpop.f32.mrf.mxu2  ;;  %v2653_v59 = vpop.permute.xlu0 %2652  ;;  %4480 = vmatpush.msra.mxu1 %v8919_v55 }
 0x398   : > { %v12087_v50 = vmax.f32 %v3329_v38, 0.0  ;;  %v2704_v30 = vsel %vm2678_vm5, %v2651_v63, %v2653_v59  ;;  %v3122_v60 = vpop.f32.mrf.mxu3  ;;  %v2826_v7 = vmax.f32 %v11846_v17, %v2653_v59  ;;  %v2655_v53 = vpop.permute.xlu1 %2654  ;;  %v8816_v63 = vld [vmem:[%s16525_s4 + $0x130] sm:$0xff]  ;;  %v8819_v38 = vld [vmem:[%s16525_s4 + $0x148] sm:$0xff]  ;;  %3918 = vmatpush.msrb.mxu2 %v8818_v48 }
 0x399   : > { %v2825_v46 = vmax.f32 %v11826_v61, %v2704_v30  ;;  %v3123_v4 = vadd.f32 %v3122_v60, %v3009_v62  ;;  %v2705_v61 = vsel %vm2678_vm5, %v2655_v53, %v2657_v19  ;;  %v2663_v30 = vpop.permute.xlu2 %2662  ;;  %v8810_v19 = vld [vmem:[%s16525_s4 + $0x100] sm:$0xff] }
 0x39a   : > { %16997 = vst [vmem:[#allocation13_spill] sm:$0xff] %v12087_v50  ;;  %8750 = vmatmul.msk.f32.gmra.mxu0 %vm3423_vm7, %v12087_v50  ;;  %8782 = vmatmul.msk.f32.gmra.mxu1 %vm3423_vm7, %v12087_v50  ;;  %v2827_v35 = vmax.f32 %v11844_v37, %v2705_v61  ;;  %v8825_v37 = vld [vmem:[%s16525_s4 + $0x178] sm:$0xff] }
 0x39b   : > { %v3241_v43 = vrot.slane %v3123_v4, 1  ;;  %4028 = vmatpush.msra.mxu3 %v8825_v37  ;;  %3919 = vmatpush.msrb.mxu2 %v8816_v63 }
 0x39c   : > { %3059 = vmatmul.f32.gmra.mxu2 %v2825_v46  ;;  %v8815_v46 = vld [vmem:[%s16525_s4 + $0x128] sm:$0xff] }
 0x39d   : > { %8737 = vmatmul.msk.f32.gmra.mxu3 %vm2868_vm6, %v2826_v7  ;;  %v3242_v39 = vsel %vm739_vm2, %v3239_v58, %v3241_v43 }
 0x39e   : > { %v3330_v34 = vmax.f32 %v3120_v3, %v3242_v39  ;;  %4029 = vmatpush.msra.mxu3 %v8823_v18 }
 0x39f   : > { %v3012_v45 = vpop.f32.mrf.mxu2 }
 0x3a0   : > { %v12102_v29 = vmax.f32 %v3330_v34, 0.0  ;;  %v3125_v17 = vpop.f32.mrf.mxu3  ;;  %v2659_v0 = vpop.permute.xlu0 %2658  ;;  %4030 = vmatpush.msra.mxu3 %v8821_v8  ;;  %v8813_v34 = vld [vmem:[%s16525_s4 + $0x118] sm:$0xff] }
 0x3a1   : > { %v3126_v13 = vadd.f32 %v3125_v17, %v3012_v45 }
 0x3a2   : > { %16998 = vst [vmem:[#allocation17_spill] sm:$0xff] %v12102_v29  ;;  %8751 = vmatmul.msk.f32.gmra.mxu0 %vm3423_vm7, %v12102_v29  ;;  %8783 = vmatmul.msk.f32.gmra.mxu1 %vm3423_vm7, %v12102_v29 }
 0x3a3   : > { %v3243_v44 = vrot.slane %v3126_v13, 1  ;;  %4031 = vmatpush.msra.mxu3 %v8819_v38 }
 0x3a4   : > { %3062 = vmatmul.f32.gmra.mxu2 %v2827_v35  ;;  %v2669_v35 = vpop.permute.xlu2 %2668 }
 0x3a5   : > { %8738 = vmatmul.msk.f32.gmra.mxu3 %vm2868_vm6, %v2828_v23  ;;  %v3244_v24 = vsel %vm739_vm2, %v3241_v43, %v3243_v44 }
 0x3a6   : > { %v3331_v36 = vmax.f32 %v3123_v4, %v3244_v24 }
 0x3a7   : > { %v3015_v9 = vpop.f32.mrf.mxu2 }
 0x3a8   : > { %v12133_v42 = vmax.f32 %v3331_v36, 0.0  ;;  %v2661_v14 = vpop.permute.xlu1 %2660  ;;  %v3128_v57 = vpop.f32.mrf.mxu3  ;;  %v8918_v36 = vld [vmem:[%s16525_s4 + $0x260] sm:$0xff] }
 0x3a9   : > { %v2706_v3 = vsel %vm2678_vm5, %v2659_v0, %v2661_v14  ;;  %v3129_v26 = vadd.f32 %v3128_v57, %v3015_v9  ;;  %v2830_v28 = vmax.f32 %v11882_v40, %v2661_v14  ;;  %v8817_v40 = vld [vmem:[%s16525_s4 + $0x138] sm:$0xff]  ;;  %4367 = vmatpush.msra.mxu0 %v8918_v36  ;;  %v2834_v0 = vmax.f32 %v11918_v51, %v2669_v35 }
 0x3aa   : > { %16999 = vst [vmem:[#allocation64_spill] sm:$0xff] %v12133_v42  ;;  %v2829_v58 = vmax.f32 %v11862_v56, %v2706_v3  ;;  %8752 = vmatmul.msk.f32.gmra.mxu0 %vm3423_vm7, %v12133_v42  ;;  %8784 = vmatmul.msk.f32.gmra.mxu1 %vm3423_vm7, %v12133_v42  ;;  %v8814_v56 = vld [vmem:[%s16525_s4 + $0x120] sm:$0xff] }
 0x3ab   : > { %v3245_v62 = vrot.slane %v3129_v26, 1  ;;  %3920 = vmatpush.msrb.mxu2 %v8814_v56  ;;  %4032 = vmatpush.msra.mxu3 %v8817_v40 }
 0x3ac   : > { %3065 = vmatmul.f32.gmra.mxu2 %v2829_v58 }
 0x3ad   : > { %8739 = vmatmul.msk.f32.gmra.mxu3 %vm2868_vm6, %v2830_v28  ;;  %v3246_v59 = vsel %vm739_vm2, %v3243_v44, %v3245_v62  ;;  %3921 = vmatpush.msrb.mxu2 %v8812_v6  ;;  %v8917_v6 = vld [vmem:[%s16525_s4 + $0x258] sm:$0xff] }
 0x3ae   : > { %v3332_v60 = vmax.f32 %v3126_v13, %v3246_v59  ;;  %4033 = vmatpush.msra.mxu3 %v8815_v46  ;;  %4481 = vmatpush.msra.mxu1 %v8917_v6 }
 0x3af   : > { %v3018_v4 = vpop.f32.mrf.mxu2  ;;  %v2665_v7 = vpop.permute.xlu0 %2664  ;;  %3922 = vmatpush.msrb.mxu2 %v8810_v19 }
 0x3b0   : > { %v12174_v43 = vmax.f32 %v3332_v60, 0.0  ;;  %v2707_v53 = vsel %vm2678_vm5, %v2663_v30, %v2665_v7  ;;  %v3131_v39 = vpop.f32.mrf.mxu3  ;;  %v2832_v17 = vmax.f32 %v11897_v10, %v2665_v7  ;;  %4034 = vmatpush.msra.mxu3 %v8813_v34  ;;  %v2667_v13 = vpop.permute.xlu1 %2666  ;;  %v8809_v10 = vld [vmem:[%s16525_s4 + $0xf8] sm:$0xff]  ;;  %v8916_v60 = vld [vmem:[%s16525_s4 + $0x250] sm:$0xff] }
 0x3b1   : > { %v2831_v61 = vmax.f32 %v11880_v20, %v2707_v53  ;;  %v3132_v45 = vadd.f32 %v3131_v39, %v3018_v4  ;;  %3923 = vmatpush.msrb.mxu2 %v8808_v2  ;;  %v2708_v44 = vsel %vm2678_vm5, %v2667_v13, %v2669_v35  ;;  %4368 = vmatpush.msra.mxu0 %v8916_v60 }
 0x3b2   : > { %17000 = vst [vmem:[#allocation35_spill] sm:$0xff] %v12174_v43  ;;  %8753 = vmatmul.msk.f32.gmra.mxu0 %vm3423_vm7, %v12174_v43  ;;  %8785 = vmatmul.msk.f32.gmra.mxu1 %vm3423_vm7, %v12174_v43  ;;  %v2833_v9 = vmax.f32 %v11895_v32, %v2708_v44  ;;  %v8914_v44 = vld [vmem:[%s16525_s4 + $0x240] sm:$0xff] }
 0x3b3   : > { %v3247_v20 = vrot.slane %v3132_v45, 1  ;;  %4035 = vmatpush.msra.mxu3 %v8811_v41  ;;  %4369 = vmatpush.msra.mxu0 %v8914_v44  ;;  %v8910_v44 = vld [vmem:[%s16525_s4 + $0x220] sm:$0xff] }
 0x3b4   : > { %3068 = vmatmul.f32.gmra.mxu2 %v2831_v61 }
 0x3b5   : > { %8740 = vmatmul.msk.f32.gmra.mxu3 %vm2868_vm6, %v2832_v17  ;;  %v3248_v23 = vsel %vm739_vm2, %v3245_v62, %v3247_v20  ;;  %v2675_v62 = vpop.permute.xlu2 %2674  ;;  %v16573_v17 = vrot.slane %v11985_v22, 2 }
 0x3b6   : > { %v3333_v15 = vmax.f32 %v3129_v26, %v3248_v23  ;;  %4036 = vmatpush.msra.mxu3 %v8809_v10  ;;  %v3749_v23 = vrot.slane %v12019_v5, 2 }
 0x3b7   : > { %v3021_v31 = vpop.f32.mrf.mxu2 }
 0x3b8   : > { %v12201_v37 = vmax.f32 %v3333_v15, 0.0  ;;  %v3134_v24 = vpop.f32.mrf.mxu3  ;;  %v2671_v52 = vpop.permute.xlu0 %2670 }
 0x3b9   : > { %v3135_v18 = vadd.f32 %v3134_v24, %v3021_v31  ;;  %v8915_v24 = vld [vmem:[%s16525_s4 + $0x248] sm:$0xff] }
 0x3ba   : > { %17001 = vst [vmem:[#allocation40_spill] sm:$0xff] %v12201_v37  ;;  %8754 = vmatmul.msk.f32.gmra.mxu0 %vm3423_vm7, %v12201_v37  ;;  %8786 = vmatmul.msk.f32.gmra.mxu1 %vm3423_vm7, %v12201_v37 }
 0x3bb   : > { %v3249_v14 = vrot.slane %v3135_v18, 1  ;;  %4482 = vmatpush.msra.mxu1 %v8915_v24 }
 0x3bc   : > { %3071 = vmatmul.f32.gmra.mxu2 %v2833_v9 }
 0x3bd   : > { %8741 = vmatmul.msk.f32.gmra.mxu3 %vm2868_vm6, %v2834_v0  ;;  %v3250_v57 = vsel %vm739_vm2, %v3247_v20, %v3249_v14 }
 0x3be   : > { %v3334_v49 = vmax.f32 %v3132_v45, %v3250_v57 }
 0x3bf   : > { %v3024_v48 = vpop.f32.mrf.mxu2 }
 0x3c0   : > { %v2673_v3 = vpop.permute.xlu1 %2672  ;;  %v12217_v26 = vmax.f32 %v3334_v49, 0.0  ;;  %v3137_v51 = vpop.f32.mrf.mxu3 }
 0x3c1   : > { %v2709_v32 = vsel %vm2678_vm5, %v2671_v52, %v2673_v3  ;;  %v3138_v58 = vadd.f32 %v3137_v51, %v3024_v48  ;;  %v2836_v28 = vmax.f32 %v11939_v1, %v2673_v3 }
 0x3c2   : > { %17002 = vst [vmem:[#allocation39_spill] sm:$0xff] %v12217_v26  ;;  %v2835_v8 = vmax.f32 %v11916_v21, %v2709_v32  ;;  %8755 = vmatmul.msk.f32.gmra.mxu0 %vm3423_vm7, %v12217_v26  ;;  %8787 = vmatmul.msk.f32.gmra.mxu1 %vm3423_vm7, %v12217_v26 }
 0x3c3   : > { %v3251_v63 = vrot.slane %v3138_v58, 1 }
 0x3c4   : > { %3074 = vmatmul.f32.gmra.mxu2 %v2835_v8 }
 0x3c5   : > { %8742 = vmatmul.msk.f32.gmra.mxu3 %vm2868_vm6, %v2836_v28  ;;  %v3252_v38 = vsel %vm739_vm2, %v3249_v14, %v3251_v63  ;;  %v3751_v14 = vrot.slane %v12036_v16, 2  ;;  %v3753_v28 = vrot.slane %v12054_v33, 2 }
 0x3c6   : > { %v3335_v56 = vmax.f32 %v3135_v18, %v3252_v38 }
 0x3c7   : > { %v3027_v40 = vpop.f32.mrf.mxu2  ;;  %v2677_v59 = vpop.permute.xlu0 %2676  ;;  %v3752_v3 = vsel %vm1176_vm3, %v3749_v23, %v3751_v14 }
 0x3c8   : > { %v12228_v21 = vmax.f32 %v3335_v56, 0.0  ;;  %v2710_v1 = vsel %vm2678_vm5, %v2675_v62, %v2677_v59  ;;  %v3140_v30 = vpop.f32.mrf.mxu3  ;;  %v2838_v7 = vmax.f32 %v11956_v54, %v2677_v59  ;;  %v8912_v56 = vld [vmem:[%s16525_s4 + $0x230] sm:$0xff] }
 0x3c9   : > { %v2837_v46 = vmax.f32 %v11937_v11, %v2710_v1  ;;  %v3141_v4 = vadd.f32 %v3140_v30, %v3027_v40  ;;  %v3747_v11 = vrot.slane %v12003_v27, 2  ;;  %4370 = vmatpush.msra.mxu0 %v8912_v56  ;;  %v3754_v1 = vsel %vm1176_vm3, %v3751_v14, %v3753_v28 }
 0x3ca   : > { %8756 = vmatmul.msk.f32.gmra.mxu0 %vm3423_vm7, %v12228_v21  ;;  %8788 = vmatmul.msk.f32.gmra.mxu1 %vm3423_vm7, %v12228_v21  ;;  %v3759_v14 = vrot.slane %v12102_v29, 2 }
 0x3cb   : > { %v3253_v53 = vrot.slane %v3141_v4, 1  ;;  %v3748_v41 = vsel %vm1176_vm3, %v16573_v17, %v3747_v11  ;;  %v3750_v55 = vsel %vm1176_vm3, %v3747_v11, %v3749_v23  ;;  %4371 = vmatpush.msra.mxu0 %v8910_v44  ;;  %v8909_v44 = vld [vmem:[%s16525_s4 + $0x218] sm:$0xff] }
 0x3cc   : > { %3077 = vmatmul.f32.gmra.mxu2 %v2837_v46 }
 0x3cd   : > { %8743 = vmatmul.msk.f32.gmra.mxu3 %vm2868_vm6, %v2838_v7  ;;  %v3254_v39 = vsel %vm739_vm2, %v3251_v63, %v3253_v53 }
 0x3ce   : > { %v3336_v19 = vmax.f32 %v3138_v58, %v3254_v39 }
 0x3cf   : > { %v3030_v34 = vpop.f32.mrf.mxu2 }
 0x3d0   : > { %v12246_v61 = vmax.f32 %v3336_v19, 0.0  ;;  %v3143_v45 = vpop.f32.mrf.mxu3  ;;  %v8913_v19 = vld [vmem:[%s16525_s4 + $0x238] sm:$0xff] }
 0x3d1   : > { %v3144_v54 = vadd.f32 %v3143_v45, %v3030_v34  ;;  %4483 = vmatpush.msra.mxu1 %v8913_v19 }
 0x3d2   : > { %8757 = vmatmul.msk.f32.gmra.mxu0 %vm3423_vm7, %v12246_v61  ;;  %8789 = vmatmul.msk.f32.gmra.mxu1 %vm3423_vm7, %v12246_v61 }
 0x3d3   : > { %v3255_v2 = vrot.slane %v3144_v54, 1 }
 0x3d4   : > { %8838 = vmatmul.msk.f32.vlgmr.msrb.gmra.mxu2 %vm3423_vm7, %v3748_v41 }
 0x3d5   : > { %8870 = vmatmul.msk.f32.vlgmr.msra.gmra.mxu3 %vm3423_vm7, %v3748_v41  ;;  %v3256_v20 = vsel %vm739_vm2, %v3253_v53, %v3255_v2 }
 0x3d6   : > { %v3337_v13 = vmax.f32 %v3141_v4, %v3256_v20  ;;  %v3755_v4 = vrot.slane %v12070_v47, 2 }
 0x3d7   : > { %v3033_v10 = vpop.f32.mrf.mxu2 }
 0x3d8   : > { %v12260_v35 = vmax.f32 %v3337_v13, 0.0  ;;  %v3146_v15 = vpop.f32.mrf.mxu3  ;;  %v3756_v45 = vsel %vm1176_vm3, %v3753_v28, %v3755_v4  ;;  %v3757_v13 = vrot.slane %v12087_v50, 2 }
 0x3d9   : > { %v3147_v31 = vadd.f32 %v3146_v15, %v3033_v10 }
 0x3da   : > { %17003 = vst [vmem:[#allocation43_spill] sm:$0xff] %v12260_v35  ;;  %8758 = vmatmul.msk.f32.gmra.mxu0 %vm3423_vm7, %v12260_v35  ;;  %8790 = vmatmul.msk.f32.gmra.mxu1 %vm3423_vm7, %v12260_v35 }
 0x3db   : > { %v3257_v36 = vrot.slane %v3147_v31, 1 }
 0x3dc   : > { %8839 = vmatmul.msk.f32.gmra.mxu2 %vm3423_vm7, %v3750_v55 }
 0x3dd   : > { %8871 = vmatmul.msk.f32.gmra.mxu3 %vm3423_vm7, %v3750_v55  ;;  %v3258_v18 = vsel %vm739_vm2, %v3255_v2, %v3257_v36 }
 0x3de   : > { %v3338_v0 = vmax.f32 %v3144_v54, %v3258_v18 }
 0x3df   : > { %v3036_v9 = vpop.f32.mrf.mxu2 }
 0x3e0   : > { %v12277_v57 = vmax.f32 %v3338_v0, 0.0  ;;  %v3149_v52 = vpop.f32.mrf.mxu3 }
 0x3e1   : > { %v3150_v49 = vadd.f32 %v3149_v52, %v3036_v9 }
 0x3e2   : > { %17004 = vst [vmem:[#allocation18_spill] sm:$0xff] %v12277_v57  ;;  %8759 = vmatmul.msk.f32.gmra.mxu0 %vm3423_vm7, %v12277_v57  ;;  %8791 = vmatmul.msk.f32.gmra.mxu1 %vm3423_vm7, %v12277_v57  ;;  %v3775_v25 = vrot.slane %v12277_v57, 2 }
 0x3e3   : > { %v3259_v48 = vrot.slane %v3150_v49, 1 }
 0x3e4   : > { %8840 = vmatmul.msk.f32.gmra.mxu2 %vm3423_vm7, %v3752_v3 }
 0x3e5   : > { %8872 = vmatmul.msk.f32.gmra.mxu3 %vm3423_vm7, %v3752_v3  ;;  %v3260_v32 = vsel %vm739_vm2, %v3257_v36, %v3259_v48  ;;  %v3758_v36 = vsel %vm1176_vm3, %v3755_v4, %v3757_v13  ;;  %v8911_v3 = vld [vmem:[%s16525_s4 + $0x228] sm:$0xff] }
 0x3e6   : > { %v3339_v51 = vmax.f32 %v3147_v31, %v3260_v32  ;;  %4484 = vmatpush.msra.mxu1 %v8911_v3 }
 0x3e7   : > { %v3039_v8 = vpop.f32.mrf.mxu2  ;;  %v12287_v58 = vpop.f32.mrf.mxu0 }
 0x3e8   : > { %v12290_v63 = vmax.f32 %v3339_v51, 0.0  ;;  %v12292_v38 = vpop.f32.mrf.mxu1  ;;  %v3152_v62 = vpop.f32.mrf.mxu3  ;;  %4485 = vmatpush.msra.mxu1 %v8909_v44 }
 0x3e9   : > { %v3153_v40 = vadd.f32 %v3152_v62, %v3039_v8  ;;  %v3760_v8 = vsel %vm1176_vm3, %v3757_v13, %v3759_v14 }
 0x3ea   : > { %17005 = vst [vmem:[#allocation15_spill] sm:$0xff] %v12290_v63  ;;  %8760 = vmatmul.msk.f32.gmra.mxu0 %vm3423_vm7, %v12290_v63  ;;  %8792 = vmatmul.msk.f32.gmra.mxu1 %vm3423_vm7, %v12290_v63 }
 0x3eb   : > { %v3261_v59 = vrot.slane %v3153_v40, 1 }
 0x3ec   : > { %8841 = vmatmul.msk.f32.gmra.mxu2 %vm3423_vm7, %v3754_v1 }
 0x3ed   : > { %8873 = vmatmul.msk.f32.gmra.mxu3 %vm3423_vm7, %v3754_v1  ;;  %v3262_v30 = vsel %vm739_vm2, %v3259_v48, %v3261_v59 }
 0x3ee   : > { %v3340_v60 = vmax.f32 %v3150_v49, %v3262_v30 }
 0x3ef   : > { %v3042_v6 = vpop.f32.mrf.mxu2  ;;  %v12305_v46 = vpop.f32.mrf.mxu0 }
 0x3f0   : > { %v12308_v7 = vmax.f32 %v3340_v60, 0.0  ;;  %v12310_v53 = vpop.f32.mrf.mxu1  ;;  %v3155_v39 = vpop.f32.mrf.mxu3 }
 0x3f1   : > { %v3156_v34 = vadd.f32 %v3155_v39, %v3042_v6  ;;  %v8908_v6 = vld [vmem:[%s16525_s4 + $0x210] sm:$0xff] }
 0x3f2   : > { %17006 = vst [vmem:[#allocation42_spill] sm:$0xff] %v12308_v7  ;;  %8761 = vmatmul.msk.f32.gmra.mxu0 %vm3423_vm7, %v12308_v7  ;;  %8793 = vmatmul.msk.f32.gmra.mxu1 %vm3423_vm7, %v12308_v7 }
 0x3f3   : > { %v3263_v11 = vrot.slane %v3156_v34, 1  ;;  %4372 = vmatpush.msra.mxu0 %v8908_v6 }
 0x3f4   : > { %8842 = vmatmul.msk.f32.gmra.mxu2 %vm3423_vm7, %v3756_v45 }
 0x3f5   : > { %8874 = vmatmul.msk.f32.gmra.mxu3 %vm3423_vm7, %v3756_v45  ;;  %v3264_v54 = vsel %vm739_vm2, %v3261_v59, %v3263_v11  ;;  %v3761_v59 = vrot.slane %v12133_v42, 2 }
 0x3f6   : > { %v3341_v2 = vmax.f32 %v3153_v40, %v3264_v54 }
 0x3f7   : > { %v3045_v41 = vpop.f32.mrf.mxu2  ;;  %v12323_v20 = vpop.f32.mrf.mxu0  ;;  %v3762_v19 = vsel %vm1176_vm3, %v3759_v14, %v3761_v59 }
 0x3f8   : > { %v12326_v10 = vmax.f32 %v3341_v2, 0.0  ;;  %v12328_v23 = vpop.f32.mrf.mxu1  ;;  %v3158_v15 = vpop.f32.mrf.mxu3  ;;  %v3763_v2 = vrot.slane %v12174_v43, 2 }
 0x3f9   : > { %v3159_v31 = vadd.f32 %v3158_v15, %v3045_v41 }
 0x3fa   : > { %8762 = vmatmul.msk.f32.gmra.mxu0 %vm3423_vm7, %v12326_v10  ;;  %8794 = vmatmul.msk.f32.gmra.mxu1 %vm3423_vm7, %v12326_v10 }
 0x3fb   : > { %v3265_v24 = vrot.slane %v3159_v31, 1 }
 0x3fc   : > { %8843 = vmatmul.msk.f32.gmra.mxu2 %vm3423_vm7, %v3758_v36 }
 0x3fd   : > { %8875 = vmatmul.msk.f32.gmra.mxu3 %vm3423_vm7, %v3758_v36  ;;  %v3266_v55 = vsel %vm739_vm2, %v3263_v11, %v3265_v24  ;;  %v3764_v36 = vsel %vm1176_vm3, %v3761_v59, %v3763_v2 }
 0x3fe   : > { %v3342_v18 = vmax.f32 %v3156_v34, %v3266_v55 }
 0x3ff   : > { %v3048_v0 = vpop.f32.mrf.mxu2  ;;  %v12341_v9 = vpop.f32.mrf.mxu0 }
 0x400   : > { %v12344_v52 = vmax.f32 %v3342_v18, 0.0  ;;  %v12346_v49 = vpop.f32.mrf.mxu1  ;;  %v3161_v48 = vpop.f32.mrf.mxu3 }
 0x401   : > { %v3162_v32 = vadd.f32 %v3161_v48, %v3048_v0  ;;  %v3765_v48 = vrot.slane %v12201_v37, 2 }
 0x402   : > { %8763 = vmatmul.msk.f32.gmra.mxu0 %vm3423_vm7, %v12344_v52  ;;  %8795 = vmatmul.msk.f32.gmra.mxu1 %vm3423_vm7, %v12344_v52 }
 0x403   : > { %v3267_v51 = vrot.slane %v3162_v32, 1 }
 0x404   : > { %8844 = vmatmul.msk.f32.gmra.mxu2 %vm3423_vm7, %v3760_v8 }
 0x405   : > { %8876 = vmatmul.msk.f32.gmra.mxu3 %vm3423_vm7, %v3760_v8  ;;  %v3268_v28 = vsel %vm739_vm2, %v3265_v24, %v3267_v51 }
 0x406   : > { %v3343_v62 = vmax.f32 %v3159_v31, %v3268_v28  ;;  %v8906_v28 = vld [vmem:[%s16525_s4 + $0x200] sm:$0xff] }
 0x407   : > { %v3051_v56 = vpop.f32.mrf.mxu2  ;;  %v12359_v40 = vpop.f32.mrf.mxu0  ;;  %4373 = vmatpush.msra.mxu0 %v8906_v28 }
 0x408   : > { %v12362_v1 = vmax.f32 %v3343_v62, 0.0  ;;  %v12364_v30 = vpop.f32.mrf.mxu1  ;;  %v3164_v60 = vpop.f32.mrf.mxu3 }
 0x409   : > { %v3165_v4 = vadd.f32 %v3164_v60, %v3051_v56  ;;  %v3766_v56 = vsel %vm1176_vm3, %v3763_v2, %v3765_v48 }
 0x40a   : > { %8764 = vmatmul.msk.f32.gmra.mxu0 %vm3423_vm7, %v12362_v1  ;;  %8796 = vmatmul.msk.f32.gmra.mxu1 %vm3423_vm7, %v12362_v1 }
 0x40b   : > { %v3269_v39 = vrot.slane %v3165_v4, 1 }
 0x40c   : > { %8845 = vmatmul.msk.f32.gmra.mxu2 %vm3423_vm7, %v3762_v19 }
 0x40d   : > { %8877 = vmatmul.msk.f32.gmra.mxu3 %vm3423_vm7, %v3762_v19  ;;  %v3270_v34 = vsel %vm739_vm2, %v3267_v51, %v3269_v39 }
 0x40e   : > { %v3344_v11 = vmax.f32 %v3162_v32, %v3270_v34 }
 0x40f   : > { %v3054_v45 = vpop.f32.mrf.mxu2  ;;  %v12377_v54 = vpop.f32.mrf.mxu0 }
 0x410   : > { %17007 = vst [vmem:[#allocation46_spill] sm:$0xff] %v12377_v54  ;;  %v12380_v41 = vmax.f32 %v3344_v11, 0.0  ;;  %v12382_v13 = vpop.f32.mrf.mxu1  ;;  %v3167_v15 = vpop.f32.mrf.mxu3 }
 0x411   : > { %17008 = vst [vmem:[#allocation19_spill] sm:$0xff] %v12382_v13  ;;  %v3168_v31 = vadd.f32 %v3167_v15, %v3054_v45  ;;  %v8907_v45 = vld [vmem:[%s16525_s4 + $0x208] sm:$0xff] }
 0x412   : > { %8765 = vmatmul.msk.f32.gmra.mxu0 %vm3423_vm7, %v12380_v41  ;;  %8797 = vmatmul.msk.f32.gmra.mxu1 %vm3423_vm7, %v12380_v41 }
 0x413   : > { %v3271_v24 = vrot.slane %v3168_v31, 1  ;;  %4486 = vmatpush.msra.mxu1 %v8907_v45 }
 0x414   : > { %8846 = vmatmul.msk.f32.gmra.mxu2 %vm3423_vm7, %v3764_v36 }
 0x415   : > { %8878 = vmatmul.msk.f32.gmra.mxu3 %vm3423_vm7, %v3764_v36  ;;  %v3272_v55 = vsel %vm739_vm2, %v3269_v39, %v3271_v24  ;;  %v3767_v39 = vrot.slane %v12217_v26, 2 }
 0x416   : > { %v3345_v18 = vmax.f32 %v3165_v4, %v3272_v55 }
 0x417   : > { %v3057_v0 = vpop.f32.mrf.mxu2  ;;  %v12395_v14 = vpop.f32.mrf.mxu0  ;;  %v3768_v44 = vsel %vm1176_vm3, %v3765_v48, %v3767_v39 }
 0x418   : > { %17009 = vst [vmem:[#allocation22_spill] sm:$0xff] %v12395_v14  ;;  %v12398_v3 = vmax.f32 %v3345_v18, 0.0  ;;  %v12400_v32 = vpop.f32.mrf.mxu1  ;;  %v3170_v51 = vpop.f32.mrf.mxu3  ;;  %v3769_v18 = vrot.slane %v12228_v21, 2 }
 0x419   : > { %17010 = vst [vmem:[#allocation23_spill] sm:$0xff] %v12400_v32  ;;  %v3171_v8 = vadd.f32 %v3170_v51, %v3057_v0 }
 0x41a   : > { %8766 = vmatmul.msk.f32.gmra.mxu0 %vm3423_vm7, %v12398_v3  ;;  %8798 = vmatmul.msk.f32.gmra.mxu1 %vm3423_vm7, %v12398_v3 }
 0x41b   : > { %v3273_v62 = vrot.slane %v3171_v8, 1 }
 0x41c   : > { %8847 = vmatmul.msk.f32.gmra.mxu2 %vm3423_vm7, %v3766_v56 }
 0x41d   : > { %8879 = vmatmul.msk.f32.gmra.mxu3 %vm3423_vm7, %v3766_v56  ;;  %v3274_v59 = vsel %vm739_vm2, %v3271_v24, %v3273_v62 }
 0x41e   : > { %v3346_v60 = vmax.f32 %v3168_v31, %v3274_v59 }
 0x41f   : > { %v3060_v6 = vpop.f32.mrf.mxu2  ;;  %v12413_v4 = vpop.f32.mrf.mxu0 }
 0x420   : > { %17011 = vst [vmem:[#allocation45_spill] sm:$0xff] %v12413_v4  ;;  %v12416_v19 = vmax.f32 %v3346_v60, 0.0  ;;  %v12418_v34 = vpop.f32.mrf.mxu1  ;;  %v3173_v11 = vpop.f32.mrf.mxu3  ;;  %v3789_v4 = vrot.slane %v12398_v3, 2 }
 0x421   : > { %17012 = vst [vmem:[#allocation49_spill] sm:$0xff] %v12418_v34  ;;  %v3174_v2 = vadd.f32 %v3173_v11, %v3060_v6  ;;  %v3771_v11 = vrot.slane %v12246_v61, 2 }
 0x422   : > { %8767 = vmatmul.msk.f32.gmra.mxu0 %vm3423_vm7, %v12416_v19  ;;  %8799 = vmatmul.msk.f32.gmra.mxu1 %vm3423_vm7, %v12416_v19 }
 0x423   : > { %v3275_v15 = vrot.slane %v3174_v2, 1 }
 0x424   : > { %8848 = vmatmul.msk.f32.gmra.mxu2 %vm3423_vm7, %v3768_v44 }
 0x425   : > { %8880 = vmatmul.msk.f32.gmra.mxu3 %vm3423_vm7, %v3768_v44  ;;  %v3276_v31 = vsel %vm739_vm2, %v3273_v62, %v3275_v15 }
 0x426   : > { %v3347_v24 = vmax.f32 %v3171_v8, %v3276_v31  ;;  %v3770_v8 = vsel %vm1176_vm3, %v3767_v39, %v3769_v18  ;;  %v8904_v39 = vld [vmem:[%s16525_s4 + $0x1f0] sm:$0xff] }
 0x427   : > { %v3063_v36 = vpop.f32.mrf.mxu2  ;;  %v12431_v55 = vpop.f32.mrf.mxu0  ;;  %4374 = vmatpush.msra.mxu0 %v8904_v39 }
 0x428   : > { %17013 = vst [vmem:[#allocation20_spill] sm:$0xff] %v12431_v55  ;;  %v12434_v0 = vmax.f32 %v3347_v24, 0.0  ;;  %v12436_v51 = vpop.f32.mrf.mxu1  ;;  %v3176_v28 = vpop.f32.mrf.mxu3  ;;  %v8905_v24 = vld [vmem:[%s16525_s4 + $0x1f8] sm:$0xff] }
 0x429   : > { %17014 = vst [vmem:[#allocation24_spill] sm:$0xff] %v12436_v51  ;;  %v3177_v56 = vadd.f32 %v3176_v28, %v3063_v36  ;;  %4487 = vmatpush.msra.mxu1 %v8905_v24  ;;  %v3772_v36 = vsel %vm1176_vm3, %v3769_v18, %v3771_v11  ;;  %v8902_v18 = vld [vmem:[%s16525_s4 + $0x1e0] sm:$0xff] }
 0x42a   : > { %8768 = vmatmul.msk.f32.gmra.mxu0 %vm3423_vm7, %v12434_v0  ;;  %8800 = vmatmul.msk.f32.gmra.mxu1 %vm3423_vm7, %v12434_v0 }
 0x42b   : > { %v3277_v48 = vrot.slane %v3177_v56, 1  ;;  %4375 = vmatpush.msra.mxu0 %v8902_v18 }
 0x42c   : > { %8849 = vmatmul.msk.f32.gmra.mxu2 %vm3423_vm7, %v3770_v8 }
 0x42d   : > { %8881 = vmatmul.msk.f32.gmra.mxu3 %vm3423_vm7, %v3770_v8  ;;  %v3278_v62 = vsel %vm739_vm2, %v3275_v15, %v3277_v48 }
 0x42e   : > { %v3348_v59 = vmax.f32 %v3174_v2, %v3278_v62 }
 0x42f   : > { %v3066_v60 = vpop.f32.mrf.mxu2  ;;  %v12446_v6 = vpop.f32.mrf.mxu0 }
 0x430   : > { %17015 = vst [vmem:[#allocation27_spill] sm:$0xff] %v12446_v6  ;;  %v12449_v45 = vmax.f32 %v3348_v59, 0.0  ;;  %v12451_v44 = vpop.f32.mrf.mxu1  ;;  %v3179_v31 = vpop.f32.mrf.mxu3 }
 0x431   : > { %17016 = vst [vmem:[#allocation48_spill] sm:$0xff] %v12451_v44  ;;  %v3180_v15 = vadd.f32 %v3179_v31, %v3066_v60  ;;  %v3773_v60 = vrot.slane %v12260_v35, 2 }
 0x432   : > { %8769 = vmatmul.msk.f32.gmra.mxu0 %vm3423_vm7, %v12449_v45  ;;  %8801 = vmatmul.msk.f32.gmra.mxu1 %vm3423_vm7, %v12449_v45 }
 0x433   : > { %v3279_v2 = vrot.slane %v3180_v15, 1 }
 0x434   : > { %8850 = vmatmul.msk.f32.gmra.mxu2 %vm3423_vm7, %v3772_v36 }
 0x435   : > { %8882 = vmatmul.msk.f32.gmra.mxu3 %vm3423_vm7, %v3772_v36  ;;  %v3280_v28 = vsel %vm739_vm2, %v3277_v48, %v3279_v2  ;;  %v3774_v48 = vsel %vm1176_vm3, %v3771_v11, %v3773_v60  ;;  %v8903_v36 = vld [vmem:[%s16525_s4 + $0x1e8] sm:$0xff] }
 0x436   : > { %v3349_v8 = vmax.f32 %v3177_v56, %v3280_v28  ;;  %4488 = vmatpush.msra.mxu1 %v8903_v36 }
 0x437   : > { %v3069_v62 = vpop.f32.mrf.mxu2  ;;  %v12467_v59 = vpop.f32.mrf.mxu0 }
 0x438   : > { %17017 = vst [vmem:[#allocation52_spill] sm:$0xff] %v12467_v59  ;;  %v12470_v31 = vmax.f32 %v3349_v8, 0.0  ;;  %v12472_v39 = vpop.f32.mrf.mxu1  ;;  %v3182_v24 = vpop.f32.mrf.mxu3 }
 0x439   : > { %17018 = vst [vmem:[#allocation28_spill] sm:$0xff] %v12472_v39  ;;  %v3183_v17 = vadd.f32 %v3182_v24, %v3069_v62 }
 0x43a   : > { %8770 = vmatmul.msk.f32.gmra.mxu0 %vm3423_vm7, %v12470_v31  ;;  %8802 = vmatmul.msk.f32.gmra.mxu1 %vm3423_vm7, %v12470_v31 }
 0x43b   : > { %v3281_v56 = vrot.slane %v3183_v17, 1 }
 0x43c   : > { %8851 = vmatmul.msk.f32.gmra.mxu2 %vm3423_vm7, %v3774_v48 }
 0x43d   : > { %8883 = vmatmul.msk.f32.gmra.mxu3 %vm3423_vm7, %v3774_v48  ;;  %v3282_v28 = vsel %vm739_vm2, %v3279_v2, %v3281_v56  ;;  %v3776_v48 = vsel %vm1176_vm3, %v3773_v60, %v3775_v25  ;;  %v9025_v60 = vld [vmem:[%s16525_s4 + $0x3b8] sm:$0xff] }
 0x43e   : > { %v3350_v8 = vmax.f32 %v3180_v15, %v3282_v28  ;;  %v9024_v15 = vld [vmem:[%s16525_s4 + $0x3b0] sm:$0xff]  ;;  %4927 = vmatpush.msrb.mxu3 %v9025_v60  ;;  %v3779_v60 = vrot.slane %v12308_v7, 2 }
 0x43f   : > { %v3072_v62 = vpop.f32.mrf.mxu2  ;;  %v12488_v24 = vpop.f32.mrf.mxu0  ;;  %4814 = vmatpush.msra.mxu2 %v9024_v15 }
 0x440   : > { %17019 = vst [vmem:[#allocation25_spill] sm:$0xff] %v12488_v24  ;;  %v12491_v39 = vmax.f32 %v3350_v8, 0.0  ;;  %v12493_v11 = vpop.f32.mrf.mxu1  ;;  %v3185_v18 = vpop.f32.mrf.mxu3 }
 0x441   : > { %17020 = vst [vmem:[#allocation29_spill] sm:$0xff] %v12493_v11  ;;  %v3186_v59 = vadd.f32 %v3185_v18, %v3072_v62  ;;  %v3777_v18 = vrot.slane %v12290_v63, 2 }
 0x442   : > { %8771 = vmatmul.msk.f32.gmra.mxu0 %vm3423_vm7, %v12491_v39  ;;  %8803 = vmatmul.msk.f32.gmra.mxu1 %vm3423_vm7, %v12491_v39 }
 0x443   : > { %v3283_v2 = vrot.slane %v3186_v59, 1 }
 0x444   : > { %8852 = vmatmul.msk.f32.gmra.mxu2 %vm3423_vm7, %v3776_v48 }
 0x445   : > { %8884 = vmatmul.msk.f32.gmra.mxu3 %vm3423_vm7, %v3776_v48  ;;  %v3284_v36 = vsel %vm739_vm2, %v3281_v56, %v3283_v2  ;;  %v3778_v48 = vsel %vm1176_vm3, %v3775_v25, %v3777_v18  ;;  %v9119_v25 = vld [vmem:[%s16525_s4 + $0x4a8] sm:$0xff] }
 0x446   : > { %v3351_v28 = vmax.f32 %v3183_v17, %v3284_v36  ;;  %v9118_v17 = vld [vmem:[%s16525_s4 + $0x4a0] sm:$0xff]  ;;  %5248 = vmatpush.msrb.mxu1 %v9119_v25  ;;  %v3781_v25 = vrot.slane %v12326_v10, 2 }
 0x447   : > { %v3075_v8 = vpop.f32.mrf.mxu2  ;;  %v12506_v62 = vpop.f32.mrf.mxu0  ;;  %5135 = vmatpush.msrb.mxu0 %v9118_v17 }
 0x448   : > { %17021 = vst [vmem:[#allocation32_spill] sm:$0xff] %v12506_v62  ;;  %v12509_v11 = vmax.f32 %v3351_v28, 0.0  ;;  %v12511_v24 = vpop.f32.mrf.mxu1  ;;  %v3188_v44 = vpop.f32.mrf.mxu3 }
 0x449   : > { %17022 = vst [vmem:[#allocation51_spill] sm:$0xff] %v12511_v24  ;;  %v3189_v15 = vadd.f32 %v3188_v44, %v3075_v8 }
 0x44a   : > { %8772 = vmatmul.msk.f32.gmra.mxu0 %vm3423_vm7, %v12509_v11  ;;  %8804 = vmatmul.msk.f32.gmra.mxu1 %vm3423_vm7, %v12509_v11 }
 0x44b   : > { %v3285_v56 = vrot.slane %v3189_v15, 1 }
 0x44c   : > { %8853 = vmatmul.msk.f32.gmra.mxu2 %vm3423_vm7, %v3778_v48 }
 0x44d   : > { %8885 = vmatmul.msk.f32.gmra.mxu3 %vm3423_vm7, %v3778_v48  ;;  %v3286_v44 = vsel %vm739_vm2, %v3283_v2, %v3285_v56  ;;  %v3780_v2 = vsel %vm1176_vm3, %v3777_v18, %v3779_v60  ;;  %v9022_v48 = vld [vmem:[%s16525_s4 + $0x3a0] sm:$0xff] }
 0x44e   : > { %v3352_v36 = vmax.f32 %v3186_v59, %v3286_v44  ;;  %4815 = vmatpush.msra.mxu2 %v9022_v48 }
 0x44f   : > { %v3078_v28 = vpop.f32.mrf.mxu2  ;;  %v12527_v8 = vpop.f32.mrf.mxu0 }
 0x450   : > { %17023 = vst [vmem:[#allocation55_spill] sm:$0xff] %v12527_v8  ;;  %v12530_v24 = vmax.f32 %v3352_v36, 0.0  ;;  %v12532_v62 = vpop.f32.mrf.mxu1  ;;  %v3191_v6 = vpop.f32.mrf.mxu3 }
 0x451   : > { %17024 = vst [vmem:[#allocation33_spill] sm:$0xff] %v12532_v62  ;;  %v3192_v17 = vadd.f32 %v3191_v6, %v3078_v28 }
 0x452   : > { %8773 = vmatmul.msk.f32.gmra.mxu0 %vm3423_vm7, %v12530_v24  ;;  %8805 = vmatmul.msk.f32.gmra.mxu1 %vm3423_vm7, %v12530_v24 }
 0x453   : > { %v3287_v59 = vrot.slane %v3192_v17, 1 }
 0x454   : > { %8854 = vmatmul.msk.f32.gmra.mxu2 %vm3423_vm7, %v3780_v2 }
 0x455   : > { %8886 = vmatmul.msk.f32.gmra.mxu3 %vm3423_vm7, %v3780_v2  ;;  %v3288_v6 = vsel %vm739_vm2, %v3285_v56, %v3287_v59  ;;  %v17027_v2 = vrot.slane %v11968_v12, 1  ;;  %v3782_v56 = vsel %vm1176_vm3, %v3779_v60, %v3781_v25  ;;  %v9116_v12 = vld [vmem:[%s16525_s4 + $0x490] sm:$0xff] }
 0x456   : > { %v3353_v44 = vmax.f32 %v3189_v15, %v3288_v6  ;;  %v9023_v15 = vld [vmem:[%s16525_s4 + $0x3a8] sm:$0xff]  ;;  %5136 = vmatpush.msrb.mxu0 %v9116_v12 }
 0x457   : > { %v12548_v36 = vpop.f32.mrf.mxu2  ;;  %v12550_v28 = vpop.f32.mrf.mxu0  ;;  %v3322_v51 = vsel %vm739_vm2, %v3287_v59, %v17027_v2  ;;  %4928 = vmatpush.msrb.mxu3 %v9023_v15 }
 0x458   : > { %17025 = vst [vmem:[#allocation30_spill] sm:$0xff] %v12550_v28  ;;  %v12553_v62 = vmax.f32 %v3353_v44, 0.0  ;;  %v12555_v18 = vpop.f32.mrf.mxu1  ;;  %v12557_v8 = vpop.f32.mrf.mxu3  ;;  %v3354_v48 = vmax.f32 %v3192_v17, %v3322_v51  ;;  %v3783_v44 = vrot.slane %v12344_v52, 2  ;;  %v9117_v17 = vld [vmem:[%s16525_s4 + $0x498] sm:$0xff] }
 0x459   : > { %17026 = vst [vmem:[#allocation54_spill] sm:$0xff] %v12555_v18  ;;  %5249 = vmatpush.msrb.mxu1 %v9117_v17 }
 0x45a   : > { %8774 = vmatmul.msk.f32.gmra.mxu0 %vm3423_vm7, %v12553_v62  ;;  %8806 = vmatmul.msk.f32.gmra.mxu1 %vm3423_vm7, %v12553_v62  ;;  %v12580_v2 = vmax.f32 %v3354_v48, 0.0  ;;  %v3784_v15 = vsel %vm1176_vm3, %v3781_v25, %v3783_v44  ;;  %v4199_v48 = vrot.slane %v12003_v27, 4  ;;  %v3785_v25 = vrot.slane %v12362_v1, 2 }
 0x45c   : > { %8855 = vmatmul.msk.f32.gmra.mxu2 %vm3423_vm7, %v3782_v56 }
 0x45d   : > { %8887 = vmatmul.msk.f32.gmra.mxu3 %vm3423_vm7, %v3782_v56  ;;  %v9020_v56 = vld [vmem:[%s16525_s4 + $0x390] sm:$0xff] }
 0x45e   : > { %4816 = vmatpush.msra.mxu2 %v9020_v56  ;;  %v9021_v56 = vld [vmem:[%s16525_s4 + $0x398] sm:$0xff] }
 0x45f   : > { %v12575_v59 = vpop.f32.mrf.mxu2  ;;  %v12577_v6 = vpop.f32.mrf.mxu0  ;;  %4929 = vmatpush.msrb.mxu3 %v9021_v56 }
 0x460   : > { %17028 = vst [vmem:[#allocation59_spill] sm:$0xff] %v12577_v6  ;;  %v12582_v60 = vpop.f32.mrf.mxu1  ;;  %v12584_v51 = vpop.f32.mrf.mxu3  ;;  %v16575_v6 = vrot.slane %v11985_v22, 4 }
 0x461   : > { %17029 = vst [vmem:[#allocation34_spill] sm:$0xff] %v12582_v60 }
 0x462   : > { %8775 = vmatmul.msk.f32.gmra.mxu0 %vm3423_vm7, %v12580_v2  ;;  %8807 = vmatmul.msk.f32.gmra.mxu1 %vm3423_vm7, %v12580_v2 }
 0x464   : > { %8856 = vmatmul.msk.f32.gmra.mxu2 %vm3423_vm7, %v3784_v15 }
 0x465   : > { %8888 = vmatmul.msk.f32.gmra.mxu3 %vm3423_vm7, %v3784_v15  ;;  %v4200_v15 = vsel %vm506_vm0, %v16575_v6, %v4199_v48  ;;  %v4201_v6 = vrot.slane %v12019_v5, 4 }
 0x467   : > { %v12600_v12 = vpop.f32.mrf.mxu2  ;;  %v12602_v60 = vpop.f32.mrf.mxu0  ;;  %v4202_v56 = vsel %vm506_vm0, %v4199_v48, %v4201_v6 }
 0x468   : > { %17030 = vst [vmem:[#allocation36_spill] sm:$0xff] %v12602_v60  ;;  %v12606_v17 = vpop.f32.mrf.mxu1  ;;  %v12608_v18 = vpop.f32.mrf.mxu3  ;;  %v3786_v60 = vsel %vm1176_vm3, %v3783_v44, %v3785_v25 }
 0x469   : > { %17031 = vst [vmem:[#allocation58_spill] sm:$0xff] %v12606_v17  ;;  %v9114_v17 = vld [vmem:[%s16525_s4 + $0x480] sm:$0xff] }
 0x46a   : > { %8932 = vmatmul.msk.f32.vlgmr.msra.gmra.mxu0 %vm3423_vm7, %v4200_v15  ;;  %8964 = vmatmul.msk.f32.vlgmr.msra.gmra.mxu1 %vm3423_vm7, %v4200_v15  ;;  %v3787_v15 = vrot.slane %v12380_v41, 2 }
 0x46b   : > { %5137 = vmatpush.msrb.mxu0 %v9114_v17 }
 0x46c   : > { %8857 = vmatmul.msk.f32.gmra.mxu2 %vm3423_vm7, %v3786_v60  ;;  %v3788_v17 = vsel %vm1176_vm3, %v3785_v25, %v3787_v15  ;;  %v9018_v25 = vld [vmem:[%s16525_s4 + $0x380] sm:$0xff] }
 0x46d   : > { %8889 = vmatmul.msk.f32.gmra.mxu3 %vm3423_vm7, %v3786_v60  ;;  %v9115_v60 = vld [vmem:[%s16525_s4 + $0x488] sm:$0xff]  ;;  %4817 = vmatpush.msra.mxu2 %v9018_v25  ;;  %v3791_v25 = vrot.slane %v12416_v19, 2 }
 0x46e   : > { %5250 = vmatpush.msrb.mxu1 %v9115_v60  ;;  %v9019_v60 = vld [vmem:[%s16525_s4 + $0x388] sm:$0xff] }
 0x46f   : > { %v12625_v28 = vpop.f32.mrf.mxu2  ;;  %v12627_v55 = vpop.f32.mrf.mxu0  ;;  %4930 = vmatpush.msrb.mxu3 %v9019_v60 }
 0x470   : > { %17032 = vst [vmem:[#allocation63_spill] sm:$0xff] %v12627_v55  ;;  %v12630_v34 = vpop.f32.mrf.mxu1  ;;  %v12632_v44 = vpop.f32.mrf.mxu3 }
 0x471   : > { %17033 = vst [vmem:[#allocation3_spill] sm:$0xff] %v12630_v34  ;;  %v4203_v34 = vrot.slane %v12036_v16, 4 }
 0x472   : > { %8933 = vmatmul.msk.f32.gmra.mxu0 %vm3423_vm7, %v4202_v56  ;;  %8965 = vmatmul.msk.f32.gmra.mxu1 %vm3423_vm7, %v4202_v56 }
 0x473   : > { %v4204_v56 = vsel %vm506_vm0, %v4201_v6, %v4203_v34 }
 0x474   : > { %8858 = vmatmul.msk.f32.gmra.mxu2 %vm3423_vm7, %v3788_v17 }
 0x475   : > { %8890 = vmatmul.msk.f32.gmra.mxu3 %vm3423_vm7, %v3788_v17  ;;  %v3790_v17 = vsel %vm1176_vm3, %v3787_v15, %v3789_v4  ;;  %v9112_v15 = vld [vmem:[%s16525_s4 + $0x470] sm:$0xff] }
 0x476   : > { %5138 = vmatpush.msrb.mxu0 %v9112_v15  ;;  %v3793_v15 = vrot.slane %v12434_v0, 2 }
 0x477   : > { %v12644_v55 = vpop.f32.mrf.mxu2  ;;  %v12646_v48 = vpop.f32.mrf.mxu0 }
 0x478   : > { %17034 = vst [vmem:[#allocation4_spill] sm:$0xff] %v12644_v55  ;;  %v12649_v32 = vpop.f32.mrf.mxu1  ;;  %v12651_v14 = vpop.f32.mrf.mxu3 }
 0x479   : > { %17035 = vst [vmem:[#allocation62_spill] sm:$0xff] %v12646_v48 }
 0x47a   : > { %17036 = vst [vmem:[#allocation67_spill] sm:$0xff] %v12649_v32  ;;  %8934 = vmatmul.msk.f32.gmra.mxu0 %vm3423_vm7, %v4204_v56  ;;  %8966 = vmatmul.msk.f32.gmra.mxu1 %vm3423_vm7, %v4204_v56  ;;  %v4205_v32 = vrot.slane %v12054_v33, 4 }
 0x47b   : > { %17037 = vst [vmem:[#allocation6_spill] sm:$0xff] %v12651_v14 }
 0x47c   : > { %8859 = vmatmul.msk.f32.gmra.mxu2 %vm3423_vm7, %v3790_v17  ;;  %v4206_v60 = vsel %vm506_vm0, %v4203_v34, %v4205_v32 }
 0x47d   : > { %8891 = vmatmul.msk.f32.gmra.mxu3 %vm3423_vm7, %v3790_v17  ;;  %v9113_v17 = vld [vmem:[%s16525_s4 + $0x478] sm:$0xff] }
 0x47e   : > { %5251 = vmatpush.msrb.mxu1 %v9113_v17  ;;  %v9017_v17 = vld [vmem:[%s16525_s4 + $0x378] sm:$0xff] }
 0x47f   : > { %v12666_v48 = vpop.f32.mrf.mxu2  ;;  %v12668_v6 = vpop.f32.mrf.mxu0  ;;  %4931 = vmatpush.msrb.mxu3 %v9017_v17 }
 0x480   : > { %17038 = vst [vmem:[#allocation66_spill] sm:$0xff] %v12666_v48  ;;  %v12671_v56 = vpop.f32.mrf.mxu1  ;;  %v12673_v13 = vpop.f32.mrf.mxu3 }
 0x481   : > { %17039 = vst [vmem:[#allocation70_spill] sm:$0xff] %v12668_v6  ;;  %v3792_v6 = vsel %vm1176_vm3, %v3789_v4, %v3791_v25  ;;  %v9016_v4 = vld [vmem:[%s16525_s4 + $0x370] sm:$0xff] }
 0x482   : > { %17040 = vst [vmem:[#allocation69_spill] sm:$0xff] %v12671_v56  ;;  %8935 = vmatmul.msk.f32.gmra.mxu0 %vm3423_vm7, %v4206_v60  ;;  %8967 = vmatmul.msk.f32.gmra.mxu1 %vm3423_vm7, %v4206_v60  ;;  %v4207_v56 = vrot.slane %v12070_v47, 4 }
 0x483   : > { %17041 = vst [vmem:[#allocation73_spill] sm:$0xff] %v12673_v13  ;;  %4818 = vmatpush.msra.mxu2 %v9016_v4 }
 0x484   : > { %8860 = vmatmul.msk.f32.gmra.mxu2 %vm3423_vm7, %v3792_v6  ;;  %v4208_v54 = vsel %vm506_vm0, %v4205_v32, %v4207_v56  ;;  %v4209_v32 = vrot.slane %v12087_v50, 4 }
 0x485   : > { %8892 = vmatmul.msk.f32.gmra.mxu3 %vm3423_vm7, %v3792_v6  ;;  %v3794_v6 = vsel %vm1176_vm3, %v3791_v25, %v3793_v15 }
 0x486   : > { %v4210_v4 = vsel %vm506_vm0, %v4207_v56, %v4209_v32  ;;  %v4211_v56 = vrot.slane %v12102_v29, 4 }
 0x487   : > { %v12688_v13 = vpop.f32.mrf.mxu2  ;;  %v12690_v34 = vpop.f32.mrf.mxu0 }
 0x488   : > { %17042 = vst [vmem:[#allocation10_spill] sm:$0xff] %v12688_v13  ;;  %v12693_v60 = vpop.f32.mrf.mxu1  ;;  %v12695_v48 = vpop.f32.mrf.mxu3 }
 0x489   : > { %17043 = vst [vmem:[#allocation72_spill] sm:$0xff] %v12690_v34 }
 0x48a   : > { %17044 = vst [vmem:[#allocation76_spill] sm:$0xff] %v12693_v60  ;;  %8936 = vmatmul.msk.f32.gmra.mxu0 %vm3423_vm7, %v4208_v54  ;;  %8968 = vmatmul.msk.f32.gmra.mxu1 %vm3423_vm7, %v4208_v54  ;;  %v3795_v54 = vrot.slane %v12449_v45, 2 }
 0x48b   : > { %17045 = vst [vmem:[#allocation75_spill] sm:$0xff] %v12695_v48 }
 0x48c   : > { %8861 = vmatmul.msk.f32.gmra.mxu2 %vm3423_vm7, %v3794_v6  ;;  %v3796_v17 = vsel %vm1176_vm3, %v3793_v15, %v3795_v54 }
 0x48d   : > { %8893 = vmatmul.msk.f32.gmra.mxu3 %vm3423_vm7, %v3794_v6  ;;  %v9110_v6 = vld [vmem:[%s16525_s4 + $0x460] sm:$0xff] }
 0x48e   : > { %5139 = vmatpush.msrb.mxu0 %v9110_v6  ;;  %v4212_v6 = vsel %vm506_vm0, %v4209_v32, %v4211_v56  ;;  %v4213_v32 = vrot.slane %v12133_v42, 4 }
 0x48f   : > { %v12710_v60 = vpop.f32.mrf.mxu2  ;;  %v12712_v34 = vpop.f32.mrf.mxu0 }
 0x490   : > { %17046 = vst [vmem:[#allocation79_spill] sm:$0xff] %v12710_v60  ;;  %v12715_v48 = vpop.f32.mrf.mxu1  ;;  %v12717_v25 = vpop.f32.mrf.mxu3 }
 0x491   : > { %17047 = vst [vmem:[#allocation78_spill] sm:$0xff] %v12712_v34 }
 0x492   : > { %17048 = vst [vmem:[#allocation82_spill] sm:$0xff] %v12715_v48  ;;  %8937 = vmatmul.msk.f32.gmra.mxu0 %vm3423_vm7, %v4210_v4  ;;  %8969 = vmatmul.msk.f32.gmra.mxu1 %vm3423_vm7, %v4210_v4  ;;  %v9111_v48 = vld [vmem:[%s16525_s4 + $0x468] sm:$0xff]  ;;  %v3797_v4 = vrot.slane %v12470_v31, 2 }
 0x493   : > { %17049 = vst [vmem:[#allocation81_spill] sm:$0xff] %v12717_v25  ;;  %5252 = vmatpush.msrb.mxu1 %v9111_v48 }
 0x494   : > { %8862 = vmatmul.msk.f32.gmra.mxu2 %vm3423_vm7, %v3796_v17  ;;  %v3798_v48 = vsel %vm1176_vm3, %v3795_v54, %v3797_v4 }
 0x495   : > { %8894 = vmatmul.msk.f32.gmra.mxu3 %vm3423_vm7, %v3796_v17  ;;  %v9014_v17 = vld [vmem:[%s16525_s4 + $0x360] sm:$0xff] }
 0x496   : > { %4819 = vmatpush.msra.mxu2 %v9014_v17  ;;  %v4214_v17 = vsel %vm506_vm0, %v4211_v56, %v4213_v32  ;;  %v9010_v56 = vld [vmem:[%s16525_s4 + $0x340] sm:$0xff] }
 0x497   : > { %v12732_v34 = vpop.f32.mrf.mxu2  ;;  %v12734_v25 = vpop.f32.mrf.mxu0 }
 0x498   : > { %17050 = vst [vmem:[#allocation85_spill] sm:$0xff] %v12732_v34  ;;  %v12737_v60 = vpop.f32.mrf.mxu1  ;;  %v12739_v15 = vpop.f32.mrf.mxu3 }
 0x499   : > { %17051 = vst [vmem:[#allocation16_spill] sm:$0xff] %v12734_v25 }
 0x49a   : > { %17052 = vst [vmem:[#allocation21_spill] sm:$0xff] %v12737_v60  ;;  %8938 = vmatmul.msk.f32.gmra.mxu0 %vm3423_vm7, %v4212_v6  ;;  %8970 = vmatmul.msk.f32.gmra.mxu1 %vm3423_vm7, %v4212_v6  ;;  %v9015_v60 = vld [vmem:[%s16525_s4 + $0x368] sm:$0xff]  ;;  %v3799_v6 = vrot.slane %v12491_v39, 2 }
 0x49b   : > { %17053 = vst [vmem:[#allocation84_spill] sm:$0xff] %v12739_v15  ;;  %4932 = vmatpush.msrb.mxu3 %v9015_v60  ;;  %v9012_v60 = vld [vmem:[%s16525_s4 + $0x350] sm:$0xff] }
 0x49c   : > { %8863 = vmatmul.msk.f32.gmra.mxu2 %vm3423_vm7, %v3798_v48 }
 0x49d   : > { %8895 = vmatmul.msk.f32.gmra.mxu3 %vm3423_vm7, %v3798_v48  ;;  %v9108_v48 = vld [vmem:[%s16525_s4 + $0x450] sm:$0xff]  ;;  %4820 = vmatpush.msra.mxu2 %v9012_v60 }
 0x49e   : > { %5140 = vmatpush.msrb.mxu0 %v9108_v48  ;;  %v9011_v48 = vld [vmem:[%s16525_s4 + $0x348] sm:$0xff] }
 0x49f   : > { %v12754_v25 = vpop.f32.mrf.mxu2  ;;  %v12756_v15 = vpop.f32.mrf.mxu0  ;;  %4821 = vmatpush.msra.mxu2 %v9010_v56 }
 0x4a0   : > { %17054 = vst [vmem:[#allocation87_spill] sm:$0xff] %v12754_v25  ;;  %v12759_v34 = vpop.f32.mrf.mxu1  ;;  %v12761_v54 = vpop.f32.mrf.mxu3  ;;  %v3801_v25 = vrot.slane %v12509_v11, 2 }
 0x4a1   : > { %17055 = vst [vmem:[#allocation65_spill] sm:$0xff] %v12756_v15  ;;  %v3800_v15 = vsel %vm1176_vm3, %v3797_v4, %v3799_v6  ;;  %v4215_v4 = vrot.slane %v12174_v43, 4 }
 0x4a2   : > { %17056 = vst [vmem:[#allocation26_spill] sm:$0xff] %v12759_v34  ;;  %8939 = vmatmul.msk.f32.gmra.mxu0 %vm3423_vm7, %v4214_v17  ;;  %8971 = vmatmul.msk.f32.gmra.mxu1 %vm3423_vm7, %v4214_v17  ;;  %v9013_v17 = vld [vmem:[%s16525_s4 + $0x358] sm:$0xff] }
 0x4a3   : > { %17057 = vst [vmem:[#allocation2_spill] sm:$0xff] %v12761_v54  ;;  %v9109_v34 = vld [vmem:[%s16525_s4 + $0x458] sm:$0xff]  ;;  %4933 = vmatpush.msrb.mxu3 %v9013_v17 }
 0x4a4   : > { %8864 = vmatmul.msk.f32.gmra.mxu2 %vm3423_vm7, %v3800_v15  ;;  %5253 = vmatpush.msrb.mxu1 %v9109_v34  ;;  %v9006_v34 = vld [vmem:[%s16525_s4 + $0x320] sm:$0xff]  ;;  %v9009_v17 = vld [vmem:[%s16525_s4 + $0x338] sm:$0xff] }
 0x4a5   : > { %8896 = vmatmul.msk.f32.gmra.mxu3 %vm3423_vm7, %v3800_v15  ;;  %v9008_v15 = vld [vmem:[%s16525_s4 + $0x330] sm:$0xff] }
 0x4a6   : > { %4822 = vmatpush.msra.mxu2 %v9008_v15  ;;  %4934 = vmatpush.msrb.mxu3 %v9011_v48  ;;  %v9004_v15 = vld [vmem:[%s16525_s4 + $0x310] sm:$0xff]  ;;  %v9007_v48 = vld [vmem:[%s16525_s4 + $0x328] sm:$0xff] }
 0x4a7   : > { %v12791_v60 = vpop.f32.mrf.mxu2  ;;  %v12793_v54 = vpop.f32.mrf.mxu0 }
 0x4a8   : > { %17058 = vst [vmem:[#allocation68_spill] sm:$0xff] %v12791_v60  ;;  %v12796_v13 = vpop.f32.mrf.mxu1  ;;  %v12798_v56 = vpop.f32.mrf.mxu3  ;;  %v4216_v60 = vsel %vm506_vm0, %v4213_v32, %v4215_v4  ;;  %4823 = vmatpush.msra.mxu2 %v9006_v34  ;;  %4935 = vmatpush.msrb.mxu3 %v9009_v17  ;;  %v9002_v32 = vld [vmem:[%s16525_s4 + $0x300] sm:$0xff]  ;;  %v4217_v34 = vrot.slane %v12201_v37, 4 }
 0x4a9   : > { %17059 = vst [vmem:[#allocation31_spill] sm:$0xff] %v12793_v54 }
 0x4aa   : > { %17060 = vst [vmem:[#allocation5_spill] sm:$0xff] %v12796_v13  ;;  %8940 = vmatmul.msk.f32.gmra.mxu0 %vm3423_vm7, %v4216_v60  ;;  %8972 = vmatmul.msk.f32.gmra.mxu1 %vm3423_vm7, %v4216_v60  ;;  %v3802_v13 = vsel %vm1176_vm3, %v3799_v6, %v3801_v25  ;;  %v9005_v60 = vld [vmem:[%s16525_s4 + $0x318] sm:$0xff]  ;;  %v9000_v6 = vld [vmem:[%s16525_s4 + $0x2f0] sm:$0xff] }
 0x4ab   : > { %17061 = vst [vmem:[#allocation71_spill] sm:$0xff] %v12798_v56  ;;  %4824 = vmatpush.msra.mxu2 %v9004_v15  ;;  %4936 = vmatpush.msrb.mxu3 %v9007_v48  ;;  %v3803_v48 = vrot.slane %v12530_v24, 2  ;;  %v9001_v56 = vld [vmem:[%s16525_s4 + $0x2f8] sm:$0xff] }
 0x4ac   : > { %8865 = vmatmul.msk.f32.gmra.mxu2 %vm3423_vm7, %v3802_v13 }
 0x4ad   : > { %8897 = vmatmul.msk.f32.gmra.mxu3 %vm3423_vm7, %v3802_v13  ;;  %4825 = vmatpush.msra.mxu2 %v9002_v32  ;;  %v9003_v13 = vld [vmem:[%s16525_s4 + $0x308] sm:$0xff] }
 0x4ae   : > { %4937 = vmatpush.msrb.mxu3 %v9005_v60  ;;  %v8998_v60 = vld [vmem:[%s16525_s4 + $0x2e0] sm:$0xff] }
 0x4af   : > { %v12831_v17 = vpop.f32.mrf.mxu2  ;;  %v12833_v15 = vpop.f32.mrf.mxu0  ;;  %4826 = vmatpush.msra.mxu2 %v9000_v6  ;;  %v9106_v6 = vld [vmem:[%s16525_s4 + $0x440] sm:$0xff] }
 0x4b0   : > { %17062 = vst [vmem:[#allocation37_spill] sm:$0xff] %v12831_v17  ;;  %4938 = vmatpush.msrb.mxu3 %v9003_v13  ;;  %v12836_v54 = vpop.f32.mrf.mxu1  ;;  %v12838_v32 = vpop.f32.mrf.mxu3  ;;  %v4218_v17 = vsel %vm506_vm0, %v4215_v4, %v4217_v34  ;;  %v8996_v13 = vld [vmem:[%s16525_s4 + $0x2d0] sm:$0xff]  ;;  %v3804_v4 = vsel %vm1176_vm3, %v3801_v25, %v3803_v48  ;;  %5141 = vmatpush.msrb.mxu0 %v9106_v6  ;;  %v3805_v6 = vrot.slane %v12553_v62, 2 }
 0x4b1   : > { %17063 = vst [vmem:[#allocation56_spill] sm:$0xff] %v12833_v15  ;;  %4827 = vmatpush.msra.mxu2 %v8998_v60  ;;  %v4219_v60 = vrot.slane %v12217_v26, 4 }
 0x4b2   : > { %17064 = vst [vmem:[#allocation7_spill] sm:$0xff] %v12836_v54  ;;  %4939 = vmatpush.msrb.mxu3 %v9001_v56  ;;  %8941 = vmatmul.msk.f32.gmra.mxu0 %vm3423_vm7, %v4218_v17  ;;  %v8999_v54 = vld [vmem:[%s16525_s4 + $0x2e8] sm:$0xff]  ;;  %v8997_v56 = vld [vmem:[%s16525_s4 + $0x2d8] sm:$0xff] }
 0x4b3   : > { %17065 = vst [vmem:[#allocation74_spill] sm:$0xff] %v12838_v32  ;;  %8973 = vmatmul.msk.f32.gmra.mxu1 %vm3423_vm7, %v4218_v17  ;;  %4828 = vmatpush.msra.mxu2 %v8996_v13  ;;  %v9107_v17 = vld [vmem:[%s16525_s4 + $0x448] sm:$0xff]  ;;  %v4220_v32 = vsel %vm506_vm0, %v4217_v34, %v4219_v60 }
 0x4b4   : > { %8866 = vmatmul.msk.f32.gmra.mxu2 %vm3423_vm7, %v3804_v4  ;;  %4940 = vmatpush.msrb.mxu3 %v8999_v54  ;;  %v3806_v54 = vsel %vm1176_vm3, %v3803_v48, %v3805_v6  ;;  %v9104_v48 = vld [vmem:[%s16525_s4 + $0x430] sm:$0xff] }
 0x4b5   : > { %8898 = vmatmul.msk.f32.gmra.mxu3 %vm3423_vm7, %v3804_v4  ;;  %5254 = vmatpush.msrb.mxu1 %v9107_v17  ;;  %v4221_v17 = vrot.slane %v12228_v21, 4 }
 0x4b6   : > { %4941 = vmatpush.msrb.mxu3 %v8997_v56  ;;  %5142 = vmatpush.msrb.mxu0 %v9104_v48  ;;  %v17078_v48 = vrot.slane %v11985_v22, 2 }
 0x4b7   : > { %v12868_v15 = vpop.f32.mrf.mxu2  ;;  %v12870_v25 = vpop.f32.mrf.mxu0 }
 0x4b8   : > { %17066 = vst [vmem:[#allocation60_spill] sm:$0xff] %v12868_v15  ;;  %v12873_v13 = vpop.f32.mrf.mxu1  ;;  %v12875_v4 = vpop.f32.mrf.mxu3 }
 0x4b9   : > { %17067 = vst [vmem:[#allocation38_spill] sm:$0xff] %v12870_v25 }
 0x4ba   : > { %17068 = vst [vmem:[#allocation77_spill] sm:$0xff] %v12873_v13  ;;  %8942 = vmatmul.msk.f32.gmra.mxu0 %vm3423_vm7, %v4220_v32  ;;  %v3807_v13 = vrot.slane %v12580_v2, 2 }
 0x4bb   : > { %17069 = vst [vmem:[#allocation41_spill] sm:$0xff] %v12875_v4  ;;  %8974 = vmatmul.msk.f32.gmra.mxu1 %vm3423_vm7, %v4220_v32  ;;  %v4222_v32 = vsel %vm506_vm0, %v4219_v60, %v4221_v17 }
 0x4bc   : > { %8867 = vmatmul.msk.f32.gmra.mxu2 %vm3423_vm7, %v3806_v54 }
 0x4bd   : > { %8899 = vmatmul.msk.f32.gmra.mxu3 %vm3423_vm7, %v3806_v54  ;;  %v3808_v54 = vsel %vm1176_vm3, %v3805_v6, %v3807_v13 }
 0x4bf   : > { %v12884_v25 = vpop.f32.mrf.mxu2  ;;  %v12886_v56 = vpop.f32.mrf.mxu0 }
 0x4c0   : > { %17070 = vst [vmem:[#allocation44_spill] sm:$0xff] %v12884_v25  ;;  %v12889_v4 = vpop.f32.mrf.mxu1  ;;  %v12891_v34 = vpop.f32.mrf.mxu3  ;;  %v9105_v25 = vld [vmem:[%s16525_s4 + $0x438] sm:$0xff] }
 0x4c1   : > { %17071 = vst [vmem:[#allocation8_spill] sm:$0xff] %v12886_v56  ;;  %5255 = vmatpush.msrb.mxu1 %v9105_v25  ;;  %v4652_v25 = vrot.slane %v12003_v27, 6 }
 0x4c2   : > { %17072 = vst [vmem:[#allocation80_spill] sm:$0xff] %v12889_v4  ;;  %8943 = vmatmul.msk.f32.gmra.mxu0 %vm3423_vm7, %v4222_v32  ;;  %v4223_v4 = vrot.slane %v12246_v61, 4 }
 0x4c3   : > { %17073 = vst [vmem:[#allocation47_spill] sm:$0xff] %v12891_v34  ;;  %8975 = vmatmul.msk.f32.gmra.mxu1 %vm3423_vm7, %v4222_v32 }
 0x4c4   : > { %8868 = vmatmul.msk.f32.gmra.mxu2 %vm3423_vm7, %v3808_v54  ;;  %v4224_v6 = vsel %vm506_vm0, %v4221_v17, %v4223_v4 }
 0x4c5   : > { %8900 = vmatmul.msk.f32.gmra.mxu3 %vm3423_vm7, %v3808_v54  ;;  %v3811_v54 = vsel %vm1176_vm3, %v3807_v13, %v17078_v48  ;;  %v16576_v13 = vrot.slane %v11985_v22, 6 }
 0x4c7   : > { %v12903_v56 = vpop.f32.mrf.mxu2  ;;  %v12905_v60 = vpop.f32.mrf.mxu0  ;;  %v4653_v48 = vsel %vm4650_vm8, %v16576_v13, %v4652_v25 }
 0x4c8   : > { %17074 = vst [vmem:[#allocation50_spill] sm:$0xff] %v12903_v56  ;;  %v12907_v34 = vpop.f32.mrf.mxu1  ;;  %v12909_v32 = vpop.f32.mrf.mxu3 }
 0x4c9   : > { %17075 = vst [vmem:[#allocation83_spill] sm:$0xff] %v12905_v60 }
 0x4ca   : > { %17076 = vst [vmem:[#allocation53_spill] sm:$0xff] %v12907_v34  ;;  %8944 = vmatmul.msk.f32.gmra.mxu0 %vm3423_vm7, %v4224_v6  ;;  %v4225_v34 = vrot.slane %v12260_v35, 4 }
 0x4cb   : > { %17077 = vst [vmem:[#allocation88_spill] sm:$0xff] %v12909_v32  ;;  %8976 = vmatmul.msk.f32.gmra.mxu1 %vm3423_vm7, %v4224_v6 }
 0x4cc   : > { %8869 = vmatmul.msk.f32.gmra.mxu2 %vm3423_vm7, %v3811_v54  ;;  %v4226_v6 = vsel %vm506_vm0, %v4223_v4, %v4225_v34  ;;  %v4227_v4 = vrot.slane %v12277_v57, 4 }
 0x4cd   : > { %8901 = vmatmul.msk.f32.gmra.mxu3 %vm3423_vm7, %v3811_v54  ;;  %v9102_v54 = vld [vmem:[%s16525_s4 + $0x420] sm:$0xff] }
 0x4ce   : > { %5143 = vmatpush.msrb.mxu0 %v9102_v54 }
 0x4cf   : > { %v12923_v60 = vpop.f32.mrf.mxu2  ;;  %v12925_v32 = vpop.f32.mrf.mxu0 }
 0x4d0   : > { %17079 = vst [vmem:[#allocation9_spill] sm:$0xff] %v12923_v60  ;;  %v12928_v17 = vpop.f32.mrf.mxu1  ;;  %v12930_v56 = vpop.f32.mrf.mxu3  ;;  %v4228_v60 = vsel %vm506_vm0, %v4225_v34, %v4227_v4 }
 0x4d1   : > { %17080 = vst [vmem:[#allocation86_spill] sm:$0xff] %v12925_v32 }
 0x4d2   : > { %17081 = vst [vmem:[#allocation57_spill] sm:$0xff] %v12928_v17  ;;  %8945 = vmatmul.msk.f32.gmra.mxu0 %vm3423_vm7, %v4226_v6 }
 0x4d3   : > { %17082 = vst [vmem:[#allocation89_spill] sm:$0xff] %v12930_v56  ;;  %8977 = vmatmul.msk.f32.gmra.mxu1 %vm3423_vm7, %v4226_v6  ;;  %v4654_v6 = vrot.slane %v12019_v5, 6 }
 0x4d4   : > { %9026 = vmatmul.msk.f32.vlgmr.msra.gmra.mxu2 %vm3423_vm7, %v4653_v48 }
 0x4d5   : > { %9058 = vmatmul.msk.f32.vlgmr.msrb.gmra.mxu3 %vm3423_vm7, %v4653_v48  ;;  %v9103_v48 = vld [vmem:[%s16525_s4 + $0x428] sm:$0xff]  ;;  %v4655_v54 = vsel %vm4650_vm8, %v4652_v25, %v4654_v6 }
 0x4d6   : > { %5256 = vmatpush.msrb.mxu1 %v9103_v48  ;;  %v9100_v48 = vld [vmem:[%s16525_s4 + $0x410] sm:$0xff] }
 0x4d7   : > { %v12945_v17 = vpop.f32.mrf.mxu2  ;;  %v12947_v32 = vpop.f32.mrf.mxu0  ;;  %5144 = vmatpush.msrb.mxu0 %v9100_v48 }
 0x4d8   : > { %17083 = vst [vmem:[#allocation61_spill] sm:$0xff] %v12945_v17  ;;  %v12950_v56 = vpop.f32.mrf.mxu1  ;;  %v12952_v13 = vpop.f32.mrf.mxu3 }
 0x4d9   : > { %17084 = vst [vmem:[#allocation90_spill] sm:$0xff] %v12947_v32 }
 0x4da   : > { %17085 = vst [vmem:[#allocation91_spill] sm:$0xff] %v12950_v56  ;;  %8946 = vmatmul.msk.f32.gmra.mxu0 %vm3423_vm7, %v4228_v60  ;;  %v4229_v56 = vrot.slane %v12290_v63, 4 }
 0x4db   : > { %17086 = vst [vmem:[#allocation92_spill] sm:$0xff] %v12952_v13  ;;  %8978 = vmatmul.msk.f32.gmra.mxu1 %vm3423_vm7, %v4228_v60  ;;  %v4656_v13 = vrot.slane %v12036_v16, 6 }
 0x4dc   : > { %9027 = vmatmul.msk.f32.gmra.mxu2 %vm3423_vm7, %v4655_v54  ;;  %v4230_v60 = vsel %vm506_vm0, %v4227_v4, %v4229_v56 }
 0x4dd   : > { %9059 = vmatmul.msk.f32.gmra.mxu3 %vm3423_vm7, %v4655_v54  ;;  %v4657_v25 = vsel %vm4650_vm8, %v4654_v6, %v4656_v13  ;;  %v4231_v54 = vrot.slane %v12308_v7, 4 }
 0x4df   : > { %v12964_v32 = vpop.f32.mrf.mxu2  ;;  %v12966_v34 = vpop.f32.mrf.mxu0 }
 0x4e0   : > { %17087 = vst [vmem:[#allocation93_spill] sm:$0xff] %v12964_v32  ;;  %v12969_v17 = vpop.f32.mrf.mxu1  ;;  %v12971_v15 = vpop.f32.mrf.mxu3  ;;  %v4660_v32 = vrot.slane %v12070_v47, 6 }
 0x4e1   : > { %17088 = vst [vmem:[#allocation94_spill] sm:$0xff] %v12966_v34  ;;  %v4658_v34 = vrot.slane %v12054_v33, 6 }
 0x4e2   : > { %17089 = vst [vmem:[#allocation95_spill] sm:$0xff] %v12969_v17  ;;  %8947 = vmatmul.msk.f32.gmra.mxu0 %vm3423_vm7, %v4230_v60 }
 0x4e3   : > { %17090 = vst [vmem:[#allocation96_spill] sm:$0xff] %v12971_v15  ;;  %8979 = vmatmul.msk.f32.gmra.mxu1 %vm3423_vm7, %v4230_v60  ;;  %v4232_v15 = vsel %vm506_vm0, %v4229_v56, %v4231_v54  ;;  %v4659_v48 = vsel %vm4650_vm8, %v4656_v13, %v4658_v34  ;;  %v4661_v13 = vsel %vm4650_vm8, %v4658_v34, %v4660_v32 }
 0x4e4   : > { %9028 = vmatmul.msk.f32.gmra.mxu2 %vm3423_vm7, %v4657_v25 }
 0x4e5   : > { %9060 = vmatmul.msk.f32.gmra.mxu3 %vm3423_vm7, %v4657_v25  ;;  %v9101_v25 = vld [vmem:[%s16525_s4 + $0x418] sm:$0xff] }
 0x4e6   : > { %5257 = vmatpush.msrb.mxu1 %v9101_v25  ;;  %v9098_v25 = vld [vmem:[%s16525_s4 + $0x400] sm:$0xff] }
 0x4e7   : > { %v12983_v17 = vpop.f32.mrf.mxu2  ;;  %v12985_v4 = vpop.f32.mrf.mxu0  ;;  %5145 = vmatpush.msrb.mxu0 %v9098_v25 }
 0x4e8   : > { %17091 = vst [vmem:[#allocation97_spill] sm:$0xff] %v12983_v17  ;;  %v12988_v60 = vpop.f32.mrf.mxu1  ;;  %v12990_v6 = vpop.f32.mrf.mxu3  ;;  %v4233_v17 = vrot.slane %v12326_v10, 4 }
 0x4e9   : > { %17092 = vst [vmem:[#allocation98_spill] sm:$0xff] %v12990_v6 }
 0x4ea   : > { %8948 = vmatmul.msk.f32.gmra.mxu0 %vm3423_vm7, %v4232_v15 }
 0x4eb   : > { %8980 = vmatmul.msk.f32.gmra.mxu1 %vm3423_vm7, %v4232_v15  ;;  %v4234_v15 = vsel %vm506_vm0, %v4231_v54, %v4233_v17 }
 0x4ec   : > { %9029 = vmatmul.msk.f32.gmra.mxu2 %vm3423_vm7, %v4659_v48 }
 0x4ed   : > { %9061 = vmatmul.msk.f32.gmra.mxu3 %vm3423_vm7, %v4659_v48  ;;  %v4235_v48 = vrot.slane %v12344_v52, 4 }
 0x4ef   : > { %v13002_v6 = vpop.f32.mrf.mxu2  ;;  %v13004_v56 = vpop.f32.mrf.mxu0  ;;  %v4236_v47 = vsel %vm506_vm0, %v4233_v17, %v4235_v48 }
 0x4f0   : > { %17093 = vst [vmem:[#allocation99_spill] sm:$0xff] %v13002_v6  ;;  %v13007_v33 = vpop.f32.mrf.mxu1  ;;  %v13009_v16 = vpop.f32.mrf.mxu3  ;;  %v4662_v6 = vrot.slane %v12087_v50, 6  ;;  %v4664_v50 = vrot.slane %v12102_v29, 6 }
 0x4f1   : > { %17094 = vst [vmem:[#allocation100_spill] sm:$0xff] %v13009_v16 }
 0x4f2   : > { %8949 = vmatmul.msk.f32.gmra.mxu0 %vm3423_vm7, %v4234_v15  ;;  %v4663_v25 = vsel %vm4650_vm8, %v4660_v32, %v4662_v6  ;;  %v4665_v32 = vsel %vm4650_vm8, %v4662_v6, %v4664_v50  ;;  %v9096_v6 = vld [vmem:[%s16525_s4 + $0x3f0] sm:$0xff] }
 0x4f3   : > { %8981 = vmatmul.msk.f32.gmra.mxu1 %vm3423_vm7, %v4234_v15  ;;  %5146 = vmatpush.msrb.mxu0 %v9096_v6  ;;  %v4668_v6 = vrot.slane %v12174_v43, 6 }
 0x4f4   : > { %9030 = vmatmul.msk.f32.gmra.mxu2 %vm3423_vm7, %v4661_v13 }
 0x4f5   : > { %9062 = vmatmul.msk.f32.gmra.mxu3 %vm3423_vm7, %v4661_v13  ;;  %v9099_v13 = vld [vmem:[%s16525_s4 + $0x408] sm:$0xff] }
 0x4f6   : > { %5258 = vmatpush.msrb.mxu1 %v9099_v13  ;;  %v4239_v13 = vrot.slane %v12380_v41, 4 }
 0x4f7   : > { %v13021_v16 = vpop.f32.mrf.mxu2  ;;  %v13023_v54 = vpop.f32.mrf.mxu0 }
 0x4f8   : > { %17095 = vst [vmem:[#allocation101_spill] sm:$0xff] %v13021_v16  ;;  %v13026_v15 = vpop.f32.mrf.mxu1  ;;  %v13028_v34 = vpop.f32.mrf.mxu3  ;;  %v4237_v16 = vrot.slane %v12362_v1, 4 }
 0x4f9   : > { %17096 = vst [vmem:[#allocation102_spill] sm:$0xff] %v13028_v34 }
 0x4fa   : > { %8950 = vmatmul.msk.f32.gmra.mxu0 %vm3423_vm7, %v4236_v47 }
 0x4fb   : > { %8982 = vmatmul.msk.f32.gmra.mxu1 %vm3423_vm7, %v4236_v47  ;;  %v4238_v47 = vsel %vm506_vm0, %v4235_v48, %v4237_v16 }
 0x4fc   : > { %9031 = vmatmul.msk.f32.gmra.mxu2 %vm3423_vm7, %v4663_v25 }
 0x4fd   : > { %9063 = vmatmul.msk.f32.gmra.mxu3 %vm3423_vm7, %v4663_v25 }
 0x4ff   : > { %v13040_v34 = vpop.f32.mrf.mxu2  ;;  %v13042_v17 = vpop.f32.mrf.mxu0 }
 0x500   : > { %17097 = vst [vmem:[#allocation103_spill] sm:$0xff] %v13040_v34  ;;  %v13045_v14 = vpop.f32.mrf.mxu1  ;;  %v13047_v55 = vpop.f32.mrf.mxu3 }
 0x501   : > { %17098 = vst [vmem:[#allocation104_spill] sm:$0xff] %v13047_v55  ;;  %v4666_v55 = vrot.slane %v12133_v42, 6 }
 0x502   : > { %8951 = vmatmul.msk.f32.gmra.mxu0 %vm3423_vm7, %v4238_v47 }
 0x503   : > { %8983 = vmatmul.msk.f32.gmra.mxu1 %vm3423_vm7, %v4238_v47  ;;  %v4240_v47 = vsel %vm506_vm0, %v4237_v16, %v4239_v13 }
 0x504   : > { %9032 = vmatmul.msk.f32.gmra.mxu2 %vm3423_vm7, %v4665_v32 }
 0x505   : > { %9064 = vmatmul.msk.f32.gmra.mxu3 %vm3423_vm7, %v4665_v32  ;;  %v9097_v32 = vld [vmem:[%s16525_s4 + $0x3f8] sm:$0xff] }
 0x506   : > { %5259 = vmatpush.msrb.mxu1 %v9097_v32 }
 0x507   : > { %v13056_v25 = vpop.f32.mrf.mxu2  ;;  %v13058_v34 = vpop.f32.mrf.mxu0 }
 0x508   : > { %17099 = vst [vmem:[#allocation105_spill] sm:$0xff] %v13056_v25  ;;  %v13061_v29 = vpop.f32.mrf.mxu1  ;;  %v13063_v48 = vpop.f32.mrf.mxu3  ;;  %v4667_v25 = vsel %vm4650_vm8, %v4664_v50, %v4666_v55  ;;  %v4669_v50 = vsel %vm4650_vm8, %v4666_v55, %v4668_v6  ;;  %v9094_v55 = vld [vmem:[%s16525_s4 + $0x3e0] sm:$0xff] }
 0x509   : > { %17100 = vst [vmem:[#allocation106_spill] sm:$0xff] %v13058_v34  ;;  %5147 = vmatpush.msrb.mxu0 %v9094_v55 }
 0x50a   : > { %17101 = vst [vmem:[#allocation107_spill] sm:$0xff] %v13061_v29  ;;  %8952 = vmatmul.msk.f32.gmra.mxu0 %vm3423_vm7, %v4240_v47 }
 0x50b   : > { %17102 = vst [vmem:[#allocation108_spill] sm:$0xff] %v13063_v48  ;;  %8984 = vmatmul.msk.f32.gmra.mxu1 %vm3423_vm7, %v4240_v47  ;;  %v4241_v48 = vrot.slane %v12398_v3, 4 }
 0x50c   : > { %9033 = vmatmul.msk.f32.gmra.mxu2 %vm3423_vm7, %v4667_v25 }
 0x50d   : > { %9065 = vmatmul.msk.f32.gmra.mxu3 %vm3423_vm7, %v4667_v25  ;;  %v4242_v34 = vsel %vm506_vm0, %v4239_v13, %v4241_v48  ;;  %v4243_v25 = vrot.slane %v12416_v19, 4 }
 0x50f   : > { %v13078_v42 = vpop.f32.mrf.mxu2  ;;  %v13080_v16 = vpop.f32.mrf.mxu0 }
 0x510   : > { %17103 = vst [vmem:[#allocation109_spill] sm:$0xff] %v13078_v42  ;;  %v13083_v47 = vpop.f32.mrf.mxu1  ;;  %v13085_v29 = vpop.f32.mrf.mxu3 }
 0x511   : > { %17104 = vst [vmem:[#allocation110_spill] sm:$0xff] %v13085_v29  ;;  %v4670_v29 = vrot.slane %v12201_v37, 6 }
 0x512   : > { %8953 = vmatmul.msk.f32.gmra.mxu0 %vm3423_vm7, %v4242_v34 }
 0x513   : > { %8985 = vmatmul.msk.f32.gmra.mxu1 %vm3423_vm7, %v4242_v34  ;;  %v4244_v34 = vsel %vm506_vm0, %v4241_v48, %v4243_v25  ;;  %v4245_v48 = vrot.slane %v12434_v0, 4 }
 0x514   : > { %9034 = vmatmul.msk.f32.gmra.mxu2 %vm3423_vm7, %v4669_v50 }
 0x515   : > { %9066 = vmatmul.msk.f32.gmra.mxu3 %vm3423_vm7, %v4669_v50  ;;  %v4671_v50 = vsel %vm4650_vm8, %v4668_v6, %v4670_v29  ;;  %v4246_v55 = vsel %vm506_vm0, %v4243_v25, %v4245_v48 }
 0x517   : > { %v13094_v32 = vpop.f32.mrf.mxu2  ;;  %v13096_v42 = vpop.f32.mrf.mxu0 }
 0x518   : > { %17105 = vst [vmem:[#allocation111_spill] sm:$0xff] %v13094_v32  ;;  %v13099_v43 = vpop.f32.mrf.mxu1  ;;  %v13101_v13 = vpop.f32.mrf.mxu3 }
 0x519   : > { %17106 = vst [vmem:[#allocation112_spill] sm:$0xff] %v13099_v43 }
 0x51a   : > { %17107 = vst [vmem:[#allocation113_spill] sm:$0xff] %v13101_v13  ;;  %8954 = vmatmul.msk.f32.gmra.mxu0 %vm3423_vm7, %v4244_v34  ;;  %v9095_v13 = vld [vmem:[%s16525_s4 + $0x3e8] sm:$0xff] }
 0x51b   : > { %8986 = vmatmul.msk.f32.gmra.mxu1 %vm3423_vm7, %v4244_v34  ;;  %v4672_v34 = vrot.slane %v12217_v26, 6 }
 0x51c   : > { %9035 = vmatmul.msk.f32.gmra.mxu2 %vm3423_vm7, %v4671_v50  ;;  %5260 = vmatpush.msrb.mxu1 %v9095_v13  ;;  %v4247_v13 = vrot.slane %v12449_v45, 4 }
 0x51d   : > { %9067 = vmatmul.msk.f32.gmra.mxu3 %vm3423_vm7, %v4671_v50  ;;  %v4673_v50 = vsel %vm4650_vm8, %v4670_v29, %v4672_v34  ;;  %v9092_v29 = vld [vmem:[%s16525_s4 + $0x3d0] sm:$0xff] }
 0x51e   : > { %5148 = vmatpush.msrb.mxu0 %v9092_v29 }
 0x51f   : > { %v13116_v32 = vpop.f32.mrf.mxu2  ;;  %v13118_v37 = vpop.f32.mrf.mxu0 }
 0x520   : > { %17108 = vst [vmem:[#allocation114_spill] sm:$0xff] %v13116_v32  ;;  %v13121_v43 = vpop.f32.mrf.mxu1  ;;  %v13123_v6 = vpop.f32.mrf.mxu3 }
 0x521   : > { %17109 = vst [vmem:[#allocation115_spill] sm:$0xff] %v13121_v43 }
 0x522   : > { %17110 = vst [vmem:[#allocation116_spill] sm:$0xff] %v13123_v6  ;;  %8955 = vmatmul.msk.f32.gmra.mxu0 %vm3423_vm7, %v4246_v55  ;;  %v4674_v6 = vrot.slane %v12228_v21, 6 }
 0x523   : > { %8987 = vmatmul.msk.f32.gmra.mxu1 %vm3423_vm7, %v4246_v55  ;;  %v4248_v55 = vsel %vm506_vm0, %v4245_v48, %v4247_v13  ;;  %v4249_v48 = vrot.slane %v12470_v31, 4 }
 0x524   : > { %9036 = vmatmul.msk.f32.gmra.mxu2 %vm3423_vm7, %v4673_v50 }
 0x525   : > { %9068 = vmatmul.msk.f32.gmra.mxu3 %vm3423_vm7, %v4673_v50  ;;  %v4675_v50 = vsel %vm4650_vm8, %v4672_v34, %v4674_v6  ;;  %v4250_v29 = vsel %vm506_vm0, %v4247_v13, %v4249_v48 }
 0x527   : > { %v13132_v32 = vpop.f32.mrf.mxu2  ;;  %v13134_v26 = vpop.f32.mrf.mxu0 }
 0x528   : > { %17111 = vst [vmem:[#allocation117_spill] sm:$0xff] %v13132_v32  ;;  %v13137_v43 = vpop.f32.mrf.mxu1  ;;  %v13139_v25 = vpop.f32.mrf.mxu3 }
 0x529   : > { %17112 = vst [vmem:[#allocation118_spill] sm:$0xff] %v13134_v26 }
 0x52a   : > { %17113 = vst [vmem:[#allocation119_spill] sm:$0xff] %v13137_v43  ;;  %8956 = vmatmul.msk.f32.gmra.mxu0 %vm3423_vm7, %v4248_v55 }
 0x52b   : > { %17114 = vst [vmem:[#allocation120_spill] sm:$0xff] %v13139_v25  ;;  %8988 = vmatmul.msk.f32.gmra.mxu1 %vm3423_vm7, %v4248_v55  ;;  %v9093_v25 = vld [vmem:[%s16525_s4 + $0x3d8] sm:$0xff]  ;;  %v4676_v55 = vrot.slane %v12246_v61, 6 }
 0x52c   : > { %9037 = vmatmul.msk.f32.gmra.mxu2 %vm3423_vm7, %v4675_v50  ;;  %5261 = vmatpush.msrb.mxu1 %v9093_v25  ;;  %v4251_v25 = vrot.slane %v12491_v39, 4 }
 0x52d   : > { %9069 = vmatmul.msk.f32.gmra.mxu3 %vm3423_vm7, %v4675_v50  ;;  %v4677_v50 = vsel %vm4650_vm8, %v4674_v6, %v4676_v55  ;;  %v9090_v6 = vld [vmem:[%s16525_s4 + $0x3c0] sm:$0xff] }
 0x52e   : > { %5149 = vmatpush.msrb.mxu0 %v9090_v6 }
 0x52f   : > { %v13154_v32 = vpop.f32.mrf.mxu2  ;;  %v13156_v43 = vpop.f32.mrf.mxu0 }
 0x530   : > { %17115 = vst [vmem:[#allocation121_spill] sm:$0xff] %v13154_v32  ;;  %v13159_v26 = vpop.f32.mrf.mxu1  ;;  %v13161_v34 = vpop.f32.mrf.mxu3 }
 0x531   : > { %17116 = vst [vmem:[#allocation122_spill] sm:$0xff] %v13156_v43 }
 0x532   : > { %17117 = vst [vmem:[#allocation123_spill] sm:$0xff] %v13159_v26  ;;  %8957 = vmatmul.msk.f32.gmra.mxu0 %vm3423_vm7, %v4250_v29 }
 0x533   : > { %17118 = vst [vmem:[#allocation124_spill] sm:$0xff] %v13161_v34  ;;  %8989 = vmatmul.msk.f32.gmra.mxu1 %vm3423_vm7, %v4250_v29  ;;  %v4678_v34 = vrot.slane %v12260_v35, 6  ;;  %v4252_v29 = vsel %vm506_vm0, %v4249_v48, %v4251_v25  ;;  %v4253_v48 = vrot.slane %v12509_v11, 4 }
 0x534   : > { %9038 = vmatmul.msk.f32.gmra.mxu2 %vm3423_vm7, %v4677_v50 }
 0x535   : > { %9070 = vmatmul.msk.f32.gmra.mxu3 %vm3423_vm7, %v4677_v50  ;;  %v4679_v50 = vsel %vm4650_vm8, %v4676_v55, %v4678_v34  ;;  %v4254_v6 = vsel %vm506_vm0, %v4251_v25, %v4253_v48 }
 0x537   : > { %v13170_v32 = vpop.f32.mrf.mxu2  ;;  %v13172_v43 = vpop.f32.mrf.mxu0 }
 0x538   : > { %17119 = vst [vmem:[#allocation125_spill] sm:$0xff] %v13170_v32  ;;  %v13175_v26 = vpop.f32.mrf.mxu1  ;;  %v13177_v13 = vpop.f32.mrf.mxu3 }
 0x539   : > { %17120 = vst [vmem:[#allocation126_spill] sm:$0xff] %v13172_v43 }
 0x53a   : > { %17121 = vst [vmem:[#allocation127_spill] sm:$0xff] %v13175_v26  ;;  %8958 = vmatmul.msk.f32.gmra.mxu0 %vm3423_vm7, %v4252_v29 }
 0x53b   : > { %17122 = vst [vmem:[#allocation128_spill] sm:$0xff] %v13177_v13  ;;  %8990 = vmatmul.msk.f32.gmra.mxu1 %vm3423_vm7, %v4252_v29  ;;  %v9091_v13 = vld [vmem:[%s16525_s4 + $0x3c8] sm:$0xff]  ;;  %v4680_v29 = vrot.slane %v12277_v57, 6 }
 0x53c   : > { %9039 = vmatmul.msk.f32.gmra.mxu2 %vm3423_vm7, %v4679_v50  ;;  %5262 = vmatpush.msrb.mxu1 %v9091_v13  ;;  %v4255_v13 = vrot.slane %v12530_v24, 4 }
 0x53d   : > { %9071 = vmatmul.msk.f32.gmra.mxu3 %vm3423_vm7, %v4679_v50  ;;  %v4681_v50 = vsel %vm4650_vm8, %v4678_v34, %v4680_v29  ;;  %v3417_v34 = vld [vmem:[%s16526_s5] sm:$0x3] }
 0x53f   : > { %v13192_v32 = vpop.f32.mrf.mxu2  ;;  %v13194_v26 = vpop.f32.mrf.mxu0 }
 0x540   : > { %17123 = vst [vmem:[#allocation129_spill] sm:$0xff] %v13192_v32  ;;  %v13197_v43 = vpop.f32.mrf.mxu1  ;;  %v13199_v55 = vpop.f32.mrf.mxu3 }
 0x541   : > { %17124 = vst [vmem:[#allocation130_spill] sm:$0xff] %v13194_v26 }
 0x542   : > { %17125 = vst [vmem:[#allocation131_spill] sm:$0xff] %v13197_v43  ;;  %8959 = vmatmul.msk.f32.gmra.mxu0 %vm3423_vm7, %v4254_v6 }
 0x543   : > { %17126 = vst [vmem:[#allocation132_spill] sm:$0xff] %v13199_v55  ;;  %8991 = vmatmul.msk.f32.gmra.mxu1 %vm3423_vm7, %v4254_v6  ;;  %v4682_v55 = vrot.slane %v12290_v63, 6  ;;  %v4256_v6 = vsel %vm506_vm0, %v4253_v48, %v4255_v13 }
 0x544   : > { %9040 = vmatmul.msk.f32.gmra.mxu2 %vm3423_vm7, %v4681_v50 }
 0x545   : > { %9072 = vmatmul.msk.f32.gmra.mxu3 %vm3423_vm7, %v4681_v50  ;;  %v4683_v50 = vsel %vm4650_vm8, %v4680_v29, %v4682_v55 }
 0x547   : > { %v13208_v32 = vpop.f32.mrf.mxu2  ;;  %v13210_v26 = vpop.f32.mrf.mxu0 }
 0x548   : > { %17127 = vst [vmem:[#allocation133_spill] sm:$0xff] %v13208_v32  ;;  %v13213_v43 = vpop.f32.mrf.mxu1  ;;  %v13215_v25 = vpop.f32.mrf.mxu3  ;;  %v4257_v32 = vrot.slane %v12553_v62, 4 }
 0x549   : > { %17128 = vst [vmem:[#allocation134_spill] sm:$0xff] %v13210_v26 }
 0x54a   : > { %17129 = vst [vmem:[#allocation135_spill] sm:$0xff] %v13213_v43  ;;  %8960 = vmatmul.msk.f32.gmra.mxu0 %vm3423_vm7, %v4256_v6  ;;  %v13227_v43 = vperm.slane %v3417_v34, 0  ;;  %v4258_v29 = vsel %vm506_vm0, %v4255_v13, %v4257_v32  ;;  %v6178_v13 = vld [vmem:[%s16527_s6 + $0x78] sm:$0xff] }
 0x54b   : > { %17130 = vst [vmem:[#allocation136_spill] sm:$0xff] %v13215_v25  ;;  %8992 = vmatmul.msk.f32.gmra.mxu1 %vm3423_vm7, %v4256_v6  ;;  %v13229_v25 = vperm.slane %v3417_v34, 1  ;;  %v4684_v6 = vrot.slane %v12308_v7, 6  ;;  %6285 = vmatpush.msrb.mxu2 %v6178_v13 }
 0x54c   : > { %9041 = vmatmul.msk.f32.gmra.mxu2 %vm3423_vm7, %v4683_v50 }
 0x54d   : > { %9073 = vmatmul.msk.f32.gmra.mxu3 %vm3423_vm7, %v4683_v50  ;;  %v3538_v50 = vadd.f32 %v12287_v58, %v13227_v43  ;;  %v3651_v34 = vadd.f32 %v12292_v38, %v13229_v25 }
 0x54f   : > { %v13231_v48 = vpop.f32.mrf.mxu2  ;;  %v13233_v26 = vpop.f32.mrf.mxu0  ;;  %v4135_v58 = vadd.f32 %v12557_v8, %v3651_v34  ;;  %v3541_v34 = vadd.f32 %v12305_v46, %v13227_v43 }
 0x550   : > { %17131 = vst [vmem:[#allocation137_spill] sm:$0xff] %v13231_v48  ;;  %v13236_v63 = vpop.f32.mrf.mxu1  ;;  %v13238_v57 = vpop.f32.mrf.mxu3  ;;  %v4685_v48 = vsel %vm4650_vm8, %v4682_v55, %v4684_v6 }
 0x551   : > { %17132 = vst [vmem:[#allocation138_spill] sm:$0xff] %v13233_v26  ;;  %v4134_v26 = vadd.f32 %v12548_v36, %v3538_v50  ;;  %v4587_v38 = vadd.f32 %v12988_v60, %v4135_v58  ;;  %v4686_v36 = vrot.slane %v12326_v10, 6  ;;  %v4136_v60 = vadd.f32 %v12575_v59, %v3541_v34 }
 0x552   : > { %17133 = vst [vmem:[#allocation139_spill] sm:$0xff] %v13236_v63  ;;  %8961 = vmatmul.msk.f32.gmra.mxu0 %vm3423_vm7, %v4258_v29 }
 0x553   : > { %17134 = vst [vmem:[#allocation140_spill] sm:$0xff] %v13238_v57  ;;  %8993 = vmatmul.msk.f32.gmra.mxu1 %vm3423_vm7, %v4258_v29  ;;  %v4259_v57 = vrot.slane %v12580_v2, 4  ;;  %v4586_v29 = vadd.f32 %v12985_v4, %v4134_v26  ;;  %v3654_v26 = vadd.f32 %v12310_v53, %v13229_v25  ;;  %v4687_v4 = vsel %vm4650_vm8, %v4684_v6, %v4686_v36 }
 0x554   : > { %9042 = vmatmul.msk.f32.gmra.mxu2 %vm3423_vm7, %v4685_v48 }
 0x555   : > { %9074 = vmatmul.msk.f32.gmra.mxu3 %vm3423_vm7, %v4685_v48  ;;  %v4260_v8 = vsel %vm506_vm0, %v4257_v32, %v4259_v57  ;;  %v4588_v32 = vadd.f32 %v13004_v56, %v4136_v60  ;;  %v3544_v56 = vadd.f32 %v12323_v20, %v13227_v43 }
 0x557   : > { %v4830_v55 = vpop.f32.mrf.mxu2  ;;  %v13258_v63 = vpop.f32.mrf.mxu0  ;;  %v4138_v34 = vadd.f32 %v12600_v12, %v3544_v56  ;;  %v4690_v12 = vrot.slane %v12362_v1, 6 }
 0x558   : > { %v13261_v50 = vadd.f32 %v4830_v55, %v4586_v29  ;;  %v13263_v48 = vpop.f32.mrf.mxu1  ;;  %v4943_v7 = vpop.f32.mrf.mxu3  ;;  %v4688_v29 = vrot.slane %v12344_v52, 6  ;;  %v17135_v55 = vrot.slane %v11985_v22, 4 }
 0x559   : > { %v13265_v35 = vadd.f32 %v4943_v7, %v4587_v38  ;;  %v4137_v7 = vadd.f32 %v12584_v51, %v3654_v26  ;;  %v4590_v26 = vadd.f32 %v13023_v54, %v4138_v34  ;;  %v3660_v54 = vadd.f32 %v12346_v49, %v13229_v25 }
 0x55a   : > { %8962 = vmatmul.msk.f32.gmra.mxu0 %vm3423_vm7, %v4260_v8  ;;  %v4263_v51 = vsel %vm506_vm0, %v4259_v57, %v17135_v55  ;;  %v6177_v57 = vld [vmem:[%s16527_s6 + $0x70] sm:$0xff] }
 0x55b   : > { %8994 = vmatmul.msk.f32.gmra.mxu1 %vm3423_vm7, %v4260_v8  ;;  %v4589_v46 = vadd.f32 %v13007_v33, %v4137_v7  ;;  %v3657_v33 = vadd.f32 %v12328_v23, %v13229_v25  ;;  %v4689_v8 = vsel %vm4650_vm8, %v4686_v36, %v4688_v29  ;;  %6286 = vmatpush.msrb.mxu2 %v6177_v57  ;;  %v17137_v57 = vld [vmem:[#allocation6_spill] sm:$0xff] }
 0x55c   : > { %9043 = vmatmul.msk.f32.gmra.mxu2 %vm3423_vm7, %v4687_v4 }
 0x55d   : > { %9075 = vmatmul.msk.f32.gmra.mxu3 %vm3423_vm7, %v4687_v4  ;;  %v4139_v20 = vadd.f32 %v12608_v18, %v3657_v33  ;;  %v3547_v18 = vadd.f32 %v12341_v9, %v13227_v43 }
 0x55f   : > { %v4833_v13 = vpop.f32.mrf.mxu2  ;;  %v13281_v58 = vpop.f32.mrf.mxu0  ;;  %v4591_v4 = vadd.f32 %v13026_v15, %v4139_v20  ;;  %v4691_v15 = vsel %vm4650_vm8, %v4688_v29, %v4690_v12 }
 0x560   : > { %v13284_v53 = vadd.f32 %v4833_v13, %v4588_v32  ;;  %v13286_v6 = vpop.f32.mrf.mxu1  ;;  %v4946_v59 = vpop.f32.mrf.mxu3  ;;  %v4140_v13 = vadd.f32 %v12625_v28, %v3547_v18 }
 0x561   : > { %v13288_v38 = vadd.f32 %v4946_v59, %v4589_v46  ;;  %v4141_v59 = vadd.f32 %v12632_v44, %v3660_v54 }
 0x562   : > { %8963 = vmatmul.msk.f32.gmra.mxu0 %vm3423_vm7, %v4263_v51  ;;  %v4592_v9 = vadd.f32 %v13042_v17, %v4140_v13  ;;  %v17136_v17 = vld [vmem:[#allocation4_spill] sm:$0xff] }
 0x563   : > { %8995 = vmatmul.msk.f32.gmra.mxu1 %vm3423_vm7, %v4263_v51  ;;  %v4593_v55 = vadd.f32 %v13045_v14, %v4141_v59  ;;  %v3663_v14 = vadd.f32 %v12364_v30, %v13229_v25  ;;  %v17140_v59 = vld [vmem:[#allocation46_spill] sm:$0xff] }
 0x564   : > { %9044 = vmatmul.msk.f32.gmra.mxu2 %vm3423_vm7, %v4689_v8 }
 0x565   : > { %9076 = vmatmul.msk.f32.gmra.mxu3 %vm3423_vm7, %v4689_v8  ;;  %v3550_v8 = vadd.f32 %v12359_v40, %v13227_v43  ;;  %v6176_v40 = vld [vmem:[%s16527_s6 + $0x68] sm:$0xff]  ;;  %v4143_v20 = vadd.f32 %v17137_v57, %v3663_v14  ;;  %v17143_v14 = vld [vmem:[#allocation66_spill] sm:$0xff] }
 0x566   : > { %6287 = vmatpush.msrb.mxu2 %v6176_v40 }
 0x567   : > { %v4836_v23 = vpop.f32.mrf.mxu2  ;;  %v13309_v60 = vpop.f32.mrf.mxu0  ;;  %v4142_v34 = vadd.f32 %v17136_v17, %v3550_v8  ;;  %v17144_v17 = vld [vmem:[#allocation73_spill] sm:$0xff] }
 0x568   : > { %v13312_v36 = vadd.f32 %v4836_v23, %v4590_v26  ;;  %v13314_v7 = vpop.f32.mrf.mxu1  ;;  %v4949_v32 = vpop.f32.mrf.mxu3  ;;  %v17138_v26 = vld [vmem:[#allocation106_spill] sm:$0xff] }
 0x569   : > { %v13316_v46 = vadd.f32 %v4949_v32, %v4591_v4  ;;  %v17139_v4 = vld [vmem:[#allocation107_spill] sm:$0xff] }
 0x56a   : > { %9120 = vmatmul.msk.f32.vlgmr.msrb.gmra.mxu0 %vm3423_vm7, %v12003_v27  ;;  %v4595_v23 = vadd.f32 %v17139_v4, %v4143_v20 }
 0x56b   : > { %9152 = vmatmul.msk.f32.vlgmr.msrb.gmra.mxu1 %vm3423_vm7, %v12003_v27  ;;  %v4692_v27 = vrot.slane %v12380_v41, 6 }
 0x56c   : > { %9045 = vmatmul.msk.f32.gmra.mxu2 %vm3423_vm7, %v4691_v15 }
 0x56d   : > { %9077 = vmatmul.msk.f32.gmra.mxu3 %vm3423_vm7, %v4691_v15  ;;  %v4693_v44 = vsel %vm4650_vm8, %v4690_v12, %v4692_v27  ;;  %v4694_v12 = vrot.slane %v12398_v3, 6 }
 0x56f   : > { %v4839_v51 = vpop.f32.mrf.mxu2  ;;  %v13333_v56 = vpop.f32.mrf.mxu0  ;;  %v4695_v8 = vsel %vm4650_vm8, %v4692_v27, %v4694_v12 }
 0x570   : > { %v13336_v49 = vadd.f32 %v4839_v51, %v4592_v9  ;;  %v13338_v29 = vpop.f32.mrf.mxu1  ;;  %v4952_v28 = vpop.f32.mrf.mxu3  ;;  %v3553_v9 = vadd.f32 %v17140_v59, %v13227_v43  ;;  %v17142_v51 = vld [vmem:[#allocation19_spill] sm:$0xff] }
 0x571   : > { %v13340_v33 = vadd.f32 %v4952_v28, %v4593_v55  ;;  %v17141_v55 = vld [vmem:[#allocation11_spill] sm:$0xff]  ;;  %v3666_v28 = vadd.f32 %v17142_v51, %v13229_v25  ;;  %v17148_v51 = vld [vmem:[#allocation10_spill] sm:$0xff] }
 0x572   : > { %9121 = vmatmul.msk.f32.gmra.mxu0 %vm3423_vm7, %v12019_v5 }
 0x573   : > { %9153 = vmatmul.msk.f32.gmra.mxu1 %vm3423_vm7, %v12019_v5  ;;  %v4594_v5 = vadd.f32 %v17138_v26, %v4142_v34  ;;  %v4145_v34 = vadd.f32 %v17144_v17, %v3666_v28 }
 0x574   : > { %9046 = vmatmul.msk.f32.gmra.mxu2 %vm3423_vm7, %v4693_v44 }
 0x575   : > { %9078 = vmatmul.msk.f32.gmra.mxu3 %vm3423_vm7, %v4693_v44  ;;  %v4144_v44 = vadd.f32 %v17143_v14, %v3553_v9  ;;  %v4597_v57 = vadd.f32 %v13083_v47, %v4145_v34  ;;  %v17146_v9 = vld [vmem:[#allocation12_spill] sm:$0xff]  ;;  %v17149_v14 = vld [vmem:[#allocation75_spill] sm:$0xff] }
 0x576   : > { %v17150_v34 = vld [vmem:[#allocation112_spill] sm:$0xff] }
 0x577   : > { %v4842_v30 = vpop.f32.mrf.mxu2  ;;  %v13360_v32 = vpop.f32.mrf.mxu0  ;;  %v4596_v40 = vadd.f32 %v13080_v16, %v4144_v44  ;;  %v17147_v16 = vld [vmem:[#allocation23_spill] sm:$0xff] }
 0x578   : > { %v13363_v18 = vadd.f32 %v4842_v30, %v4594_v5  ;;  %v13365_v54 = vpop.f32.mrf.mxu1  ;;  %v4955_v15 = vpop.f32.mrf.mxu3  ;;  %v4696_v5 = vrot.slane %v12416_v19, 6  ;;  %v3669_v47 = vadd.f32 %v17147_v16, %v13229_v25  ;;  %v17152_v16 = vld [vmem:[#allocation45_spill] sm:$0xff] }
 0x579   : > { %v13367_v13 = vadd.f32 %v4955_v15, %v4595_v23  ;;  %v17145_v15 = vld [vmem:[#allocation22_spill] sm:$0xff] }
 0x57a   : > { %9122 = vmatmul.msk.f32.gmra.mxu0 %vm3423_vm7, %v17141_v55  ;;  %v3556_v59 = vadd.f32 %v17145_v15, %v13227_v43  ;;  %v4147_v44 = vadd.f32 %v17149_v14, %v3669_v47  ;;  %v3559_v47 = vadd.f32 %v17152_v16, %v13227_v43 }
 0x57b   : > { %9154 = vmatmul.msk.f32.gmra.mxu1 %vm3423_vm7, %v17141_v55  ;;  %v4697_v55 = vsel %vm4650_vm8, %v4694_v12, %v4696_v5  ;;  %v4698_v12 = vrot.slane %v12434_v0, 6 }
 0x57c   : > { %9047 = vmatmul.msk.f32.gmra.mxu2 %vm3423_vm7, %v4695_v8  ;;  %v4146_v28 = vadd.f32 %v17148_v51, %v3556_v59 }
 0x57d   : > { %9079 = vmatmul.msk.f32.gmra.mxu3 %vm3423_vm7, %v4695_v8  ;;  %v6175_v8 = vld [vmem:[%s16527_s6 + $0x60] sm:$0xff] }
 0x57e   : > { %6288 = vmatpush.msrb.mxu2 %v6175_v8  ;;  %v4598_v17 = vadd.f32 %v13096_v42, %v4146_v28  ;;  %v17154_v42 = vld [vmem:[#allocation49_spill] sm:$0xff]  ;;  %v4699_v28 = vsel %vm4650_vm8, %v4696_v5, %v4698_v12  ;;  %v17155_v8 = vld [vmem:[#allocation79_spill] sm:$0xff] }
 0x57f   : > { %v4845_v20 = vpop.f32.mrf.mxu2  ;;  %v13384_v26 = vpop.f32.mrf.mxu0  ;;  %v3672_v51 = vadd.f32 %v17154_v42, %v13229_v25  ;;  %v4148_v14 = vadd.f32 %v17155_v8, %v3559_v47 }
 0x580   : > { %v13387_v4 = vadd.f32 %v4845_v20, %v4596_v40  ;;  %v13389_v27 = vpop.f32.mrf.mxu1  ;;  %v4958_v23 = vpop.f32.mrf.mxu3  ;;  %v4599_v40 = vadd.f32 %v17150_v34, %v4147_v44  ;;  %v17156_v44 = vld [vmem:[#allocation81_spill] sm:$0xff] }
 0x581   : > { %v13391_v30 = vadd.f32 %v4958_v23, %v4597_v57  ;;  %v4600_v34 = vadd.f32 %v13118_v37, %v4148_v14  ;;  %v4702_v14 = vrot.slane %v12470_v31, 6 }
 0x582   : > { %9123 = vmatmul.msk.f32.gmra.mxu0 %vm3423_vm7, %v17146_v9 }
 0x583   : > { %9155 = vmatmul.msk.f32.gmra.mxu1 %vm3423_vm7, %v17146_v9 }
 0x584   : > { %9048 = vmatmul.msk.f32.gmra.mxu2 %vm3423_vm7, %v4697_v55 }
 0x585   : > { %9080 = vmatmul.msk.f32.gmra.mxu3 %vm3423_vm7, %v4697_v55  ;;  %v17153_v55 = vld [vmem:[#allocation14_spill] sm:$0xff] }
 0x587   : > { %v4848_v57 = vpop.f32.mrf.mxu2  ;;  %v13411_v20 = vpop.f32.mrf.mxu0 }
 0x588   : > { %v13414_v23 = vadd.f32 %v4848_v57, %v4598_v17  ;;  %v13416_v15 = vpop.f32.mrf.mxu1  ;;  %v4961_v59 = vpop.f32.mrf.mxu3  ;;  %v4149_v17 = vadd.f32 %v17156_v44, %v3672_v51  ;;  %v6174_v51 = vld [vmem:[%s16527_s6 + $0x58] sm:$0xff] }
 0x589   : > { %17151 = vst [vmem:[#allocation4_spill] sm:$0xff] %v13416_v15  ;;  %v13418_v9 = vadd.f32 %v4961_v59, %v4599_v40  ;;  %v17157_v40 = vld [vmem:[#allocation115_spill] sm:$0xff]  ;;  %v17158_v15 = vld [vmem:[#allocation13_spill] sm:$0xff]  ;;  %6289 = vmatpush.msrb.mxu2 %v6174_v51 }
 0x58a   : > { %9124 = vmatmul.msk.f32.gmra.mxu0 %vm3423_vm7, %v17153_v55  ;;  %v4601_v57 = vadd.f32 %v17157_v40, %v4149_v17  ;;  %v17161_v17 = vld [vmem:[#allocation17_spill] sm:$0xff] }
 0x58b   : > { %9156 = vmatmul.msk.f32.gmra.mxu1 %vm3423_vm7, %v17153_v55  ;;  %v4700_v55 = vrot.slane %v12449_v45, 6 }
 0x58c   : > { %9049 = vmatmul.msk.f32.gmra.mxu2 %vm3423_vm7, %v4699_v28 }
 0x58d   : > { %9081 = vmatmul.msk.f32.gmra.mxu3 %vm3423_vm7, %v4699_v28  ;;  %v4701_v37 = vsel %vm4650_vm8, %v4698_v12, %v4700_v55  ;;  %v4703_v12 = vsel %vm4650_vm8, %v4700_v55, %v4702_v14  ;;  %v6173_v55 = vld [vmem:[%s16527_s6 + $0x50] sm:$0xff] }
 0x58e   : > { %6290 = vmatpush.msrb.mxu2 %v6173_v55  ;;  %v17170_v55 = vld [vmem:[#allocation40_spill] sm:$0xff] }
 0x58f   : > { %v4851_v59 = vpop.f32.mrf.mxu2  ;;  %v13435_v16 = vpop.f32.mrf.mxu0 }
 0x590   : > { %v13438_v42 = vadd.f32 %v4851_v59, %v4600_v34  ;;  %v13440_v5 = vpop.f32.mrf.mxu1  ;;  %v4964_v47 = vpop.f32.mrf.mxu3  ;;  %v4704_v34 = vrot.slane %v12491_v39, 6 }
 0x591   : > { %v13442_v8 = vadd.f32 %v4964_v47, %v4601_v57  ;;  %v17164_v57 = vld [vmem:[#allocation64_spill] sm:$0xff] }
 0x592   : > { %9125 = vmatmul.msk.f32.gmra.mxu0 %vm3423_vm7, %v17158_v15  ;;  %v4705_v59 = vsel %vm4650_vm8, %v4702_v14, %v4704_v34 }
 0x593   : > { %9157 = vmatmul.msk.f32.gmra.mxu1 %vm3423_vm7, %v17158_v15 }
 0x594   : > { %9050 = vmatmul.msk.f32.gmra.mxu2 %vm3423_vm7, %v4701_v37 }
 0x595   : > { %9082 = vmatmul.msk.f32.gmra.mxu3 %vm3423_vm7, %v4701_v37  ;;  %v4706_v37 = vrot.slane %v12509_v11, 6 }
 0x597   : > { %v13454_v28 = vpop.f32.mrf.mxu0  ;;  %v4707_v14 = vsel %vm4650_vm8, %v4704_v34, %v4706_v37  ;;  %v6172_v34 = vld [vmem:[%s16527_s6 + $0x48] sm:$0xff] }
 0x598   : > { %17159 = vst [vmem:[#allocation6_spill] sm:$0xff] %v13454_v28  ;;  %v13457_v44 = vpop.f32.mrf.mxu1  ;;  %6291 = vmatpush.msrb.mxu2 %v6172_v34  ;;  %v4712_v34 = vrot.slane %v12580_v2, 6 }
 0x599   : > { %17160 = vst [vmem:[#allocation106_spill] sm:$0xff] %v13457_v44 }
 0x59a   : > { %9126 = vmatmul.msk.f32.gmra.mxu0 %vm3423_vm7, %v17161_v17 }
 0x59b   : > { %9158 = vmatmul.msk.f32.gmra.mxu1 %vm3423_vm7, %v17161_v17  ;;  %v17167_v17 = vld [vmem:[#allocation35_spill] sm:$0xff] }
 0x59c   : > { %9051 = vmatmul.msk.f32.gmra.mxu2 %vm3423_vm7, %v4703_v12 }
 0x59d   : > { %9083 = vmatmul.msk.f32.gmra.mxu3 %vm3423_vm7, %v4703_v12 }
 0x59f   : > { %v13466_v15 = vpop.f32.mrf.mxu0 }
 0x5a0   : > { %17162 = vst [vmem:[#allocation107_spill] sm:$0xff] %v13466_v15  ;;  %v13469_v40 = vpop.f32.mrf.mxu1  ;;  %v17195_v15 = vld [vmem:[#allocation85_spill] sm:$0xff] }
 0x5a1   : > { %17163 = vst [vmem:[#allocation46_spill] sm:$0xff] %v13469_v40  ;;  %v9227_v40 = vld [vmem:[%s16527_s6 + $0xe0] sm:$0xff] }
 0x5a2   : > { %9127 = vmatmul.msk.f32.gmra.mxu0 %vm3423_vm7, %v17164_v57 }
 0x5a3   : > { %9159 = vmatmul.msk.f32.gmra.mxu1 %vm3423_vm7, %v17164_v57  ;;  %v4708_v57 = vrot.slane %v12530_v24, 6 }
 0x5a4   : > { %9052 = vmatmul.msk.f32.gmra.mxu2 %vm3423_vm7, %v4705_v59 }
 0x5a5   : > { %9084 = vmatmul.msk.f32.gmra.mxu3 %vm3423_vm7, %v4705_v59 }
 0x5a7   : > { %v13481_v47 = vpop.f32.mrf.mxu0 }
 0x5a8   : > { %17165 = vst [vmem:[#allocation11_spill] sm:$0xff] %v13481_v47  ;;  %v13484_v51 = vpop.f32.mrf.mxu1 }
 0x5a9   : > { %17166 = vst [vmem:[#allocation19_spill] sm:$0xff] %v13484_v51  ;;  %v17173_v51 = vld [vmem:[#allocation39_spill] sm:$0xff] }
 0x5aa   : > { %9128 = vmatmul.msk.f32.gmra.mxu0 %vm3423_vm7, %v17167_v17 }
 0x5ab   : > { %9160 = vmatmul.msk.f32.gmra.mxu1 %vm3423_vm7, %v17167_v17  ;;  %v4709_v17 = vsel %vm4650_vm8, %v4706_v37, %v4708_v57 }
 0x5ac   : > { %9053 = vmatmul.msk.f32.gmra.mxu2 %vm3423_vm7, %v4707_v14 }
 0x5ad   : > { %9085 = vmatmul.msk.f32.gmra.mxu3 %vm3423_vm7, %v4707_v14 }
 0x5af   : > { %v13493_v12 = vpop.f32.mrf.mxu0 }
 0x5b0   : > { %17168 = vst [vmem:[#allocation66_spill] sm:$0xff] %v13493_v12  ;;  %v13496_v59 = vpop.f32.mrf.mxu1 }
 0x5b1   : > { %17169 = vst [vmem:[#allocation73_spill] sm:$0xff] %v13496_v59  ;;  %v4710_v59 = vrot.slane %v12553_v62, 6 }
 0x5b2   : > { %9129 = vmatmul.msk.f32.gmra.mxu0 %vm3423_vm7, %v17170_v55 }
 0x5b3   : > { %9161 = vmatmul.msk.f32.gmra.mxu1 %vm3423_vm7, %v17170_v55  ;;  %v4711_v55 = vsel %vm4650_vm8, %v4708_v57, %v4710_v59  ;;  %v4713_v57 = vsel %vm4650_vm8, %v4710_v59, %v4712_v34 }
 0x5b4   : > { %9054 = vmatmul.msk.f32.gmra.mxu2 %vm3423_vm7, %v4709_v17 }
 0x5b5   : > { %9086 = vmatmul.msk.f32.gmra.mxu3 %vm3423_vm7, %v4709_v17 }
 0x5b7   : > { %v13508_v14 = vpop.f32.mrf.mxu0 }
 0x5b8   : > { %17171 = vst [vmem:[#allocation22_spill] sm:$0xff] %v13508_v14  ;;  %v13511_v12 = vpop.f32.mrf.mxu1 }
 0x5b9   : > { %17172 = vst [vmem:[#allocation12_spill] sm:$0xff] %v13511_v12 }
 0x5ba   : > { %9130 = vmatmul.msk.f32.gmra.mxu0 %vm3423_vm7, %v17173_v51 }
 0x5bb   : > { %9162 = vmatmul.msk.f32.gmra.mxu1 %vm3423_vm7, %v17173_v51  ;;  %v6171_v51 = vld [vmem:[%s16527_s6 + $0x40] sm:$0xff] }
 0x5bc   : > { %9055 = vmatmul.msk.f32.gmra.mxu2 %vm3423_vm7, %v4711_v55 }
 0x5bd   : > { %9087 = vmatmul.msk.f32.gmra.mxu3 %vm3423_vm7, %v4711_v55  ;;  %6292 = vmatpush.msrb.mxu2 %v6171_v51 }
 0x5bf   : > { %v13520_v37 = vpop.f32.mrf.mxu0 }
 0x5c0   : > { %17174 = vst [vmem:[#allocation23_spill] sm:$0xff] %v13520_v37  ;;  %v13523_v17 = vpop.f32.mrf.mxu1  ;;  %v6180_v37 = vld [vmem:[%s16527_s6 + $0x88] sm:$0xf] }
 0x5c1   : > { %17175 = vst [vmem:[#allocation10_spill] sm:$0xff] %v13523_v17  ;;  %9184 = vmatpush.msk.msra.mxu3 %vm506_vm0, %v6180_v37  ;;  %v9234_v37 = vld [vmem:[%s16527_s6 + $0x118] sm:$0xf] }
 0x5c2   : > { %9131 = vmatmul.msk.f32.gmra.mxu0 %vm3423_vm7, %v12228_v21  ;;  %9235 = vmatpush.msk.msra.mxu1 %vm506_vm0, %v9234_v37  ;;  %v9231_v37 = vld [vmem:[%s16527_s6 + $0x100] sm:$0xff] }
 0x5c3   : > { %9163 = vmatmul.msk.f32.gmra.mxu1 %vm3423_vm7, %v12228_v21  ;;  %v17178_v21 = vrot.slane %v11985_v22, 6 }
 0x5c4   : > { %9056 = vmatmul.msk.f32.gmra.mxu2 %vm3423_vm7, %v4713_v57 }
 0x5c5   : > { %9088 = vmatmul.msk.f32.gmra.mxu3 %vm3423_vm7, %v4713_v57  ;;  %v4716_v59 = vsel %vm4650_vm8, %v4712_v34, %v17178_v21  ;;  %v6170_v34 = vld [vmem:[%s16527_s6 + $0x38] sm:$0xff] }
 0x5c6   : > { %6293 = vmatpush.msrb.mxu2 %v6170_v34  ;;  %v6169_v34 = vld [vmem:[%s16527_s6 + $0x30] sm:$0xff] }
 0x5c7   : > { %v13535_v55 = vpop.f32.mrf.mxu0 }
 0x5c8   : > { %17176 = vst [vmem:[#allocation75_spill] sm:$0xff] %v13535_v55  ;;  %v13537_v17 = vpop.f32.mrf.mxu1  ;;  %6294 = vmatpush.msrb.mxu2 %v6169_v34 }
 0x5c9   : > { %17177 = vst [vmem:[#allocation112_spill] sm:$0xff] %v13537_v17  ;;  %v17181_v17 = vld [vmem:[#allocation43_spill] sm:$0xff] }
 0x5ca   : > { %9132 = vmatmul.msk.f32.gmra.mxu0 %vm3423_vm7, %v12246_v61 }
 0x5cb   : > { %9164 = vmatmul.msk.f32.gmra.mxu1 %vm3423_vm7, %v12246_v61  ;;  %v9232_v61 = vld [vmem:[%s16527_s6 + $0x108] sm:$0xff] }
 0x5cc   : > { %9057 = vmatmul.msk.f32.gmra.mxu2 %vm3423_vm7, %v4716_v59  ;;  %6793 = vmatpush.msra.mxu0 %v9232_v61 }
 0x5cd   : > { %9089 = vmatmul.msk.f32.gmra.mxu3 %vm3423_vm7, %v4716_v59 }
 0x5ce   : > { %6794 = vmatpush.msra.mxu0 %v9231_v37 }
 0x5cf   : > { %v13552_v51 = vpop.f32.mrf.mxu0 }
 0x5d0   : > { %17179 = vst [vmem:[#allocation45_spill] sm:$0xff] %v13552_v51  ;;  %v13554_v57 = vpop.f32.mrf.mxu1  ;;  %v17187_v51 = vld [vmem:[#allocation15_spill] sm:$0xff] }
 0x5d1   : > { %17180 = vst [vmem:[#allocation14_spill] sm:$0xff] %v13554_v57 }
 0x5d2   : > { %9133 = vmatmul.msk.f32.gmra.mxu0 %vm3423_vm7, %v17181_v17 }
 0x5d3   : > { %9165 = vmatmul.msk.f32.gmra.mxu1 %vm3423_vm7, %v17181_v17  ;;  %v17184_v17 = vld [vmem:[#allocation18_spill] sm:$0xff] }
 0x5d7   : > { %v13570_v21 = vpop.f32.mrf.mxu0 }
 0x5d8   : > { %17182 = vst [vmem:[#allocation49_spill] sm:$0xff] %v13570_v21  ;;  %v13572_v59 = vpop.f32.mrf.mxu1 }
 0x5d9   : > { %17183 = vst [vmem:[#allocation79_spill] sm:$0xff] %v13572_v59  ;;  %v17188_v59 = vld [vmem:[#allocation42_spill] sm:$0xff] }
 0x5da   : > { %9134 = vmatmul.msk.f32.gmra.mxu0 %vm3423_vm7, %v17184_v17 }
 0x5db   : > { %9166 = vmatmul.msk.f32.gmra.mxu1 %vm3423_vm7, %v17184_v17 }
 0x5df   : > { %v13578_v57 = vpop.f32.mrf.mxu0 }
 0x5e0   : > { %17185 = vst [vmem:[#allocation81_spill] sm:$0xff] %v13578_v57  ;;  %v13580_v61 = vpop.f32.mrf.mxu1 }
 0x5e1   : > { %17186 = vst [vmem:[#allocation115_spill] sm:$0xff] %v13580_v61 }
 0x5e2   : > { %9135 = vmatmul.msk.f32.gmra.mxu0 %vm3423_vm7, %v17187_v51 }
 0x5e3   : > { %9167 = vmatmul.msk.f32.gmra.mxu1 %vm3423_vm7, %v17187_v51 }
 0x5e7   : > { %v5151_v17 = vpop.f32.mrf.mxu0 }
 0x5e8   : > { %v5264_v57 = vpop.f32.mrf.mxu1  ;;  %v13602_v37 = vadd.f32 %v5151_v17, %v13261_v50  ;;  %v6168_v50 = vld [vmem:[%s16527_s6 + $0x28] sm:$0xff] }
 0x5e9   : > { %v13593_v61 = vadd.f32 %v5264_v57, %v13265_v35  ;;  %v9230_v57 = vld [vmem:[%s16527_s6 + $0xf8] sm:$0xff]  ;;  %6295 = vmatpush.msrb.mxu2 %v6168_v50 }
 0x5ea   : > { %9136 = vmatmul.msk.f32.gmra.mxu0 %vm3423_vm7, %v17188_v59 }
 0x5eb   : > { %9168 = vmatmul.msk.f32.gmra.mxu1 %vm3423_vm7, %v17188_v59  ;;  %5490 = vrot.lane.b32.xlu2 %v13593_v61, %s9604_s25 }
 0x5ec   : > { %6795 = vmatpush.msra.mxu0 %v9230_v57 }
 0x5ef   : > { %v5154_v51 = vpop.f32.mrf.mxu0 }
 0x5f0   : > { %v13605_v34 = vadd.f32 %v5154_v51, %v13284_v53  ;;  %v5267_v21 = vpop.f32.mrf.mxu1  ;;  %v13624_v53 = vpop.f32.mrf.mxu2 }
 0x5f1   : > { %v13608_v35 = vadd.f32 %v5267_v21, %v13288_v38  ;;  %v13627_v38 = vpop.f32.mrf.mxu3 }
 0x5f2   : > { %v9427_v59 = vpack.i.bf16 %v13605_v34, %v13602_v37  ;;  %9137 = vmatmul.msk.f32.gmra.mxu0 %vm3423_vm7, %v12326_v10 }
 0x5f3   : > { %9169 = vmatmul.msk.f32.gmra.mxu1 %vm3423_vm7, %v12326_v10  ;;  %5494 = vrot.lane.b32.xlu0 %v13608_v35, %s9604_s25 }
 0x5f4   : > { %9428 = vrot.lane.b32.xlu1 %v9427_v59, %s9604_s25 }
 0x5f7   : > { %v5157_v21 = vpop.f32.mrf.mxu0 }
 0x5f8   : > { %v5270_v17 = vpop.f32.mrf.mxu1  ;;  %v13633_v10 = vadd.f32 %v5157_v21, %v13312_v36  ;;  %v13643_v57 = vpop.f32.mrf.mxu2  ;;  %v9229_v21 = vld [vmem:[%s16527_s6 + $0xf0] sm:$0xff] }
 0x5f9   : > { %v13630_v51 = vadd.f32 %v5270_v17, %v13316_v46  ;;  %v13645_v46 = vpop.f32.mrf.mxu3  ;;  %6796 = vmatpush.msra.mxu0 %v9229_v21 }
 0x5fa   : > { %9138 = vmatmul.msk.f32.gmra.mxu0 %vm3423_vm7, %v12344_v52 }
 0x5fb   : > { %9170 = vmatmul.msk.f32.gmra.mxu1 %vm3423_vm7, %v12344_v52  ;;  %5498 = vrot.lane.b32.xlu2 %v13630_v51, %s9604_s25 }
 0x5fc   : > { %5496 = vrot.lane.b32.xlu1 %v13633_v10, %s9604_s25 }
 0x5ff   : > { %v5160_v59 = vpop.f32.mrf.mxu0 }
 0x600   : > { %v13648_v36 = vadd.f32 %v5160_v59, %v13336_v49  ;;  %v5273_v50 = vpop.f32.mrf.mxu1  ;;  %v6167_v49 = vld [vmem:[%s16527_s6 + $0x20] sm:$0xff]  ;;  %v13667_v17 = vpop.f32.mrf.mxu2 }
 0x601   : > { %v13654_v52 = vadd.f32 %v5273_v50, %v13340_v33  ;;  %6296 = vmatpush.msrb.mxu2 %v6167_v49  ;;  %v13675_v55 = vpop.f32.mrf.mxu3 }
 0x602   : > { %9139 = vmatmul.msk.f32.gmra.mxu0 %vm3423_vm7, %v12362_v1  ;;  %5500 = vrot.lane.b32.xlu0 %v13648_v36, %s9604_s25 }
 0x603   : > { %9171 = vmatmul.msk.f32.gmra.mxu1 %vm3423_vm7, %v12362_v1 }
 0x604   : > { %5502 = vrot.lane.b32.xlu1 %v13654_v52, %s9604_s25 }
 0x607   : > { %v5163_v33 = vpop.f32.mrf.mxu0 }
 0x608   : > { %v13670_v59 = vadd.f32 %v5163_v33, %v13363_v18  ;;  %v5276_v50 = vpop.f32.mrf.mxu1  ;;  %v9228_v33 = vld [vmem:[%s16527_s6 + $0xe8] sm:$0xff] }
 0x609   : > { %v13673_v1 = vadd.f32 %v5276_v50, %v13367_v13  ;;  %v13694_v50 = vpop.f32.mrf.mxu2  ;;  %6797 = vmatpush.msra.mxu0 %v9228_v33 }
 0x60a   : > { %9140 = vmatmul.msk.f32.gmra.mxu0 %vm3423_vm7, %v12380_v41  ;;  %5504 = vrot.lane.b32.xlu2 %v13670_v59, %s9604_s25 }
 0x60b   : > { %9172 = vmatmul.msk.f32.gmra.mxu1 %vm3423_vm7, %v12380_v41  ;;  %5506 = vrot.lane.b32.xlu0 %v13673_v1, %s9604_s25  ;;  %v6166_v41 = vld [vmem:[%s16527_s6 + $0x18] sm:$0xff] }
 0x60c   : > { %6297 = vmatpush.msrb.mxu2 %v6166_v41  ;;  %6798 = vmatpush.msra.mxu0 %v9227_v40 }
 0x60f   : > { %v5166_v18 = vpop.f32.mrf.mxu0 }
 0x610   : > { %v13686_v21 = vadd.f32 %v5166_v18, %v13387_v4  ;;  %v5279_v13 = vpop.f32.mrf.mxu1  ;;  %v13707_v4 = vpop.f32.mrf.mxu3 }
 0x611   : > { %v13689_v49 = vadd.f32 %v5279_v13, %v13391_v30  ;;  %v13723_v33 = vpop.f32.mrf.mxu2 }
 0x612   : > { %9141 = vmatmul.msk.f32.gmra.mxu0 %vm3423_vm7, %v12398_v3  ;;  %5508 = vrot.lane.b32.xlu1 %v13686_v21, %s9604_s25 }
 0x613   : > { %9173 = vmatmul.msk.f32.gmra.mxu1 %vm3423_vm7, %v12398_v3  ;;  %5510 = vrot.lane.b32.xlu2 %v13689_v49, %s9604_s25 }
 0x617   : > { %v5169_v30 = vpop.f32.mrf.mxu0 }
 0x618   : > { %v13710_v18 = vadd.f32 %v5169_v30, %v13414_v23  ;;  %v5282_v13 = vpop.f32.mrf.mxu1  ;;  %v13725_v23 = vpop.f32.mrf.mxu3 }
 0x619   : > { %v13713_v3 = vadd.f32 %v5282_v13, %v13418_v9  ;;  %v17191_v9 = vld [vmem:[#allocation20_spill] sm:$0xff] }
 0x61a   : > { %17189 = vst [vmem:[#allocation13_spill] sm:$0xff] %v13710_v18  ;;  %9142 = vmatmul.msk.f32.gmra.mxu0 %vm3423_vm7, %v12416_v19  ;;  %5512 = vrot.lane.b32.xlu0 %v13710_v18, %s9604_s25  ;;  %v3562_v30 = vadd.f32 %v17191_v9, %v13227_v43  ;;  %v17198_v9 = vld [vmem:[#allocation119_spill] sm:$0xff] }
 0x61b   : > { %17190 = vst [vmem:[#allocation17_spill] sm:$0xff] %v13713_v3  ;;  %9174 = vmatmul.msk.f32.gmra.mxu1 %vm3423_vm7, %v12416_v19  ;;  %5514 = vrot.lane.b32.xlu1 %v13713_v3, %s9604_s25  ;;  %v17193_v19 = vld [vmem:[#allocation24_spill] sm:$0xff] }
 0x61c   : > { %v3675_v14 = vadd.f32 %v17193_v19, %v13229_v25  ;;  %v4150_v44 = vadd.f32 %v17195_v15, %v3562_v30  ;;  %v13756_v19 = vpop.f32.mrf.mxu2 }
 0x61f   : > { %v5172_v41 = vpop.f32.mrf.mxu0 }
 0x620   : > { %v13730_v13 = vadd.f32 %v5172_v41, %v13438_v42  ;;  %v5285_v12 = vpop.f32.mrf.mxu1  ;;  %v17196_v42 = vld [vmem:[#allocation84_spill] sm:$0xff]  ;;  %v13761_v28 = vpop.f32.mrf.mxu3 }
 0x621   : > { %v13735_v47 = vadd.f32 %v5285_v12, %v13442_v8  ;;  %v4151_v41 = vadd.f32 %v17196_v42, %v3675_v14  ;;  %v6165_v8 = vld [vmem:[%s16527_s6 + $0x10] sm:$0xff]  ;;  %v17197_v12 = vld [vmem:[#allocation118_spill] sm:$0xff] }
 0x622   : > { %17192 = vst [vmem:[#allocation64_spill] sm:$0xff] %v13730_v13  ;;  %9143 = vmatmul.msk.f32.gmra.mxu0 %vm3423_vm7, %v12434_v0  ;;  %5516 = vrot.lane.b32.xlu2 %v13730_v13, %s9604_s25  ;;  %v4602_v15 = vadd.f32 %v17197_v12, %v4150_v44  ;;  %v17201_v44 = vld [vmem:[#allocation48_spill] sm:$0xff]  ;;  %v17204_v12 = vld [vmem:[#allocation122_spill] sm:$0xff] }
 0x623   : > { %17194 = vst [vmem:[#allocation35_spill] sm:$0xff] %v13735_v47  ;;  %9175 = vmatmul.msk.f32.gmra.mxu1 %vm3423_vm7, %v12434_v0  ;;  %5518 = vrot.lane.b32.xlu0 %v13735_v47, %s9604_s25  ;;  %v4603_v30 = vadd.f32 %v17198_v9, %v4151_v41  ;;  %v17199_v47 = vld [vmem:[#allocation27_spill] sm:$0xff]  ;;  %v3678_v40 = vadd.f32 %v17201_v44, %v13229_v25 }
 0x624   : > { %6298 = vmatpush.msrb.mxu2 %v6165_v8  ;;  %v5055_v0 = vadd.f32 %v13624_v53, %v4602_v15  ;;  %v3565_v13 = vadd.f32 %v17199_v47, %v13227_v43  ;;  %v17202_v41 = vld [vmem:[#allocation87_spill] sm:$0xff] }
 0x625   : > { %v5056_v14 = vadd.f32 %v13627_v38, %v4603_v30  ;;  %v17203_v38 = vld [vmem:[#allocation2_spill] sm:$0xff] }
 0x626   : > { %v4152_v53 = vadd.f32 %v17202_v41, %v3565_v13  ;;  %v4153_v47 = vadd.f32 %v17203_v38, %v3678_v40  ;;  %v17208_v41 = vld [vmem:[#allocation28_spill] sm:$0xff] }
 0x627   : > { %v5175_v42 = vpop.f32.mrf.mxu0  ;;  %v3681_v38 = vadd.f32 %v17208_v41, %v13229_v25 }
 0x628   : > { %v13763_v18 = vadd.f32 %v5175_v42, %v5055_v0  ;;  %v5288_v3 = vpop.f32.mrf.mxu1  ;;  %v4604_v15 = vadd.f32 %v17204_v12, %v4152_v53  ;;  %v13785_v42 = vpop.f32.mrf.mxu2  ;;  %v17210_v53 = vld [vmem:[#allocation68_spill] sm:$0xff]  ;;  %v17211_v12 = vld [vmem:[#allocation71_spill] sm:$0xff] }
 0x629   : > { %v13767_v8 = vadd.f32 %v5288_v3, %v5056_v14  ;;  %v17205_v3 = vld [vmem:[#allocation123_spill] sm:$0xff]  ;;  %v17206_v14 = vld [vmem:[#allocation52_spill] sm:$0xff] }
 0x62a   : > { %17200 = vst [vmem:[#allocation40_spill] sm:$0xff] %v13763_v18  ;;  %9144 = vmatmul.msk.f32.gmra.mxu0 %vm3423_vm7, %v12449_v45  ;;  %5520 = vrot.lane.b32.xlu1 %v13763_v18, %s9604_s25  ;;  %v4605_v9 = vadd.f32 %v17205_v3, %v4153_v47  ;;  %v5057_v13 = vadd.f32 %v13643_v57, %v4604_v15  ;;  %v9226_v57 = vld [vmem:[%s16527_s6 + $0xd8] sm:$0xff]  ;;  %v13797_v47 = vpop.f32.mrf.mxu3  ;;  %v6164_v3 = vld [vmem:[%s16527_s6 + $0x8] sm:$0xff] }
 0x62b   : > { %9176 = vmatmul.msk.f32.gmra.mxu1 %vm3423_vm7, %v12449_v45  ;;  %5522 = vrot.lane.b32.xlu2 %v13767_v8, %s9604_s25  ;;  %v3568_v45 = vadd.f32 %v17206_v14, %v13227_v43  ;;  %v4155_v15 = vadd.f32 %v17211_v12, %v3681_v38  ;;  %v17215_v12 = vld [vmem:[#allocation29_spill] sm:$0xff] }
 0x62c   : > { %v5058_v30 = vadd.f32 %v13645_v46, %v4605_v9  ;;  %v17212_v9 = vld [vmem:[#allocation126_spill] sm:$0xff]  ;;  %6799 = vmatpush.msra.mxu0 %v9226_v57  ;;  %6299 = vmatpush.msrb.mxu2 %v6164_v3  ;;  %v17216_v57 = vld [vmem:[#allocation37_spill] sm:$0xff] }
 0x62d   : > { %v4154_v46 = vadd.f32 %v17210_v53, %v3568_v45 }
 0x62f   : > { %v5178_v0 = vpop.f32.mrf.mxu0 }
 0x630   : > { %v13787_v44 = vadd.f32 %v5178_v0, %v5057_v13  ;;  %v5291_v40 = vpop.f32.mrf.mxu1  ;;  %v4606_v13 = vadd.f32 %v17212_v9, %v4154_v46  ;;  %v13824_v3 = vpop.f32.mrf.mxu2 }
 0x631   : > { %v13791_v18 = vadd.f32 %v5291_v40, %v5058_v30  ;;  %v17213_v30 = vld [vmem:[#allocation127_spill] sm:$0xff]  ;;  %v17214_v40 = vld [vmem:[#allocation25_spill] sm:$0xff] }
 0x632   : > { %17207 = vst [vmem:[#allocation39_spill] sm:$0xff] %v13787_v44  ;;  %9145 = vmatmul.msk.f32.gmra.mxu0 %vm3423_vm7, %v12470_v31  ;;  %5524 = vrot.lane.b32.xlu0 %v13787_v44, %s9604_s25  ;;  %v4607_v0 = vadd.f32 %v17213_v30, %v4155_v15  ;;  %v3571_v41 = vadd.f32 %v17214_v40, %v13227_v43  ;;  %v17218_v15 = vld [vmem:[#allocation130_spill] sm:$0xff]  ;;  %v17219_v30 = vld [vmem:[#allocation131_spill] sm:$0xff] }
 0x633   : > { %17209 = vst [vmem:[#allocation43_spill] sm:$0xff] %v13791_v18  ;;  %9177 = vmatmul.msk.f32.gmra.mxu1 %vm3423_vm7, %v12470_v31  ;;  %5526 = vrot.lane.b32.xlu1 %v13791_v18, %s9604_s25  ;;  %v5059_v31 = vadd.f32 %v13667_v17, %v4606_v13  ;;  %v3684_v44 = vadd.f32 %v17215_v12, %v13229_v25  ;;  %v13836_v13 = vpop.f32.mrf.mxu3 }
 0x634   : > { %v5060_v14 = vadd.f32 %v13675_v55, %v4607_v0  ;;  %v4156_v46 = vadd.f32 %v17216_v57, %v3571_v41  ;;  %v17217_v55 = vld [vmem:[#allocation74_spill] sm:$0xff] }
 0x635   : > { %v4157_v17 = vadd.f32 %v17217_v55, %v3684_v44  ;;  %v17222_v55 = vld [vmem:[#allocation60_spill] sm:$0xff] }
 0x636   : > { %v4608_v9 = vadd.f32 %v17218_v15, %v4156_v46  ;;  %v9225_v46 = vld [vmem:[%s16527_s6 + $0xd0] sm:$0xff]  ;;  %v6163_v15 = vld [vmem:[%s16527_s6] sm:$0xff] }
 0x637   : > { %v5181_v45 = vpop.f32.mrf.mxu0  ;;  %v4609_v0 = vadd.f32 %v17219_v30, %v4157_v17  ;;  %6800 = vmatpush.msra.mxu0 %v9225_v46  ;;  %6300 = vmatpush.msrb.mxu2 %v6163_v15  ;;  %v17228_v15 = vld [vmem:[#allocation44_spill] sm:$0xff] }
 0x638   : > { %v13817_v38 = vadd.f32 %v5181_v45, %v5059_v31  ;;  %v5294_v53 = vpop.f32.mrf.mxu1  ;;  %v5061_v31 = vadd.f32 %v13694_v50, %v4608_v9  ;;  %v17224_v9 = vld [vmem:[#allocation134_spill] sm:$0xff] }
 0x639   : > { %v13821_v18 = vadd.f32 %v5294_v53, %v5060_v14  ;;  %v5062_v14 = vadd.f32 %v13707_v4, %v4609_v0  ;;  %v17221_v53 = vld [vmem:[#allocation51_spill] sm:$0xff]  ;;  %v17223_v4 = vld [vmem:[#allocation41_spill] sm:$0xff]  ;;  %v13866_v0 = vpop.f32.mrf.mxu2 }
 0x63a   : > { %9146 = vmatmul.msk.f32.gmra.mxu0 %vm3423_vm7, %v12491_v39  ;;  %5528 = vrot.lane.b32.xlu2 %v13817_v38, %s9604_s25  ;;  %v3687_v12 = vadd.f32 %v17221_v53, %v13229_v25 }
 0x63b   : > { %9178 = vmatmul.msk.f32.gmra.mxu1 %vm3423_vm7, %v12491_v39  ;;  %5530 = vrot.lane.b32.xlu0 %v13821_v18, %s9604_s25  ;;  %v17220_v39 = vld [vmem:[#allocation32_spill] sm:$0xff] }
 0x63c   : > { %v3574_v44 = vadd.f32 %v17220_v39, %v13227_v43  ;;  %v4159_v17 = vadd.f32 %v17223_v4, %v3687_v12 }
 0x63e   : > { %v4158_v50 = vadd.f32 %v17222_v55, %v3574_v44 }
 0x63f   : > { %v5184_v45 = vpop.f32.mrf.mxu0 }
 0x640   : > { %v13843_v40 = vadd.f32 %v5184_v45, %v5061_v31  ;;  %v5297_v41 = vpop.f32.mrf.mxu1  ;;  %v4610_v30 = vadd.f32 %v17224_v9, %v4158_v50  ;;  %v17225_v31 = vld [vmem:[#allocation135_spill] sm:$0xff]  ;;  %v13870_v45 = vpop.f32.mrf.mxu3  ;;  %v17227_v50 = vld [vmem:[#allocation33_spill] sm:$0xff]  ;;  %v17230_v9 = vld [vmem:[#allocation138_spill] sm:$0xff] }
 0x641   : > { %v13847_v57 = vadd.f32 %v5297_v41, %v5062_v14  ;;  %v17226_v41 = vld [vmem:[#allocation55_spill] sm:$0xff]  ;;  %v3690_v4 = vadd.f32 %v17227_v50, %v13229_v25 }
 0x642   : > { %9147 = vmatmul.msk.f32.gmra.mxu0 %vm3423_vm7, %v12509_v11  ;;  %5532 = vrot.lane.b32.xlu1 %v13843_v40, %s9604_s25  ;;  %v5063_v14 = vadd.f32 %v13723_v33, %v4610_v30  ;;  %v3577_v53 = vadd.f32 %v17226_v41, %v13227_v43  ;;  %v17229_v33 = vld [vmem:[#allocation47_spill] sm:$0xff] }
 0x643   : > { %9179 = vmatmul.msk.f32.gmra.mxu1 %vm3423_vm7, %v12509_v11  ;;  %5534 = vrot.lane.b32.xlu2 %v13847_v57, %s9604_s25  ;;  %v4611_v11 = vadd.f32 %v17225_v31, %v4159_v17  ;;  %v17231_v31 = vld [vmem:[#allocation139_spill] sm:$0xff] }
 0x644   : > { %v4160_v17 = vadd.f32 %v17228_v15, %v3577_v53 }
 0x645   : > { %v5064_v39 = vadd.f32 %v13725_v23, %v4611_v11  ;;  %v4161_v23 = vadd.f32 %v17229_v33, %v3690_v4  ;;  %v17233_v33 = vld [vmem:[#allocation54_spill] sm:$0xff] }
 0x646   : > { %v4612_v30 = vadd.f32 %v17230_v9, %v4160_v17  ;;  %v9223_v17 = vld [vmem:[%s16527_s6 + $0xc0] sm:$0xff] }
 0x647   : > { %v5187_v44 = vpop.f32.mrf.mxu0  ;;  %v4613_v11 = vadd.f32 %v17231_v31, %v4161_v23  ;;  %v3693_v23 = vadd.f32 %v17233_v33, %v13229_v25  ;;  %v17236_v33 = vld [vmem:[#allocation59_spill] sm:$0xff] }
 0x648   : > { %v13875_v12 = vadd.f32 %v5187_v44, %v5063_v14  ;;  %v5300_v55 = vpop.f32.mrf.mxu1  ;;  %v5065_v14 = vadd.f32 %v13756_v19, %v4612_v30  ;;  %v9224_v44 = vld [vmem:[%s16527_s6 + $0xc8] sm:$0xff]  ;;  %v13905_v4 = vpop.f32.mrf.mxu3  ;;  %v17234_v30 = vld [vmem:[#allocation50_spill] sm:$0xff] }
 0x649   : > { %v13879_v46 = vadd.f32 %v5300_v55, %v5064_v39  ;;  %v13894_v39 = vpop.f32.mrf.mxu2  ;;  %v5066_v41 = vadd.f32 %v13761_v28, %v4613_v11  ;;  %6801 = vmatpush.msra.mxu0 %v9224_v44  ;;  %v17232_v55 = vld [vmem:[#allocation30_spill] sm:$0xff]  ;;  %v9233_v28 = vld [vmem:[%s16527_s6 + $0x110] sm:$0xff]  ;;  %v9222_v11 = vld [vmem:[%s16527_s6 + $0xb8] sm:$0xff] }
 0x64a   : > { %9148 = vmatmul.msk.f32.gmra.mxu0 %vm3423_vm7, %v12530_v24  ;;  %5536 = vrot.lane.b32.xlu0 %v13875_v12, %s9604_s25  ;;  %v3580_v50 = vadd.f32 %v17232_v55, %v13227_v43  ;;  %v9221_v44 = vld [vmem:[%s16527_s6 + $0xb0] sm:$0xff]  ;;  %v9220_v55 = vld [vmem:[%s16527_s6 + $0xa8] sm:$0xff] }
 0x64b   : > { %9180 = vmatmul.msk.f32.gmra.mxu1 %vm3423_vm7, %v12530_v24  ;;  %5538 = vrot.lane.b32.xlu1 %v13879_v46, %s9604_s25  ;;  %v6179_v24 = vld [vmem:[%s16527_s6 + $0x80] sm:$0xff] }
 0x64c   : > { %6413 = vmatpush.msra.mxu3 %v6179_v24  ;;  %6802 = vmatpush.msra.mxu0 %v9223_v17  ;;  %v4162_v31 = vadd.f32 %v17234_v30, %v3580_v50 }
 0x64d   : > { %6921 = vmatpush.msra.mxu1 %v9233_v28 }
 0x64e   : > { %6803 = vmatpush.msra.mxu0 %v9222_v11  ;;  %v5491_v11 = vpop.permute.xlu2 %5490 }
 0x64f   : > { %v5190_v53 = vpop.f32.mrf.mxu0 }
 0x650   : > { %v13907_v19 = vadd.f32 %v5190_v53, %v5065_v14  ;;  %v5303_v15 = vpop.f32.mrf.mxu1  ;;  %v17235_v14 = vld [vmem:[#allocation88_spill] sm:$0xff]  ;;  %6804 = vmatpush.msra.mxu0 %v9221_v44  ;;  %v13959_v44 = vpop.f32.mrf.mxu3 }
 0x651   : > { %v13914_v9 = vadd.f32 %v5303_v15, %v5066_v41  ;;  %v4163_v24 = vadd.f32 %v17235_v14, %v3693_v23  ;;  %v4614_v41 = vadd.f32 %v13258_v63, %v4162_v31  ;;  %v3583_v23 = vadd.f32 %v17236_v33, %v13227_v43  ;;  %v13947_v30 = vpop.f32.mrf.mxu2 }
 0x652   : > { %9149 = vmatmul.msk.f32.gmra.mxu0 %vm3423_vm7, %v12553_v62  ;;  %5540 = vrot.lane.b32.xlu2 %v13907_v19, %s9604_s25 }
 0x653   : > { %9181 = vmatmul.msk.f32.gmra.mxu1 %vm3423_vm7, %v12553_v62  ;;  %5542 = vrot.lane.b32.xlu0 %v13914_v9, %s9604_s25  ;;  %v9283_v62 = vld [vmem:[%s16527_s6 + $0x198] sm:$0xff]  ;;  %v4615_v53 = vadd.f32 %v13263_v48, %v4163_v24  ;;  %v5067_v50 = vadd.f32 %v13785_v42, %v4614_v41  ;;  %v17237_v48 = vld [vmem:[#allocation34_spill] sm:$0xff] }
 0x654   : > { %7073 = vmatpush.msra.mxu2 %v9283_v62  ;;  %6805 = vmatpush.msra.mxu0 %v9220_v55  ;;  %v3696_v31 = vadd.f32 %v17237_v48, %v13229_v25  ;;  %v9219_v42 = vld [vmem:[%s16527_s6 + $0xa0] sm:$0xff]  ;;  %v17239_v62 = vld [vmem:[#allocation89_spill] sm:$0xff] }
 0x655   : > { %v5068_v15 = vadd.f32 %v13797_v47, %v4615_v53  ;;  %v17238_v47 = vld [vmem:[#allocation9_spill] sm:$0xff] }
 0x656   : > { %v4164_v24 = vadd.f32 %v17238_v47, %v3583_v23  ;;  %v4165_v41 = vadd.f32 %v17239_v62, %v3696_v31  ;;  %v9218_v53 = vld [vmem:[%s16527_s6 + $0x98] sm:$0xff]  ;;  %6806 = vmatpush.msra.mxu0 %v9219_v42  ;;  %v17240_v23 = vld [vmem:[#allocation36_spill] sm:$0xff]  ;;  %v5499_v42 = vpop.permute.xlu2 %5498 }
 0x657   : > { %v5193_v17 = vpop.f32.mrf.mxu0 }
 0x658   : > { %v13949_v63 = vadd.f32 %v5193_v17, %v5067_v50  ;;  %v5306_v28 = vpop.f32.mrf.mxu1  ;;  %v4616_v55 = vadd.f32 %v13281_v58, %v4164_v24  ;;  %v4617_v50 = vadd.f32 %v13286_v6, %v4165_v41  ;;  %6807 = vmatpush.msra.mxu0 %v9218_v53  ;;  %v17242_v58 = vld [vmem:[#allocation58_spill] sm:$0xff]  ;;  %v17244_v24 = vld [vmem:[#allocation61_spill] sm:$0xff] }
 0x659   : > { %v13953_v14 = vadd.f32 %v5306_v28, %v5068_v15  ;;  %v3586_v28 = vadd.f32 %v17240_v23, %v13227_v43  ;;  %v3699_v6 = vadd.f32 %v17242_v58, %v13229_v25  ;;  %v9282_v23 = vld [vmem:[%s16527_s6 + $0x190] sm:$0xff]  ;;  %v17248_v58 = vld [vmem:[#allocation93_spill] sm:$0xff] }
 0x65a   : > { %9150 = vmatmul.msk.f32.gmra.mxu0 %vm3423_vm7, %v12580_v2  ;;  %5544 = vrot.lane.b32.xlu1 %v13949_v63, %s9604_s25  ;;  %v5069_v15 = vadd.f32 %v13824_v3, %v4616_v55  ;;  %v5070_v17 = vadd.f32 %v13836_v13, %v4617_v50  ;;  %v13989_v3 = vpop.f32.mrf.mxu2  ;;  %v17245_v13 = vld [vmem:[#allocation92_spill] sm:$0xff]  ;;  %v14001_v55 = vpop.f32.mrf.mxu3  ;;  %v14004_v50 = vmax.f32 %v13593_v61, %v5491_v11 }
 0x65b   : > { %9182 = vmatmul.msk.f32.gmra.mxu1 %vm3423_vm7, %v12580_v2  ;;  %5546 = vrot.lane.b32.xlu2 %v13953_v14, %s9604_s25  ;;  %v9217_v2 = vld [vmem:[%s16527_s6 + $0x90] sm:$0xff]  ;;  %v4166_v62 = vadd.f32 %v17244_v24, %v3586_v28  ;;  %v4167_v41 = vadd.f32 %v17245_v13, %v3699_v6 }
 0x65c   : > { %6808 = vmatpush.msra.mxu0 %v9217_v2  ;;  %v14007_v2 = vmax.f32 %v13630_v51, %v5499_v42  ;;  %7074 = vmatpush.msra.mxu2 %v9282_v23 }
 0x65d   : > { %v4618_v53 = vadd.f32 %v13309_v60, %v4166_v62  ;;  %v17247_v60 = vld [vmem:[#allocation3_spill] sm:$0xff] }
 0x65e   : > { %v3702_v28 = vadd.f32 %v17247_v60, %v13229_v25 }
 0x65f   : > { %v5196_v33 = vpop.f32.mrf.mxu0 }
 0x660   : > { %v13982_v48 = vadd.f32 %v5196_v33, %v5069_v15  ;;  %v5309_v31 = vpop.f32.mrf.mxu1 }
 0x661   : > { %v13986_v47 = vadd.f32 %v5309_v31, %v5070_v17  ;;  %v4619_v17 = vadd.f32 %v13314_v7, %v4167_v41  ;;  %v5071_v31 = vadd.f32 %v13866_v0, %v4618_v53  ;;  %v16614_v41 = vrot.slane %v14004_v50, 2  ;;  %v17249_v53 = vld [vmem:[#allocation96_spill] sm:$0xff] }
 0x662   : > { %17241 = vst [vmem:[#allocation18_spill] sm:$0xff] %v13982_v48  ;;  %9151 = vmatmul.msk.f32.gmra.mxu0 %vm3423_vm7, %v11985_v22  ;;  %5548 = vrot.lane.b32.xlu0 %v13982_v48, %s9604_s25 }
 0x663   : > { %17243 = vst [vmem:[#allocation15_spill] sm:$0xff] %v13986_v47  ;;  %9183 = vmatmul.msk.f32.gmra.mxu1 %vm3423_vm7, %v11985_v22  ;;  %5550 = vrot.lane.b32.xlu1 %v13986_v47, %s9604_s25  ;;  %v17246_v22 = vld [vmem:[#allocation63_spill] sm:$0xff]  ;;  %v5072_v24 = vadd.f32 %v13870_v45, %v4619_v17 }
 0x664   : > { %v3589_v15 = vadd.f32 %v17246_v22, %v13227_v43  ;;  %v5849_v22 = vrot.slane %v14007_v2, 2 }
 0x665   : > { %v5495_v33 = vpop.permute.xlu0 %5494 }
 0x666   : > { %v5716_v61 = vmax.f32 %v13608_v35, %v5495_v33  ;;  %v9429_v51 = vpop.permute.xlu1 %9428  ;;  %v4168_v6 = vadd.f32 %v17248_v58, %v3589_v15  ;;  %v4169_v35 = vadd.f32 %v17249_v53, %v3702_v28 }
 0x667   : > { %v9431_v7 = vunpack.i.h.bf16 %v9429_v51  ;;  %v9430_v62 = vunpack.i.l.bf16 %v9429_v51  ;;  %v5199_v13 = vpop.f32.mrf.mxu0 }
 0x668   : > { %v5845_v48 = vrot.slane %v5716_v61, 2  ;;  %v14023_v60 = vadd.f32 %v5199_v13, %v5071_v31  ;;  %v5312_v0 = vpop.f32.mrf.mxu1  ;;  %v4621_v58 = vadd.f32 %v13338_v29, %v4169_v35 }
 0x669   : > { %v5618_v47 = vsel %vm5616_vm9, %v9431_v7, %v5495_v33  ;;  %v5617_v23 = vsel %vm5616_vm9, %v9430_v62, %v5491_v11  ;;  %v14028_v15 = vadd.f32 %v5312_v0, %v5072_v24  ;;  %v4620_v11 = vadd.f32 %v13333_v56, %v4168_v6  ;;  %v14047_v24 = vpop.f32.mrf.mxu2 }
 0x66a   : > { %v5846_v45 = vsel %vm1176_vm3, %v16614_v41, %v5845_v48  ;;  %v5850_v17 = vsel %vm1176_vm3, %v5845_v48, %v5849_v22  ;;  %v5715_v31 = vmax.f32 %v13605_v34, %v5618_v47  ;;  %v14038_v51 = vmax.f32 %v13602_v37, %v5617_v23  ;;  %5552 = vrot.lane.b32.xlu2 %v14023_v60, %s9604_s25  ;;  %v5505_v23 = vpop.permute.xlu2 %5504 }
 0x66b   : > { %v6036_v33 = vmax.f32 %v14004_v50, %v5846_v45  ;;  %v6038_v28 = vmax.f32 %v5716_v61, %v5850_v17  ;;  %5554 = vrot.lane.b32.xlu0 %v14028_v15, %s9604_s25  ;;  %v5073_v56 = vadd.f32 %v13894_v39, %v4620_v11  ;;  %v5074_v6 = vadd.f32 %v13905_v4, %v4621_v58  ;;  %v14056_v61 = vpop.f32.mrf.mxu3  ;;  %v17250_v4 = vld [vmem:[#allocation62_spill] sm:$0xff] }
 0x66c   : > { %v5842_v48 = vrot.slane %v5715_v31, 2  ;;  %v16613_v34 = vrot.slane %v14038_v51, 2  ;;  %v3592_v35 = vadd.f32 %v17250_v4, %v13227_v43  ;;  %v9281_v4 = vld [vmem:[%s16527_s6 + $0x188] sm:$0xff] }
 0x66d   : > { %v14050_v37 = vmax.f32 %v6036_v33, 0.0  ;;  %v14052_v47 = vmax.f32 %v6038_v28, 0.0  ;;  %v17251_v33 = vld [vmem:[#allocation67_spill] sm:$0xff]  ;;  %7075 = vmatpush.msra.mxu2 %v9281_v4 }
 0x66e   : > { %v5843_v29 = vsel %vm1176_vm3, %v16613_v34, %v5842_v48  ;;  %v5497_v7 = vpop.permute.xlu1 %5496  ;;  %v3705_v28 = vadd.f32 %v17251_v33, %v13229_v25 }
 0x66f   : > { %v16615_v62 = vrot.slane %v14052_v47, 4  ;;  %v6035_v13 = vmax.f32 %v14038_v51, %v5843_v29  ;;  %9185 = vmatmul.msk.f32.vlgmr.msra.gmra.mxu3 %vm6185_vm10, %v14050_v37  ;;  %v5619_v0 = vsel %vm5616_vm9, %v5497_v7, %v5499_v42  ;;  %v5202_v53 = vpop.f32.mrf.mxu0  ;;  %v16612_v39 = vrot.slane %v14050_v37, 4  ;;  %v17254_v7 = vld [vmem:[#allocation97_spill] sm:$0xff] }
 0x670   : > { %v14070_v45 = vmax.f32 %v13633_v10, %v5619_v0  ;;  %v14072_v17 = vadd.f32 %v5202_v53, %v5073_v56  ;;  %v5315_v11 = vpop.f32.mrf.mxu1  ;;  %v4170_v10 = vadd.f32 %v17254_v7, %v3592_v35 }
 0x671   : > { %v14076_v58 = vmax.f32 %v6035_v13, 0.0  ;;  %v14078_v29 = vadd.f32 %v5315_v11, %v5074_v6  ;;  %v14085_v42 = vsel %vm506_vm0, %v16612_v39, %v16615_v62  ;;  %v17255_v13 = vld [vmem:[#allocation98_spill] sm:$0xff]  ;;  %v14104_v7 = vpop.f32.mrf.mxu2 }
 0x672   : > { %17253 = vst [vmem:[#allocation20_spill] sm:$0xff] %v14085_v42  ;;  %v5847_v56 = vrot.slane %v14070_v45, 2  ;;  %9236 = vmatmul.msk.f32.vlgmr.msra.gmra.mxu1 %vm6185_vm10, %v14085_v42  ;;  %5556 = vrot.lane.b32.xlu1 %v14072_v17, %s9604_s25  ;;  %v4171_v6 = vadd.f32 %v17255_v13, %v3705_v28  ;;  %v4622_v0 = vadd.f32 %v13360_v32, %v4170_v10  ;;  %v5511_v41 = vpop.permute.xlu2 %5510 }
 0x673   : > { %17252 = vst [vmem:[#allocation42_spill] sm:$0xff] %v14076_v58  ;;  %5558 = vrot.lane.b32.xlu2 %v14078_v29, %s9604_s25  ;;  %6301 = vmatmul.f32.vlgmr.msrb.gmra.mxu2 %v14076_v58 }
 0x674   : > { %v5848_v53 = vsel %vm1176_vm3, %v5842_v48, %v5847_v56  ;;  %v4623_v35 = vadd.f32 %v13365_v54, %v4171_v6  ;;  %v5501_v11 = vpop.permute.xlu0 %5500  ;;  %v5075_v28 = vadd.f32 %v13947_v30, %v4622_v0  ;;  %v17257_v30 = vld [vmem:[#allocation69_spill] sm:$0xff] }
 0x675   : > { %v6037_v33 = vmax.f32 %v5715_v31, %v5848_v53  ;;  %v17256_v31 = vld [vmem:[#allocation70_spill] sm:$0xff]  ;;  %v3708_v0 = vadd.f32 %v17257_v30, %v13229_v25  ;;  %v14119_v53 = vpop.f32.mrf.mxu3 }
 0x676   : > { %v5503_v13 = vpop.permute.xlu1 %5502  ;;  %v5076_v39 = vadd.f32 %v13959_v44, %v4623_v35  ;;  %v3595_v6 = vadd.f32 %v17256_v31, %v13227_v43  ;;  %v17258_v31 = vld [vmem:[#allocation99_spill] sm:$0xff] }
 0x677   : > { %9186 = vmatmul.msk.f32.gmra.mxu3 %vm6185_vm10, %v14052_v47  ;;  %v5620_v32 = vsel %vm5616_vm9, %v5501_v11, %v5503_v13  ;;  %v14111_v48 = vmax.f32 %v13654_v52, %v5503_v13  ;;  %v5205_v10 = vpop.f32.mrf.mxu0  ;;  %v14113_v54 = vmax.f32 %v6037_v33, 0.0  ;;  %v16616_v13 = vrot.slane %v14076_v58, 4 }
 0x678   : > { %v14122_v44 = vmax.f32 %v13648_v36, %v5620_v32  ;;  %v14124_v4 = vadd.f32 %v5205_v10, %v5075_v28  ;;  %v5318_v35 = vpop.f32.mrf.mxu1  ;;  %v4172_v34 = vadd.f32 %v17258_v31, %v3595_v6  ;;  %v17259_v36 = vld [vmem:[#allocation100_spill] sm:$0xff] }
 0x679   : > { %v5853_v52 = vrot.slane %v14111_v48, 2  ;;  %v14127_v11 = vadd.f32 %v5318_v35, %v5076_v39  ;;  %v6544_v33 = vrot.slane %v14113_v54, 4  ;;  %v4173_v28 = vadd.f32 %v17259_v36, %v3708_v0 }
 0x67a   : > { %v5851_v30 = vrot.slane %v14122_v44, 2  ;;  %5560 = vrot.lane.b32.xlu0 %v14124_v4, %s9604_s25  ;;  %v4624_v10 = vadd.f32 %v13384_v26, %v4172_v34  ;;  %v14153_v35 = vmax.f32 %v13689_v49, %v5511_v41 }
 0x67b   : > { %v5854_v32 = vsel %vm1176_vm3, %v5849_v22, %v5853_v52  ;;  %5562 = vrot.lane.b32.xlu1 %v14127_v11, %s9604_s25  ;;  %6304 = vmatmul.f32.gmra.mxu2 %v14113_v54  ;;  %v14145_v39 = vsel %vm506_vm0, %v16616_v13, %v6544_v33  ;;  %v4625_v22 = vadd.f32 %v13389_v27, %v4173_v28 }
 0x67c   : > { %17260 = vst [vmem:[#allocation24_spill] sm:$0xff] %v14145_v39  ;;  %6809 = vmatmul.f32.vlgmr.msra.gmra.mxu0 %v14145_v39  ;;  %v6040_v6 = vmax.f32 %v14007_v2, %v5854_v32  ;;  %v5852_v0 = vsel %vm1176_vm3, %v5847_v56, %v5851_v30  ;;  %v5077_v62 = vadd.f32 %v13989_v3, %v4624_v10  ;;  %v17262_v2 = vld [vmem:[#allocation72_spill] sm:$0xff]  ;;  %v14171_v10 = vpop.f32.mrf.mxu2  ;;  %v17267_v39 = vrot.slane %v14052_v47, 4 }
 0x67d   : > { %v5507_v31 = vpop.permute.xlu0 %5506  ;;  %v6039_v36 = vmax.f32 %v14070_v45, %v5852_v0  ;;  %v3598_v32 = vadd.f32 %v17262_v2, %v13227_v43  ;;  %v5078_v56 = vadd.f32 %v14001_v55, %v4625_v22  ;;  %v17264_v45 = vld [vmem:[#allocation76_spill] sm:$0xff]  ;;  %v17266_v2 = vld [vmem:[#allocation102_spill] sm:$0xff] }
 0x67e   : > { %v5621_v13 = vsel %vm5616_vm9, %v5505_v23, %v5507_v31  ;;  %v5722_v26 = vmax.f32 %v13673_v1, %v5507_v31  ;;  %v14159_v34 = vmax.f32 %v6040_v6, 0.0  ;;  %v3711_v3 = vadd.f32 %v17264_v45, %v13229_v25  ;;  %v17265_v31 = vld [vmem:[#allocation101_spill] sm:$0xff] }
 0x67f   : > { %v14165_v27 = vmax.f32 %v13670_v59, %v5621_v13  ;;  %v5208_v49 = vpop.f32.mrf.mxu0  ;;  %v14167_v28 = vmax.f32 %v6039_v36, 0.0  ;;  %v4174_v36 = vadd.f32 %v17265_v31, %v3598_v32  ;;  %v17271_v31 = vld [vmem:[#allocation4_spill] sm:$0xff] }
 0x680   : > { %17261 = vst [vmem:[#allocation85_spill] sm:$0xff] %v14159_v34  ;;  %v5857_v23 = vrot.slane %v5722_v26, 2  ;;  %v14173_v1 = vadd.f32 %v5208_v49, %v5077_v62  ;;  %v5321_v6 = vpop.f32.mrf.mxu1  ;;  %9187 = vmatmul.msk.f32.gmra.mxu3 %vm6185_vm10, %v14159_v34  ;;  %v6551_v55 = vrot.slane %v14159_v34, 4  ;;  %v4175_v45 = vadd.f32 %v17266_v2, %v3711_v3  ;;  %v14185_v62 = vpop.f32.mrf.mxu3 }
 0x681   : > { %17263 = vst [vmem:[#allocation84_spill] sm:$0xff] %v14167_v28  ;;  %v5855_v13 = vrot.slane %v14165_v27, 2  ;;  %v14180_v0 = vadd.f32 %v5321_v6, %v5078_v56  ;;  %v6549_v22 = vrot.slane %v14167_v28, 4  ;;  %v17269_v56 = vrot.slane %v14153_v35, 2 }
 0x682   : > { %v5858_v49 = vsel %vm1176_vm3, %v5853_v52, %v5857_v23  ;;  %5564 = vrot.lane.b32.xlu2 %v14173_v1, %s9604_s25  ;;  %v14193_v59 = vsel %vm506_vm0, %v17267_v39, %v6551_v55  ;;  %v4626_v3 = vadd.f32 %v13411_v20, %v4174_v36  ;;  %v4627_v2 = vadd.f32 %v17271_v31, %v4175_v45  ;;  %v17273_v20 = vld [vmem:[#allocation78_spill] sm:$0xff] }
 0x683   : > { %17268 = vst [vmem:[#allocation118_spill] sm:$0xff] %v14193_v59  ;;  %v5862_v6 = vsel %vm1176_vm3, %v5857_v23, %v17269_v56  ;;  %5566 = vrot.lane.b32.xlu0 %v14180_v0, %s9604_s25  ;;  %6307 = vmatmul.f32.gmra.mxu2 %v14167_v28  ;;  %v14202_v32 = vsel %vm506_vm0, %v6544_v33, %v6549_v22  ;;  %v9280_v23 = vld [vmem:[%s16527_s6 + $0x180] sm:$0xff] }
 0x684   : > { %17270 = vst [vmem:[#allocation119_spill] sm:$0xff] %v14202_v32  ;;  %v6042_v52 = vmax.f32 %v14111_v48, %v5858_v49  ;;  %9237 = vmatmul.msk.f32.gmra.mxu1 %vm6185_vm10, %v14193_v59  ;;  %6812 = vmatmul.f32.gmra.mxu0 %v14202_v32  ;;  %v5856_v39 = vsel %vm1176_vm3, %v5851_v30, %v5855_v13  ;;  %v5509_v56 = vpop.permute.xlu1 %5508  ;;  %v14222_v59 = vpop.permute.xlu2 %5516 }
 0x685   : > { %v6041_v48 = vmax.f32 %v14122_v44, %v5856_v39  ;;  %7076 = vmatpush.msra.mxu2 %v9280_v23  ;;  %v3601_v36 = vadd.f32 %v17273_v20, %v13227_v43  ;;  %v5079_v49 = vadd.f32 %v14047_v24, %v4626_v3  ;;  %v6044_v42 = vmax.f32 %v5722_v26, %v5862_v6  ;;  %v17275_v39 = vld [vmem:[#allocation82_spill] sm:$0xff]  ;;  %v17276_v20 = vld [vmem:[#allocation103_spill] sm:$0xff]  ;;  %v17277_v3 = vld [vmem:[#allocation104_spill] sm:$0xff] }
 0x686   : > { %v14214_v33 = vmax.f32 %v6042_v52, 0.0  ;;  %v5622_v30 = vsel %vm5616_vm9, %v5509_v56, %v5511_v41  ;;  %v5080_v32 = vadd.f32 %v14056_v61, %v4627_v2  ;;  %v3714_v23 = vadd.f32 %v17275_v39, %v13229_v25 }
 0x687   : > { %v14225_v45 = vmax.f32 %v13686_v21, %v5622_v30  ;;  %v5211_v52 = vpop.f32.mrf.mxu0  ;;  %v14227_v31 = vmax.f32 %v6041_v48, 0.0  ;;  %v4176_v24 = vadd.f32 %v17276_v20, %v3601_v36  ;;  %v14243_v48 = vpop.f32.mrf.mxu2  ;;  %v14245_v30 = vmax.f32 %v6044_v42, 0.0  ;;  %v17281_v20 = vld [vmem:[#allocation17_spill] sm:$0xff] }
 0x688   : > { %17272 = vst [vmem:[#allocation27_spill] sm:$0xff] %v14214_v33  ;;  %v6555_v44 = vrot.slane %v14214_v33, 4  ;;  %v14233_v26 = vadd.f32 %v5211_v52, %v5079_v49  ;;  %v5324_v41 = vpop.f32.mrf.mxu1  ;;  %9188 = vmatmul.msk.f32.gmra.mxu3 %vm6185_vm10, %v14214_v33  ;;  %v4177_v2 = vadd.f32 %v17277_v3, %v3714_v23  ;;  %v14259_v49 = vpop.f32.mrf.mxu3  ;;  %v17283_v3 = vld [vmem:[#allocation16_spill] sm:$0xff] }
 0x689   : > { %17274 = vst [vmem:[#allocation48_spill] sm:$0xff] %v14227_v31  ;;  %v5859_v61 = vrot.slane %v14225_v45, 2  ;;  %v14238_v21 = vadd.f32 %v5324_v41, %v5080_v32  ;;  %v6553_v6 = vrot.slane %v14227_v31, 4  ;;  %v4628_v56 = vadd.f32 %v13435_v16, %v4176_v24 }
 0x68a   : > { %17278 = vst [vmem:[#allocation87_spill] sm:$0xff] %v14245_v30  ;;  %5568 = vrot.lane.b32.xlu1 %v14233_v26, %s9604_s25  ;;  %v14253_v32 = vsel %vm506_vm0, %v6551_v55, %v6555_v44  ;;  %v4629_v52 = vadd.f32 %v13440_v5, %v4177_v2  ;;  %v6559_v41 = vrot.slane %v14245_v30, 4  ;;  %v17285_v2 = vld [vmem:[#allocation21_spill] sm:$0xff] }
 0x68b   : > { %5570 = vrot.lane.b32.xlu2 %v14238_v21, %s9604_s25  ;;  %6310 = vmatmul.f32.gmra.mxu2 %v14227_v31  ;;  %17279 = vst [vmem:[#allocation2_spill] sm:$0xff] %v14253_v32  ;;  %v14256_v36 = vsel %vm506_vm0, %v6549_v22, %v6553_v6  ;;  %v5860_v16 = vsel %vm1176_vm3, %v5855_v13, %v5859_v61  ;;  %v17288_v31 = vrot.slane %v14153_v35, 2 }
 0x68c   : > { %17280 = vst [vmem:[#allocation122_spill] sm:$0xff] %v14256_v36  ;;  %9238 = vmatmul.msk.f32.gmra.mxu1 %vm6185_vm10, %v14253_v32  ;;  %6815 = vmatmul.f32.gmra.mxu0 %v14256_v36  ;;  %v6043_v42 = vmax.f32 %v14165_v27, %v5860_v16  ;;  %v5081_v39 = vadd.f32 %v14104_v7, %v4628_v56  ;;  %v5513_v23 = vpop.permute.xlu0 %5512  ;;  %v17284_v16 = vld [vmem:[#allocation13_spill] sm:$0xff] }
 0x68d   : > { %v5515_v55 = vpop.permute.xlu1 %5514  ;;  %v3604_v36 = vadd.f32 %v17283_v3, %v13227_v43  ;;  %v5082_v27 = vadd.f32 %v14119_v53, %v4629_v52  ;;  %v3717_v56 = vadd.f32 %v17285_v2, %v13229_v25 }
 0x68e   : > { %v14268_v22 = vmax.f32 %v17281_v20, %v5515_v55  ;;  %v5623_v13 = vsel %vm5616_vm9, %v5513_v23, %v5515_v55  ;;  %v14271_v24 = vmax.f32 %v6043_v42, 0.0  ;;  %v14288_v23 = vpop.permute.xlu2 %5522 }
 0x68f   : > { %v14278_v5 = vmax.f32 %v17284_v16, %v5623_v13  ;;  %v5214_v7 = vpop.f32.mrf.mxu0  ;;  %v17286_v13 = vld [vmem:[#allocation105_spill] sm:$0xff]  ;;  %v17287_v16 = vld [vmem:[#allocation108_spill] sm:$0xff] }
 0x690   : > { %17282 = vst [vmem:[#allocation123_spill] sm:$0xff] %v14271_v24  ;;  %v5865_v20 = vrot.slane %v14268_v22, 2  ;;  %v14283_v32 = vadd.f32 %v5214_v7, %v5081_v39  ;;  %v5327_v42 = vpop.f32.mrf.mxu1  ;;  %9189 = vmatmul.msk.f32.gmra.mxu3 %vm6185_vm10, %v14245_v30  ;;  %v6557_v55 = vrot.slane %v14271_v24, 4  ;;  %v4178_v3 = vadd.f32 %v17286_v13, %v3604_v36  ;;  %v14312_v13 = vpop.f32.mrf.mxu2 }
 0x691   : > { %v5863_v53 = vrot.slane %v14278_v5, 2  ;;  %v14291_v52 = vadd.f32 %v5327_v42, %v5082_v27  ;;  %v4179_v2 = vadd.f32 %v17287_v16, %v3717_v56  ;;  %v14301_v7 = vsel %vm506_vm0, %v6555_v44, %v6559_v41  ;;  %v17291_v42 = vld [vmem:[#allocation6_spill] sm:$0xff]  ;;  %v17292_v16 = vld [vmem:[#allocation65_spill] sm:$0xff]  ;;  %v14331_v30 = vpop.f32.mrf.mxu3 }
 0x692   : > { %v5866_v39 = vsel %vm1176_vm3, %v17288_v31, %v5865_v20  ;;  %5572 = vrot.lane.b32.xlu0 %v14283_v32, %s9604_s25  ;;  %17289 = vst [vmem:[#allocation52_spill] sm:$0xff] %v14301_v7  ;;  %v14307_v27 = vsel %vm506_vm0, %v6553_v6, %v6557_v55  ;;  %v4630_v31 = vadd.f32 %v17291_v42, %v4178_v3 }
 0x693   : > { %5574 = vrot.lane.b32.xlu1 %v14291_v52, %s9604_s25  ;;  %6313 = vmatmul.f32.gmra.mxu2 %v14271_v24  ;;  %17290 = vst [vmem:[#allocation28_spill] sm:$0xff] %v14307_v27  ;;  %v6046_v36 = vmax.f32 %v14153_v35, %v5866_v39  ;;  %v5864_v56 = vsel %vm1176_vm3, %v5859_v61, %v5863_v53  ;;  %v17293_v39 = vld [vmem:[#allocation106_spill] sm:$0xff] }
 0x694   : > { %v14316_v44 = vmax.f32 %v13767_v8, %v14288_v23  ;;  %9239 = vmatmul.msk.f32.gmra.mxu1 %vm6185_vm10, %v14301_v7  ;;  %6818 = vmatmul.f32.gmra.mxu0 %v14307_v27  ;;  %v6045_v6 = vmax.f32 %v14225_v45, %v5864_v56  ;;  %v3607_v35 = vadd.f32 %v17292_v16, %v13227_v43  ;;  %v9279_v8 = vld [vmem:[%s16527_s6 + $0x178] sm:$0xff]  ;;  %v17295_v45 = vld [vmem:[#allocation35_spill] sm:$0xff] }
 0x695   : > { %v4631_v61 = vadd.f32 %v17293_v39, %v4179_v2  ;;  %v5519_v24 = vpop.permute.xlu0 %5518  ;;  %v14325_v3 = vmax.f32 %v6046_v36, 0.0  ;;  %v5083_v42 = vadd.f32 %v14171_v10, %v4630_v31  ;;  %7077 = vmatpush.msra.mxu2 %v9279_v8  ;;  %v17297_v2 = vld [vmem:[#allocation26_spill] sm:$0xff]  ;;  %v17298_v39 = vld [vmem:[#allocation64_spill] sm:$0xff]  ;;  %v17299_v8 = vld [vmem:[#allocation109_spill] sm:$0xff] }
 0x696   : > { %v5624_v27 = vsel %vm5616_vm9, %v14222_v59, %v5519_v24  ;;  %v5728_v56 = vmax.f32 %v17295_v45, %v5519_v24  ;;  %v14336_v7 = vmax.f32 %v6045_v6, 0.0  ;;  %v3720_v36 = vadd.f32 %v17297_v2, %v13229_v25 }
 0x697   : > { %17294 = vst [vmem:[#allocation68_spill] sm:$0xff] %v14325_v3  ;;  %v5084_v16 = vadd.f32 %v14185_v62, %v4631_v61  ;;  %v14342_v33 = vmax.f32 %v17298_v39, %v5624_v27  ;;  %v5217_v28 = vpop.f32.mrf.mxu0  ;;  %v6563_v10 = vrot.slane %v14325_v3, 4  ;;  %v16631_v31 = vrot.slane %v14316_v44, 2  ;;  %v17300_v61 = vld [vmem:[#allocation110_spill] sm:$0xff] }
 0x698   : > { %17296 = vst [vmem:[#allocation71_spill] sm:$0xff] %v14336_v7  ;;  %v5869_v34 = vrot.slane %v5728_v56, 2  ;;  %v14346_v59 = vadd.f32 %v5217_v28, %v5083_v42  ;;  %v5330_v24 = vpop.f32.mrf.mxu1  ;;  %9190 = vmatmul.msk.f32.gmra.mxu3 %vm6185_vm10, %v14325_v3  ;;  %v6561_v6 = vrot.slane %v14336_v7, 4  ;;  %v4180_v45 = vadd.f32 %v17299_v8, %v3607_v35 }
 0x699   : > { %v5867_v62 = vrot.slane %v14342_v33, 2  ;;  %v14353_v27 = vadd.f32 %v5330_v24, %v5084_v16  ;;  %v4181_v2 = vadd.f32 %v17300_v61, %v3720_v36  ;;  %v14363_v42 = vsel %vm506_vm0, %v6559_v41, %v6563_v10  ;;  %v17303_v16 = vld [vmem:[#allocation107_spill] sm:$0xff]  ;;  %v17305_v61 = vld [vmem:[#allocation46_spill] sm:$0xff] }
 0x69a   : > { %v5870_v39 = vsel %vm1176_vm3, %v5865_v20, %v5869_v34  ;;  %v5874_v28 = vsel %vm1176_vm3, %v5869_v34, %v16631_v31  ;;  %5576 = vrot.lane.b32.xlu2 %v14346_v59, %s9604_s25  ;;  %17301 = vst [vmem:[#allocation126_spill] sm:$0xff] %v14363_v42  ;;  %v14369_v35 = vsel %vm506_vm0, %v6557_v55, %v6561_v6  ;;  %v17304_v24 = vld [vmem:[#allocation31_spill] sm:$0xff] }
 0x69b   : > { %5578 = vrot.lane.b32.xlu0 %v14353_v27, %s9604_s25  ;;  %6316 = vmatmul.f32.gmra.mxu2 %v14336_v7  ;;  %17302 = vst [vmem:[#allocation127_spill] sm:$0xff] %v14369_v35  ;;  %v6048_v20 = vmax.f32 %v14268_v22, %v5870_v39  ;;  %v5868_v36 = vsel %vm1176_vm3, %v5863_v53, %v5867_v62  ;;  %v14384_v53 = vpop.f32.mrf.mxu2 }
 0x69c   : > { %v4632_v34 = vadd.f32 %v17303_v16, %v4180_v45  ;;  %9240 = vmatmul.msk.f32.gmra.mxu1 %vm6185_vm10, %v14363_v42  ;;  %6821 = vmatmul.f32.gmra.mxu0 %v14369_v35  ;;  %v6047_v41 = vmax.f32 %v14278_v5, %v5868_v36  ;;  %v3610_v8 = vadd.f32 %v17304_v24, %v13227_v43  ;;  %v5521_v55 = vpop.permute.xlu1 %5520  ;;  %v14391_v36 = vpop.permute.xlu2 %5528  ;;  %v17308_v24 = vld [vmem:[#allocation40_spill] sm:$0xff]  ;;  %v17312_v42 = vld [vmem:[#allocation11_spill] sm:$0xff] }
 0x69d   : > { %v4633_v31 = vadd.f32 %v17305_v61, %v4181_v2  ;;  %v14381_v7 = vmax.f32 %v6048_v20, 0.0  ;;  %v6050_v45 = vmax.f32 %v5728_v56, %v5874_v28  ;;  %v5625_v39 = vsel %vm5616_vm9, %v5521_v55, %v14288_v23  ;;  %v17310_v61 = vld [vmem:[#allocation111_spill] sm:$0xff]  ;;  %v14400_v28 = vpop.f32.mrf.mxu3 }
 0x69e   : > { %v5085_v22 = vadd.f32 %v14243_v48, %v4632_v34  ;;  %v14388_v16 = vmax.f32 %v6047_v41, 0.0  ;;  %v14394_v35 = vmax.f32 %v17308_v24, %v5625_v39  ;;  %v17309_v48 = vld [vmem:[#allocation5_spill] sm:$0xff]  ;;  %v4182_v56 = vadd.f32 %v17310_v61, %v3610_v8 }
 0x69f   : > { %17306 = vst [vmem:[#allocation25_spill] sm:$0xff] %v14381_v7  ;;  %v5086_v5 = vadd.f32 %v14259_v49, %v4633_v31  ;;  %v5220_v2 = vpop.f32.mrf.mxu0  ;;  %v6567_v20 = vrot.slane %v14381_v7, 4  ;;  %v3723_v34 = vadd.f32 %v17309_v48, %v13229_v25  ;;  %v17311_v39 = vld [vmem:[#allocation113_spill] sm:$0xff]  ;;  %v14412_v3 = vmax.f32 %v6050_v45, 0.0  ;;  %v9278_v45 = vld [vmem:[%s16527_s6 + $0x170] sm:$0xff] }
 0x6a0   : > { %17307 = vst [vmem:[#allocation29_spill] sm:$0xff] %v14388_v16  ;;  %v14402_v23 = vadd.f32 %v5220_v2, %v5085_v22  ;;  %v5333_v41 = vpop.f32.mrf.mxu1  ;;  %9191 = vmatmul.msk.f32.gmra.mxu3 %vm6185_vm10, %v14381_v7  ;;  %v6565_v49 = vrot.slane %v14388_v16, 4  ;;  %v5871_v31 = vrot.slane %v14394_v35, 2  ;;  %v4634_v48 = vadd.f32 %v17312_v42, %v4182_v56  ;;  %v17316_v2 = vld [vmem:[#allocation19_spill] sm:$0xff]  ;;  %7078 = vmatpush.msra.mxu2 %v9278_v45 }
 0x6a1   : > { %v14408_v55 = vadd.f32 %v5333_v41, %v5086_v5  ;;  %v4183_v24 = vadd.f32 %v17311_v39, %v3723_v34  ;;  %17313 = vst [vmem:[#allocation37_spill] sm:$0xff] %v14412_v3  ;;  %v14420_v8 = vsel %vm506_vm0, %v6563_v10, %v6567_v20  ;;  %v17317_v56 = vld [vmem:[#allocation43_spill] sm:$0xff] }
 0x6a2   : > { %5580 = vrot.lane.b32.xlu1 %v14402_v23, %s9604_s25  ;;  %17314 = vst [vmem:[#allocation74_spill] sm:$0xff] %v14420_v8  ;;  %v14423_v22 = vsel %vm506_vm0, %v6561_v6, %v6565_v49  ;;  %v5872_v5 = vsel %vm1176_vm3, %v5867_v62, %v5871_v31  ;;  %v5087_v10 = vadd.f32 %v14312_v13, %v4634_v48  ;;  %v17321_v48 = vld [vmem:[#allocation7_spill] sm:$0xff] }
 0x6a3   : > { %5582 = vrot.lane.b32.xlu2 %v14408_v55, %s9604_s25  ;;  %6319 = vmatmul.f32.gmra.mxu2 %v14388_v16  ;;  %17315 = vst [vmem:[#allocation130_spill] sm:$0xff] %v14423_v22  ;;  %v6049_v42 = vmax.f32 %v14342_v33, %v5872_v5  ;;  %v4635_v34 = vadd.f32 %v17316_v2, %v4183_v24  ;;  %v6571_v33 = vrot.slane %v14412_v3, 4  ;;  %v17319_v5 = vld [vmem:[#allocation56_spill] sm:$0xff]  ;;  %v17320_v24 = vld [vmem:[#allocation39_spill] sm:$0xff] }
 0x6a4   : > { %9241 = vmatmul.msk.f32.gmra.mxu1 %vm6185_vm10, %v14420_v8  ;;  %6824 = vmatmul.f32.gmra.mxu0 %v14423_v22  ;;  %v5525_v6 = vpop.permute.xlu0 %5524  ;;  %v3613_v22 = vadd.f32 %v17319_v5, %v13227_v43  ;;  %v3726_v45 = vadd.f32 %v17321_v48, %v13229_v25  ;;  %v17323_v16 = vld [vmem:[#allocation116_spill] sm:$0xff] }
 0x6a5   : > { %v5527_v61 = vpop.permute.xlu1 %5526  ;;  %v14439_v39 = vmax.f32 %v6049_v42, 0.0  ;;  %v5088_v8 = vadd.f32 %v14331_v30, %v4635_v34  ;;  %v14458_v30 = vpop.permute.xlu2 %5534 }
 0x6a6   : > { %v14436_v62 = vmax.f32 %v17317_v56, %v5527_v61  ;;  %v5626_v41 = vsel %vm5616_vm9, %v5525_v6, %v5527_v61  ;;  %v14450_v56 = vpop.f32.mrf.mxu2  ;;  %v4185_v7 = vadd.f32 %v17323_v16, %v3726_v45  ;;  %v5021_v58 = vpop.f32.mrf.mxu3  ;;  %v17327_v45 = vld [vmem:[#allocation66_spill] sm:$0xff] }
 0x6a7   : > { %17318 = vst [vmem:[#allocation131_spill] sm:$0xff] %v14439_v39  ;;  %v14446_v2 = vmax.f32 %v17320_v24, %v5626_v41  ;;  %v5223_v13 = vpop.f32.mrf.mxu0  ;;  %v6569_v5 = vrot.slane %v14439_v39, 4  ;;  %v17322_v24 = vld [vmem:[#allocation114_spill] sm:$0xff] }
 0x6a8   : > { %v5877_v61 = vrot.slane %v14436_v62, 2  ;;  %v14453_v42 = vadd.f32 %v5223_v13, %v5087_v10  ;;  %v5336_v6 = vpop.f32.mrf.mxu1  ;;  %9192 = vmatmul.msk.f32.gmra.mxu3 %vm6185_vm10, %v14412_v3  ;;  %v4184_v48 = vadd.f32 %v17322_v24, %v3613_v22  ;;  %v17324_v10 = vrot.slane %v14316_v44, 2 }
 0x6a9   : > { %v5875_v34 = vrot.slane %v14446_v2, 2  ;;  %v14461_v41 = vadd.f32 %v5336_v6, %v5088_v8  ;;  %v14471_v3 = vsel %vm506_vm0, %v6567_v20, %v6571_v33  ;;  %v14477_v8 = vsel %vm506_vm0, %v6565_v49, %v6569_v5  ;;  %v17328_v49 = vld [vmem:[#allocation38_spill] sm:$0xff] }
 0x6aa   : > { %v5878_v13 = vsel %vm1176_vm3, %v17324_v10, %v5877_v61  ;;  %5584 = vrot.lane.b32.xlu0 %v14453_v42, %s9604_s25  ;;  %17325 = vst [vmem:[#allocation32_spill] sm:$0xff] %v14471_v3  ;;  %v4636_v6 = vadd.f32 %v17327_v45, %v4184_v48  ;;  %v14484_v24 = vmax.f32 %v13847_v57, %v14458_v30 }
 0x6ab   : > { %5586 = vrot.lane.b32.xlu1 %v14461_v41, %s9604_s25  ;;  %6322 = vmatmul.f32.gmra.mxu2 %v14439_v39  ;;  %17326 = vst [vmem:[#allocation51_spill] sm:$0xff] %v14477_v8  ;;  %v6052_v16 = vmax.f32 %v14316_v44, %v5878_v13  ;;  %v5876_v22 = vsel %vm1176_vm3, %v5871_v31, %v5875_v34  ;;  %v17329_v39 = vld [vmem:[#allocation73_spill] sm:$0xff] }
 0x6ac   : > { %9242 = vmatmul.msk.f32.gmra.mxu1 %vm6185_vm10, %v14471_v3  ;;  %6827 = vmatmul.f32.gmra.mxu0 %v14477_v8  ;;  %v6051_v20 = vmax.f32 %v14394_v35, %v5876_v22  ;;  %v3616_v10 = vadd.f32 %v17328_v49, %v13227_v43  ;;  %v4637_v44 = vadd.f32 %v17329_v39, %v4185_v7  ;;  %v17332_v8 = vld [vmem:[#allocation77_spill] sm:$0xff] }
 0x6ad   : > { %v5531_v13 = vpop.permute.xlu0 %5530  ;;  %v14493_v31 = vmax.f32 %v6052_v16, 0.0  ;;  %v5089_v48 = vadd.f32 %v14384_v53, %v4636_v6  ;;  %v3729_v35 = vadd.f32 %v17332_v8, %v13229_v25  ;;  %v17333_v8 = vld [vmem:[#allocation117_spill] sm:$0xff] }
 0x6ae   : > { %v5627_v57 = vsel %vm5616_vm9, %v14391_v36, %v5531_v13  ;;  %v5734_v45 = vmax.f32 %v13821_v18, %v5531_v13  ;;  %v14499_v3 = vmax.f32 %v6051_v20, 0.0  ;;  %v5090_v22 = vadd.f32 %v14400_v28, %v4637_v44  ;;  %v17334_v44 = vld [vmem:[#allocation120_spill] sm:$0xff] }
 0x6af   : > { %17330 = vst [vmem:[#allocation60_spill] sm:$0xff] %v14493_v31  ;;  %v14505_v49 = vmax.f32 %v13817_v38, %v5627_v57  ;;  %v5226_v7 = vpop.f32.mrf.mxu0  ;;  %v6575_v39 = vrot.slane %v14493_v31, 4  ;;  %v4186_v20 = vadd.f32 %v17333_v8, %v3616_v10  ;;  %v4187_v13 = vadd.f32 %v17334_v44, %v3729_v35  ;;  %v4911_v57 = vpop.f32.mrf.mxu2  ;;  %v9277_v8 = vld [vmem:[%s16527_s6 + $0x168] sm:$0xff] }
 0x6b0   : > { %17331 = vst [vmem:[#allocation41_spill] sm:$0xff] %v14499_v3  ;;  %v5881_v16 = vrot.slane %v5734_v45, 2  ;;  %v14509_v6 = vadd.f32 %v5226_v7, %v5089_v48  ;;  %v5339_v36 = vpop.f32.mrf.mxu1  ;;  %9193 = vmatmul.msk.f32.gmra.mxu3 %vm6185_vm10, %v14493_v31  ;;  %v6573_v18 = vrot.slane %v14499_v3, 4  ;;  %v17335_v48 = vrot.slane %v14484_v24, 2  ;;  %7079 = vmatpush.msra.mxu2 %v9277_v8 }
 0x6b1   : > { %v5879_v28 = vrot.slane %v14505_v49, 2  ;;  %v14516_v38 = vadd.f32 %v5339_v36, %v5090_v22  ;;  %v14526_v31 = vsel %vm506_vm0, %v6571_v33, %v6575_v39  ;;  %v17338_v22 = vld [vmem:[#allocation22_spill] sm:$0xff]  ;;  %v5024_v36 = vpop.f32.mrf.mxu3 }
 0x6b2   : > { %v5882_v53 = vsel %vm1176_vm3, %v5877_v61, %v5881_v16  ;;  %v5886_v7 = vsel %vm1176_vm3, %v5881_v16, %v17335_v48  ;;  %5588 = vrot.lane.b32.xlu2 %v14509_v6, %s9604_s25  ;;  %17336 = vst [vmem:[#allocation134_spill] sm:$0xff] %v14526_v31  ;;  %v14532_v10 = vsel %vm506_vm0, %v6569_v5, %v6573_v18  ;;  %v17339_v5 = vld [vmem:[#allocation8_spill] sm:$0xff] }
 0x6b3   : > { %5590 = vrot.lane.b32.xlu0 %v14516_v38, %s9604_s25  ;;  %6325 = vmatmul.f32.gmra.mxu2 %v14499_v3  ;;  %17337 = vst [vmem:[#allocation135_spill] sm:$0xff] %v14532_v10  ;;  %v6054_v61 = vmax.f32 %v14436_v62, %v5882_v53  ;;  %v5880_v35 = vsel %vm1176_vm3, %v5875_v34, %v5879_v28  ;;  %v17340_v62 = vld [vmem:[#allocation12_spill] sm:$0xff] }
 0x6b4   : > { %v4638_v16 = vadd.f32 %v17338_v22, %v4186_v20  ;;  %9243 = vmatmul.msk.f32.gmra.mxu1 %vm6185_vm10, %v14526_v31  ;;  %6830 = vmatmul.f32.gmra.mxu0 %v14532_v10  ;;  %v6053_v33 = vmax.f32 %v14446_v2, %v5880_v35  ;;  %v3619_v44 = vadd.f32 %v17339_v5, %v13227_v43  ;;  %v5533_v34 = vpop.permute.xlu1 %5532  ;;  %v14554_v31 = vpop.permute.xlu2 %5540 }
 0x6b5   : > { %v4639_v53 = vadd.f32 %v17340_v62, %v4187_v13  ;;  %v14547_v48 = vmax.f32 %v6054_v61, 0.0  ;;  %v6056_v22 = vmax.f32 %v5734_v45, %v5886_v7  ;;  %v5628_v10 = vsel %vm5616_vm9, %v5533_v34, %v14458_v30  ;;  %v17343_v61 = vld [vmem:[#allocation80_spill] sm:$0xff]  ;;  %v17344_v62 = vld [vmem:[#allocation121_spill] sm:$0xff] }
 0x6b6   : > { %v5091_v20 = vadd.f32 %v14450_v56, %v4638_v16  ;;  %v14552_v2 = vmax.f32 %v6053_v33, 0.0  ;;  %v14557_v3 = vmax.f32 %v13843_v40, %v5628_v10  ;;  %v3732_v8 = vadd.f32 %v17343_v61, %v13229_v25  ;;  %v17345_v10 = vld [vmem:[#allocation124_spill] sm:$0xff]  ;;  %v17346_v33 = vld [vmem:[#allocation23_spill] sm:$0xff]  ;;  %v17350_v61 = vld [vmem:[#allocation10_spill] sm:$0xff] }
 0x6b7   : > { %17341 = vst [vmem:[#allocation55_spill] sm:$0xff] %v14547_v48  ;;  %v5092_v35 = vadd.f32 %v5021_v58, %v4639_v53  ;;  %v5229_v5 = vpop.f32.mrf.mxu0  ;;  %v6579_v13 = vrot.slane %v14547_v48, 4  ;;  %v4188_v56 = vadd.f32 %v17344_v62, %v3619_v44  ;;  %v14573_v34 = vmax.f32 %v6056_v22, 0.0 }
 0x6b8   : > { %17342 = vst [vmem:[#allocation33_spill] sm:$0xff] %v14552_v2  ;;  %v14563_v45 = vadd.f32 %v5229_v5, %v5091_v20  ;;  %v5342_v7 = vpop.f32.mrf.mxu1  ;;  %9194 = vmatmul.msk.f32.gmra.mxu3 %vm6185_vm10, %v14547_v48  ;;  %v6577_v58 = vrot.slane %v14552_v2, 4  ;;  %v5883_v30 = vrot.slane %v14557_v3, 2  ;;  %v4189_v16 = vadd.f32 %v17345_v10, %v3732_v8  ;;  %v4914_v5 = vpop.f32.mrf.mxu2 }
 0x6b9   : > { %v14569_v40 = vadd.f32 %v5342_v7, %v5092_v35  ;;  %v4640_v53 = vadd.f32 %v17346_v33, %v4188_v56  ;;  %17347 = vst [vmem:[#allocation44_spill] sm:$0xff] %v14573_v34  ;;  %v14581_v44 = vsel %vm506_vm0, %v6575_v39, %v6579_v13  ;;  %v5027_v39 = vpop.f32.mrf.mxu3  ;;  %v6583_v33 = vrot.slane %v14573_v34, 4 }
 0x6ba   : > { %5592 = vrot.lane.b32.xlu1 %v14563_v45, %s9604_s25  ;;  %17348 = vst [vmem:[#allocation47_spill] sm:$0xff] %v14581_v44  ;;  %v14584_v20 = vsel %vm506_vm0, %v6573_v18, %v6577_v58  ;;  %v5884_v35 = vsel %vm1176_vm3, %v5879_v28, %v5883_v30  ;;  %v4641_v8 = vadd.f32 %v17350_v61, %v4189_v16  ;;  %v17353_v16 = vld [vmem:[#allocation53_spill] sm:$0xff] }
 0x6bb   : > { %5594 = vrot.lane.b32.xlu2 %v14569_v40, %s9604_s25  ;;  %6328 = vmatmul.f32.gmra.mxu2 %v14552_v2  ;;  %17349 = vst [vmem:[#allocation138_spill] sm:$0xff] %v14584_v20  ;;  %v6055_v22 = vmax.f32 %v14505_v49, %v5884_v35  ;;  %v5093_v62 = vadd.f32 %v4911_v57, %v4640_v53 }
 0x6bc   : > { %9244 = vmatmul.msk.f32.gmra.mxu1 %vm6185_vm10, %v14581_v44  ;;  %6833 = vmatmul.f32.gmra.mxu0 %v14584_v20  ;;  %v5537_v7 = vpop.permute.xlu0 %5536  ;;  %v17352_v44 = vld [vmem:[#allocation83_spill] sm:$0xff]  ;;  %v5094_v2 = vadd.f32 %v5024_v36, %v4641_v8  ;;  %v3735_v53 = vadd.f32 %v17353_v16, %v13229_v25  ;;  %v17356_v16 = vrot.slane %v14484_v24, 2 }
 0x6bd   : > { %v5539_v56 = vpop.permute.xlu1 %5538  ;;  %v14596_v28 = vmax.f32 %v6055_v22, 0.0  ;;  %v3622_v20 = vadd.f32 %v17352_v44, %v13227_v43  ;;  %v17354_v44 = vld [vmem:[#allocation125_spill] sm:$0xff] }
 0x6be   : > { %v14593_v10 = vmax.f32 %v13879_v46, %v5539_v56  ;;  %v5629_v18 = vsel %vm5616_vm9, %v5537_v7, %v5539_v56  ;;  %v14612_v56 = vpop.permute.xlu2 %5546  ;;  %v17355_v7 = vld [vmem:[#allocation128_spill] sm:$0xff] }
 0x6bf   : > { %17351 = vst [vmem:[#allocation139_spill] sm:$0xff] %v14596_v28  ;;  %v14602_v49 = vmax.f32 %v13875_v12, %v5629_v18  ;;  %v5232_v57 = vpop.f32.mrf.mxu0  ;;  %v6581_v22 = vrot.slane %v14596_v28, 4  ;;  %v4190_v8 = vadd.f32 %v17354_v44, %v3622_v20  ;;  %v4191_v18 = vadd.f32 %v17355_v7, %v3735_v53 }
 0x6c0   : > { %v5889_v46 = vrot.slane %v14593_v10, 2  ;;  %v14607_v35 = vadd.f32 %v5232_v57, %v5093_v62  ;;  %v5345_v61 = vpop.f32.mrf.mxu1  ;;  %9195 = vmatmul.msk.f32.gmra.mxu3 %vm6185_vm10, %v14573_v34  ;;  %v14625_v57 = vsel %vm506_vm0, %v6579_v13, %v6583_v33  ;;  %v14638_v7 = vmax.f32 %v13953_v14, %v14612_v56  ;;  %v9276_v14 = vld [vmem:[%s16527_s6 + $0x160] sm:$0xff] }
 0x6c1   : > { %v5887_v36 = vrot.slane %v14602_v49, 2  ;;  %v14615_v12 = vadd.f32 %v5345_v61, %v5094_v2  ;;  %17357 = vst [vmem:[#allocation30_spill] sm:$0xff] %v14625_v57  ;;  %v14631_v2 = vsel %vm506_vm0, %v6577_v58, %v6581_v22  ;;  %v17359_v61 = vld [vmem:[#allocation75_spill] sm:$0xff]  ;;  %v17360_v58 = vld [vmem:[#allocation86_spill] sm:$0xff]  ;;  %7080 = vmatpush.msra.mxu2 %v9276_v14  ;;  %v17365_v14 = vld [vmem:[#allocation132_spill] sm:$0xff] }
 0x6c2   : > { %v5890_v62 = vsel %vm1176_vm3, %v17356_v16, %v5889_v46  ;;  %5596 = vrot.lane.b32.xlu0 %v14607_v35, %s9604_s25  ;;  %17358 = vst [vmem:[#allocation54_spill] sm:$0xff] %v14631_v2  ;;  %v4642_v44 = vadd.f32 %v17359_v61, %v4190_v8  ;;  %v3625_v16 = vadd.f32 %v17360_v58, %v13227_v43  ;;  %v4917_v61 = vpop.f32.mrf.mxu2 }
 0x6c3   : > { %5598 = vrot.lane.b32.xlu1 %v14615_v12, %s9604_s25  ;;  %6331 = vmatmul.f32.gmra.mxu2 %v14596_v28  ;;  %v6058_v20 = vmax.f32 %v14484_v24, %v5890_v62  ;;  %v5888_v53 = vsel %vm1176_vm3, %v5883_v30, %v5887_v36  ;;  %v17361_v28 = vld [vmem:[#allocation112_spill] sm:$0xff] }
 0x6c4   : > { %9245 = vmatmul.msk.f32.gmra.mxu1 %vm6185_vm10, %v14625_v57  ;;  %6836 = vmatmul.f32.gmra.mxu0 %v14631_v2  ;;  %v6057_v13 = vmax.f32 %v14557_v3, %v5888_v53  ;;  %v4643_v24 = vadd.f32 %v17361_v28, %v4191_v18  ;;  %v5095_v8 = vadd.f32 %v4914_v5, %v4642_v44  ;;  %v17363_v53 = vld [vmem:[#allocation57_spill] sm:$0xff]  ;;  %v5030_v5 = vpop.f32.mrf.mxu3  ;;  %v16659_v44 = vrot.slane %v14638_v7, 2 }
 0x6c5   : > { %v5543_v62 = vpop.permute.xlu0 %5542  ;;  %v14647_v30 = vmax.f32 %v6058_v20, 0.0  ;;  %v3738_v28 = vadd.f32 %v17363_v53, %v13229_v25 }
 0x6c6   : > { %v5630_v57 = vsel %vm5616_vm9, %v14554_v31, %v5543_v62  ;;  %v5740_v2 = vmax.f32 %v13914_v9, %v5543_v62  ;;  %v14655_v3 = vmax.f32 %v6057_v13, 0.0  ;;  %v5096_v18 = vadd.f32 %v5027_v39, %v4643_v24  ;;  %v17364_v39 = vld [vmem:[#allocation129_spill] sm:$0xff] }
 0x6c7   : > { %17362 = vst [vmem:[#allocation50_spill] sm:$0xff] %v14647_v30  ;;  %v14660_v20 = vmax.f32 %v13907_v19, %v5630_v57  ;;  %v5235_v58 = vpop.f32.mrf.mxu0  ;;  %v6587_v34 = vrot.slane %v14647_v30, 4  ;;  %v9285_v19 = vld [vmem:[%s16527_s6 + $0x1a8] sm:$0xf]  ;;  %v4192_v57 = vadd.f32 %v17364_v39, %v3625_v16  ;;  %v17370_v39 = vld [vmem:[#allocation14_spill] sm:$0xff] }
 0x6c8   : > { %v5893_v48 = vrot.slane %v5740_v2, 2  ;;  %v14664_v31 = vadd.f32 %v5235_v58, %v5095_v8  ;;  %v5348_v9 = vpop.f32.mrf.mxu1  ;;  %9196 = vmatmul.msk.f32.gmra.mxu3 %vm6185_vm10, %v14647_v30  ;;  %v6585_v13 = vrot.slane %v14655_v3, 4  ;;  %v4193_v8 = vadd.f32 %v17365_v14, %v3738_v28 }
 0x6c9   : > { %v5891_v24 = vrot.slane %v14660_v20, 2  ;;  %v14674_v62 = vadd.f32 %v5348_v9, %v5096_v18  ;;  %9286 = vmatpush.msk.msrb.mxu3 %vm506_vm0, %v9285_v19  ;;  %v14685_v30 = vsel %vm506_vm0, %v6583_v33, %v6587_v34  ;;  %v17368_v18 = vld [vmem:[#allocation45_spill] sm:$0xff]  ;;  %v17369_v9 = vld [vmem:[#allocation90_spill] sm:$0xff] }
 0x6ca   : > { %v5894_v53 = vsel %vm1176_vm3, %v5889_v46, %v5893_v48  ;;  %v5898_v58 = vsel %vm1176_vm3, %v5893_v48, %v16659_v44  ;;  %5600 = vrot.lane.b32.xlu2 %v14664_v31, %s9604_s25  ;;  %17366 = vst [vmem:[#allocation88_spill] sm:$0xff] %v14685_v30  ;;  %v14691_v16 = vsel %vm506_vm0, %v6581_v22, %v6585_v13 }
 0x6cb   : > { %5602 = vrot.lane.b32.xlu0 %v14674_v62, %s9604_s25  ;;  %6334 = vmatmul.f32.gmra.mxu2 %v14655_v3  ;;  %17367 = vst [vmem:[#allocation59_spill] sm:$0xff] %v14691_v16  ;;  %v6060_v46 = vmax.f32 %v14593_v10, %v5894_v53  ;;  %v5892_v28 = vsel %vm1176_vm3, %v5887_v36, %v5891_v24 }
 0x6cc   : > { %v4644_v48 = vadd.f32 %v17368_v18, %v4192_v57  ;;  %9246 = vmatmul.msk.f32.gmra.mxu1 %vm6185_vm10, %v14685_v30  ;;  %6839 = vmatmul.f32.gmra.mxu0 %v14691_v16  ;;  %v6059_v33 = vmax.f32 %v14602_v49, %v5892_v28  ;;  %v3628_v19 = vadd.f32 %v17369_v9, %v13227_v43  ;;  %v5545_v22 = vpop.permute.xlu1 %5544  ;;  %v17373_v9 = vld [vmem:[#allocation91_spill] sm:$0xff]  ;;  %v4920_v30 = vpop.f32.mrf.mxu2 }
 0x6cd   : > { %v4645_v14 = vadd.f32 %v17370_v39, %v4193_v8  ;;  %v14703_v44 = vmax.f32 %v6060_v46, 0.0  ;;  %v6062_v53 = vmax.f32 %v5740_v2, %v5898_v58  ;;  %v5631_v36 = vsel %vm5616_vm9, %v5545_v22, %v14612_v56  ;;  %v17374_v39 = vld [vmem:[#allocation133_spill] sm:$0xff] }
 0x6ce   : > { %v5097_v10 = vadd.f32 %v4917_v61, %v4644_v48  ;;  %v14707_v57 = vmax.f32 %v6059_v33, 0.0  ;;  %v14710_v16 = vmax.f32 %v13949_v63, %v5631_v36  ;;  %v3741_v8 = vadd.f32 %v17373_v9, %v13229_v25  ;;  %v17375_v48 = vld [vmem:[#allocation136_spill] sm:$0xff] }
 0x6cf   : > { %17371 = vst [vmem:[#allocation34_spill] sm:$0xff] %v14703_v44  ;;  %v5098_v18 = vadd.f32 %v5030_v5, %v4645_v14  ;;  %v5238_v49 = vpop.f32.mrf.mxu0  ;;  %v6591_v28 = vrot.slane %v14703_v44, 4  ;;  %v4194_v46 = vadd.f32 %v17374_v39, %v3628_v19  ;;  %v14721_v5 = vpop.permute.xlu2 %5552  ;;  %v17376_v14 = vld [vmem:[#allocation49_spill] sm:$0xff]  ;;  %v14728_v36 = vmax.f32 %v6062_v53, 0.0 }
 0x6d0   : > { %17372 = vst [vmem:[#allocation9_spill] sm:$0xff] %v14707_v57  ;;  %v14716_v61 = vadd.f32 %v5238_v49, %v5097_v10  ;;  %v5351_v2 = vpop.f32.mrf.mxu1  ;;  %9197 = vmatmul.msk.f32.gmra.mxu3 %vm6185_vm10, %v14703_v44  ;;  %v6589_v56 = vrot.slane %v14707_v57, 4  ;;  %v5895_v63 = vrot.slane %v14710_v16, 2  ;;  %v4195_v33 = vadd.f32 %v17375_v48, %v3741_v8  ;;  %v5033_v19 = vpop.f32.mrf.mxu3  ;;  %v9334_v10 = vld [vmem:[%s16527_s6 + $0x228] sm:$0xff]  ;;  %v9336_v49 = vld [vmem:[%s16527_s6 + $0x238] sm:$0xf] }
 0x6d1   : > { %v14724_v58 = vadd.f32 %v5351_v2, %v5098_v18  ;;  %v4646_v22 = vadd.f32 %v17376_v14, %v4194_v46  ;;  %v14742_v18 = vsel %vm506_vm0, %v6587_v34, %v6591_v28  ;;  %v9275_v39 = vld [vmem:[%s16527_s6 + $0x158] sm:$0xff]  ;;  %v17379_v46 = vld [vmem:[#allocation94_spill] sm:$0xff]  ;;  %v17380_v2 = vld [vmem:[#allocation79_spill] sm:$0xff]  ;;  %7353 = vmatpush.msrb.mxu0 %v9334_v10  ;;  %9337 = vmatpush.msk.msrb.mxu1 %vm506_vm0, %v9336_v49 }
 0x6d2   : > { %5604 = vrot.lane.b32.xlu1 %v14716_v61, %s9604_s25  ;;  %17377 = vst [vmem:[#allocation89_spill] sm:$0xff] %v14742_v18  ;;  %v14745_v53 = vsel %vm506_vm0, %v6585_v13, %v6589_v56  ;;  %v5896_v9 = vsel %vm1176_vm3, %v5891_v24, %v5895_v63  ;;  %v3631_v34 = vadd.f32 %v17379_v46, %v13227_v43  ;;  %v17381_v24 = vld [vmem:[#allocation15_spill] sm:$0xff] }
 0x6d3   : > { %5606 = vrot.lane.b32.xlu2 %v14724_v58, %s9604_s25  ;;  %6337 = vmatmul.f32.gmra.mxu2 %v14707_v57  ;;  %17378 = vst [vmem:[#allocation36_spill] sm:$0xff] %v14745_v53  ;;  %v6061_v8 = vmax.f32 %v14660_v20, %v5896_v9  ;;  %v4647_v48 = vadd.f32 %v17380_v2, %v4195_v33  ;;  %v17383_v43 = vld [vmem:[#allocation95_spill] sm:$0xff]  ;;  %v17385_v2 = vld [vmem:[#allocation137_spill] sm:$0xff] }
 0x6d4   : > { %9247 = vmatmul.msk.f32.gmra.mxu1 %vm6185_vm10, %v14742_v18  ;;  %6842 = vmatmul.f32.gmra.mxu0 %v14745_v53  ;;  %v5099_v13 = vadd.f32 %v4920_v30, %v4646_v22  ;;  %v5549_v57 = vpop.permute.xlu0 %5548  ;;  %v6595_v53 = vrot.slane %v14728_v36, 4  ;;  %v3744_v46 = vadd.f32 %v17383_v43, %v13229_v25  ;;  %v17384_v30 = vld [vmem:[#allocation18_spill] sm:$0xff]  ;;  %v4196_v49 = vadd.f32 %v17385_v2, %v3631_v34  ;;  %v4923_v43 = vpop.f32.mrf.mxu2 }
 0x6d5   : > { %v5551_v14 = vpop.permute.xlu1 %5550  ;;  %v14763_v9 = vmax.f32 %v6061_v8, 0.0  ;;  %7081 = vmatpush.msra.mxu2 %v9275_v39  ;;  %v5100_v33 = vadd.f32 %v5033_v19, %v4647_v48  ;;  %v17386_v19 = vld [vmem:[#allocation140_spill] sm:$0xff]  ;;  %v17388_v34 = vrot.slane %v14638_v7, 2 }
 0x6d6   : > { %v14760_v18 = vmax.f32 %v17381_v24, %v5551_v14  ;;  %v5632_v20 = vsel %vm5616_vm9, %v5549_v57, %v5551_v14  ;;  %v4197_v48 = vadd.f32 %v17386_v19, %v3744_v46  ;;  %v17387_v14 = vld [vmem:[#allocation81_spill] sm:$0xff] }
 0x6d7   : > { %17382 = vst [vmem:[#allocation58_spill] sm:$0xff] %v14763_v9  ;;  %v14769_v22 = vmax.f32 %v17384_v30, %v5632_v20  ;;  %v5241_v10 = vpop.f32.mrf.mxu0  ;;  %v6593_v8 = vrot.slane %v14763_v9, 4  ;;  %v4648_v20 = vadd.f32 %v17387_v14, %v4196_v49  ;;  %v14789_v30 = vsel %vm506_vm0, %v6591_v28, %v6595_v53 }
 0x6d8   : > { %v5901_v24 = vrot.slane %v14760_v18, 2  ;;  %v14773_v44 = vadd.f32 %v5241_v10, %v5099_v13  ;;  %v5354_v57 = vpop.f32.mrf.mxu1  ;;  %9198 = vmatmul.msk.f32.gmra.mxu3 %vm6185_vm10, %v14728_v36  ;;  %17389 = vst [vmem:[#allocation61_spill] sm:$0xff] %v14789_v30  ;;  %v5559_v10 = vpop.permute.xlu2 %5558 }
 0x6d9   : > { %v5899_v39 = vrot.slane %v14769_v22, 2  ;;  %v14779_v25 = vadd.f32 %v5354_v57, %v5100_v33  ;;  %v14795_v46 = vsel %vm506_vm0, %v6589_v56, %v6593_v8  ;;  %v5036_v49 = vpop.f32.mrf.mxu3  ;;  %v17391_v57 = vld [vmem:[#allocation115_spill] sm:$0xff]  ;;  %v5101_v14 = vadd.f32 %v4923_v43, %v4648_v20 }
 0x6da   : > { %v5902_v13 = vsel %vm1176_vm3, %v17388_v34, %v5901_v24  ;;  %5608 = vrot.lane.b32.xlu0 %v14773_v44, %s9604_s25  ;;  %17390 = vst [vmem:[#allocation92_spill] sm:$0xff] %v14795_v46  ;;  %v4649_v19 = vadd.f32 %v17391_v57, %v4197_v48  ;;  %v14807_v56 = vmax.f32 %v14078_v29, %v5559_v10 }
 0x6db   : > { %5610 = vrot.lane.b32.xlu1 %v14779_v25, %s9604_s25  ;;  %6340 = vmatmul.f32.gmra.mxu2 %v14763_v9  ;;  %v6064_v33 = vmax.f32 %v14638_v7, %v5902_v13  ;;  %v5900_v2 = vsel %vm1176_vm3, %v5895_v63, %v5899_v39 }
 0x6dc   : > { %9248 = vmatmul.msk.f32.gmra.mxu1 %vm6185_vm10, %v14789_v30  ;;  %6845 = vmatmul.f32.gmra.mxu0 %v14795_v46  ;;  %v6063_v28 = vmax.f32 %v14710_v16, %v5900_v2  ;;  %v5102_v30 = vadd.f32 %v5036_v49, %v4649_v19 }
 0x6dd   : > { %v5555_v34 = vpop.permute.xlu0 %5554  ;;  %v14804_v9 = vmax.f32 %v6064_v33, 0.0 }
 0x6de   : > { %v5633_v7 = vsel %vm5616_vm9, %v14721_v5, %v5555_v34  ;;  %v5746_v63 = vmax.f32 %v14028_v15, %v5555_v34  ;;  %v14812_v13 = vmax.f32 %v6063_v28, 0.0  ;;  %v9333_v15 = vld [vmem:[%s16527_s6 + $0x220] sm:$0xff]  ;;  %v9274_v34 = vld [vmem:[%s16527_s6 + $0x150] sm:$0xff] }
 0x6df   : > { %v5745_v46 = vmax.f32 %v14023_v60, %v5633_v7  ;;  %v5244_v16 = vpop.f32.mrf.mxu0  ;;  %v6599_v48 = vrot.slane %v14804_v9, 4  ;;  %v5909_v60 = vrot.slane %v14807_v56, 2  ;;  %7354 = vmatpush.msrb.mxu0 %v9333_v15  ;;  %7082 = vmatpush.msra.mxu2 %v9274_v34 }
 0x6e0   : > { %v5905_v20 = vrot.slane %v5746_v63, 2  ;;  %v14816_v43 = vadd.f32 %v5244_v16, %v5101_v14  ;;  %v5357_v33 = vpop.f32.mrf.mxu1  ;;  %9199 = vmatmul.msk.f32.gmra.mxu3 %vm6185_vm10, %v14804_v9  ;;  %v6597_v29 = vrot.slane %v14812_v13, 4  ;;  %v5565_v15 = vpop.permute.xlu2 %5564 }
 0x6e1   : > { %v5903_v5 = vrot.slane %v5745_v46, 2  ;;  %v14821_v2 = vadd.f32 %v5357_v33, %v5102_v30  ;;  %v14831_v28 = vsel %vm506_vm0, %v6595_v53, %v6599_v48 }
 0x6e2   : > { %v5906_v49 = vsel %vm1176_vm3, %v5901_v24, %v5905_v20  ;;  %5612 = vrot.lane.b32.xlu2 %v14816_v43, %s9604_s25  ;;  %v14837_v30 = vsel %vm506_vm0, %v6593_v8, %v6597_v29  ;;  %v5910_v24 = vsel %vm1176_vm3, %v5905_v20, %v5909_v60 }
 0x6e3   : > { %5614 = vrot.lane.b32.xlu0 %v14821_v2, %s9604_s25  ;;  %6343 = vmatmul.f32.gmra.mxu2 %v14812_v13  ;;  %v6066_v57 = vmax.f32 %v14760_v18, %v5906_v49  ;;  %v5904_v19 = vsel %vm1176_vm3, %v5899_v39, %v5903_v5  ;;  %v6068_v16 = vmax.f32 %v5746_v63, %v5910_v24  ;;  %s16342_s25 = scalar_lea.vmem %s16531_s10, %s8346_s17 }
 0x6e4   : > { %9249 = vmatmul.msk.f32.gmra.mxu1 %vm6185_vm10, %v14831_v28  ;;  %v5557_v53 = vpop.permute.xlu1 %5556  ;;  %6848 = vmatmul.f32.gmra.mxu0 %v14837_v30  ;;  %v6065_v14 = vmax.f32 %v14769_v22, %v5904_v19 }
 0x6e5   : > { %v5634_v8 = vsel %vm5616_vm9, %v5557_v53, %v5559_v10  ;;  %v14850_v7 = vmax.f32 %v6066_v57, 0.0  ;;  %v14860_v10 = vmax.f32 %v6068_v16, 0.0 }
 0x6e6   : > { %v5747_v18 = vmax.f32 %v14072_v17, %v5634_v8  ;;  %v14853_v39 = vmax.f32 %v6065_v14, 0.0 }
 0x6e7   : > { %v6603_v20 = vrot.slane %v14850_v7, 4  ;;  %17392 = vst [vmem:[#allocation63_spill] sm:$0xff] %v14860_v10  ;;  %v6607_v34 = vrot.slane %v14860_v10, 4 }
 0x6e8   : > { %v5907_v33 = vrot.slane %v5747_v18, 2  ;;  %9200 = vmatmul.msk.f32.gmra.mxu3 %vm6185_vm10, %v14850_v7  ;;  %v6601_v22 = vrot.slane %v14853_v39, 4 }
 0x6e9   : > { %v14864_v17 = vsel %vm506_vm0, %v6599_v48, %v6603_v20 }
 0x6ea   : > { %v5908_v49 = vsel %vm1176_vm3, %v5903_v5, %v5907_v33  ;;  %v14867_v63 = vsel %vm506_vm0, %v6597_v29, %v6601_v22 }
 0x6eb   : > { %6346 = vmatmul.f32.gmra.mxu2 %v14853_v39  ;;  %17393 = vst [vmem:[#allocation3_spill] sm:$0xff] %v14867_v63  ;;  %v6067_v57 = vmax.f32 %v5745_v46, %v5908_v49 }
 0x6ec   : > { %9250 = vmatmul.msk.f32.gmra.mxu1 %vm6185_vm10, %v14864_v17  ;;  %v5561_v19 = vpop.permute.xlu0 %5560  ;;  %6851 = vmatmul.f32.gmra.mxu0 %v14867_v63 }
 0x6ed   : > { %v5563_v24 = vpop.permute.xlu1 %5562  ;;  %v14872_v53 = vmax.f32 %v6067_v57, 0.0  ;;  %v5571_v57 = vpop.permute.xlu2 %5570 }
 0x6ee   : > { %v5750_v5 = vmax.f32 %v14127_v11, %v5563_v24  ;;  %v5635_v14 = vsel %vm5616_vm9, %v5561_v19, %v5563_v24  ;;  %v14884_v11 = vsel %vm506_vm0, %v6603_v20, %v6607_v34  ;;  %v14892_v19 = vld [vmem:[%s16528_s7] ss:$0 sm:$0xff] }
 0x6ef   : > { %17394 = vst [vmem:[#allocation93_spill] sm:$0xff] %v14872_v53  ;;  %v5749_v48 = vmax.f32 %v14124_v4, %v5635_v14  ;;  %v6605_v29 = vrot.slane %v14872_v53, 4 }
 0x6f0   : > { %v5913_v46 = vrot.slane %v5750_v5, 2  ;;  %9201 = vmatmul.msk.f32.gmra.mxu3 %vm6185_vm10, %v14860_v10  ;;  %17395 = vst [vmem:[#allocation96_spill] sm:$0xff] %v14884_v11  ;;  %v9273_v10 = vld [vmem:[%s16527_s6 + $0x148] sm:$0xff] }
 0x6f1   : > { %v5911_v8 = vrot.slane %v5749_v48, 2  ;;  %v14887_v4 = vsel %vm506_vm0, %v6601_v22, %v6605_v29  ;;  %v9332_v22 = vld [vmem:[%s16527_s6 + $0x218] sm:$0xff]  ;;  %7083 = vmatpush.msra.mxu2 %v9273_v10 }
 0x6f2   : > { %v5914_v16 = vsel %vm1176_vm3, %v5909_v60, %v5913_v46  ;;  %v6415_v49 = vpop.f32.mrf.mxu3  ;;  %17396 = vst [vmem:[#allocation62_spill] sm:$0xff] %v14887_v4  ;;  %7355 = vmatpush.msrb.mxu0 %v9332_v22 }
 0x6f3   : > { %6349 = vmatmul.f32.gmra.mxu2 %v14872_v53  ;;  %v6070_v24 = vmax.f32 %v14807_v56, %v5914_v16  ;;  %v5912_v14 = vsel %vm1176_vm3, %v5907_v33, %v5911_v8  ;;  %v14908_v56 = vmax.f32 %v14238_v21, %v5571_v57 }
 0x6f4   : > { %9251 = vmatmul.msk.f32.gmra.mxu1 %vm6185_vm10, %v14884_v11  ;;  %6854 = vmatmul.f32.gmra.mxu0 %v14887_v4  ;;  %v6069_v60 = vmax.f32 %v5747_v18, %v5912_v14 }
 0x6f5   : > { %v5567_v20 = vpop.permute.xlu0 %5566  ;;  %v14899_v53 = vmax.f32 %v6070_v24, 0.0  ;;  %v5921_v10 = vrot.slane %v14908_v56, 2 }
 0x6f6   : > { %v5636_v33 = vsel %vm5616_vm9, %v5565_v15, %v5567_v20  ;;  %v5752_v16 = vmax.f32 %v14180_v0, %v5567_v20  ;;  %v6302_v4 = vpop.f32.mrf.mxu2  ;;  %v14912_v18 = vmax.f32 %v6069_v60, 0.0  ;;  %v14920_v15 = vpop.f32.mrf.mxu1 }
 0x6f7   : > { %17397 = vst [vmem:[#allocation67_spill] sm:$0xff] %v14899_v53  ;;  %v5751_v24 = vmax.f32 %v14173_v1, %v5636_v33  ;;  %v6303_v14 = vadd.f32 %v14892_v19, %v6302_v4  ;;  %v6611_v11 = vrot.slane %v14899_v53, 4 }
 0x6f8   : > { %17398 = vst [vmem:[#allocation97_spill] sm:$0xff] %v14912_v18  ;;  %v5917_v63 = vrot.slane %v5752_v16, 2  ;;  %9202 = vmatmul.msk.f32.gmra.mxu3 %vm6185_vm10, %v14899_v53  ;;  %v6609_v21 = vrot.slane %v14912_v18, 4 }
 0x6f9   : > { %17399 = vst [vmem:[#allocation98_spill] sm:$0xff] %v14920_v15  ;;  %v5915_v0 = vrot.slane %v5751_v24, 2  ;;  %v14922_v20 = vadd.f32 %v6415_v49, %v6303_v14  ;;  %v14924_v60 = vpop.f32.mrf.mxu0  ;;  %v14930_v22 = vsel %vm506_vm0, %v6607_v34, %v6611_v11 }
 0x6fa   : > { %17401 = vst [vmem:[#allocation69_spill] sm:$0xff] %v14924_v60  ;;  %v5918_v1 = vsel %vm1176_vm3, %v5913_v46, %v5917_v63  ;;  %v6418_v4 = vpop.f32.mrf.mxu3  ;;  %v14933_v33 = vsel %vm506_vm0, %v6605_v29, %v6609_v21  ;;  %v5922_v49 = vsel %vm1176_vm3, %v5917_v63, %v5921_v10 }
 0x6fb   : > { %17400 = vst [vmem:[#allocation70_spill] sm:$0xff] %v14922_v20  ;;  %6352 = vmatmul.f32.gmra.mxu2 %v14912_v18  ;;  %v6072_v53 = vmax.f32 %v5750_v5, %v5918_v1  ;;  %v5916_v15 = vsel %vm1176_vm3, %v5911_v8, %v5915_v0  ;;  %v6074_v5 = vmax.f32 %v5752_v16, %v5922_v49  ;;  %v5577_v1 = vpop.permute.xlu2 %5576  ;;  %v9331_v16 = vld [vmem:[%s16527_s6 + $0x210] sm:$0xff] }
 0x6fc   : > { %17402 = vst [vmem:[#allocation99_spill] sm:$0xff] %v14930_v22  ;;  %9252 = vmatmul.msk.f32.gmra.mxu1 %vm6185_vm10, %v14930_v22  ;;  %v5569_v14 = vpop.permute.xlu1 %5568  ;;  %6857 = vmatmul.f32.gmra.mxu0 %v14933_v33  ;;  %v6071_v46 = vmax.f32 %v5749_v48, %v5916_v15 }
 0x6fd   : > { %v5637_v20 = vsel %vm5616_vm9, %v5569_v14, %v5571_v57  ;;  %v14941_v18 = vmax.f32 %v6072_v53, 0.0  ;;  %7356 = vmatpush.msrb.mxu0 %v9331_v16 }
 0x6fe   : > { %v5753_v34 = vmax.f32 %v14233_v26, %v5637_v20  ;;  %v6305_v29 = vpop.f32.mrf.mxu2  ;;  %v14944_v60 = vmax.f32 %v6071_v46, 0.0  ;;  %v14961_v20 = vmax.f32 %v6074_v5, 0.0 }
 0x6ff   : > { %v6306_v8 = vadd.f32 %v14892_v19, %v6305_v29  ;;  %v6615_v63 = vrot.slane %v14941_v18, 4  ;;  %v9272_v29 = vld [vmem:[%s16527_s6 + $0x140] sm:$0xff] }
 0x700   : > { %17403 = vst [vmem:[#allocation100_spill] sm:$0xff] %v14944_v60  ;;  %v5919_v22 = vrot.slane %v5753_v34, 2  ;;  %9203 = vmatmul.msk.f32.gmra.mxu3 %vm6185_vm10, %v14941_v18  ;;  %v6613_v48 = vrot.slane %v14944_v60, 4  ;;  %7084 = vmatpush.msra.mxu2 %v9272_v29 }
 0x701   : > { %v14951_v57 = vadd.f32 %v6418_v4, %v6306_v8  ;;  %v14953_v53 = vpop.f32.mrf.mxu1  ;;  %v14955_v26 = vpop.f32.mrf.mxu0  ;;  %17405 = vst [vmem:[#allocation76_spill] sm:$0xff] %v14961_v20  ;;  %v14965_v14 = vsel %vm506_vm0, %v6611_v11, %v6615_v63 }
 0x702   : > { %v5920_v15 = vsel %vm1176_vm3, %v5915_v0, %v5919_v22  ;;  %17406 = vst [vmem:[#allocation101_spill] sm:$0xff] %v14965_v14  ;;  %v14968_v4 = vsel %vm506_vm0, %v6609_v21, %v6613_v48 }
 0x703   : > { %17404 = vst [vmem:[#allocation72_spill] sm:$0xff] %v14951_v57  ;;  %6355 = vmatmul.f32.gmra.mxu2 %v14944_v60  ;;  %v6421_v49 = vpop.f32.mrf.mxu3  ;;  %v6073_v46 = vmax.f32 %v5751_v24, %v5920_v15  ;;  %v6619_v57 = vrot.slane %v14961_v20, 4 }
 0x704   : > { %17407 = vst [vmem:[#allocation102_spill] sm:$0xff] %v14968_v4  ;;  %9253 = vmatmul.msk.f32.gmra.mxu1 %vm6185_vm10, %v14965_v14  ;;  %v5573_v0 = vpop.permute.xlu0 %5572  ;;  %6860 = vmatmul.f32.gmra.mxu0 %v14968_v4 }
 0x705   : > { %v5575_v5 = vpop.permute.xlu1 %5574  ;;  %v14976_v8 = vmax.f32 %v6073_v46, 0.0 }
 0x706   : > { %v5756_v11 = vmax.f32 %v14291_v52, %v5575_v5  ;;  %v5638_v21 = vsel %vm5616_vm9, %v5573_v0, %v5575_v5  ;;  %v6308_v24 = vpop.f32.mrf.mxu2 }
 0x707   : > { %17408 = vst [vmem:[#allocation4_spill] sm:$0xff] %v14976_v8  ;;  %v5755_v15 = vmax.f32 %v14283_v32, %v5638_v21  ;;  %v6309_v16 = vadd.f32 %v14892_v19, %v6308_v24  ;;  %v6617_v4 = vrot.slane %v14976_v8, 4  ;;  %v5583_v32 = vpop.permute.xlu2 %5582  ;;  %v14995_v21 = vsel %vm506_vm0, %v6615_v63, %v6619_v57 }
 0x708   : > { %v5925_v14 = vrot.slane %v5756_v11, 2  ;;  %9204 = vmatmul.msk.f32.gmra.mxu3 %vm6185_vm10, %v14961_v20 }
 0x709   : > { %v5923_v46 = vrot.slane %v5755_v15, 2  ;;  %v14986_v60 = vadd.f32 %v6421_v49, %v6309_v16  ;;  %v14988_v29 = vpop.f32.mrf.mxu1  ;;  %v14990_v52 = vpop.f32.mrf.mxu0  ;;  %v14998_v24 = vsel %vm506_vm0, %v6613_v48, %v6617_v4 }
 0x70a   : > { %17410 = vst [vmem:[#allocation82_spill] sm:$0xff] %v14988_v29  ;;  %v5926_v0 = vsel %vm1176_vm3, %v5921_v10, %v5925_v14 }
 0x70b   : > { %17409 = vst [vmem:[#allocation78_spill] sm:$0xff] %v14986_v60  ;;  %6358 = vmatmul.f32.gmra.mxu2 %v14976_v8  ;;  %v6424_v5 = vpop.f32.mrf.mxu3  ;;  %v6076_v20 = vmax.f32 %v14908_v56, %v5926_v0  ;;  %v5924_v49 = vsel %vm1176_vm3, %v5919_v22, %v5923_v46  ;;  %v15008_v8 = vmax.f32 %v14408_v55, %v5583_v32 }
 0x70c   : > { %17411 = vst [vmem:[#allocation103_spill] sm:$0xff] %v14998_v24  ;;  %9254 = vmatmul.msk.f32.gmra.mxu1 %vm6185_vm10, %v14995_v21  ;;  %6863 = vmatmul.f32.gmra.mxu0 %v14998_v24  ;;  %v6075_v10 = vmax.f32 %v5753_v34, %v5924_v49 }
 0x70d   : > { %v5579_v16 = vpop.permute.xlu0 %5578  ;;  %v15005_v60 = vmax.f32 %v6076_v20, 0.0 }
 0x70e   : > { %v5639_v63 = vsel %vm5616_vm9, %v5577_v1, %v5579_v16  ;;  %v5758_v48 = vmax.f32 %v14353_v27, %v5579_v16  ;;  %v6311_v29 = vpop.f32.mrf.mxu2  ;;  %v15012_v56 = vmax.f32 %v6075_v10, 0.0 }
 0x70f   : > { %v5757_v22 = vmax.f32 %v14346_v59, %v5639_v63  ;;  %v6312_v0 = vadd.f32 %v14892_v19, %v6311_v29  ;;  %v6623_v24 = vrot.slane %v15005_v60, 4  ;;  %v9330_v59 = vld [vmem:[%s16527_s6 + $0x208] sm:$0xff]  ;;  %v5933_v29 = vrot.slane %v15008_v8, 2 }
 0x710   : > { %v5929_v34 = vrot.slane %v5758_v48, 2  ;;  %9205 = vmatmul.msk.f32.gmra.mxu3 %vm6185_vm10, %v15005_v60  ;;  %v6621_v55 = vrot.slane %v15012_v56, 4  ;;  %7357 = vmatpush.msrb.mxu0 %v9330_v59 }
 0x711   : > { %v5927_v20 = vrot.slane %v5757_v22, 2  ;;  %v15020_v49 = vadd.f32 %v6424_v5, %v6312_v0  ;;  %v15022_v1 = vpop.f32.mrf.mxu1  ;;  %v15024_v27 = vpop.f32.mrf.mxu0  ;;  %v15033_v63 = vsel %vm506_vm0, %v6619_v57, %v6623_v24  ;;  %v9271_v57 = vld [vmem:[%s16527_s6 + $0x138] sm:$0xff] }
 0x712   : > { %17413 = vst [vmem:[#allocation17_spill] sm:$0xff] %v15022_v1  ;;  %v5930_v10 = vsel %vm1176_vm3, %v5925_v14, %v5929_v34  ;;  %v15036_v5 = vsel %vm506_vm0, %v6617_v4, %v6621_v55  ;;  %v5934_v1 = vsel %vm1176_vm3, %v5929_v34, %v5933_v29  ;;  %7085 = vmatpush.msra.mxu2 %v9271_v57 }
 0x713   : > { %17412 = vst [vmem:[#allocation104_spill] sm:$0xff] %v15020_v49  ;;  %6361 = vmatmul.f32.gmra.mxu2 %v15012_v56  ;;  %v6427_v16 = vpop.f32.mrf.mxu3  ;;  %v6078_v0 = vmax.f32 %v5756_v11, %v5930_v10  ;;  %v5928_v49 = vsel %vm1176_vm3, %v5923_v46, %v5927_v20  ;;  %v6080_v10 = vmax.f32 %v5758_v48, %v5934_v1 }
 0x714   : > { %17414 = vst [vmem:[#allocation16_spill] sm:$0xff] %v15024_v27  ;;  %9255 = vmatmul.msk.f32.gmra.mxu1 %vm6185_vm10, %v15033_v63  ;;  %v5581_v27 = vpop.permute.xlu1 %5580  ;;  %6866 = vmatmul.f32.gmra.mxu0 %v15036_v5  ;;  %v6077_v14 = vmax.f32 %v5755_v15, %v5928_v49  ;;  %v5589_v15 = vpop.permute.xlu2 %5588 }
 0x715   : > { %17415 = vst [vmem:[#allocation13_spill] sm:$0xff] %v15033_v63  ;;  %v5640_v59 = vsel %vm5616_vm9, %v5581_v27, %v5583_v32  ;;  %v15047_v4 = vmax.f32 %v6078_v0, 0.0  ;;  %v15064_v48 = vmax.f32 %v6080_v10, 0.0 }
 0x716   : > { %17416 = vst [vmem:[#allocation21_spill] sm:$0xff] %v15036_v5  ;;  %v5759_v11 = vmax.f32 %v14402_v23, %v5640_v59  ;;  %v6314_v46 = vpop.f32.mrf.mxu2  ;;  %v15050_v34 = vmax.f32 %v6077_v14, 0.0 }
 0x717   : > { %v6315_v63 = vadd.f32 %v14892_v19, %v6314_v46  ;;  %v6627_v5 = vrot.slane %v15047_v4, 4  ;;  %17420 = vst [vmem:[#allocation65_spill] sm:$0xff] %v15064_v48 }
 0x718   : > { %17417 = vst [vmem:[#allocation105_spill] sm:$0xff] %v15050_v34  ;;  %v5931_v49 = vrot.slane %v5759_v11, 2  ;;  %9206 = vmatmul.msk.f32.gmra.mxu3 %vm6185_vm10, %v15047_v4  ;;  %v6625_v32 = vrot.slane %v15050_v34, 4 }
 0x719   : > { %v15057_v27 = vadd.f32 %v6427_v16, %v6315_v63  ;;  %v15059_v0 = vpop.f32.mrf.mxu1  ;;  %v15061_v23 = vpop.f32.mrf.mxu0  ;;  %v15068_v57 = vsel %vm506_vm0, %v6623_v24, %v6627_v5 }
 0x71a   : > { %17419 = vst [vmem:[#allocation6_spill] sm:$0xff] %v15059_v0  ;;  %v5932_v14 = vsel %vm1176_vm3, %v5927_v20, %v5931_v49  ;;  %v15071_v59 = vsel %vm506_vm0, %v6621_v55, %v6625_v32 }
 0x71b   : > { %17418 = vst [vmem:[#allocation108_spill] sm:$0xff] %v15057_v27  ;;  %6364 = vmatmul.f32.gmra.mxu2 %v15050_v34  ;;  %v6430_v1 = vpop.f32.mrf.mxu3  ;;  %v6079_v46 = vmax.f32 %v5757_v22, %v5932_v14  ;;  %v6631_v22 = vrot.slane %v15064_v48, 4 }
 0x71c   : > { %17421 = vst [vmem:[#allocation106_spill] sm:$0xff] %v15068_v57  ;;  %9256 = vmatmul.msk.f32.gmra.mxu1 %vm6185_vm10, %v15068_v57  ;;  %v5585_v16 = vpop.permute.xlu0 %5584  ;;  %6869 = vmatmul.f32.gmra.mxu0 %v15071_v59 }
 0x71d   : > { %17422 = vst [vmem:[#allocation35_spill] sm:$0xff] %v15071_v59  ;;  %v5587_v63 = vpop.permute.xlu1 %5586  ;;  %v15076_v20 = vmax.f32 %v6079_v46, 0.0 }
 0x71e   : > { %v5762_v10 = vmax.f32 %v14461_v41, %v5587_v63  ;;  %v5641_v27 = vsel %vm5616_vm9, %v5585_v16, %v5587_v63  ;;  %v6317_v34 = vpop.f32.mrf.mxu2 }
 0x71f   : > { %17423 = vst [vmem:[#allocation26_spill] sm:$0xff] %v15076_v20  ;;  %v5761_v24 = vmax.f32 %v14453_v42, %v5641_v27  ;;  %v6318_v55 = vadd.f32 %v14892_v19, %v6317_v34  ;;  %v6629_v14 = vrot.slane %v15076_v20, 4  ;;  %v5595_v42 = vpop.permute.xlu2 %5594  ;;  %v15095_v27 = vsel %vm506_vm0, %v6627_v5, %v6631_v22  ;;  %v9329_v5 = vld [vmem:[%s16527_s6 + $0x200] sm:$0xff] }
 0x720   : > { %v5937_v57 = vrot.slane %v5762_v10, 2  ;;  %9207 = vmatmul.msk.f32.gmra.mxu3 %vm6185_vm10, %v15064_v48  ;;  %17426 = vst [vmem:[#allocation110_spill] sm:$0xff] %v15095_v27  ;;  %7358 = vmatpush.msrb.mxu0 %v9329_v5 }
 0x721   : > { %v5935_v59 = vrot.slane %v5761_v24, 2  ;;  %v15086_v46 = vadd.f32 %v6430_v1, %v6318_v55  ;;  %v15088_v0 = vpop.f32.mrf.mxu1  ;;  %v15090_v41 = vpop.f32.mrf.mxu0  ;;  %v15098_v63 = vsel %vm506_vm0, %v6625_v32, %v6629_v14  ;;  %v9270_v32 = vld [vmem:[%s16527_s6 + $0x130] sm:$0xff] }
 0x722   : > { %17425 = vst [vmem:[#allocation109_spill] sm:$0xff] %v15088_v0  ;;  %v5938_v16 = vsel %vm1176_vm3, %v5933_v29, %v5937_v57  ;;  %7086 = vmatpush.msra.mxu2 %v9270_v32 }
 0x723   : > { %17424 = vst [vmem:[#allocation64_spill] sm:$0xff] %v15086_v46  ;;  %6367 = vmatmul.f32.gmra.mxu2 %v15076_v20  ;;  %v6433_v34 = vpop.f32.mrf.mxu3  ;;  %v6082_v48 = vmax.f32 %v15008_v8, %v5938_v16  ;;  %v5936_v1 = vsel %vm1176_vm3, %v5931_v49, %v5935_v59  ;;  %v15114_v8 = vmax.f32 %v14569_v40, %v5595_v42 }
 0x724   : > { %17427 = vst [vmem:[#allocation107_spill] sm:$0xff] %v15098_v63  ;;  %9257 = vmatmul.msk.f32.gmra.mxu1 %vm6185_vm10, %v15095_v27  ;;  %6872 = vmatmul.f32.gmra.mxu0 %v15098_v63  ;;  %v6081_v29 = vmax.f32 %v5759_v11, %v5936_v1 }
 0x725   : > { %v5591_v55 = vpop.permute.xlu0 %5590  ;;  %v15105_v46 = vmax.f32 %v6082_v48, 0.0 }
 0x726   : > { %v5642_v49 = vsel %vm5616_vm9, %v5589_v15, %v5591_v55  ;;  %v5764_v16 = vmax.f32 %v14516_v38, %v5591_v55  ;;  %v6320_v63 = vpop.f32.mrf.mxu2  ;;  %v15118_v11 = vmax.f32 %v6081_v29, 0.0  ;;  %v5945_v55 = vrot.slane %v15114_v8, 2 }
 0x727   : > { %v5763_v48 = vmax.f32 %v14509_v6, %v5642_v49  ;;  %v6321_v1 = vadd.f32 %v14892_v19, %v6320_v63  ;;  %v6635_v27 = vrot.slane %v15105_v46, 4 }
 0x728   : > { %17428 = vst [vmem:[#allocation31_spill] sm:$0xff] %v15118_v11  ;;  %v5941_v20 = vrot.slane %v5764_v16, 2  ;;  %9208 = vmatmul.msk.f32.gmra.mxu3 %vm6185_vm10, %v15105_v46  ;;  %v6633_v40 = vrot.slane %v15118_v11, 4 }
 0x729   : > { %v5939_v15 = vrot.slane %v5763_v48, 2  ;;  %v15126_v0 = vadd.f32 %v6433_v34, %v6321_v1  ;;  %v15128_v38 = vpop.f32.mrf.mxu1  ;;  %v15130_v29 = vpop.f32.mrf.mxu0  ;;  %v15136_v5 = vsel %vm506_vm0, %v6631_v22, %v6635_v27 }
 0x72a   : > { %17430 = vst [vmem:[#allocation40_spill] sm:$0xff] %v15128_v38  ;;  %v5942_v6 = vsel %vm1176_vm3, %v5937_v57, %v5941_v20  ;;  %v15139_v32 = vsel %vm506_vm0, %v6629_v14, %v6633_v40  ;;  %v5946_v1 = vsel %vm1176_vm3, %v5941_v20, %v5945_v55 }
 0x72b   : > { %17429 = vst [vmem:[#allocation46_spill] sm:$0xff] %v15126_v0  ;;  %6370 = vmatmul.f32.gmra.mxu2 %v15118_v11  ;;  %v6436_v63 = vpop.f32.mrf.mxu3  ;;  %v6084_v49 = vmax.f32 %v5762_v10, %v5942_v6  ;;  %v5940_v34 = vsel %vm1176_vm3, %v5935_v59, %v5939_v15  ;;  %v6086_v10 = vmax.f32 %v5764_v16, %v5946_v1  ;;  %v5601_v6 = vpop.permute.xlu2 %5600  ;;  %v9328_v16 = vld [vmem:[%s16527_s6 + $0x1f8] sm:$0xff] }
 0x72c   : > { %17431 = vst [vmem:[#allocation5_spill] sm:$0xff] %v15130_v29  ;;  %9258 = vmatmul.msk.f32.gmra.mxu1 %vm6185_vm10, %v15136_v5  ;;  %v5593_v0 = vpop.permute.xlu1 %5592  ;;  %6875 = vmatmul.f32.gmra.mxu0 %v15139_v32  ;;  %v6083_v57 = vmax.f32 %v5761_v24, %v5940_v34 }
 0x72d   : > { %17432 = vst [vmem:[#allocation111_spill] sm:$0xff] %v15136_v5  ;;  %v5643_v11 = vsel %vm5616_vm9, %v5593_v0, %v5595_v42  ;;  %v15147_v38 = vmax.f32 %v6084_v49, 0.0  ;;  %v15167_v49 = vmax.f32 %v6086_v10, 0.0  ;;  %7359 = vmatpush.msrb.mxu0 %v9328_v16 }
 0x72e   : > { %v5765_v22 = vmax.f32 %v14563_v45, %v5643_v11  ;;  %v6323_v14 = vpop.f32.mrf.mxu2  ;;  %v15150_v29 = vmax.f32 %v6083_v57, 0.0 }
 0x72f   : > { %v6324_v59 = vadd.f32 %v14892_v19, %v6323_v14  ;;  %v6639_v20 = vrot.slane %v15147_v38, 4  ;;  %17435 = vst [vmem:[#allocation19_spill] sm:$0xff] %v15167_v49  ;;  %v9269_v14 = vld [vmem:[%s16527_s6 + $0x128] sm:$0xff] }
 0x730   : > { %17433 = vst [vmem:[#allocation113_spill] sm:$0xff] %v15150_v29  ;;  %v5943_v5 = vrot.slane %v5765_v22, 2  ;;  %9209 = vmatmul.msk.f32.gmra.mxu3 %vm6185_vm10, %v15147_v38  ;;  %v6637_v24 = vrot.slane %v15150_v29, 4  ;;  %7087 = vmatpush.msra.mxu2 %v9269_v14 }
 0x731   : > { %v15157_v0 = vadd.f32 %v6436_v63, %v6324_v59  ;;  %v15159_v42 = vpop.f32.mrf.mxu1  ;;  %v15161_v45 = vpop.f32.mrf.mxu0  ;;  %v15171_v1 = vsel %vm506_vm0, %v6635_v27, %v6639_v20 }
 0x732   : > { %v5944_v11 = vsel %vm1176_vm3, %v5939_v15, %v5943_v5  ;;  %17436 = vst [vmem:[#allocation43_spill] sm:$0xff] %v15171_v1  ;;  %v15174_v63 = vsel %vm506_vm0, %v6633_v40, %v6637_v24 }
 0x733   : > { %17434 = vst [vmem:[#allocation11_spill] sm:$0xff] %v15157_v0  ;;  %6373 = vmatmul.f32.gmra.mxu2 %v15150_v29  ;;  %v6439_v34 = vpop.f32.mrf.mxu3  ;;  %v6085_v57 = vmax.f32 %v5763_v48, %v5944_v11  ;;  %v6643_v0 = vrot.slane %v15167_v49, 4 }
 0x734   : > { %17437 = vst [vmem:[#allocation56_spill] sm:$0xff] %v15174_v63  ;;  %9259 = vmatmul.msk.f32.gmra.mxu1 %vm6185_vm10, %v15171_v1  ;;  %v5597_v15 = vpop.permute.xlu0 %5596  ;;  %6878 = vmatmul.f32.gmra.mxu0 %v15174_v63 }
 0x735   : > { %v5599_v10 = vpop.permute.xlu1 %5598  ;;  %v15182_v59 = vmax.f32 %v6085_v57, 0.0 }
 0x736   : > { %v5768_v27 = vmax.f32 %v14615_v12, %v5599_v10  ;;  %v5644_v40 = vsel %vm5616_vm9, %v5597_v15, %v5599_v10  ;;  %v6326_v48 = vpop.f32.mrf.mxu2  ;;  %v5607_v15 = vpop.permute.xlu2 %5606 }
 0x737   : > { %17438 = vst [vmem:[#allocation39_spill] sm:$0xff] %v15182_v59  ;;  %v5767_v11 = vmax.f32 %v14607_v35, %v5644_v40  ;;  %v6327_v16 = vadd.f32 %v14892_v19, %v6326_v48  ;;  %v6641_v63 = vrot.slane %v15182_v59, 4  ;;  %v15201_v40 = vsel %vm506_vm0, %v6639_v20, %v6643_v0 }
 0x738   : > { %v5949_v1 = vrot.slane %v5768_v27, 2  ;;  %9210 = vmatmul.msk.f32.gmra.mxu3 %vm6185_vm10, %v15167_v49 }
 0x739   : > { %v5947_v57 = vrot.slane %v5767_v11, 2  ;;  %v15192_v29 = vadd.f32 %v6439_v34, %v6327_v16  ;;  %v15194_v14 = vpop.f32.mrf.mxu1  ;;  %v15196_v12 = vpop.f32.mrf.mxu0  ;;  %v15204_v48 = vsel %vm506_vm0, %v6637_v24, %v6641_v63 }
 0x73a   : > { %17440 = vst [vmem:[#allocation114_spill] sm:$0xff] %v15194_v14  ;;  %v5950_v35 = vsel %vm1176_vm3, %v5945_v55, %v5949_v1  ;;  %v15212_v55 = vmax.f32 %v14724_v58, %v5607_v15 }
 0x73b   : > { %17439 = vst [vmem:[#allocation7_spill] sm:$0xff] %v15192_v29  ;;  %6376 = vmatmul.f32.gmra.mxu2 %v15182_v59  ;;  %v6442_v10 = vpop.f32.mrf.mxu3  ;;  %v6088_v49 = vmax.f32 %v15114_v8, %v5950_v35  ;;  %v5948_v34 = vsel %vm1176_vm3, %v5943_v5, %v5947_v57 }
 0x73c   : > { %17441 = vst [vmem:[#allocation116_spill] sm:$0xff] %v15204_v48  ;;  %9260 = vmatmul.msk.f32.gmra.mxu1 %vm6185_vm10, %v15201_v40  ;;  %6881 = vmatmul.f32.gmra.mxu0 %v15204_v48  ;;  %v6087_v16 = vmax.f32 %v5765_v22, %v5948_v34 }
 0x73d   : > { %v5603_v29 = vpop.permute.xlu0 %5602  ;;  %v15214_v59 = vmax.f32 %v6088_v49, 0.0  ;;  %v16700_v49 = vrot.slane %v15212_v55, 2 }
 0x73e   : > { %v5645_v20 = vsel %vm5616_vm9, %v5601_v6, %v5603_v29  ;;  %v5770_v24 = vmax.f32 %v14674_v62, %v5603_v29  ;;  %v6329_v14 = vpop.f32.mrf.mxu2  ;;  %v15218_v8 = vmax.f32 %v6087_v16, 0.0 }
 0x73f   : > { %v5769_v5 = vmax.f32 %v14664_v31, %v5645_v20  ;;  %v6330_v35 = vadd.f32 %v14892_v19, %v6329_v14  ;;  %v6647_v48 = vrot.slane %v15214_v59, 4  ;;  %v9327_v31 = vld [vmem:[%s16527_s6 + $0x1f0] sm:$0xff] }
 0x740   : > { %v5953_v22 = vrot.slane %v5770_v24, 2  ;;  %9211 = vmatmul.msk.f32.gmra.mxu3 %vm6185_vm10, %v15214_v59  ;;  %v6645_v58 = vrot.slane %v15218_v8, 4  ;;  %7360 = vmatpush.msrb.mxu0 %v9327_v31 }
 0x741   : > { %v5951_v6 = vrot.slane %v5769_v5, 2  ;;  %v15227_v34 = vadd.f32 %v6442_v10, %v6330_v35  ;;  %v15229_v62 = vpop.f32.mrf.mxu1  ;;  %v15235_v14 = vpop.f32.mrf.mxu0  ;;  %v15238_v16 = vsel %vm506_vm0, %v6643_v0, %v6647_v48 }
 0x742   : > { %17443 = vst [vmem:[#allocation38_spill] sm:$0xff] %v15229_v62  ;;  %v5954_v29 = vsel %vm1176_vm3, %v5949_v1, %v5953_v22  ;;  %v5958_v20 = vsel %vm1176_vm3, %v5953_v22, %v16700_v49  ;;  %v15245_v35 = vsel %vm506_vm0, %v6641_v63, %v6645_v58  ;;  %v9268_v22 = vld [vmem:[%s16527_s6 + $0x120] sm:$0xff] }
 0x743   : > { %17442 = vst [vmem:[#allocation66_spill] sm:$0xff] %v15227_v34  ;;  %6379 = vmatmul.f32.gmra.mxu2 %v15218_v8  ;;  %v6445_v10 = vpop.f32.mrf.mxu3  ;;  %v6090_v34 = vmax.f32 %v5768_v27, %v5954_v29  ;;  %v5952_v62 = vsel %vm1176_vm3, %v5947_v57, %v5951_v6  ;;  %v6092_v63 = vmax.f32 %v5770_v24, %v5958_v20 }
 0x744   : > { %17444 = vst [vmem:[#allocation73_spill] sm:$0xff] %v15238_v16  ;;  %9261 = vmatmul.msk.f32.gmra.mxu1 %vm6185_vm10, %v15238_v16  ;;  %v5605_v1 = vpop.permute.xlu1 %5604  ;;  %6884 = vmatmul.f32.gmra.mxu0 %v15245_v35  ;;  %v6089_v0 = vmax.f32 %v5767_v11, %v5952_v62 }
 0x745   : > { %v5646_v31 = vsel %vm5616_vm9, %v5605_v1, %v5607_v15  ;;  %v15255_v49 = vmax.f32 %v6090_v34, 0.0  ;;  %7088 = vmatpush.msra.mxu2 %v9268_v22  ;;  %v15273_v24 = vmax.f32 %v6092_v63, 0.0  ;;  %v9326_v63 = vld [vmem:[%s16527_s6 + $0x1e8] sm:$0xff] }
 0x746   : > { %v15258_v27 = vmax.f32 %v14716_v61, %v5646_v31  ;;  %v6332_v57 = vpop.f32.mrf.mxu2  ;;  %v15260_v29 = vmax.f32 %v6089_v0, 0.0  ;;  %v9284_v61 = vld [vmem:[%s16527_s6 + $0x1a0] sm:$0xff]  ;;  %7361 = vmatpush.msrb.mxu0 %v9326_v63  ;;  %v17453_v63 = vrot.slane %v15212_v55, 2 }
 0x747   : > { %v6333_v16 = vadd.f32 %v14892_v19, %v6332_v57  ;;  %v6651_v11 = vrot.slane %v15255_v49, 4  ;;  %17447 = vst [vmem:[#allocation120_spill] sm:$0xff] %v15273_v24  ;;  %7201 = vmatpush.msrb.mxu3 %v9284_v61 }
 0x748   : > { %17445 = vst [vmem:[#allocation77_spill] sm:$0xff] %v15260_v29  ;;  %v5955_v62 = vrot.slane %v15258_v27, 2  ;;  %9212 = vmatmul.msk.f32.gmra.mxu3 %vm6185_vm10, %v15255_v49  ;;  %v6649_v15 = vrot.slane %v15260_v29, 4 }
 0x749   : > { %v15268_v34 = vadd.f32 %v6445_v10, %v6333_v16  ;;  %v15276_v1 = vpop.f32.mrf.mxu1  ;;  %v15280_v22 = vsel %vm506_vm0, %v6647_v48, %v6651_v11  ;;  %v15285_v31 = vpop.f32.mrf.mxu0 }
 0x74a   : > { %v5956_v20 = vsel %vm1176_vm3, %v5951_v6, %v5955_v62  ;;  %17448 = vst [vmem:[#allocation22_spill] sm:$0xff] %v15276_v1  ;;  %v15283_v16 = vsel %vm506_vm0, %v6645_v58, %v6649_v15 }
 0x74b   : > { %17446 = vst [vmem:[#allocation117_spill] sm:$0xff] %v15268_v34  ;;  %6382 = vmatmul.f32.gmra.mxu2 %v15260_v29  ;;  %v6448_v0 = vpop.f32.mrf.mxu3  ;;  %v6091_v10 = vmax.f32 %v5769_v5, %v5956_v20  ;;  %v6655_v20 = vrot.slane %v15273_v24, 4 }
 0x74c   : > { %17449 = vst [vmem:[#allocation8_spill] sm:$0xff] %v15280_v22  ;;  %9262 = vmatmul.msk.f32.gmra.mxu1 %vm6185_vm10, %v15280_v22  ;;  %6887 = vmatmul.f32.gmra.mxu0 %v15283_v16  ;;  %v5609_v6 = vpop.permute.xlu0 %5608 }
 0x74d   : > { %17450 = vst [vmem:[#allocation12_spill] sm:$0xff] %v15283_v16  ;;  %v5611_v57 = vpop.permute.xlu1 %5610  ;;  %v15293_v61 = vmax.f32 %v6091_v10, 0.0 }
 0x74e   : > { %v15296_v48 = vmax.f32 %v14779_v25, %v5611_v57  ;;  %v5647_v5 = vsel %vm5616_vm9, %v5609_v6, %v5611_v57  ;;  %v6335_v58 = vpop.f32.mrf.mxu2  ;;  %v9325_v25 = vld [vmem:[%s16527_s6 + $0x1e0] sm:$0xff] }
 0x74f   : > { %17451 = vst [vmem:[#allocation80_spill] sm:$0xff] %v15293_v61  ;;  %v15301_v34 = vmax.f32 %v14773_v44, %v5647_v5  ;;  %v6336_v16 = vadd.f32 %v14892_v19, %v6335_v58  ;;  %v6653_v22 = vrot.slane %v15293_v61, 4  ;;  %7362 = vmatpush.msrb.mxu0 %v9325_v25  ;;  %v9335_v44 = vld [vmem:[%s16527_s6 + $0x230] sm:$0xff]  ;;  %v15321_v5 = vsel %vm506_vm0, %v6651_v11, %v6655_v20  ;;  %v9324_v58 = vld [vmem:[%s16527_s6 + $0x1d8] sm:$0xff] }
 0x750   : > { %v5961_v29 = vrot.slane %v15296_v48, 2  ;;  %9213 = vmatmul.msk.f32.gmra.mxu3 %vm6185_vm10, %v15273_v24  ;;  %17454 = vst [vmem:[#allocation124_spill] sm:$0xff] %v15321_v5  ;;  %7481 = vmatpush.msrb.mxu1 %v9335_v44  ;;  %v9323_v44 = vld [vmem:[%s16527_s6 + $0x1d0] sm:$0xff] }
 0x751   : > { %v5959_v10 = vrot.slane %v15301_v34, 2  ;;  %v15312_v6 = vadd.f32 %v6448_v0, %v6336_v16  ;;  %v15328_v16 = vsel %vm506_vm0, %v6649_v15, %v6653_v22  ;;  %7363 = vmatpush.msrb.mxu0 %v9324_v58  ;;  %v7649_v15 = vld [vmem:[%s16529_s8 + $0x30] sm:$0x3] }
 0x752   : > { %v5962_v57 = vsel %vm1176_vm3, %v17453_v63, %v5961_v29  ;;  %17455 = vst [vmem:[#allocation23_spill] sm:$0xff] %v15328_v16  ;;  %v5613_v63 = vpop.permute.xlu2 %5612  ;;  %9370 = vmatpush.msk.msrb.mxu2 %vm4650_vm8, %v7649_v15 }
 0x753   : > { %17452 = vst [vmem:[#allocation121_spill] sm:$0xff] %v15312_v6  ;;  %6385 = vmatmul.f32.gmra.mxu2 %v15293_v61  ;;  %v6451_v0 = vpop.f32.mrf.mxu3  ;;  %v6094_v25 = vmax.f32 %v15212_v55, %v5962_v57  ;;  %v5960_v6 = vsel %vm1176_vm3, %v5955_v62, %v5959_v10  ;;  %v9322_v55 = vld [vmem:[%s16527_s6 + $0x1c8] sm:$0xff]  ;;  %v15345_v62 = vpop.f32.mrf.mxu1  ;;  %7364 = vmatpush.msrb.mxu0 %v9323_v44 }
 0x754   : > { %9263 = vmatmul.msk.f32.gmra.mxu1 %vm6185_vm10, %v15321_v5  ;;  %6890 = vmatmul.f32.gmra.mxu0 %v15328_v16  ;;  %v6093_v11 = vmax.f32 %v15258_v27, %v5960_v6  ;;  %17456 = vst [vmem:[#allocation10_spill] sm:$0xff] %v15345_v62  ;;  %v15350_v27 = vpop.f32.mrf.mxu0 }
 0x755   : > { %v5615_v57 = vpop.permute.xlu0 %5614  ;;  %v15347_v58 = vmax.f32 %v6094_v25, 0.0  ;;  %7365 = vmatpush.msrb.mxu0 %v9322_v55 }
 0x756   : > { %v5648_v6 = vsel %vm5616_vm9, %v5613_v63, %v5615_v57  ;;  %v5776_v16 = vmax.f32 %v14821_v2, %v5615_v57  ;;  %v6338_v5 = vpop.f32.mrf.mxu2  ;;  %v15354_v61 = vmax.f32 %v6093_v11, 0.0  ;;  %v9321_v2 = vld [vmem:[%s16527_s6 + $0x1c0] sm:$0xff] }
 0x757   : > { %v5775_v24 = vmax.f32 %v14816_v43, %v5648_v6  ;;  %v6339_v1 = vadd.f32 %v14892_v19, %v6338_v5  ;;  %v6659_v62 = vrot.slane %v15347_v58, 4  ;;  %7366 = vmatpush.msrb.mxu0 %v9321_v2  ;;  %v9320_v5 = vld [vmem:[%s16527_s6 + $0x1b8] sm:$0xff] }
 0x758   : > { %v5965_v25 = vrot.slane %v5776_v16, 2  ;;  %9214 = vmatmul.msk.f32.gmra.mxu3 %vm6185_vm10, %v15347_v58  ;;  %v6657_v44 = vrot.slane %v15354_v61, 4 }
 0x759   : > { %v5963_v63 = vrot.slane %v5775_v24, 2  ;;  %v15365_v11 = vadd.f32 %v6451_v0, %v6339_v1  ;;  %v15373_v55 = vsel %vm506_vm0, %v6655_v20, %v6659_v62  ;;  %v17458_v0 = vrot.slane %v14004_v50, 2  ;;  %7367 = vmatpush.msrb.mxu0 %v9320_v5 }
 0x75a   : > { %v5966_v43 = vsel %vm1176_vm3, %v5961_v29, %v5965_v25  ;;  %v15376_v57 = vsel %vm506_vm0, %v6653_v22, %v6657_v44  ;;  %v17459_v20 = vrot.slane %v14038_v51, 2 }
 0x75b   : > { %17457 = vst [vmem:[#allocation83_spill] sm:$0xff] %v15365_v11  ;;  %6388 = vmatmul.f32.gmra.mxu2 %v15354_v61  ;;  %v6454_v15 = vpop.f32.mrf.mxu3  ;;  %v6096_v6 = vmax.f32 %v15296_v48, %v5966_v43  ;;  %v5964_v1 = vsel %vm1176_vm3, %v5959_v10, %v5963_v63  ;;  %v6034_v29 = vsel %vm1176_vm3, %v5965_v25, %v17458_v0  ;;  %v9319_v48 = vld [vmem:[%s16527_s6 + $0x1b0] sm:$0xff]  ;;  %v15397_v0 = vpop.f32.mrf.mxu1 }
 0x75c   : > { %9264 = vmatmul.msk.f32.gmra.mxu1 %vm6185_vm10, %v15373_v55  ;;  %6893 = vmatmul.f32.gmra.mxu0 %v15376_v57  ;;  %v6095_v2 = vmax.f32 %v15301_v34, %v5964_v1  ;;  %v6033_v22 = vsel %vm1176_vm3, %v5963_v63, %v17459_v20  ;;  %v6098_v43 = vmax.f32 %v5776_v16, %v6034_v29  ;;  %v15401_v63 = vpop.f32.mrf.mxu0 }
 0x75d   : > { %v15393_v10 = vmax.f32 %v6096_v6, 0.0  ;;  %v6097_v51 = vmax.f32 %v5775_v24, %v6033_v22  ;;  %7368 = vmatpush.msrb.mxu0 %v9319_v48 }
 0x75e   : > { %v6341_v50 = vpop.f32.mrf.mxu2  ;;  %v15395_v25 = vmax.f32 %v6095_v2, 0.0  ;;  %v15408_v1 = vmax.f32 %v6098_v43, 0.0 }
 0x75f   : > { %v6342_v11 = vadd.f32 %v14892_v19, %v6341_v50  ;;  %v6663_v34 = vrot.slane %v15393_v10, 4  ;;  %v15417_v2 = vmax.f32 %v6097_v51, 0.0 }
 0x760   : > { %9215 = vmatmul.msk.f32.gmra.mxu3 %vm6185_vm10, %v15393_v10  ;;  %v6661_v6 = vrot.slane %v15395_v25, 4  ;;  %17460 = vst [vmem:[#allocation53_spill] sm:$0xff] %v15408_v1  ;;  %v6667_v20 = vrot.slane %v15408_v1, 4 }
 0x761   : > { %v15406_v5 = vadd.f32 %v6454_v15, %v6342_v11  ;;  %v15412_v29 = vsel %vm506_vm0, %v6659_v62, %v6663_v34  ;;  %17461 = vst [vmem:[#allocation125_spill] sm:$0xff] %v15417_v2  ;;  %v6665_v22 = vrot.slane %v15417_v2, 4 }
 0x762   : > { %v15415_v24 = vsel %vm506_vm0, %v6657_v44, %v6661_v6  ;;  %v15435_v43 = vsel %vm506_vm0, %v6663_v34, %v6667_v20 }
 0x763   : > { %6391 = vmatmul.f32.gmra.mxu2 %v15395_v25  ;;  %v6457_v16 = vpop.f32.mrf.mxu3  ;;  %v15427_v62 = vpop.f32.mrf.mxu1  ;;  %17463 = vst [vmem:[#allocation75_spill] sm:$0xff] %v15435_v43  ;;  %v15438_v51 = vsel %vm506_vm0, %v6661_v6, %v6665_v22 }
 0x764   : > { %9265 = vmatmul.msk.f32.gmra.mxu1 %vm6185_vm10, %v15412_v29  ;;  %6896 = vmatmul.f32.gmra.mxu0 %v15415_v24  ;;  %v15431_v48 = vpop.f32.mrf.mxu0  ;;  %17464 = vst [vmem:[#allocation86_spill] sm:$0xff] %v15438_v51 }
 0x766   : > { %v6344_v11 = vpop.f32.mrf.mxu2 }
 0x767   : > { %v6345_v15 = vadd.f32 %v14892_v19, %v6344_v11 }
 0x768   : > { %9216 = vmatmul.msk.f32.gmra.mxu3 %vm6185_vm10, %v15408_v1 }
 0x769   : > { %v15429_v44 = vadd.f32 %v6457_v16, %v6345_v15 }
 0x76b   : > { %17462 = vst [vmem:[#allocation128_spill] sm:$0xff] %v15429_v44  ;;  %6394 = vmatmul.f32.gmra.mxu2 %v15417_v2  ;;  %v6460_v50 = vpop.f32.mrf.mxu3  ;;  %v15448_v44 = vpop.f32.mrf.mxu1  ;;  %v17466_v2 = vrot.slane %v14050_v37, 4 }
 0x76c   : > { %9266 = vmatmul.msk.f32.gmra.mxu1 %vm6185_vm10, %v15435_v43  ;;  %6899 = vmatmul.f32.gmra.mxu0 %v15438_v51  ;;  %v17468_v43 = vld [vmem:[#allocation42_spill] sm:$0xff] }
 0x76d   : > { %v15453_v6 = vsel %vm506_vm0, %v6667_v20, %v17466_v2  ;;  %v17469_v51 = vrot.slane %v17468_v43, 4 }
 0x76e   : > { %v6347_v11 = vpop.f32.mrf.mxu2  ;;  %17467 = vst [vmem:[#allocation57_spill] sm:$0xff] %v15453_v6 }
 0x76f   : > { %v6348_v16 = vadd.f32 %v14892_v19, %v6347_v11  ;;  %v15459_v1 = vsel %vm506_vm0, %v6665_v22, %v17469_v51  ;;  %v15461_v11 = vpop.f32.mrf.mxu0  ;;  %v17473_v22 = vld [vmem:[#allocation84_spill] sm:$0xff]  ;;  %v17474_v51 = vld [vmem:[#allocation118_spill] sm:$0xff] }
 0x770   : > { %9287 = vmatmul.msk.f32.vlgmr.msrb.gmra.mxu3 %vm6185_vm10, %v14052_v47  ;;  %17470 = vst [vmem:[#allocation129_spill] sm:$0xff] %v15459_v1 }
 0x771   : > { %v15446_v15 = vadd.f32 %v6460_v50, %v6348_v16  ;;  %v17471_v16 = vld [vmem:[#allocation85_spill] sm:$0xff] }
 0x773   : > { %17465 = vst [vmem:[#allocation112_spill] sm:$0xff] %v15446_v15  ;;  %v6463_v34 = vpop.f32.mrf.mxu3  ;;  %7089 = vmatmul.f32.vlgmr.msra.gmra.mxu2 %v14113_v54  ;;  %v7648_v54 = vld [vmem:[%s16529_s8 + $0x28] sm:$0xff] }
 0x774   : > { %9267 = vmatmul.msk.f32.gmra.mxu1 %vm6185_vm10, %v15453_v6  ;;  %6902 = vmatmul.f32.gmra.mxu0 %v15459_v1  ;;  %v17475_v15 = vld [vmem:[#allocation119_spill] sm:$0xff]  ;;  %v15478_v1 = vpop.f32.mrf.mxu1  ;;  %v17480_v6 = vld [vmem:[#allocation48_spill] sm:$0xff] }
 0x775   : > { %7764 = vmatpush.msrb.mxu2 %v7648_v54  ;;  %17476 = vst [vmem:[#allocation45_spill] sm:$0xff] %v15478_v1 }
 0x776   : > { %v6350_v47 = vpop.f32.mrf.mxu2 }
 0x777   : > { %v6351_v50 = vadd.f32 %v14892_v19, %v6350_v47  ;;  %v15480_v47 = vpop.f32.mrf.mxu0 }
 0x778   : > { %9288 = vmatmul.msk.f32.gmra.mxu3 %vm6185_vm10, %v17471_v16  ;;  %17477 = vst [vmem:[#allocation90_spill] sm:$0xff] %v15480_v47 }
 0x779   : > { %v15469_v2 = vadd.f32 %v6463_v34, %v6351_v50  ;;  %v17478_v50 = vld [vmem:[#allocation27_spill] sm:$0xff] }
 0x77b   : > { %17472 = vst [vmem:[#allocation132_spill] sm:$0xff] %v15469_v2  ;;  %v6466_v20 = vpop.f32.mrf.mxu3  ;;  %7092 = vmatmul.f32.gmra.mxu2 %v17473_v22  ;;  %v17481_v22 = vld [vmem:[#allocation2_spill] sm:$0xff] }
 0x77c   : > { %9338 = vmatmul.msk.f32.vlgmr.msrb.gmra.mxu1 %vm6185_vm10, %v17474_v51  ;;  %7369 = vmatmul.f32.vlgmr.msrb.gmra.mxu0 %v17475_v15  ;;  %v17482_v51 = vld [vmem:[#allocation122_spill] sm:$0xff]  ;;  %v15491_v43 = vpop.f32.mrf.mxu1 }
 0x77d   : > { %17483 = vst [vmem:[#allocation91_spill] sm:$0xff] %v15491_v43  ;;  %v17490_v43 = vld [vmem:[#allocation68_spill] sm:$0xff] }
 0x77e   : > { %v6353_v16 = vpop.f32.mrf.mxu2 }
 0x77f   : > { %v6354_v34 = vadd.f32 %v14892_v19, %v6353_v16  ;;  %v15494_v47 = vpop.f32.mrf.mxu0  ;;  %v17485_v16 = vld [vmem:[#allocation87_spill] sm:$0xff] }
 0x780   : > { %9289 = vmatmul.msk.f32.gmra.mxu3 %vm6185_vm10, %v17478_v50  ;;  %17484 = vst [vmem:[#allocation133_spill] sm:$0xff] %v15494_v47  ;;  %v17487_v50 = vld [vmem:[#allocation123_spill] sm:$0xff] }
 0x781   : > { %v15485_v2 = vadd.f32 %v6466_v20, %v6354_v34 }
 0x783   : > { %17479 = vst [vmem:[#allocation14_spill] sm:$0xff] %v15485_v2  ;;  %v6469_v54 = vpop.f32.mrf.mxu3  ;;  %7095 = vmatmul.f32.gmra.mxu2 %v17480_v6  ;;  %v17488_v6 = vld [vmem:[#allocation52_spill] sm:$0xff] }
 0x784   : > { %9339 = vmatmul.msk.f32.gmra.mxu1 %vm6185_vm10, %v17481_v22  ;;  %7372 = vmatmul.f32.gmra.mxu0 %v17482_v51  ;;  %v17489_v22 = vld [vmem:[#allocation28_spill] sm:$0xff] }
 0x786   : > { %v6356_v15 = vpop.f32.mrf.mxu2 }
 0x787   : > { %v6357_v1 = vadd.f32 %v14892_v19, %v6356_v15  ;;  %v15507_v15 = vpop.f32.mrf.mxu1 }
 0x788   : > { %9290 = vmatmul.msk.f32.gmra.mxu3 %vm6185_vm10, %v17485_v16  ;;  %17491 = vst [vmem:[#allocation49_spill] sm:$0xff] %v15507_v15  ;;  %v17494_v16 = vld [vmem:[#allocation71_spill] sm:$0xff] }
 0x789   : > { %v15498_v20 = vadd.f32 %v6469_v54, %v6357_v1  ;;  %v15511_v1 = vpop.f32.mrf.mxu0 }
 0x78a   : > { %17493 = vst [vmem:[#allocation79_spill] sm:$0xff] %v15511_v1  ;;  %v17511_v1 = vld [vmem:[#allocation60_spill] sm:$0xff] }
 0x78b   : > { %17486 = vst [vmem:[#allocation136_spill] sm:$0xff] %v15498_v20  ;;  %v6472_v34 = vpop.f32.mrf.mxu3  ;;  %7098 = vmatmul.f32.gmra.mxu2 %v17487_v50  ;;  %v17495_v50 = vld [vmem:[#allocation126_spill] sm:$0xff]  ;;  %v17497_v20 = vld [vmem:[#allocation25_spill] sm:$0xff] }
 0x78c   : > { %9340 = vmatmul.msk.f32.gmra.mxu1 %vm6185_vm10, %v17488_v6  ;;  %7375 = vmatmul.f32.gmra.mxu0 %v17489_v22  ;;  %v17496_v6 = vld [vmem:[#allocation127_spill] sm:$0xff] }
 0x78e   : > { %v6359_v51 = vpop.f32.mrf.mxu2 }
 0x78f   : > { %v6360_v2 = vadd.f32 %v14892_v19, %v6359_v51 }
 0x790   : > { %9291 = vmatmul.msk.f32.gmra.mxu3 %vm6185_vm10, %v17490_v43 }
 0x791   : > { %v15509_v47 = vadd.f32 %v6472_v34, %v6360_v2  ;;  %v15522_v2 = vpop.f32.mrf.mxu1  ;;  %v15525_v15 = vpop.f32.mrf.mxu0 }
 0x792   : > { %17499 = vst [vmem:[#allocation95_spill] sm:$0xff] %v15522_v2  ;;  %v17507_v2 = vld [vmem:[#allocation32_spill] sm:$0xff] }
 0x793   : > { %17492 = vst [vmem:[#allocation94_spill] sm:$0xff] %v15509_v47  ;;  %v6475_v54 = vpop.f32.mrf.mxu3  ;;  %7101 = vmatmul.f32.gmra.mxu2 %v17494_v16  ;;  %v17500_v47 = vld [vmem:[#allocation29_spill] sm:$0xff]  ;;  %v17502_v16 = vld [vmem:[#allocation74_spill] sm:$0xff] }
 0x794   : > { %9341 = vmatmul.msk.f32.gmra.mxu1 %vm6185_vm10, %v17495_v50  ;;  %7378 = vmatmul.f32.gmra.mxu0 %v17496_v6  ;;  %17501 = vst [vmem:[#allocation18_spill] sm:$0xff] %v15525_v15  ;;  %v17503_v50 = vld [vmem:[#allocation130_spill] sm:$0xff] }
 0x795   : > { %v7647_v6 = vld [vmem:[%s16529_s8 + $0x20] sm:$0xff] }
 0x796   : > { %v6362_v22 = vpop.f32.mrf.mxu2  ;;  %7765 = vmatpush.msrb.mxu2 %v7647_v6 }
 0x797   : > { %v6363_v51 = vadd.f32 %v14892_v19, %v6362_v22  ;;  %v17504_v22 = vld [vmem:[#allocation37_spill] sm:$0xff] }
 0x798   : > { %9292 = vmatmul.msk.f32.gmra.mxu3 %vm6185_vm10, %v17497_v20 }
 0x799   : > { %v15520_v43 = vadd.f32 %v6475_v54, %v6363_v51  ;;  %v15544_v15 = vpop.f32.mrf.mxu0 }
 0x79a   : > { %17510 = vst [vmem:[#allocation81_spill] sm:$0xff] %v15544_v15  ;;  %v17523_v15 = vld [vmem:[#allocation44_spill] sm:$0xff] }
 0x79b   : > { %17498 = vst [vmem:[#allocation15_spill] sm:$0xff] %v15520_v43  ;;  %v6478_v34 = vpop.f32.mrf.mxu3  ;;  %7104 = vmatmul.f32.gmra.mxu2 %v17500_v47  ;;  %v17506_v43 = vld [vmem:[#allocation131_spill] sm:$0xff] }
 0x79c   : > { %9342 = vmatmul.msk.f32.gmra.mxu1 %vm6185_vm10, %v17502_v16  ;;  %7381 = vmatmul.f32.gmra.mxu0 %v17503_v50  ;;  %v17508_v16 = vld [vmem:[#allocation51_spill] sm:$0xff]  ;;  %v15542_v50 = vpop.f32.mrf.mxu1 }
 0x79d   : > { %17509 = vst [vmem:[#allocation140_spill] sm:$0xff] %v15542_v50 }
 0x79e   : > { %v6365_v20 = vpop.f32.mrf.mxu2 }
 0x79f   : > { %v6366_v54 = vadd.f32 %v14892_v19, %v6365_v20 }
 0x7a0   : > { %9293 = vmatmul.msk.f32.gmra.mxu3 %vm6185_vm10, %v17504_v22  ;;  %v17513_v22 = vld [vmem:[#allocation41_spill] sm:$0xff] }
 0x7a1   : > { %v15536_v51 = vadd.f32 %v6478_v34, %v6366_v54 }
 0x7a3   : > { %17505 = vst [vmem:[#allocation137_spill] sm:$0xff] %v15536_v51  ;;  %v6481_v47 = vpop.f32.mrf.mxu3  ;;  %7107 = vmatmul.f32.gmra.mxu2 %v17506_v43  ;;  %v17514_v43 = vld [vmem:[#allocation134_spill] sm:$0xff] }
 0x7a4   : > { %9343 = vmatmul.msk.f32.gmra.mxu1 %vm6185_vm10, %v17507_v2  ;;  %7384 = vmatmul.f32.gmra.mxu0 %v17508_v16  ;;  %v17515_v2 = vld [vmem:[#allocation135_spill] sm:$0xff]  ;;  %v15555_v51 = vpop.f32.mrf.mxu1 }
 0x7a5   : > { %17516 = vst [vmem:[#allocation85_spill] sm:$0xff] %v15555_v51 }
 0x7a6   : > { %v6368_v6 = vpop.f32.mrf.mxu2 }
 0x7a7   : > { %v6369_v20 = vadd.f32 %v14892_v19, %v6368_v6  ;;  %v15560_v19 = vld [vmem:[%s16528_s7] ss:$0 sm:$0xff]  ;;  %v17518_v6 = vld [vmem:[#allocation55_spill] sm:$0xff] }
 0x7a8   : > { %9294 = vmatmul.msk.f32.gmra.mxu3 %vm6185_vm10, %v17511_v1 }
 0x7a9   : > { %v15549_v34 = vadd.f32 %v6481_v47, %v6369_v20  ;;  %v15563_v47 = vpop.f32.mrf.mxu0 }
 0x7aa   : > { %17517 = vst [vmem:[#allocation84_spill] sm:$0xff] %v15563_v47 }
 0x7ab   : > { %17512 = vst [vmem:[#allocation115_spill] sm:$0xff] %v15549_v34  ;;  %v6484_v54 = vpop.f32.mrf.mxu3  ;;  %7110 = vmatmul.f32.gmra.mxu2 %v17513_v22  ;;  %v17522_v34 = vld [vmem:[#allocation138_spill] sm:$0xff] }
 0x7ac   : > { %9344 = vmatmul.msk.f32.gmra.mxu1 %vm6185_vm10, %v17514_v43  ;;  %7387 = vmatmul.f32.gmra.mxu0 %v17515_v2  ;;  %v17520_v43 = vld [vmem:[#allocation33_spill] sm:$0xff]  ;;  %v17521_v2 = vld [vmem:[#allocation47_spill] sm:$0xff] }
 0x7ae   : > { %v6371_v16 = vpop.f32.mrf.mxu2 }
 0x7af   : > { %v6372_v1 = vadd.f32 %v15560_v19, %v6371_v16  ;;  %v15576_v16 = vpop.f32.mrf.mxu1 }
 0x7b0   : > { %9295 = vmatmul.msk.f32.gmra.mxu3 %vm6185_vm10, %v17518_v6  ;;  %v17525_v6 = vld [vmem:[#allocation139_spill] sm:$0xff] }
 0x7b1   : > { %v15567_v20 = vadd.f32 %v6484_v54, %v6372_v1  ;;  %v15580_v54 = vpop.f32.mrf.mxu0 }
 0x7b3   : > { %17519 = vst [vmem:[#allocation118_spill] sm:$0xff] %v15567_v20  ;;  %v6487_v22 = vpop.f32.mrf.mxu3  ;;  %7113 = vmatmul.f32.gmra.mxu2 %v17520_v43  ;;  %v17526_v43 = vld [vmem:[#allocation30_spill] sm:$0xff] }
 0x7b4   : > { %9345 = vmatmul.msk.f32.gmra.mxu1 %vm6185_vm10, %v17521_v2  ;;  %7390 = vmatmul.f32.gmra.mxu0 %v17522_v34  ;;  %v17527_v2 = vld [vmem:[#allocation54_spill] sm:$0xff] }
 0x7b5   : > { %v17528_v20 = vld [vmem:[#allocation50_spill] sm:$0xff] }
 0x7b6   : > { %v6374_v51 = vpop.f32.mrf.mxu2 }
 0x7b7   : > { %v6375_v50 = vadd.f32 %v15560_v19, %v6374_v51 }
 0x7b8   : > { %9296 = vmatmul.msk.f32.gmra.mxu3 %vm6185_vm10, %v17523_v15 }
 0x7b9   : > { %v15578_v47 = vadd.f32 %v6487_v22, %v6375_v50  ;;  %v15591_v50 = vpop.f32.mrf.mxu1 }
 0x7ba   : > { %17530 = vst [vmem:[#allocation48_spill] sm:$0xff] %v15591_v50  ;;  %v17537_v50 = vld [vmem:[#allocation89_spill] sm:$0xff] }
 0x7bb   : > { %17524 = vst [vmem:[#allocation119_spill] sm:$0xff] %v15578_v47  ;;  %v6490_v1 = vpop.f32.mrf.mxu3  ;;  %7116 = vmatmul.f32.gmra.mxu2 %v17525_v6  ;;  %v15594_v47 = vpop.f32.mrf.mxu0  ;;  %v17532_v6 = vld [vmem:[#allocation88_spill] sm:$0xff] }
 0x7bc   : > { %9346 = vmatmul.msk.f32.gmra.mxu1 %vm6185_vm10, %v17526_v43  ;;  %7393 = vmatmul.f32.gmra.mxu0 %v17527_v2  ;;  %17531 = vst [vmem:[#allocation2_spill] sm:$0xff] %v15594_v47  ;;  %v17533_v43 = vld [vmem:[#allocation59_spill] sm:$0xff]  ;;  %v7646_v2 = vld [vmem:[%s16529_s8 + $0x18] sm:$0xff] }
 0x7bd   : > { %7766 = vmatpush.msrb.mxu2 %v7646_v2 }
 0x7be   : > { %v6377_v34 = vpop.f32.mrf.mxu2 }
 0x7bf   : > { %v6378_v51 = vadd.f32 %v15560_v19, %v6377_v34  ;;  %v17534_v34 = vld [vmem:[#allocation34_spill] sm:$0xff] }
 0x7c0   : > { %9297 = vmatmul.msk.f32.gmra.mxu3 %vm6185_vm10, %v17528_v20 }
 0x7c1   : > { %v15589_v15 = vadd.f32 %v6490_v1, %v6378_v51 }
 0x7c3   : > { %17529 = vst [vmem:[#allocation27_spill] sm:$0xff] %v15589_v15  ;;  %v6493_v22 = vpop.f32.mrf.mxu3  ;;  %7119 = vmatmul.f32.gmra.mxu2 %v14655_v3  ;;  %v17536_v15 = vld [vmem:[#allocation9_spill] sm:$0xff]  ;;  %v15613_v47 = vpop.f32.mrf.mxu0 }
 0x7c4   : > { %9347 = vmatmul.msk.f32.gmra.mxu1 %vm6185_vm10, %v17532_v6  ;;  %7396 = vmatmul.f32.gmra.mxu0 %v17533_v43  ;;  %v17538_v6 = vld [vmem:[#allocation36_spill] sm:$0xff]  ;;  %v15611_v43 = vpop.f32.mrf.mxu1  ;;  %17540 = vst [vmem:[#allocation123_spill] sm:$0xff] %v15613_v47 }
 0x7c5   : > { %17539 = vst [vmem:[#allocation87_spill] sm:$0xff] %v15611_v43 }
 0x7c6   : > { %v6380_v20 = vpop.f32.mrf.mxu2 }
 0x7c7   : > { %v6381_v1 = vadd.f32 %v15560_v19, %v6380_v20 }
 0x7c8   : > { %9298 = vmatmul.msk.f32.gmra.mxu3 %vm6185_vm10, %v17534_v34  ;;  %v17542_v34 = vld [vmem:[#allocation58_spill] sm:$0xff] }
 0x7c9   : > { %v15605_v51 = vadd.f32 %v6493_v22, %v6381_v1 }
 0x7cb   : > { %17535 = vst [vmem:[#allocation122_spill] sm:$0xff] %v15605_v51  ;;  %v6496_v3 = vpop.f32.mrf.mxu3  ;;  %7122 = vmatmul.f32.gmra.mxu2 %v17536_v15  ;;  %v17543_v15 = vld [vmem:[#allocation61_spill] sm:$0xff]  ;;  %v15627_v47 = vpop.f32.mrf.mxu0 }
 0x7cc   : > { %9348 = vmatmul.msk.f32.gmra.mxu1 %vm6185_vm10, %v17537_v50  ;;  %7399 = vmatmul.f32.gmra.mxu0 %v17538_v6  ;;  %v17544_v50 = vld [vmem:[#allocation92_spill] sm:$0xff]  ;;  %v15624_v51 = vpop.f32.mrf.mxu1 }
 0x7ce   : > { %v6383_v2 = vpop.f32.mrf.mxu2 }
 0x7cf   : > { %v6384_v20 = vadd.f32 %v15560_v19, %v6383_v2 }
 0x7d0   : > { %9299 = vmatmul.msk.f32.gmra.mxu3 %vm6185_vm10, %v14728_v36 }
 0x7d1   : > { %v15618_v22 = vadd.f32 %v6496_v3, %v6384_v20 }
 0x7d3   : > { %17541 = vst [vmem:[#allocation52_spill] sm:$0xff] %v15618_v22  ;;  %v6499_v1 = vpop.f32.mrf.mxu3  ;;  %7125 = vmatmul.f32.gmra.mxu2 %v17542_v34  ;;  %v17563_v22 = vld [vmem:[#allocation72_spill] sm:$0xff] }
 0x7d4   : > { %9349 = vmatmul.msk.f32.gmra.mxu1 %vm6185_vm10, %v17543_v15  ;;  %7402 = vmatmul.f32.gmra.mxu0 %v17544_v50  ;;  %v15640_v34 = vpop.f32.mrf.mxu1  ;;  %v7645_v50 = vld [vmem:[%s16529_s8 + $0x10] sm:$0xff] }
 0x7d5   : > { %7767 = vmatpush.msrb.mxu2 %v7645_v50  ;;  %v17556_v50 = vld [vmem:[#allocation98_spill] sm:$0xff] }
 0x7d6   : > { %v6386_v6 = vpop.f32.mrf.mxu2 }
 0x7d7   : > { %v6387_v43 = vadd.f32 %v15560_v19, %v6386_v6 }
 0x7d8   : > { %9300 = vmatmul.msk.f32.gmra.mxu3 %vm6185_vm10, %v14804_v9  ;;  %v15644_v9 = vpop.f32.mrf.mxu0 }
 0x7d9   : > { %v15631_v36 = vadd.f32 %v6499_v1, %v6387_v43  ;;  %v17548_v1 = vld [vmem:[#allocation63_spill] sm:$0xff] }
 0x7db   : > { %17545 = vst [vmem:[#allocation28_spill] sm:$0xff] %v15631_v36  ;;  %v6502_v3 = vpop.f32.mrf.mxu3  ;;  %7128 = vmatmul.f32.gmra.mxu2 %v14812_v13  ;;  %v17547_v13 = vld [vmem:[#allocation3_spill] sm:$0xff] }
 0x7dc   : > { %9350 = vmatmul.msk.f32.gmra.mxu1 %vm6185_vm10, %v14831_v28  ;;  %7405 = vmatmul.f32.gmra.mxu0 %v14837_v30  ;;  %v15658_v6 = vpop.f32.mrf.mxu1  ;;  %v17558_v36 = vld [vmem:[#allocation99_spill] sm:$0xff] }
 0x7de   : > { %v6389_v2 = vpop.f32.mrf.mxu2 }
 0x7df   : > { %v6390_v20 = vadd.f32 %v15560_v19, %v6389_v2  ;;  %v17551_v2 = vld [vmem:[#allocation96_spill] sm:$0xff] }
 0x7e0   : > { %9301 = vmatmul.msk.f32.gmra.mxu3 %vm6185_vm10, %v14850_v7 }
 0x7e1   : > { %v15642_v15 = vadd.f32 %v6502_v3, %v6390_v20  ;;  %v17550_v3 = vld [vmem:[#allocation93_spill] sm:$0xff]  ;;  %v17552_v20 = vld [vmem:[#allocation62_spill] sm:$0xff] }
 0x7e3   : > { %17546 = vst [vmem:[#allocation68_spill] sm:$0xff] %v15642_v15  ;;  %v6505_v43 = vpop.f32.mrf.mxu3  ;;  %7131 = vmatmul.f32.gmra.mxu2 %v14853_v39  ;;  %v17557_v15 = vld [vmem:[#allocation97_spill] sm:$0xff] }
 0x7e4   : > { %9351 = vmatmul.msk.f32.gmra.mxu1 %vm6185_vm10, %v14864_v17  ;;  %7408 = vmatmul.f32.gmra.mxu0 %v17547_v13  ;;  %v15661_v17 = vpop.f32.mrf.mxu0 }
 0x7e6   : > { %v6392_v28 = vpop.f32.mrf.mxu2 }
 0x7e7   : > { %v6393_v30 = vadd.f32 %v15560_v19, %v6392_v28  ;;  %v17553_v28 = vld [vmem:[#allocation67_spill] sm:$0xff] }
 0x7e8   : > { %9302 = vmatmul.msk.f32.gmra.mxu3 %vm6185_vm10, %v17548_v1  ;;  %v17555_v1 = vld [vmem:[#allocation69_spill] sm:$0xff] }
 0x7e9   : > { %v15653_v7 = vadd.f32 %v6505_v43, %v6393_v30 }
 0x7eb   : > { %17549 = vst [vmem:[#allocation71_spill] sm:$0xff] %v15653_v7  ;;  %v6508_v39 = vpop.f32.mrf.mxu3  ;;  %7134 = vmatmul.f32.gmra.mxu2 %v17550_v3  ;;  %v6924_v7 = vadd.f32 %v17556_v50, %v17555_v1  ;;  %v17560_v1 = vld [vmem:[#allocation100_spill] sm:$0xff]  ;;  %v17562_v50 = vld [vmem:[#allocation102_spill] sm:$0xff] }
 0x7ec   : > { %9352 = vmatmul.msk.f32.gmra.mxu1 %vm6185_vm10, %v17551_v2  ;;  %7411 = vmatmul.f32.gmra.mxu0 %v17552_v20  ;;  %v15677_v2 = vpop.f32.mrf.mxu1  ;;  %v15679_v20 = vpop.f32.mrf.mxu0 }
 0x7ee   : > { %v6395_v13 = vpop.f32.mrf.mxu2 }
 0x7ef   : > { %v6396_v43 = vadd.f32 %v15560_v19, %v6395_v13  ;;  %v17559_v13 = vld [vmem:[#allocation70_spill] sm:$0xff] }
 0x7f0   : > { %9303 = vmatmul.msk.f32.gmra.mxu3 %vm6185_vm10, %v17553_v28  ;;  %v7019_v28 = vadd.f32 %v6924_v7, %v17559_v13  ;;  %v17564_v13 = vld [vmem:[#allocation76_spill] sm:$0xff] }
 0x7f1   : > { %v15669_v30 = vadd.f32 %v6508_v39, %v6396_v43 }
 0x7f3   : > { %17554 = vst [vmem:[#allocation126_spill] sm:$0xff] %v15669_v30  ;;  %7137 = vmatmul.f32.gmra.mxu2 %v17557_v15  ;;  %v7203_v3 = vpop.f32.mrf.mxu3  ;;  %v6927_v15 = vadd.f32 %v14953_v53, %v14955_v26  ;;  %v17565_v26 = vld [vmem:[#allocation82_spill] sm:$0xff] }
 0x7f4   : > { %9353 = vmatmul.msk.f32.gmra.mxu1 %vm6185_vm10, %v17558_v36  ;;  %7414 = vmatmul.f32.gmra.mxu0 %v14933_v33  ;;  %v17561_v33 = vld [vmem:[#allocation101_spill] sm:$0xff] }
 0x7f5   : > { %v7020_v7 = vadd.f32 %v6927_v15, %v17563_v22  ;;  %v17567_v22 = vld [vmem:[#allocation103_spill] sm:$0xff] }
 0x7f6   : > { %v7090_v19 = vpop.f32.mrf.mxu2 }
 0x7f7   : > { %v7204_v39 = vadd.f32 %v7203_v3, %v7090_v19  ;;  %v15693_v3 = vpop.f32.mrf.mxu1 }
 0x7f8   : > { %9304 = vmatmul.msk.f32.gmra.mxu3 %vm6185_vm10, %v14941_v18  ;;  %v15695_v18 = vpop.f32.mrf.mxu0 }
 0x7f9   : > { %v15684_v43 = vadd.f32 %v7204_v39, %v7019_v28  ;;  %v6930_v28 = vadd.f32 %v17565_v26, %v14990_v52  ;;  %v17566_v39 = vld [vmem:[#allocation4_spill] sm:$0xff] }
 0x7fb   : > { %7140 = vmatmul.f32.gmra.mxu2 %v17560_v1  ;;  %v7206_v36 = vpop.f32.mrf.mxu3 }
 0x7fc   : > { %9354 = vmatmul.msk.f32.gmra.mxu1 %vm6185_vm10, %v17561_v33  ;;  %7417 = vmatmul.f32.gmra.mxu0 %v17562_v50 }
 0x7fe   : > { %v7093_v30 = vpop.f32.mrf.mxu2 }
 0x7ff   : > { %v7207_v19 = vadd.f32 %v7206_v36, %v7093_v30  ;;  %v17568_v30 = vld [vmem:[#allocation78_spill] sm:$0xff]  ;;  %v15710_v50 = vpop.f32.mrf.mxu1 }
 0x800   : > { %9305 = vmatmul.msk.f32.gmra.mxu3 %vm6185_vm10, %v17564_v13  ;;  %v7021_v36 = vadd.f32 %v6930_v28, %v17568_v30  ;;  %17569 = vst [vmem:[#allocation127_spill] sm:$0xff] %v15710_v50  ;;  %v15714_v52 = vpop.f32.mrf.mxu0  ;;  %v17571_v13 = vld [vmem:[#allocation17_spill] sm:$0xff]  ;;  %v17579_v50 = vld [vmem:[#allocation106_spill] sm:$0xff] }
 0x801   : > { %v15699_v53 = vadd.f32 %v7207_v19, %v7020_v7  ;;  %v17570_v19 = vld [vmem:[#allocation16_spill] sm:$0xff]  ;;  %v17573_v28 = vld [vmem:[#allocation21_spill] sm:$0xff] }
 0x802   : > { %v6933_v26 = vadd.f32 %v17571_v13, %v17570_v19  ;;  %v17577_v13 = vld [vmem:[#allocation105_spill] sm:$0xff] }
 0x803   : > { %7143 = vmatmul.f32.gmra.mxu2 %v17566_v39  ;;  %v7209_v1 = vpop.f32.mrf.mxu3  ;;  %v17572_v39 = vld [vmem:[#allocation13_spill] sm:$0xff] }
 0x804   : > { %9355 = vmatmul.msk.f32.gmra.mxu1 %vm6185_vm10, %v14995_v21  ;;  %7420 = vmatmul.f32.gmra.mxu0 %v17567_v22  ;;  %v17574_v22 = vld [vmem:[#allocation104_spill] sm:$0xff] }
 0x806   : > { %v7096_v15 = vpop.f32.mrf.mxu2 }
 0x807   : > { %v7210_v33 = vadd.f32 %v7209_v1, %v7096_v15  ;;  %v7022_v15 = vadd.f32 %v6933_v26, %v17574_v22  ;;  %v15732_v19 = vpop.f32.mrf.mxu1  ;;  %v17580_v26 = vld [vmem:[#allocation35_spill] sm:$0xff]  ;;  %v17582_v22 = vld [vmem:[#allocation65_spill] sm:$0xff] }
 0x808   : > { %9306 = vmatmul.msk.f32.gmra.mxu3 %vm6185_vm10, %v15005_v60  ;;  %v7644_v60 = vld [vmem:[%s16529_s8 + $0x8] sm:$0xff]  ;;  %17576 = vst [vmem:[#allocation25_spill] sm:$0xff] %v15732_v19  ;;  %v17585_v19 = vld [vmem:[#allocation110_spill] sm:$0xff] }
 0x809   : > { %v15712_v7 = vadd.f32 %v7210_v33, %v7021_v36  ;;  %7768 = vmatpush.msrb.mxu2 %v7644_v60 }
 0x80b   : > { %7146 = vmatmul.f32.gmra.mxu2 %v15012_v56  ;;  %v7212_v21 = vpop.f32.mrf.mxu3  ;;  %v17575_v56 = vld [vmem:[#allocation6_spill] sm:$0xff] }
 0x80c   : > { %9356 = vmatmul.msk.f32.gmra.mxu1 %vm6185_vm10, %v17572_v39  ;;  %7423 = vmatmul.f32.gmra.mxu0 %v17573_v28  ;;  %v6936_v33 = vadd.f32 %v17575_v56, %v15061_v23  ;;  %v15735_v28 = vpop.f32.mrf.mxu0  ;;  %v17584_v56 = vld [vmem:[#allocation26_spill] sm:$0xff] }
 0x80d   : > { %17578 = vst [vmem:[#allocation29_spill] sm:$0xff] %v15735_v28  ;;  %v17617_v28 = vld [vmem:[#allocation121_spill] sm:$0xff] }
 0x80e   : > { %v7099_v1 = vpop.f32.mrf.mxu2 }
 0x80f   : > { %v7213_v30 = vadd.f32 %v7212_v21, %v7099_v1  ;;  %v17581_v1 = vld [vmem:[#allocation108_spill] sm:$0xff] }
 0x810   : > { %9307 = vmatmul.msk.f32.gmra.mxu3 %vm6185_vm10, %v15047_v4  ;;  %v7023_v4 = vadd.f32 %v6936_v33, %v17581_v1 }
 0x811   : > { %v15728_v36 = vadd.f32 %v7213_v30, %v7022_v15  ;;  %v17583_v15 = vld [vmem:[#allocation109_spill] sm:$0xff] }
 0x812   : > { %v6939_v30 = vadd.f32 %v17583_v15, %v15090_v41 }
 0x813   : > { %7149 = vmatmul.f32.gmra.mxu2 %v17577_v13  ;;  %v7215_v39 = vpop.f32.mrf.mxu3 }
 0x814   : > { %9357 = vmatmul.msk.f32.gmra.mxu1 %vm6185_vm10, %v17579_v50  ;;  %7426 = vmatmul.f32.gmra.mxu0 %v17580_v26  ;;  %v17586_v50 = vld [vmem:[#allocation107_spill] sm:$0xff]  ;;  %v15751_v26 = vpop.f32.mrf.mxu1  ;;  %v15753_v33 = vpop.f32.mrf.mxu0 }
 0x815   : > { %17587 = vst [vmem:[#allocation74_spill] sm:$0xff] %v15751_v26 }
 0x816   : > { %v7102_v21 = vpop.f32.mrf.mxu2  ;;  %17588 = vst [vmem:[#allocation130_spill] sm:$0xff] %v15753_v33  ;;  %v17594_v33 = vld [vmem:[#allocation46_spill] sm:$0xff] }
 0x817   : > { %v7216_v60 = vadd.f32 %v7215_v39, %v7102_v21  ;;  %v17589_v21 = vld [vmem:[#allocation64_spill] sm:$0xff] }
 0x818   : > { %9308 = vmatmul.msk.f32.gmra.mxu3 %vm6185_vm10, %v17582_v22  ;;  %v7024_v1 = vadd.f32 %v6939_v30, %v17589_v21  ;;  %v17591_v22 = vld [vmem:[#allocation40_spill] sm:$0xff] }
 0x819   : > { %v15743_v23 = vadd.f32 %v7216_v60, %v7023_v4  ;;  %v17590_v60 = vld [vmem:[#allocation5_spill] sm:$0xff] }
 0x81a   : > { %v6942_v15 = vadd.f32 %v17591_v22, %v17590_v60 }
 0x81b   : > { %7152 = vmatmul.f32.gmra.mxu2 %v17584_v56  ;;  %v7218_v13 = vpop.f32.mrf.mxu3  ;;  %v17592_v56 = vld [vmem:[#allocation31_spill] sm:$0xff] }
 0x81c   : > { %9358 = vmatmul.msk.f32.gmra.mxu1 %vm6185_vm10, %v17585_v19  ;;  %7429 = vmatmul.f32.gmra.mxu0 %v17586_v50  ;;  %v17593_v50 = vld [vmem:[#allocation111_spill] sm:$0xff]  ;;  %v7025_v30 = vadd.f32 %v6942_v15, %v17594_v33  ;;  %v17597_v33 = vld [vmem:[#allocation56_spill] sm:$0xff] }
 0x81e   : > { %v7105_v39 = vpop.f32.mrf.mxu2 }
 0x81f   : > { %v7219_v4 = vadd.f32 %v7218_v13, %v7105_v39  ;;  %v15767_v13 = vpop.f32.mrf.mxu1 }
 0x820   : > { %9309 = vmatmul.msk.f32.gmra.mxu3 %vm6185_vm10, %v15105_v46  ;;  %v15769_v46 = vpop.f32.mrf.mxu0 }
 0x821   : > { %v15758_v41 = vadd.f32 %v7219_v4, %v7024_v1  ;;  %v6945_v1 = vadd.f32 %v15159_v42, %v15161_v45  ;;  %v17595_v4 = vld [vmem:[#allocation113_spill] sm:$0xff]  ;;  %v7643_v42 = vld [vmem:[%s16529_s8] sm:$0xff] }
 0x822   : > { %7769 = vmatpush.msrb.mxu2 %v7643_v42 }
 0x823   : > { %7155 = vmatmul.f32.gmra.mxu2 %v17592_v56  ;;  %v7221_v19 = vpop.f32.mrf.mxu3 }
 0x824   : > { %9359 = vmatmul.msk.f32.gmra.mxu1 %vm6185_vm10, %v17593_v50  ;;  %7432 = vmatmul.f32.gmra.mxu0 %v15139_v32  ;;  %v17596_v32 = vld [vmem:[#allocation43_spill] sm:$0xff] }
 0x826   : > { %v7108_v26 = vpop.f32.mrf.mxu2 }
 0x827   : > { %v7222_v39 = vadd.f32 %v7221_v19, %v7108_v26  ;;  %v17598_v26 = vld [vmem:[#allocation11_spill] sm:$0xff] }
 0x828   : > { %9310 = vmatmul.msk.f32.gmra.mxu3 %vm6185_vm10, %v15147_v38  ;;  %v7026_v15 = vadd.f32 %v6945_v1, %v17598_v26  ;;  %v17599_v19 = vld [vmem:[#allocation19_spill] sm:$0xff]  ;;  %v15784_v38 = vpop.f32.mrf.mxu1  ;;  %v15791_v45 = vpop.f32.mrf.mxu0 }
 0x829   : > { %v15773_v21 = vadd.f32 %v7222_v39, %v7025_v30  ;;  %v17600_v30 = vld [vmem:[#allocation114_spill] sm:$0xff] }
 0x82a   : > { %v6948_v39 = vadd.f32 %v17600_v30, %v15196_v12  ;;  %v17605_v30 = vld [vmem:[#allocation73_spill] sm:$0xff] }
 0x82b   : > { %7158 = vmatmul.f32.gmra.mxu2 %v17595_v4  ;;  %v7224_v60 = vpop.f32.mrf.mxu3  ;;  %v17601_v4 = vld [vmem:[#allocation39_spill] sm:$0xff] }
 0x82c   : > { %9360 = vmatmul.msk.f32.gmra.mxu1 %vm6185_vm10, %v17596_v32  ;;  %7435 = vmatmul.f32.gmra.mxu0 %v17597_v33  ;;  %v17603_v33 = vld [vmem:[#allocation7_spill] sm:$0xff] }
 0x82e   : > { %v7111_v22 = vpop.f32.mrf.mxu2 }
 0x82f   : > { %v7225_v56 = vadd.f32 %v7224_v60, %v7111_v22  ;;  %v17602_v60 = vld [vmem:[#allocation116_spill] sm:$0xff]  ;;  %v7027_v22 = vadd.f32 %v6948_v39, %v17603_v33 }
 0x830   : > { %9311 = vmatmul.msk.f32.gmra.mxu3 %vm6185_vm10, %v17599_v19  ;;  %v15806_v19 = vpop.f32.mrf.mxu1 }
 0x831   : > { %v15786_v50 = vadd.f32 %v7225_v56, %v7026_v15  ;;  %v17604_v56 = vld [vmem:[#allocation38_spill] sm:$0xff] }
 0x832   : > { %v6951_v12 = vadd.f32 %v17604_v56, %v15235_v14 }
 0x833   : > { %7161 = vmatmul.f32.gmra.mxu2 %v17601_v4  ;;  %v7227_v1 = vpop.f32.mrf.mxu3  ;;  %v17606_v4 = vld [vmem:[#allocation66_spill] sm:$0xff] }
 0x834   : > { %9361 = vmatmul.msk.f32.gmra.mxu1 %vm6185_vm10, %v15201_v40  ;;  %7438 = vmatmul.f32.gmra.mxu0 %v17602_v60  ;;  %v15809_v40 = vpop.f32.mrf.mxu0  ;;  %v17607_v60 = vld [vmem:[#allocation22_spill] sm:$0xff] }
 0x836   : > { %v7114_v32 = vpop.f32.mrf.mxu2 }
 0x837   : > { %v7228_v26 = vadd.f32 %v7227_v1, %v7114_v32  ;;  %v17608_v32 = vld [vmem:[#allocation77_spill] sm:$0xff] }
 0x838   : > { %9312 = vmatmul.msk.f32.gmra.mxu3 %vm6185_vm10, %v15214_v59  ;;  %v7028_v59 = vadd.f32 %v6951_v12, %v17606_v4  ;;  %v17613_v4 = vld [vmem:[#allocation10_spill] sm:$0xff] }
 0x839   : > { %v15802_v15 = vadd.f32 %v7228_v26, %v7027_v22  ;;  %v17609_v22 = vld [vmem:[#allocation8_spill] sm:$0xff] }
 0x83a   : > { %v17610_v26 = vld [vmem:[#allocation12_spill] sm:$0xff] }
 0x83b   : > { %7164 = vmatmul.f32.gmra.mxu2 %v15218_v8  ;;  %v7230_v42 = vpop.f32.mrf.mxu3  ;;  %v6954_v8 = vadd.f32 %v17607_v60, %v15285_v31 }
 0x83c   : > { %9362 = vmatmul.msk.f32.gmra.mxu1 %vm6185_vm10, %v17605_v30  ;;  %7441 = vmatmul.f32.gmra.mxu0 %v15245_v35  ;;  %v15825_v35 = vpop.f32.mrf.mxu1  ;;  %v15827_v56 = vpop.f32.mrf.mxu0 }
 0x83e   : > { %v7117_v39 = vpop.f32.mrf.mxu2 }
 0x83f   : > { %v7231_v1 = vadd.f32 %v7230_v42, %v7117_v39  ;;  %v17611_v42 = vld [vmem:[#allocation117_spill] sm:$0xff]  ;;  %v17612_v39 = vld [vmem:[#allocation120_spill] sm:$0xff] }
 0x840   : > { %9313 = vmatmul.msk.f32.gmra.mxu3 %vm6185_vm10, %v15255_v49  ;;  %v7029_v49 = vadd.f32 %v6954_v8, %v17611_v42 }
 0x841   : > { %v15817_v14 = vadd.f32 %v7231_v1, %v7028_v59  ;;  %v6957_v59 = vadd.f32 %v17613_v4, %v15350_v27  ;;  %v17614_v1 = vld [vmem:[#allocation80_spill] sm:$0xff] }
 0x843   : > { %7167 = vmatmul.f32.gmra.mxu2 %v17608_v32  ;;  %v7233_v33 = vpop.f32.mrf.mxu3  ;;  %v17615_v32 = vld [vmem:[#allocation124_spill] sm:$0xff]  ;;  %v7030_v8 = vadd.f32 %v6957_v59, %v17617_v28 }
 0x844   : > { %9363 = vmatmul.msk.f32.gmra.mxu1 %vm6185_vm10, %v17609_v22  ;;  %7444 = vmatmul.f32.gmra.mxu0 %v17610_v26  ;;  %v17616_v22 = vld [vmem:[#allocation23_spill] sm:$0xff]  ;;  %v15843_v42 = vpop.f32.mrf.mxu0 }
 0x846   : > { %v7120_v12 = vpop.f32.mrf.mxu2 }
 0x847   : > { %v7234_v30 = vadd.f32 %v7233_v33, %v7120_v12  ;;  %v15841_v33 = vpop.f32.mrf.mxu1 }
 0x848   : > { %9314 = vmatmul.msk.f32.gmra.mxu3 %vm6185_vm10, %v17612_v39  ;;  %v17618_v39 = vld [vmem:[#allocation83_spill] sm:$0xff] }
 0x849   : > { %v15832_v31 = vadd.f32 %v7234_v30, %v7029_v49  ;;  %v6960_v49 = vadd.f32 %v15397_v0, %v15401_v63 }
 0x84b   : > { %7170 = vmatmul.f32.gmra.mxu2 %v17614_v1  ;;  %v7236_v60 = vpop.f32.mrf.mxu3  ;;  %v7031_v4 = vadd.f32 %v6960_v49, %v17618_v39 }
 0x84c   : > { %9364 = vmatmul.msk.f32.gmra.mxu1 %vm6185_vm10, %v17615_v32  ;;  %7447 = vmatmul.f32.gmra.mxu0 %v17616_v22  ;;  %v15862_v0 = vpop.f32.mrf.mxu0 }
 0x84e   : > { %v7123_v26 = vpop.f32.mrf.mxu2 }
 0x84f   : > { %v7237_v12 = vadd.f32 %v7236_v60, %v7123_v26  ;;  %v17619_v60 = vld [vmem:[#allocation53_spill] sm:$0xff] }
 0x850   : > { %9315 = vmatmul.msk.f32.gmra.mxu3 %vm6185_vm10, %v15347_v58  ;;  %v15858_v58 = vpop.f32.mrf.mxu1 }
 0x851   : > { %v15847_v27 = vadd.f32 %v7237_v12, %v7030_v8  ;;  %v17623_v8 = vld [vmem:[#allocation128_spill] sm:$0xff] }
 0x853   : > { %7173 = vmatmul.f32.gmra.mxu2 %v15354_v61  ;;  %v7239_v30 = vpop.f32.mrf.mxu3  ;;  %v6963_v61 = vadd.f32 %v15427_v62, %v15431_v48  ;;  %v6966_v62 = vadd.f32 %v15448_v44, %v15461_v11  ;;  %v7484_v44 = vadd.f32 %v15767_v13, %v15769_v46  ;;  %v17629_v46 = vld [vmem:[#allocation112_spill] sm:$0xff] }
 0x854   : > { %9365 = vmatmul.msk.f32.gmra.mxu1 %vm6185_vm10, %v15373_v55  ;;  %7450 = vmatmul.f32.gmra.mxu0 %v15376_v57 }
 0x855   : > { %v7033_v12 = vadd.f32 %v6966_v62, %v17623_v8 }
 0x856   : > { %v7126_v28 = vpop.f32.mrf.mxu2 }
 0x857   : > { %v7240_v59 = vadd.f32 %v7239_v30, %v7126_v28  ;;  %v17624_v30 = vld [vmem:[#allocation90_spill] sm:$0xff]  ;;  %v17625_v28 = vld [vmem:[#allocation45_spill] sm:$0xff] }
 0x858   : > { %9316 = vmatmul.msk.f32.gmra.mxu3 %vm6185_vm10, %v15393_v10  ;;  %v7032_v10 = vadd.f32 %v6963_v61, %v15406_v5  ;;  %v15877_v48 = vpop.f32.mrf.mxu1  ;;  %v17622_v5 = vld [vmem:[#allocation86_spill] sm:$0xff]  ;;  %v6969_v39 = vadd.f32 %v17625_v28, %v17624_v30  ;;  %v17627_v61 = vld [vmem:[#allocation57_spill] sm:$0xff]  ;;  %v17634_v30 = vld [vmem:[#allocation132_spill] sm:$0xff] }
 0x859   : > { %v15860_v1 = vadd.f32 %v7240_v59, %v7031_v4  ;;  %v17626_v4 = vld [vmem:[#allocation42_spill] sm:$0xff] }
 0x85b   : > { %7176 = vmatmul.f32.gmra.mxu2 %v15395_v25  ;;  %v7242_v55 = vpop.f32.mrf.mxu3  ;;  %v17620_v25 = vld [vmem:[#allocation125_spill] sm:$0xff] }
 0x85c   : > { %9366 = vmatmul.msk.f32.gmra.mxu1 %vm6185_vm10, %v15412_v29  ;;  %7453 = vmatmul.f32.gmra.mxu0 %v15415_v24  ;;  %v15880_v29 = vpop.f32.mrf.mxu0  ;;  %v17621_v24 = vld [vmem:[#allocation75_spill] sm:$0xff] }
 0x85e   : > { %v7129_v57 = vpop.f32.mrf.mxu2 }
 0x85f   : > { %v7243_v63 = vadd.f32 %v7242_v55, %v7129_v57  ;;  %v17628_v55 = vld [vmem:[#allocation129_spill] sm:$0xff]  ;;  %v7579_v57 = vadd.f32 %v7484_v44, %v15684_v43  ;;  %v17632_v43 = vld [vmem:[#allocation20_spill] sm:$0xff] }
 0x860   : > { %9317 = vmatmul.msk.f32.gmra.mxu3 %vm6185_vm10, %v17619_v60 }
 0x861   : > { %v15873_v32 = vadd.f32 %v7243_v63, %v7032_v10  ;;  %v15899_v10 = vpop.f32.mrf.mxu1  ;;  %v7034_v63 = vadd.f32 %v6969_v39, %v17629_v46  ;;  %v7611_v62 = vmax.f32 %v7579_v57, 0.0  ;;  %v17636_v57 = vld [vmem:[#allocation49_spill] sm:$0xff] }
 0x863   : > { %7179 = vmatmul.f32.gmra.mxu2 %v17620_v25  ;;  %v7245_v22 = vpop.f32.mrf.mxu3  ;;  %v7487_v25 = vadd.f32 %v15784_v38, %v15791_v45 }
 0x864   : > { %9367 = vmatmul.msk.f32.gmra.mxu1 %vm6185_vm10, %v17621_v24  ;;  %7456 = vmatmul.f32.gmra.mxu0 %v17622_v5  ;;  %v17630_v24 = vld [vmem:[#allocation133_spill] sm:$0xff]  ;;  %v17631_v5 = vld [vmem:[#allocation91_spill] sm:$0xff] }
 0x866   : > { %v7132_v26 = vpop.f32.mrf.mxu2 }
 0x867   : > { %v7246_v49 = vadd.f32 %v7245_v22, %v7132_v26  ;;  %v6972_v26 = vadd.f32 %v17631_v5, %v17630_v24  ;;  %v7493_v5 = vadd.f32 %v15825_v35, %v15827_v56  ;;  %v7496_v35 = vadd.f32 %v15841_v33, %v15843_v42 }
 0x868   : > { %9318 = vmatmul.msk.f32.gmra.mxu3 %vm6185_vm10, %v14050_v37  ;;  %v15901_v37 = vpop.f32.mrf.mxu0  ;;  %v7499_v33 = vadd.f32 %v15858_v58, %v15862_v0  ;;  %v7502_v58 = vadd.f32 %v15877_v48, %v15880_v29 }
 0x869   : > { %v15890_v11 = vadd.f32 %v7246_v49, %v7033_v12  ;;  %v17633_v12 = vld [vmem:[#allocation24_spill] sm:$0xff]  ;;  %v7580_v49 = vadd.f32 %v7487_v25, %v15699_v53  ;;  %v7035_v28 = vadd.f32 %v6972_v26, %v17634_v30  ;;  %v15916_v39 = vpop.f32.mrf.mxu1  ;;  %v7505_v48 = vadd.f32 %v15899_v10, %v15901_v37 }
 0x86a   : > { %v17640_v30 = vld [vmem:[#allocation136_spill] sm:$0xff] }
 0x86b   : > { %7182 = vmatmul.f32.gmra.mxu2 %v17626_v4  ;;  %v7248_v59 = vpop.f32.mrf.mxu3  ;;  %v7612_v4 = vmax.f32 %v7580_v49, 0.0 }
 0x86c   : > { %9368 = vmatmul.msk.f32.gmra.mxu1 %vm6185_vm10, %v17627_v61  ;;  %7459 = vmatmul.f32.gmra.mxu0 %v17628_v55  ;;  %v17635_v55 = vld [vmem:[#allocation79_spill] sm:$0xff] }
 0x86e   : > { %v7135_v13 = vpop.f32.mrf.mxu2 }
 0x86f   : > { %v7249_v60 = vadd.f32 %v7248_v59, %v7135_v13  ;;  %v7490_v59 = vadd.f32 %v15806_v19, %v15809_v40  ;;  %v6975_v13 = vadd.f32 %v17636_v57, %v17635_v55  ;;  %v17642_v55 = vld [vmem:[#allocation140_spill] sm:$0xff] }
 0x870   : > { %v15918_v45 = vpop.f32.mrf.mxu0 }
 0x871   : > { %v15906_v22 = vadd.f32 %v7249_v60, %v7034_v63  ;;  %v7581_v53 = vadd.f32 %v7490_v59, %v15712_v7  ;;  %v17637_v60 = vld [vmem:[#allocation14_spill] sm:$0xff]  ;;  %v15931_v26 = vpop.f32.mrf.mxu1  ;;  %v7582_v7 = vadd.f32 %v7493_v5, %v15728_v36  ;;  %v17641_v59 = vld [vmem:[#allocation81_spill] sm:$0xff]  ;;  %v7583_v36 = vadd.f32 %v7496_v35, %v15743_v23  ;;  %v17644_v5 = vld [vmem:[#allocation84_spill] sm:$0xff] }
 0x872   : > { %v6981_v57 = vadd.f32 %v17642_v55, %v17641_v59  ;;  %v6987_v35 = vadd.f32 %v15576_v16, %v15580_v54 }
 0x873   : > { %v7251_v8 = vpop.f32.mrf.mxu3  ;;  %9371 = vmatmul.msk.f32.vlgmr.msrb.gmra.mxu2 %vm7654_vm11, %v7611_v62  ;;  %v7036_v62 = vadd.f32 %v6975_v13, %v17637_v60  ;;  %v7613_v24 = vmax.f32 %v7581_v53, 0.0  ;;  %v17643_v60 = vld [vmem:[#allocation94_spill] sm:$0xff] }
 0x874   : > { %9369 = vmatmul.msk.f32.gmra.mxu1 %vm6185_vm10, %v17632_v43  ;;  %7462 = vmatmul.f32.gmra.mxu0 %v17633_v12  ;;  %v17639_v43 = vld [vmem:[#allocation95_spill] sm:$0xff] }
 0x876   : > { %v7138_v44 = vpop.f32.mrf.mxu2 }
 0x877   : > { %v7252_v38 = vadd.f32 %v7251_v8, %v7138_v44  ;;  %v17638_v8 = vld [vmem:[#allocation18_spill] sm:$0xff] }
 0x878   : > { %v15935_v40 = vpop.f32.mrf.mxu0  ;;  %v6978_v12 = vadd.f32 %v17639_v43, %v17638_v8  ;;  %v17645_v8 = vld [vmem:[#allocation85_spill] sm:$0xff] }
 0x879   : > { %v15922_v61 = vadd.f32 %v7252_v38, %v7035_v28  ;;  %v15948_v13 = vpop.f32.mrf.mxu1  ;;  %v6984_v43 = vadd.f32 %v17645_v8, %v17644_v5  ;;  %v17650_v5 = vld [vmem:[#allocation115_spill] sm:$0xff] }
 0x87a   : > { %v7037_v28 = vadd.f32 %v6978_v12, %v17640_v30  ;;  %v17646_v30 = vld [vmem:[#allocation15_spill] sm:$0xff] }
 0x87b   : > { %v7254_v46 = vpop.f32.mrf.mxu3  ;;  %9372 = vmatmul.msk.f32.gmra.mxu2 %vm7654_vm11, %v7612_v4  ;;  %v7614_v4 = vmax.f32 %v7582_v7, 0.0 }
 0x87e   : > { %v7141_v63 = vpop.f32.mrf.mxu2 }
 0x87f   : > { %v7255_v25 = vadd.f32 %v7254_v46, %v7141_v63 }
 0x880   : > { %v15951_v53 = vpop.f32.mrf.mxu0 }
 0x881   : > { %v15933_v19 = vadd.f32 %v7255_v25, %v7036_v62  ;;  %v7038_v62 = vadd.f32 %v6981_v57, %v17643_v60  ;;  %v15963_v7 = vpop.f32.mrf.mxu1  ;;  %v17647_v57 = vld [vmem:[#allocation137_spill] sm:$0xff] }
 0x883   : > { %v7257_v49 = vpop.f32.mrf.mxu3  ;;  %9373 = vmatmul.msk.f32.gmra.mxu2 %vm7654_vm11, %v7613_v24  ;;  %v7615_v24 = vmax.f32 %v7583_v36, 0.0 }
 0x886   : > { %v7144_v44 = vpop.f32.mrf.mxu2 }
 0x887   : > { %v7258_v38 = vadd.f32 %v7257_v49, %v7144_v44  ;;  %v7584_v49 = vadd.f32 %v7499_v33, %v15758_v41  ;;  %v7585_v41 = vadd.f32 %v7502_v58, %v15773_v21  ;;  %v7586_v21 = vadd.f32 %v7505_v48, %v15786_v50 }
 0x888   : > { %v15965_v23 = vpop.f32.mrf.mxu0 }
 0x889   : > { %v15944_v56 = vadd.f32 %v7258_v38, %v7037_v28  ;;  %v7039_v28 = vadd.f32 %v6984_v43, %v17646_v30  ;;  %v7519_v36 = vpop.f32.mrf.mxu1  ;;  %v17651_v30 = vld [vmem:[#allocation123_spill] sm:$0xff] }
 0x88b   : > { %v7260_v46 = vpop.f32.mrf.mxu3  ;;  %9374 = vmatmul.msk.f32.gmra.mxu2 %vm7654_vm11, %v7614_v4  ;;  %v7616_v4 = vmax.f32 %v7584_v49, 0.0  ;;  %v7508_v49 = vadd.f32 %v15916_v39, %v15918_v45  ;;  %v7511_v39 = vadd.f32 %v15931_v26, %v15935_v40  ;;  %v7514_v26 = vadd.f32 %v15948_v13, %v15951_v53 }
 0x88c   : > { %v7517_v13 = vadd.f32 %v15963_v7, %v15965_v23  ;;  %v7005_v7 = vadd.f32 %v15677_v2, %v15679_v20 }
 0x88d   : > { %v7587_v50 = vadd.f32 %v7508_v49, %v15802_v15  ;;  %v7588_v15 = vadd.f32 %v7511_v39, %v15817_v14 }
 0x88e   : > { %v7147_v63 = vpop.f32.mrf.mxu2 }
 0x88f   : > { %v7261_v25 = vadd.f32 %v7260_v46, %v7147_v63  ;;  %v7040_v46 = vadd.f32 %v6987_v35, %v17647_v57  ;;  %v17653_v35 = vld [vmem:[#allocation118_spill] sm:$0xff]  ;;  %v6996_v57 = vadd.f32 %v15624_v51, %v15627_v47  ;;  %v6999_v47 = vadd.f32 %v15640_v34, %v15644_v9 }
 0x890   : > { %v7406_v60 = vpop.f32.mrf.mxu0  ;;  %v7002_v34 = vadd.f32 %v15658_v6, %v15661_v17 }
 0x891   : > { %v15957_v42 = vadd.f32 %v7261_v25, %v7038_v62  ;;  %v7617_v62 = vmax.f32 %v7585_v41, 0.0  ;;  %v17648_v25 = vld [vmem:[#allocation2_spill] sm:$0xff] }
 0x893   : > { %v7263_v12 = vpop.f32.mrf.mxu3  ;;  %9375 = vmatmul.msk.f32.gmra.mxu2 %vm7654_vm11, %v7615_v24  ;;  %v17649_v24 = vld [vmem:[#allocation48_spill] sm:$0xff] }
 0x894   : > { %v6990_v16 = vadd.f32 %v17649_v24, %v17648_v25  ;;  %v17654_v25 = vld [vmem:[#allocation119_spill] sm:$0xff] }
 0x895   : > { %v7043_v24 = vadd.f32 %v6996_v57, %v17654_v25 }
 0x896   : > { %v7150_v44 = vpop.f32.mrf.mxu2  ;;  %v7041_v8 = vadd.f32 %v6990_v16, %v17650_v5 }
 0x897   : > { %v7264_v38 = vadd.f32 %v7263_v12, %v7150_v44  ;;  %v7618_v12 = vmax.f32 %v7586_v21, 0.0  ;;  %v7522_v44 = vpop.f32.mrf.mxu1  ;;  %v7589_v21 = vadd.f32 %v7514_v26, %v15832_v31  ;;  %v7590_v31 = vadd.f32 %v7517_v13, %v15847_v27  ;;  %v17657_v27 = vld [vmem:[#allocation52_spill] sm:$0xff] }
 0x898   : > { %v7409_v37 = vpop.f32.mrf.mxu0 }
 0x899   : > { %v15970_v0 = vadd.f32 %v7264_v38, %v7039_v28  ;;  %v17652_v28 = vld [vmem:[#allocation87_spill] sm:$0xff]  ;;  %v7621_v49 = vmax.f32 %v7589_v21, 0.0 }
 0x89a   : > { %v6993_v38 = vadd.f32 %v17652_v28, %v17651_v30  ;;  %v17656_v28 = vld [vmem:[#allocation122_spill] sm:$0xff] }
 0x89b   : > { %v7266_v59 = vpop.f32.mrf.mxu3  ;;  %9376 = vmatmul.msk.f32.gmra.mxu2 %vm7654_vm11, %v7616_v4 }
 0x89e   : > { %v7153_v55 = vpop.f32.mrf.mxu2 }
 0x89f   : > { %v7267_v63 = vadd.f32 %v7266_v59, %v7153_v55  ;;  %v7042_v59 = vadd.f32 %v6993_v38, %v17653_v35  ;;  %v7619_v55 = vmax.f32 %v7587_v50, 0.0  ;;  %v7045_v38 = vadd.f32 %v7002_v34, %v17656_v28 }
 0x8a0   : > { %v7622_v35 = vmax.f32 %v7590_v31, 0.0 }
 0x8a1   : > { %v15979_v29 = vadd.f32 %v7267_v63, %v7040_v46  ;;  %v7525_v46 = vpop.f32.mrf.mxu1 }
 0x8a3   : > { %v7269_v54 = vpop.f32.mrf.mxu3  ;;  %9377 = vmatmul.msk.f32.gmra.mxu2 %vm7654_vm11, %v7617_v62  ;;  %v7412_v62 = vpop.f32.mrf.mxu0 }
 0x8a4   : > { %v7526_v26 = vadd.f32 %v7525_v46, %v7412_v62  ;;  %v17661_v46 = vld [vmem:[#allocation29_spill] sm:$0xff] }
 0x8a5   : > { %v17662_v62 = vld [vmem:[#allocation25_spill] sm:$0xff] }
 0x8a6   : > { %v7156_v33 = vpop.f32.mrf.mxu2  ;;  %v7014_v34 = vadd.f32 %v17662_v62, %v17661_v46 }
 0x8a7   : > { %v7270_v43 = vadd.f32 %v7269_v54, %v7156_v33  ;;  %v7620_v54 = vmax.f32 %v7588_v15, 0.0 }
 0x8a9   : > { %v15988_v10 = vadd.f32 %v7270_v43, %v7041_v8  ;;  %v7528_v33 = vpop.f32.mrf.mxu1  ;;  %v17655_v8 = vld [vmem:[#allocation27_spill] sm:$0xff] }
 0x8aa   : > { %v7044_v43 = vadd.f32 %v6999_v47, %v17655_v8 }
 0x8ab   : > { %v7272_v4 = vpop.f32.mrf.mxu3  ;;  %9378 = vmatmul.msk.f32.gmra.mxu2 %vm7654_vm11, %v7618_v12  ;;  %v7415_v14 = vpop.f32.mrf.mxu0 }
 0x8ae   : > { %v7159_v58 = vpop.f32.mrf.mxu2 }
 0x8af   : > { %v7273_v41 = vadd.f32 %v7272_v4, %v7159_v58 }
 0x8b1   : > { %v15997_v45 = vadd.f32 %v7273_v41, %v7042_v59  ;;  %v7531_v4 = vpop.f32.mrf.mxu1  ;;  %v7520_v59 = vadd.f32 %v7519_v36, %v7406_v60  ;;  %v7008_v60 = vadd.f32 %v15693_v3, %v15695_v18  ;;  %v7593_v18 = vadd.f32 %v7526_v26, %v15890_v11  ;;  %v17663_v11 = vld [vmem:[#allocation71_spill] sm:$0xff] }
 0x8b3   : > { %v7275_v63 = vpop.f32.mrf.mxu3  ;;  %9379 = vmatmul.msk.f32.gmra.mxu2 %vm7654_vm11, %v7619_v55  ;;  %v7418_v58 = vpop.f32.mrf.mxu0  ;;  %v7591_v6 = vadd.f32 %v7520_v59, %v15860_v1  ;;  %v7046_v55 = vadd.f32 %v7005_v7, %v17657_v27  ;;  %v17658_v1 = vld [vmem:[#allocation28_spill] sm:$0xff] }
 0x8b4   : > { %v7532_v59 = vadd.f32 %v7531_v4, %v7418_v58  ;;  %v16063_v4 = vld [vmem:[%s16530_s9] ss:$0 sm:$0xff] }
 0x8b5   : > { %v7623_v57 = vmax.f32 %v7591_v6, 0.0 }
 0x8b6   : > { %v7162_v48 = vpop.f32.mrf.mxu2  ;;  %v7595_v6 = vadd.f32 %v7532_v59, %v15922_v61 }
 0x8b7   : > { %v7276_v16 = vadd.f32 %v7275_v63, %v7162_v48  ;;  %v7523_v63 = vadd.f32 %v7522_v44, %v7409_v37  ;;  %v17659_v44 = vld [vmem:[#allocation127_spill] sm:$0xff] }
 0x8b8   : > { %v7011_v37 = vadd.f32 %v17659_v44, %v15714_v52 }
 0x8b9   : > { %v16006_v40 = vadd.f32 %v7276_v16, %v7043_v24  ;;  %v7534_v15 = vpop.f32.mrf.mxu1  ;;  %v7592_v2 = vadd.f32 %v7523_v63, %v15873_v32  ;;  %v7047_v24 = vadd.f32 %v7008_v60, %v17658_v1  ;;  %v17660_v32 = vld [vmem:[#allocation68_spill] sm:$0xff]  ;;  %v7627_v60 = vmax.f32 %v7595_v6, 0.0 }
 0x8ba   : > { %v7048_v8 = vadd.f32 %v7011_v37, %v17660_v32 }
 0x8bb   : > { %v7278_v51 = vpop.f32.mrf.mxu3  ;;  %9380 = vmatmul.msk.f32.gmra.mxu2 %vm7654_vm11, %v7620_v54  ;;  %v7421_v36 = vpop.f32.mrf.mxu0  ;;  %v7624_v54 = vmax.f32 %v7592_v2, 0.0 }
 0x8be   : > { %v7165_v5 = vpop.f32.mrf.mxu2 }
 0x8bf   : > { %v7279_v12 = vadd.f32 %v7278_v51, %v7165_v5 }
 0x8c1   : > { %v16015_v53 = vadd.f32 %v7279_v12, %v7044_v43  ;;  %v7537_v51 = vpop.f32.mrf.mxu1  ;;  %v7625_v12 = vmax.f32 %v7593_v18, 0.0 }
 0x8c3   : > { %v7281_v9 = vpop.f32.mrf.mxu3  ;;  %9381 = vmatmul.msk.f32.gmra.mxu2 %vm7654_vm11, %v7621_v49  ;;  %v7424_v3 = vpop.f32.mrf.mxu0  ;;  %v7529_v49 = vadd.f32 %v7528_v33, %v7415_v14  ;;  %v17664_v33 = vld [vmem:[#allocation130_spill] sm:$0xff] }
 0x8c4   : > { %v17665_v14 = vld [vmem:[#allocation74_spill] sm:$0xff] }
 0x8c6   : > { %v7168_v30 = vpop.f32.mrf.mxu2 }
 0x8c7   : > { %v7282_v50 = vadd.f32 %v7281_v9, %v7168_v30  ;;  %v7594_v9 = vadd.f32 %v7529_v49, %v15906_v22  ;;  %v17666_v22 = vld [vmem:[#allocation126_spill] sm:$0xff] }
 0x8c9   : > { %v16022_v41 = vadd.f32 %v7282_v50, %v7045_v38  ;;  %v7540_v31 = vpop.f32.mrf.mxu1  ;;  %v7049_v38 = vadd.f32 %v7014_v34, %v17663_v11 }
 0x8cb   : > { %v7284_v23 = vpop.f32.mrf.mxu3  ;;  %9382 = vmatmul.msk.f32.gmra.mxu2 %vm7654_vm11, %v7622_v35  ;;  %v7427_v30 = vpop.f32.mrf.mxu0  ;;  %v7626_v35 = vmax.f32 %v7594_v9, 0.0 }
 0x8cc   : > { %v7541_v37 = vadd.f32 %v7540_v31, %v7427_v30 }
 0x8ce   : > { %v7171_v17 = vpop.f32.mrf.mxu2  ;;  %v7598_v18 = vadd.f32 %v7541_v37, %v15957_v42 }
 0x8cf   : > { %v7285_v39 = vadd.f32 %v7284_v23, %v7171_v17  ;;  %v7017_v23 = vadd.f32 %v17665_v14, %v17664_v33 }
 0x8d1   : > { %v16029_v48 = vadd.f32 %v7285_v39, %v7046_v55  ;;  %v7050_v55 = vadd.f32 %v7017_v23, %v17666_v22  ;;  %v7543_v39 = vpop.f32.mrf.mxu1 }
 0x8d3   : > { %v7287_v25 = vpop.f32.mrf.mxu3  ;;  %9383 = vmatmul.msk.f32.gmra.mxu2 %vm7654_vm11, %v7623_v57  ;;  %v7430_v63 = vpop.f32.mrf.mxu0 }
 0x8d6   : > { %v7174_v20 = vpop.f32.mrf.mxu2 }
 0x8d7   : > { %v7288_v16 = vadd.f32 %v7287_v25, %v7174_v20  ;;  %v7535_v25 = vadd.f32 %v7534_v15, %v7421_v36 }
 0x8d9   : > { %v16036_v47 = vadd.f32 %v7288_v16, %v7047_v24  ;;  %v7596_v61 = vadd.f32 %v7535_v25, %v15933_v19  ;;  %v7538_v24 = vadd.f32 %v7537_v51, %v7424_v3  ;;  %v7546_v16 = vpop.f32.mrf.mxu1 }
 0x8db   : > { %v7290_v21 = vpop.f32.mrf.mxu3  ;;  %9384 = vmatmul.msk.f32.gmra.mxu2 %vm7654_vm11, %v7624_v54  ;;  %v7628_v1 = vmax.f32 %v7596_v61, 0.0  ;;  %v7433_v36 = vpop.f32.mrf.mxu0  ;;  %v7597_v54 = vadd.f32 %v7538_v24, %v15944_v56  ;;  %v7630_v56 = vmax.f32 %v7598_v18, 0.0 }
 0x8dd   : > { %v7629_v44 = vmax.f32 %v7597_v54, 0.0 }
 0x8de   : > { %v7177_v5 = vpop.f32.mrf.mxu2 }
 0x8df   : > { %v7291_v43 = vadd.f32 %v7290_v21, %v7177_v5 }
 0x8e1   : > { %v16043_v13 = vadd.f32 %v7291_v43, %v7048_v8  ;;  %v7549_v51 = vpop.f32.mrf.mxu1  ;;  %v7544_v8 = vadd.f32 %v7543_v39, %v7430_v63 }
 0x8e3   : > { %9385 = vmatmul.msk.f32.gmra.mxu2 %vm7654_vm11, %v7625_v12  ;;  %v7293_v52 = vpop.f32.mrf.mxu3  ;;  %v7436_v3 = vpop.f32.mrf.mxu0  ;;  %v7599_v12 = vadd.f32 %v7544_v8, %v15970_v0 }
 0x8e5   : > { %v7631_v42 = vmax.f32 %v7599_v12, 0.0 }
 0x8e6   : > { %v7180_v28 = vpop.f32.mrf.mxu2 }
 0x8e7   : > { %v7294_v50 = vadd.f32 %v7293_v52, %v7180_v28  ;;  %v7547_v52 = vadd.f32 %v7546_v16, %v7433_v36 }
 0x8e9   : > { %v16050_v7 = vadd.f32 %v7294_v50, %v7049_v38  ;;  %v7552_v49 = vpop.f32.mrf.mxu1  ;;  %v7600_v31 = vadd.f32 %v7547_v52, %v15979_v29  ;;  %v7550_v50 = vadd.f32 %v7549_v51, %v7436_v3 }
 0x8eb   : > { %9386 = vmatmul.msk.f32.gmra.mxu2 %vm7654_vm11, %v7626_v35  ;;  %v7296_v17 = vpop.f32.mrf.mxu3  ;;  %v7439_v46 = vpop.f32.mrf.mxu0  ;;  %v7632_v38 = vmax.f32 %v7600_v31, 0.0  ;;  %v7601_v59 = vadd.f32 %v7550_v50, %v15988_v10 }
 0x8ec   : > { %v7553_v23 = vadd.f32 %v7552_v49, %v7439_v46 }
 0x8ed   : > { %v7633_v29 = vmax.f32 %v7601_v59, 0.0 }
 0x8ee   : > { %v7183_v27 = vpop.f32.mrf.mxu2  ;;  %v7602_v22 = vadd.f32 %v7553_v23, %v15997_v45 }
 0x8ef   : > { %v7297_v57 = vadd.f32 %v7296_v17, %v7183_v27 }
 0x8f0   : > { %v7634_v10 = vmax.f32 %v7602_v22, 0.0 }
 0x8f1   : > { %v16057_v2 = vadd.f32 %v7297_v57, %v7050_v55  ;;  %v7555_v28 = vpop.f32.mrf.mxu1 }
 0x8f3   : > { %9387 = vmatmul.msk.f32.gmra.mxu2 %vm7654_vm11, %v7627_v60  ;;  %v7442_v11 = vpop.f32.mrf.mxu0 }
 0x8f4   : > { %v7556_v57 = vadd.f32 %v7555_v28, %v7442_v11 }
 0x8f6   : > { %v7771_v58 = vpop.f32.mrf.mxu2  ;;  %v7603_v61 = vadd.f32 %v7556_v57, %v16006_v40 }
 0x8f7   : > { %v16067_v20 = vadd.f32 %v16063_v4, %v7771_v58 }
 0x8f8   : > { %v7635_v45 = vmax.f32 %v7603_v61, 0.0 }
 0x8f9   : > { %v7868_v15 = vsel %vm7867_vm12, %v16067_v20, -inf  ;;  %v7558_v6 = vpop.f32.mrf.mxu1 }
 0x8fa   : > { %7869 = vmax.xlane.f32.xlu1 %v7868_v15 }
 0x8fb   : > { %9388 = vmatmul.msk.f32.gmra.mxu2 %vm7654_vm11, %v7628_v1  ;;  %v7445_v27 = vpop.f32.mrf.mxu0 }
 0x8fc   : > { %v7559_v24 = vadd.f32 %v7558_v6, %v7445_v27 }
 0x8fe   : > { %v7774_v26 = vpop.f32.mrf.mxu2  ;;  %v7604_v15 = vadd.f32 %v7559_v24, %v16015_v53 }
 0x8ff   : > { %v16074_v19 = vadd.f32 %v16063_v4, %v7774_v26 }
 0x900   : > { %v7636_v40 = vmax.f32 %v7604_v15, 0.0 }
 0x901   : > { %v7871_v21 = vsel %vm7867_vm12, %v16074_v19, -inf  ;;  %v7561_v60 = vpop.f32.mrf.mxu1 }
 0x902   : > { %7872 = vmax.xlane.f32.xlu2 %v7871_v21 }
 0x903   : > { %9389 = vmatmul.msk.f32.gmra.mxu2 %vm7654_vm11, %v7629_v44  ;;  %v7448_v25 = vpop.f32.mrf.mxu0 }
 0x904   : > { %v7562_v37 = vadd.f32 %v7561_v60, %v7448_v25 }
 0x906   : > { %v7777_v5 = vpop.f32.mrf.mxu2  ;;  %v7605_v51 = vadd.f32 %v7562_v37, %v16022_v41 }
 0x907   : > { %v16081_v32 = vadd.f32 %v16063_v4, %v7777_v5 }
 0x909   : > { %v7874_v43 = vsel %vm7867_vm12, %v16081_v32, -inf  ;;  %v7564_v36 = vpop.f32.mrf.mxu1 }
 0x90a   : > { %7875 = vmax.xlane.f32.xlu0 %v7874_v43 }
 0x90b   : > { %9390 = vmatmul.msk.f32.gmra.mxu2 %vm7654_vm11, %v7630_v56  ;;  %v7451_v54 = vpop.f32.mrf.mxu0  ;;  %v7637_v56 = vmax.f32 %v7605_v51, 0.0 }
 0x90c   : > { %v7565_v8 = vadd.f32 %v7564_v36, %v7451_v54 }
 0x90e   : > { %v7780_v62 = vpop.f32.mrf.mxu2  ;;  %v7606_v12 = vadd.f32 %v7565_v8, %v16029_v48 }
 0x90f   : > { %v16088_v34 = vadd.f32 %v16063_v4, %v7780_v62 }
 0x910   : > { %v7638_v41 = vmax.f32 %v7606_v12, 0.0 }
 0x911   : > { %v7877_v9 = vsel %vm7867_vm12, %v16088_v34, -inf  ;;  %v7567_v18 = vpop.f32.mrf.mxu1 }
 0x912   : > { %7878 = vmax.xlane.f32.xlu2 %v7877_v9 }
 0x913   : > { %9391 = vmatmul.msk.f32.gmra.mxu2 %vm7654_vm11, %v7631_v42  ;;  %v7454_v5 = vpop.f32.mrf.mxu0 }
 0x914   : > { %v7568_v62 = vadd.f32 %v7567_v18, %v7454_v5 }
 0x916   : > { %v7783_v30 = vpop.f32.mrf.mxu2  ;;  %v7607_v31 = vadd.f32 %v7568_v62, %v16036_v47 }
 0x917   : > { %v16095_v0 = vadd.f32 %v16063_v4, %v7783_v30 }
 0x918   : > { %v7639_v48 = vmax.f32 %v7607_v31, 0.0 }
 0x919   : > { %v7880_v35 = vsel %vm7867_vm12, %v16095_v0, -inf  ;;  %v7570_v42 = vpop.f32.mrf.mxu1 }
 0x91a   : > { %7881 = vmax.xlane.f32.xlu1 %v7880_v35 }
 0x91b   : > { %9392 = vmatmul.msk.f32.gmra.mxu2 %vm7654_vm11, %v7632_v38  ;;  %v7457_v9 = vpop.f32.mrf.mxu0 }
 0x91c   : > { %v7571_v11 = vadd.f32 %v7570_v42, %v7457_v9 }
 0x91e   : > { %v7786_v33 = vpop.f32.mrf.mxu2  ;;  %v7608_v59 = vadd.f32 %v7571_v11, %v16043_v13 }
 0x91f   : > { %v16102_v14 = vadd.f32 %v16063_v4, %v7786_v33 }
 0x920   : > { %v7640_v47 = vmax.f32 %v7608_v59, 0.0 }
 0x921   : > { %v7883_v17 = vsel %vm7867_vm12, %v16102_v14, -inf  ;;  %v7573_v50 = vpop.f32.mrf.mxu1 }
 0x922   : > { %7884 = vmax.xlane.f32.xlu2 %v7883_v17 }
 0x923   : > { %9393 = vmatmul.msk.f32.gmra.mxu2 %vm7654_vm11, %v7633_v29  ;;  %v7460_v35 = vpop.f32.mrf.mxu0 }
 0x924   : > { %v7574_v23 = vadd.f32 %v7573_v50, %v7460_v35 }
 0x926   : > { %v7789_v55 = vpop.f32.mrf.mxu2  ;;  %v7609_v17 = vadd.f32 %v7574_v23, %v16050_v7 }
 0x927   : > { %v16109_v39 = vadd.f32 %v16063_v4, %v7789_v55 }
 0x928   : > { %v7641_v13 = vmax.f32 %v7609_v17, 0.0 }
 0x929   : > { %v7886_v63 = vsel %vm7867_vm12, %v16109_v39, -inf  ;;  %v7576_v27 = vpop.f32.mrf.mxu1 }
 0x92a   : > { %7887 = vmax.xlane.f32.xlu0 %v7886_v63 }
 0x92b   : > { %9394 = vmatmul.msk.f32.gmra.mxu2 %vm7654_vm11, %v7634_v10  ;;  %v7463_v22 = vpop.f32.mrf.mxu0 }
 0x92c   : > { %v7577_v57 = vadd.f32 %v7576_v27, %v7463_v22 }
 0x92e   : > { %v7792_v58 = vpop.f32.mrf.mxu2  ;;  %v7610_v60 = vadd.f32 %v7577_v57, %v16057_v2 }
 0x92f   : > { %v16116_v1 = vadd.f32 %v16063_v4, %v7792_v58 }
 0x930   : > { %v7642_v7 = vmax.f32 %v7610_v60, 0.0 }
 0x931   : > { %v7889_v16 = vsel %vm7867_vm12, %v16116_v1, -inf }
 0x932   : > { %7890 = vmax.xlane.f32.xlu1 %v7889_v16 }
 0x933   : > { %9395 = vmatmul.msk.f32.gmra.mxu2 %vm7654_vm11, %v7635_v45 }
 0x936   : > { %v7795_v26 = vpop.f32.mrf.mxu2 }
 0x937   : > { %v16123_v44 = vadd.f32 %v16063_v4, %v7795_v26 }
 0x939   : > { %v7892_v21 = vsel %vm7867_vm12, %v16123_v44, -inf }
 0x93a   : > { %7893 = vmax.xlane.f32.xlu2 %v7892_v21 }
 0x93b   : > { %9396 = vmatmul.msk.f32.gmra.mxu2 %vm7654_vm11, %v7636_v40 }
 0x93e   : > { %v7798_v3 = vpop.f32.mrf.mxu2 }
 0x93f   : > { %v16130_v53 = vadd.f32 %v16063_v4, %v7798_v3 }
 0x941   : > { %v7895_v43 = vsel %vm7867_vm12, %v16130_v53, -inf }
 0x942   : > { %7896 = vmax.xlane.f32.xlu0 %v7895_v43 }
 0x943   : > { %9397 = vmatmul.msk.f32.gmra.mxu2 %vm7654_vm11, %v7637_v56 }
 0x946   : > { %v7801_v49 = vpop.f32.mrf.mxu2 }
 0x947   : > { %v16137_v46 = vadd.f32 %v16063_v4, %v7801_v49 }
 0x949   : > { %v7898_v52 = vsel %vm7867_vm12, %v16137_v46, -inf }
 0x94a   : > { %7899 = vmax.xlane.f32.xlu1 %v7898_v52 }
 0x94b   : > { %9398 = vmatmul.msk.f32.gmra.mxu2 %vm7654_vm11, %v7638_v41 }
 0x94e   : > { %v7804_v30 = vpop.f32.mrf.mxu2 }
 0x94f   : > { %v16144_v28 = vadd.f32 %v16063_v4, %v7804_v30 }
 0x951   : > { %v7901_v38 = vsel %vm7867_vm12, %v16144_v28, -inf }
 0x952   : > { %7902 = vmax.xlane.f32.xlu2 %v7901_v38 }
 0x953   : > { %9399 = vmatmul.msk.f32.gmra.mxu2 %vm7654_vm11, %v7639_v48 }
 0x956   : > { %v7807_v33 = vpop.f32.mrf.mxu2 }
 0x957   : > { %v16151_v29 = vadd.f32 %v16063_v4, %v7807_v33 }
 0x959   : > { %v7904_v6 = vsel %vm7867_vm12, %v16151_v29, -inf }
 0x95a   : > { %7905 = vmax.xlane.f32.xlu0 %v7904_v6 }
 0x95b   : > { %9400 = vmatmul.msk.f32.gmra.mxu2 %vm7654_vm11, %v7640_v47 }
 0x95e   : > { %v7810_v55 = vpop.f32.mrf.mxu2 }
 0x95f   : > { %v16158_v10 = vadd.f32 %v16063_v4, %v7810_v55 }
 0x961   : > { %v7907_v63 = vsel %vm7867_vm12, %v16158_v10, -inf }
 0x962   : > { %7908 = vmax.xlane.f32.xlu1 %v7907_v63 }
 0x963   : > { %9401 = vmatmul.msk.f32.gmra.mxu2 %vm7654_vm11, %v7641_v13 }
 0x966   : > { %v7813_v25 = vpop.f32.mrf.mxu2 }
 0x967   : > { %v16165_v61 = vadd.f32 %v16063_v4, %v7813_v25 }
 0x969   : > { %v7910_v58 = vsel %vm7867_vm12, %v16165_v61, -inf }
 0x96a   : > { %7911 = vmax.xlane.f32.xlu2 %v7910_v58 }
 0x96b   : > { %9402 = vmatmul.msk.f32.gmra.mxu2 %vm7654_vm11, %v7642_v7 }
 0x96d   : > { %v7870_v45 = vpop.xlane.xlu1 %7869 }
 0x96e   : > { %v16171_v24 = vsub.f32 %v16067_v20, %v7870_v45  ;;  %v7816_v16 = vpop.f32.mrf.mxu2 }
 0x96f   : > { %v16174_v15 = vadd.f32 %v16063_v4, %v7816_v16 }
 0x970   : > { %v7996_v2 = vmul.f32 1.442695, %v16171_v24 }
 0x971   : > { %v7913_v36 = vsel %vm7867_vm12, %v16174_v15, -inf }
 0x972   : > { %9434 = vpow2.f32 %v7996_v2  ;;  %7914 = vmax.xlane.f32.xlu0 %v7913_v36 }
 0x975   : > { %v7873_v54 = vpop.xlane.xlu2 %7872 }
 0x976   : > { %v16180_v26 = vsub.f32 %v16074_v19, %v7873_v54  ;;  %v7819_v40 = vpop.f32.mrf.mxu2 }
 0x977   : > { %v16183_v37 = vadd.f32 %v16063_v4, %v7819_v40 }
 0x978   : > { %v9435_v20 = vpop.eup %9434  ;;  %v7998_v21 = vmul.f32 1.442695, %v16180_v26 }
 0x979   : > { %v7916_v51 = vsel %vm7867_vm12, %v16183_v37, -inf  ;;  %v8060_v3 = vsel %vm7867_vm12, %v9435_v20, 0.0 }
 0x97a   : > { %9436 = vpow2.f32 %v7998_v21  ;;  %7917 = vmax.xlane.f32.xlu1 %v7916_v51  ;;  %8061 = vadd.xlane.f32.xlu2 %v8060_v3 }
 0x97d   : > { %v7876_v18 = vpop.xlane.xlu0 %7875 }
 0x97e   : > { %v16190_v5 = vsub.f32 %v16081_v32, %v7876_v18  ;;  %v7822_v19 = vpop.f32.mrf.mxu2 }
 0x97f   : > { %v16193_v56 = vadd.f32 %v16063_v4, %v7822_v19 }
 0x980   : > { %v9437_v8 = vpop.eup %9436  ;;  %v8000_v43 = vmul.f32 1.442695, %v16190_v5 }
 0x981   : > { %v8063_v12 = vsel %vm7867_vm12, %v9437_v8, 0.0  ;;  %v7919_v49 = vsel %vm7867_vm12, %v16193_v56, -inf }
 0x982   : > { %9438 = vpow2.f32 %v8000_v43  ;;  %8064 = vadd.xlane.f32.xlu0 %v8063_v12  ;;  %7920 = vmax.xlane.f32.xlu2 %v7919_v49 }
 0x985   : > { %v7879_v41 = vpop.xlane.xlu2 %7878 }
 0x986   : > { %v16200_v62 = vsub.f32 %v16088_v34, %v7879_v41  ;;  %v7825_v32 = vpop.f32.mrf.mxu2 }
 0x987   : > { %v16203_v42 = vadd.f32 %v16063_v4, %v7825_v32 }
 0x988   : > { %v9439_v52 = vpop.eup %9438  ;;  %v8002_v9 = vmul.f32 1.442695, %v16200_v62 }
 0x989   : > { %v7922_v31 = vsel %vm7867_vm12, %v16203_v42, -inf  ;;  %v8066_v30 = vsel %vm7867_vm12, %v9439_v52, 0.0 }
 0x98a   : > { %9440 = vpow2.f32 %v8002_v9  ;;  %7923 = vmax.xlane.f32.xlu0 %v7922_v31  ;;  %8067 = vadd.xlane.f32.xlu1 %v8066_v30 }
 0x98d   : > { %v7882_v48 = vpop.xlane.xlu1 %7881 }
 0x98e   : > { %v16210_v11 = vsub.f32 %v16095_v0, %v7882_v48  ;;  %v7828_v34 = vpop.f32.mrf.mxu2 }
 0x98f   : > { %v16213_v38 = vadd.f32 %v16063_v4, %v7828_v34 }
 0x990   : > { %v9441_v50 = vpop.eup %9440  ;;  %v8004_v35 = vmul.f32 1.442695, %v16210_v11 }
 0x991   : > { %v7925_v59 = vsel %vm7867_vm12, %v16213_v38, -inf  ;;  %v8069_v33 = vsel %vm7867_vm12, %v9441_v50, 0.0 }
 0x992   : > { %9442 = vpow2.f32 %v8004_v35  ;;  %7926 = vmax.xlane.f32.xlu1 %v7925_v59  ;;  %8070 = vadd.xlane.f32.xlu2 %v8069_v33 }
 0x995   : > { %v7885_v47 = vpop.xlane.xlu2 %7884 }
 0x996   : > { %v16220_v23 = vsub.f32 %v16102_v14, %v7885_v47  ;;  %v7831_v0 = vpop.f32.mrf.mxu2 }
 0x997   : > { %v16223_v6 = vadd.f32 %v16063_v4, %v7831_v0 }
 0x998   : > { %v9443_v17 = vpop.eup %9442  ;;  %v8006_v27 = vmul.f32 1.442695, %v16220_v23 }
 0x999   : > { %v7928_v22 = vsel %vm7867_vm12, %v16223_v6, -inf  ;;  %v8072_v55 = vsel %vm7867_vm12, %v9443_v17, 0.0 }
 0x99a   : > { %9444 = vpow2.f32 %v8006_v27  ;;  %7929 = vmax.xlane.f32.xlu2 %v7928_v22  ;;  %8073 = vadd.xlane.f32.xlu0 %v8072_v55 }
 0x99d   : > { %v7888_v13 = vpop.xlane.xlu0 %7887 }
 0x99e   : > { %v16230_v57 = vsub.f32 %v16109_v39, %v7888_v13  ;;  %v7834_v14 = vpop.f32.mrf.mxu2 }
 0x99f   : > { %v16233_v63 = vadd.f32 %v16063_v4, %v7834_v14 }
 0x9a0   : > { %v9445_v60 = vpop.eup %9444  ;;  %v8008_v25 = vmul.f32 1.442695, %v16230_v57 }
 0x9a1   : > { %v8075_v7 = vsel %vm7867_vm12, %v9445_v60, 0.0  ;;  %v7931_v58 = vsel %vm7867_vm12, %v16233_v63, -inf }
 0x9a2   : > { %9446 = vpow2.f32 %v8008_v25  ;;  %8076 = vadd.xlane.f32.xlu1 %v8075_v7  ;;  %7932 = vmax.xlane.f32.xlu0 %v7931_v58 }
 0x9a5   : > { %v7891_v45 = vpop.xlane.xlu1 %7890 }
 0x9a6   : > { %v16240_v16 = vsub.f32 %v16116_v1, %v7891_v45  ;;  %v7837_v39 = vpop.f32.mrf.mxu2 }
 0x9a7   : > { %v16243_v2 = vadd.f32 %v16063_v4, %v7837_v39 }
 0x9a8   : > { %v9447_v36 = vpop.eup %9446  ;;  %v8010_v54 = vmul.f32 1.442695, %v16240_v16 }
 0x9a9   : > { %v7934_v40 = vsel %vm7867_vm12, %v16243_v2, -inf  ;;  %v8078_v20 = vsel %vm7867_vm12, %v9447_v36, 0.0 }
 0x9aa   : > { %9448 = vpow2.f32 %v8010_v54  ;;  %7935 = vmax.xlane.f32.xlu1 %v7934_v40  ;;  %8079 = vadd.xlane.f32.xlu2 %v8078_v20 }
 0x9ad   : > { %v7894_v21 = vpop.xlane.xlu2 %7893 }
 0x9ae   : > { %v16250_v51 = vsub.f32 %v16123_v44, %v7894_v21  ;;  %v7840_v1 = vpop.f32.mrf.mxu2 }
 0x9af   : > { %v16253_v3 = vadd.f32 %v16063_v4, %v7840_v1 }
 0x9b0   : > { %v9449_v18 = vpop.eup %9448  ;;  %v8012_v19 = vmul.f32 1.442695, %v16250_v51 }
 0x9b1   : > { %v7937_v8 = vsel %vm7867_vm12, %v16253_v3, -inf  ;;  %v8081_v43 = vsel %vm7867_vm12, %v9449_v18, 0.0 }
 0x9b2   : > { %9450 = vpow2.f32 %v8012_v19  ;;  %7938 = vmax.xlane.f32.xlu2 %v7937_v8  ;;  %8082 = vadd.xlane.f32.xlu0 %v8081_v43 }
 0x9b5   : > { %v7897_v12 = vpop.xlane.xlu0 %7896 }
 0x9b6   : > { %v16260_v49 = vsub.f32 %v16130_v53, %v7897_v12  ;;  %v7843_v44 = vpop.f32.mrf.mxu2 }
 0x9b7   : > { %v16263_v41 = vadd.f32 %v16063_v4, %v7843_v44 }
 0x9b8   : > { %v9451_v32 = vpop.eup %9450  ;;  %v8014_v52 = vmul.f32 1.442695, %v16260_v49 }
 0x9b9   : > { %v8084_v9 = vsel %vm7867_vm12, %v9451_v32, 0.0  ;;  %v7940_v31 = vsel %vm7867_vm12, %v16263_v41, -inf }
 0x9ba   : > { %9452 = vpow2.f32 %v8014_v52  ;;  %8085 = vadd.xlane.f32.xlu1 %v8084_v9  ;;  %7941 = vmax.xlane.f32.xlu0 %v7940_v31 }
 0x9bd   : > { %v7900_v30 = vpop.xlane.xlu1 %7899 }
 0x9be   : > { %v16270_v48 = vsub.f32 %v16137_v46, %v7900_v30  ;;  %v7846_v53 = vpop.f32.mrf.mxu2 }
 0x9bf   : > { %v16273_v34 = vadd.f32 %v16063_v4, %v7846_v53 }
 0x9c0   : > { %v9453_v50 = vpop.eup %9452  ;;  %v8016_v35 = vmul.f32 1.442695, %v16270_v48 }
 0x9c1   : > { %v7943_v59 = vsel %vm7867_vm12, %v16273_v34, -inf  ;;  %v8087_v33 = vsel %vm7867_vm12, %v9453_v50, 0.0 }
 0x9c2   : > { %9454 = vpow2.f32 %v8016_v35  ;;  %7944 = vmax.xlane.f32.xlu1 %v7943_v59  ;;  %8088 = vadd.xlane.f32.xlu2 %v8087_v33 }
 0x9c5   : > { %v7903_v39 = vpop.xlane.xlu2 %7902 }
 0x9c6   : > { %v7849_v47 = vpop.f32.mrf.mxu2  ;;  %v16315_v44 = vsub.f32 %v16144_v28, %v7903_v39 }
 0x9c7   : > { %v16280_v0 = vadd.f32 %v16063_v4, %v7849_v47 }
 0x9c8   : > { %v9455_v46 = vpop.eup %9454 }
 0x9c9   : > { %v7946_v17 = vsel %vm7867_vm12, %v16280_v0, -inf  ;;  %v8090_v27 = vsel %vm7867_vm12, %v9455_v46, 0.0 }
 0x9ca   : > { %7947 = vmax.xlane.f32.xlu2 %v7946_v17  ;;  %8091 = vadd.xlane.f32.xlu0 %v8090_v27 }
 0x9cd   : > { %v7906_v14 = vpop.xlane.xlu0 %7905 }
 0x9ce   : > { %v7852_v22 = vpop.f32.mrf.mxu2  ;;  %v16294_v7 = vsub.f32 %v16151_v29, %v7906_v14 }
 0x9cf   : > { %v16286_v55 = vadd.f32 %v16063_v4, %v7852_v22 }
 0x9d0   : > { %v8020_v45 = vmul.f32 1.442695, %v16294_v7 }
 0x9d1   : > { %v7949_v13 = vsel %vm7867_vm12, %v16286_v55, -inf }
 0x9d2   : > { %7950 = vmax.xlane.f32.xlu0 %v7949_v13  ;;  %9456 = vpow2.f32 %v8020_v45 }
 0x9d5   : > { %v7909_v36 = vpop.xlane.xlu1 %7908 }
 0x9d6   : > { %v7855_v60 = vpop.f32.mrf.mxu2  ;;  %v16303_v20 = vsub.f32 %v16158_v10, %v7909_v36 }
 0x9d7   : > { %v16291_v25 = vadd.f32 %v16063_v4, %v7855_v60 }
 0x9d8   : > { %v8022_v21 = vmul.f32 1.442695, %v16303_v20  ;;  %v9457_v19 = vpop.eup %9456 }
 0x9d9   : > { %v7952_v58 = vsel %vm7867_vm12, %v16291_v25, -inf  ;;  %v8096_v32 = vsel %vm7867_vm12, %v9457_v19, 0.0 }
 0x9da   : > { %7953 = vmax.xlane.f32.xlu1 %v7952_v58  ;;  %9458 = vpow2.f32 %v8022_v21 }
 0x9dd   : > { %v7912_v1 = vpop.xlane.xlu2 %7911 }
 0x9de   : > { %v7858_v54 = vpop.f32.mrf.mxu2  ;;  %v16329_v59 = vsub.f32 %v16165_v61, %v7912_v1 }
 0x9df   : > { %v16300_v40 = vadd.f32 %v16063_v4, %v7858_v54 }
 0x9e0   : > { %v9459_v53 = vpop.eup %9458  ;;  %v8024_v17 = vmul.f32 1.442695, %v16329_v59 }
 0x9e1   : > { %v7955_v29 = vsel %vm7867_vm12, %v16300_v40, -inf }
 0x9e2   : > { %7956 = vmax.xlane.f32.xlu2 %v7955_v29 }
 0x9e5   : > { %v7915_v18 = vpop.xlane.xlu0 %7914 }
 0x9e6   : > { %v16309_v8 = vsub.f32 %v16174_v15, %v7915_v18  ;;  %v7861_v43 = vpop.f32.mrf.mxu2  ;;  %v8018_v15 = vmul.f32 1.442695, %v16315_v44 }
 0x9e7   : > { %v16312_v12 = vadd.f32 %v16063_v4, %v7861_v43 }
 0x9e8   : > { %v8026_v10 = vmul.f32 1.442695, %v16309_v8 }
 0x9e9   : > { %v7958_v52 = vsel %vm7867_vm12, %v16312_v12, -inf }
 0x9ea   : > { %9460 = vpow2.f32 %v8026_v10  ;;  %8097 = vadd.xlane.f32.xlu2 %v8096_v32  ;;  %7959 = vmax.xlane.f32.xlu0 %v7958_v52 }
 0x9ed   : > { %v8062_v9 = vpop.xlane.xlu2 %8061  ;;  %v7918_v31 = vpop.xlane.xlu1 %7917 }
 0x9ee   : > { %9462 = vlog2.f32 %v8062_v9  ;;  %v16323_v30 = vsub.f32 %v16183_v37, %v7918_v31  ;;  %v7864_v28 = vpop.f32.mrf.mxu2  ;;  %v8099_v37 = vsel %vm7867_vm12, %v9459_v53, 0.0 }
 0x9ef   : > { %v16326_v50 = vadd.f32 %v16063_v4, %v7864_v28  ;;  %9464 = vpow2.f32 %v8018_v15 }
 0x9f0   : > { %v9461_v35 = vpop.eup %9460  ;;  %v8028_v33 = vmul.f32 1.442695, %v16323_v30 }
 0x9f1   : > { %v8105_v47 = vsel %vm7867_vm12, %v9461_v35, 0.0  ;;  %v7961_v46 = vsel %vm7867_vm12, %v16326_v50, -inf }
 0x9f2   : > { %9466 = vpow2.f32 %v8028_v33  ;;  %8106 = vadd.xlane.f32.xlu2 %v8105_v47  ;;  %7962 = vmax.xlane.f32.xlu1 %v7961_v46 }
 0x9f3   : > { %8100 = vadd.xlane.f32.xlu0 %v8099_v37 }
 0x9f4   : > { %v9463_v4 = vpop.eup %9462 }
 0x9f5   : > { %v8157_v27 = vmul.f32 0.6931472, %v9463_v4  ;;  %v8065_v22 = vpop.xlane.xlu0 %8064  ;;  %v7921_v61 = vpop.xlane.xlu2 %7920 }
 0x9f6   : > { %v9465_v13 = vpop.eup %9464  ;;  %9468 = vlog2.f32 %v8065_v22  ;;  %v16346_v58 = vsub.f32 %v16193_v56, %v7921_v61 }
 0x9f7   : > { %v8220_v14 = vsub.f32 %v16171_v24, %v8157_v27  ;;  %9470 = vpow2.f32 %v8024_v17  ;;  %v8093_v45 = vsel %vm7867_vm12, %v9465_v13, 0.0 }
 0x9f8   : > { %v9467_v60 = vpop.eup %9466  ;;  %v8030_v54 = vmul.f32 1.442695, %v16346_v58 }
 0x9f9   : > { %8252 = vst.msk [vmem:[%s16342_s25] sm:$0xff] %vm7867_vm12, %v8220_v14  ;;  %v8108_v39 = vsel %vm7867_vm12, %v9467_v60, 0.0 }
 0x9fa   : > { %8094 = vadd.xlane.f32.xlu1 %v8093_v45 }
 0x9fb   : > { %8109 = vadd.xlane.f32.xlu0 %v8108_v39 }
 0x9fc   : > { %v9469_v36 = vpop.eup %9468 }
 0x9fd   : > { %v8159_v29 = vmul.f32 0.6931472, %v9469_v36  ;;  %v7924_v21 = vpop.xlane.xlu0 %7923  ;;  %v8068_v24 = vpop.xlane.xlu1 %8067 }
 0x9fe   : > { %v9471_v1 = vpop.eup %9470  ;;  %v16354_v18 = vsub.f32 %v16203_v42, %v7924_v21  ;;  %9472 = vlog2.f32 %v8068_v24 }
 0x9ff   : > { %v8221_v56 = vsub.f32 %v16180_v26, %v8159_v29  ;;  %9474 = vpow2.f32 %v8030_v54  ;;  %v8102_v43 = vsel %vm7867_vm12, %v9471_v1, 0.0 }
 0xa00   : > { %v8032_v19 = vmul.f32 1.442695, %v16354_v18 }
 0xa01   : > { %8253 = vst.msk [vmem:[%s16342_s25 + $0x8] sm:$0xff] %vm7867_vm12, %v8221_v56 }
 0xa02   : > { %9476 = vpow2.f32 %v8032_v19  ;;  %8103 = vadd.xlane.f32.xlu1 %v8102_v43 }
 0xa04   : > { %v9473_v10 = vpop.eup %9472 }
 0xa05   : > { %v8161_v32 = vmul.f32 0.6931472, %v9473_v10  ;;  %v8071_v52 = vpop.xlane.xlu2 %8070  ;;  %v7927_v15 = vpop.xlane.xlu1 %7926 }
 0xa06   : > { %v9475_v9 = vpop.eup %9474  ;;  %9478 = vlog2.f32 %v8071_v52  ;;  %v16362_v42 = vsub.f32 %v16213_v38, %v7927_v15 }
 0xa07   : > { %v8222_v26 = vsub.f32 %v16190_v5, %v8161_v32  ;;  %v8111_v35 = vsel %vm7867_vm12, %v9475_v9, 0.0 }
 0xa08   : > { %v9477_v31 = vpop.eup %9476  ;;  %v8034_v28 = vmul.f32 1.442695, %v16362_v42 }
 0xa09   : > { %8254 = vst.msk [vmem:[%s16342_s25 + $0x10] sm:$0xff] %vm7867_vm12, %v8222_v26  ;;  %v8114_v53 = vsel %vm7867_vm12, %v9477_v31, 0.0 }
 0xa0a   : > { %9480 = vpow2.f32 %v8034_v28  ;;  %8115 = vadd.xlane.f32.xlu2 %v8114_v53  ;;  %8112 = vadd.xlane.f32.xlu1 %v8111_v35 }
 0xa0c   : > { %v9479_v33 = vpop.eup %9478 }
 0xa0d   : > { %v8163_v47 = vmul.f32 0.6931472, %v9479_v33  ;;  %v7930_v46 = vpop.xlane.xlu2 %7929  ;;  %v8074_v38 = vpop.xlane.xlu0 %8073 }
 0xa0e   : > { %v16371_v37 = vsub.f32 %v16223_v6, %v7930_v46  ;;  %9482 = vlog2.f32 %v8074_v38 }
 0xa0f   : > { %v8223_v5 = vsub.f32 %v16200_v62, %v8163_v47 }
 0xa10   : > { %v9481_v4 = vpop.eup %9480  ;;  %v8036_v17 = vmul.f32 1.442695, %v16371_v37 }
 0xa11   : > { %8255 = vst.msk [vmem:[%s16342_s25 + $0x18] sm:$0xff] %vm7867_vm12, %v8223_v5  ;;  %v8117_v27 = vsel %vm7867_vm12, %v9481_v4, 0.0 }
 0xa12   : > { %9484 = vpow2.f32 %v8036_v17  ;;  %8118 = vadd.xlane.f32.xlu0 %v8117_v27 }
 0xa14   : > { %v9483_v22 = vpop.eup %9482 }
 0xa15   : > { %v8165_v61 = vmul.f32 0.6931472, %v9483_v22  ;;  %v7933_v13 = vpop.xlane.xlu0 %7932  ;;  %v8077_v14 = vpop.xlane.xlu1 %8076 }
 0xa16   : > { %v16379_v6 = vsub.f32 %v16233_v63, %v7933_v13  ;;  %9486 = vlog2.f32 %v8077_v14 }
 0xa17   : > { %v8224_v62 = vsub.f32 %v16210_v11, %v8165_v61 }
 0xa18   : > { %v9485_v60 = vpop.eup %9484  ;;  %v8038_v45 = vmul.f32 1.442695, %v16379_v6 }
 0xa19   : > { %8256 = vst.msk [vmem:[%s16342_s25 + $0x20] sm:$0xff] %vm7867_vm12, %v8224_v62  ;;  %v8120_v39 = vsel %vm7867_vm12, %v9485_v60, 0.0 }
 0xa1a   : > { %9488 = vpow2.f32 %v8038_v45  ;;  %8121 = vadd.xlane.f32.xlu1 %v8120_v39 }
 0xa1c   : > { %v9487_v36 = vpop.eup %9486 }
 0xa1d   : > { %v8167_v54 = vmul.f32 0.6931472, %v9487_v36  ;;  %v8080_v29 = vpop.xlane.xlu2 %8079  ;;  %v7936_v21 = vpop.xlane.xlu1 %7935 }
 0xa1e   : > { %9490 = vlog2.f32 %v8080_v29  ;;  %v16387_v63 = vsub.f32 %v16243_v2, %v7936_v21 }
 0xa1f   : > { %v8225_v11 = vsub.f32 %v16220_v23, %v8167_v54 }
 0xa20   : > { %v9489_v24 = vpop.eup %9488  ;;  %v8040_v1 = vmul.f32 1.442695, %v16387_v63 }
 0xa21   : > { %8257 = vst.msk [vmem:[%s16342_s25 + $0x28] sm:$0xff] %vm7867_vm12, %v8225_v11  ;;  %v8123_v56 = vsel %vm7867_vm12, %v9489_v24, 0.0 }
 0xa22   : > { %9492 = vpow2.f32 %v8040_v1  ;;  %8124 = vadd.xlane.f32.xlu2 %v8123_v56 }
 0xa24   : > { %v9491_v19 = vpop.eup %9490 }
 0xa25   : > { %v8169_v43 = vmul.f32 0.6931472, %v9491_v19  ;;  %v7939_v10 = vpop.xlane.xlu2 %7938  ;;  %v8083_v32 = vpop.xlane.xlu0 %8082 }
 0xa26   : > { %v16395_v52 = vsub.f32 %v16253_v3, %v7939_v10  ;;  %9494 = vlog2.f32 %v8083_v32 }
 0xa27   : > { %v8226_v23 = vsub.f32 %v16230_v57, %v8169_v43 }
 0xa28   : > { %v9493_v2 = vpop.eup %9492  ;;  %v8042_v15 = vmul.f32 1.442695, %v16395_v52 }
 0xa29   : > { %8258 = vst.msk [vmem:[%s16342_s25 + $0x30] sm:$0xff] %vm7867_vm12, %v8226_v23  ;;  %v8126_v9 = vsel %vm7867_vm12, %v9493_v2, 0.0 }
 0xa2a   : > { %9496 = vpow2.f32 %v8042_v15  ;;  %8127 = vadd.xlane.f32.xlu0 %v8126_v9 }
 0xa2c   : > { %v9495_v26 = vpop.eup %9494 }
 0xa2d   : > { %v8171_v31 = vmul.f32 0.6931472, %v9495_v26  ;;  %v7942_v28 = vpop.xlane.xlu0 %7941  ;;  %v8086_v53 = vpop.xlane.xlu1 %8085 }
 0xa2e   : > { %v16403_v3 = vsub.f32 %v16263_v41, %v7942_v28  ;;  %9498 = vlog2.f32 %v8086_v53 }
 0xa2f   : > { %v8227_v57 = vsub.f32 %v16240_v16, %v8171_v31 }
 0xa30   : > { %v9497_v35 = vpop.eup %9496  ;;  %v8044_v33 = vmul.f32 1.442695, %v16403_v3 }
 0xa31   : > { %8259 = vst.msk [vmem:[%s16342_s25 + $0x38] sm:$0xff] %vm7867_vm12, %v8227_v57  ;;  %v8129_v47 = vsel %vm7867_vm12, %v9497_v35, 0.0 }
 0xa32   : > { %9500 = vpow2.f32 %v8044_v33  ;;  %8130 = vadd.xlane.f32.xlu1 %v8129_v47 }
 0xa34   : > { %v9499_v46 = vpop.eup %9498 }
 0xa35   : > { %v8173_v38 = vmul.f32 0.6931472, %v9499_v46  ;;  %v8089_v5 = vpop.xlane.xlu2 %8088  ;;  %v7945_v4 = vpop.xlane.xlu1 %7944 }
 0xa36   : > { %9502 = vlog2.f32 %v8089_v5  ;;  %v16411_v41 = vsub.f32 %v16273_v34, %v7945_v4 }
 0xa37   : > { %v8228_v16 = vsub.f32 %v16250_v51, %v8173_v38 }
 0xa38   : > { %v9501_v17 = vpop.eup %9500  ;;  %v8046_v27 = vmul.f32 1.442695, %v16411_v41 }
 0xa39   : > { %8260 = vst.msk [vmem:[%s16342_s25 + $0x40] sm:$0xff] %vm7867_vm12, %v8228_v16  ;;  %v8132_v22 = vsel %vm7867_vm12, %v9501_v17, 0.0 }
 0xa3a   : > { %9504 = vpow2.f32 %v8046_v27  ;;  %8133 = vadd.xlane.f32.xlu2 %v8132_v22 }
 0xa3c   : > { %v9503_v61 = vpop.eup %9502 }
 0xa3d   : > { %v8175_v13 = vmul.f32 0.6931472, %v9503_v61  ;;  %v7948_v14 = vpop.xlane.xlu2 %7947  ;;  %v8092_v62 = vpop.xlane.xlu0 %8091 }
 0xa3e   : > { %v16419_v60 = vsub.f32 %v16280_v0, %v7948_v14  ;;  %9506 = vlog2.f32 %v8092_v62 }
 0xa3f   : > { %v8229_v51 = vsub.f32 %v16260_v49, %v8175_v13 }
 0xa40   : > { %v9505_v34 = vpop.eup %9504  ;;  %v8048_v45 = vmul.f32 1.442695, %v16419_v60 }
 0xa41   : > { %8261 = vst.msk [vmem:[%s16342_s25 + $0x48] sm:$0xff] %vm7867_vm12, %v8229_v51  ;;  %v8135_v39 = vsel %vm7867_vm12, %v9505_v34, 0.0 }
 0xa42   : > { %9508 = vpow2.f32 %v8048_v45  ;;  %8136 = vadd.xlane.f32.xlu0 %v8135_v39 }
 0xa44   : > { %v9507_v36 = vpop.eup %9506 }
 0xa45   : > { %v8177_v54 = vmul.f32 0.6931472, %v9507_v36  ;;  %v7951_v29 = vpop.xlane.xlu0 %7950 }
 0xa46   : > { %v16427_v21 = vsub.f32 %v16286_v55, %v7951_v29 }
 0xa47   : > { %v8230_v0 = vsub.f32 %v16270_v48, %v8177_v54 }
 0xa48   : > { %v9509_v11 = vpop.eup %9508  ;;  %v8050_v49 = vmul.f32 1.442695, %v16427_v21 }
 0xa49   : > { %8262 = vst.msk [vmem:[%s16342_s25 + $0x50] sm:$0xff] %vm7867_vm12, %v8230_v0  ;;  %v8138_v24 = vsel %vm7867_vm12, %v9509_v11, 0.0 }
 0xa4a   : > { %9510 = vpow2.f32 %v8050_v49  ;;  %8139 = vadd.xlane.f32.xlu1 %v8138_v24 }
 0xa4d   : > { %v7954_v1 = vpop.xlane.xlu1 %7953 }
 0xa4e   : > { %v16435_v56 = vsub.f32 %v16291_v25, %v7954_v1 }
 0xa50   : > { %v9511_v19 = vpop.eup %9510  ;;  %v8052_v43 = vmul.f32 1.442695, %v16435_v56 }
 0xa51   : > { %v8141_v55 = vsel %vm7867_vm12, %v9511_v19, 0.0 }
 0xa52   : > { %9512 = vpow2.f32 %v8052_v43  ;;  %8142 = vadd.xlane.f32.xlu2 %v8141_v55 }
 0xa55   : > { %v7957_v48 = vpop.xlane.xlu2 %7956 }
 0xa56   : > { %v16440_v10 = vsub.f32 %v16300_v40, %v7957_v48 }
 0xa58   : > { %v9513_v32 = vpop.eup %9512  ;;  %v8054_v23 = vmul.f32 1.442695, %v16440_v10 }
 0xa59   : > { %v8144_v2 = vsel %vm7867_vm12, %v9513_v32, 0.0 }
 0xa5a   : > { %9514 = vpow2.f32 %v8054_v23  ;;  %8145 = vadd.xlane.f32.xlu0 %v8144_v2 }
 0xa5d   : > { %v8098_v25 = vpop.xlane.xlu2 %8097  ;;  %v7960_v15 = vpop.xlane.xlu0 %7959 }
 0xa5e   : > { %9516 = vlog2.f32 %v8098_v25  ;;  %v16445_v9 = vsub.f32 %v16312_v12, %v7960_v15 }
 0xa60   : > { %v9515_v26 = vpop.eup %9514  ;;  %v8056_v31 = vmul.f32 1.442695, %v16445_v9 }
 0xa61   : > { %v8147_v40 = vsel %vm7867_vm12, %v9515_v26, 0.0 }
 0xa62   : > { %9518 = vpow2.f32 %v8056_v31  ;;  %8148 = vadd.xlane.f32.xlu1 %v8147_v40 }
 0xa64   : > { %v9517_v28 = vpop.eup %9516 }
 0xa65   : > { %v8181_v53 = vmul.f32 0.6931472, %v9517_v28  ;;  %v8107_v57 = vpop.xlane.xlu2 %8106  ;;  %v7963_v35 = vpop.xlane.xlu1 %7962 }
 0xa66   : > { %9520 = vlog2.f32 %v8107_v57  ;;  %v16450_v33 = vsub.f32 %v16326_v50, %v7963_v35  ;;  %v8101_v47 = vpop.xlane.xlu0 %8100 }
 0xa67   : > { %v8232_v12 = vsub.f32 %v16294_v7, %v8181_v53  ;;  %9522 = vlog2.f32 %v8101_v47 }
 0xa68   : > { %v9519_v46 = vpop.eup %9518  ;;  %v8058_v38 = vmul.f32 1.442695, %v16450_v33 }
 0xa69   : > { %8264 = vst.msk [vmem:[%s16342_s25 + $0x60] sm:$0xff] %vm7867_vm12, %v8232_v12  ;;  %v8150_v5 = vsel %vm7867_vm12, %v9519_v46, 0.0 }
 0xa6a   : > { %9524 = vpow2.f32 %v8058_v38  ;;  %8151 = vadd.xlane.f32.xlu2 %v8150_v5 }
 0xa6c   : > { %v9521_v4 = vpop.eup %9520 }
 0xa6d   : > { %v9523_v16 = vpop.eup %9522  ;;  %v8187_v17 = vmul.f32 0.6931472, %v9521_v4  ;;  %v8095_v50 = vpop.xlane.xlu1 %8094 }
 0xa6e   : > { %v8183_v27 = vmul.f32 0.6931472, %v9523_v16  ;;  %9526 = vlog2.f32 %v8095_v50  ;;  %v8110_v22 = vpop.xlane.xlu0 %8109 }
 0xa6f   : > { %v8235_v7 = vsub.f32 %v16309_v8, %v8187_v17  ;;  %9528 = vlog2.f32 %v8110_v22 }
 0xa70   : > { %v9525_v61 = vpop.eup %9524  ;;  %v8233_v13 = vsub.f32 %v16303_v20, %v8183_v27 }
 0xa71   : > { %8267 = vst.msk [vmem:[%s16342_s25 + $0x78] sm:$0xff] %vm7867_vm12, %v8235_v7  ;;  %v8153_v14 = vsel %vm7867_vm12, %v9525_v61, 0.0 }
 0xa72   : > { %8265 = vst.msk [vmem:[%s16342_s25 + $0x68] sm:$0xff] %vm7867_vm12, %v8233_v13  ;;  %8154 = vadd.xlane.f32.xlu0 %v8153_v14 }
 0xa74   : > { %v9527_v62 = vpop.eup %9526 }
 0xa75   : > { %v9529_v51 = vpop.eup %9528  ;;  %v8179_v34 = vmul.f32 0.6931472, %v9527_v62  ;;  %v8104_v45 = vpop.xlane.xlu1 %8103 }
 0xa76   : > { %v8189_v39 = vmul.f32 0.6931472, %v9529_v51  ;;  %9530 = vlog2.f32 %v8104_v45 }
 0xa77   : > { %v8231_v8 = vsub.f32 %v16315_v44, %v8179_v34 }
 0xa78   : > { %v8236_v36 = vsub.f32 %v16323_v30, %v8189_v39 }
 0xa79   : > { %8263 = vst.msk [vmem:[%s16342_s25 + $0x58] sm:$0xff] %vm7867_vm12, %v8231_v8 }
 0xa7a   : > { %8268 = vst.msk [vmem:[%s16342_s25 + $0x80] sm:$0xff] %vm7867_vm12, %v8236_v36 }
 0xa7c   : > { %v9531_v20 = vpop.eup %9530 }
 0xa7d   : > { %v8185_v54 = vmul.f32 0.6931472, %v9531_v20  ;;  %v8116_v29 = vpop.xlane.xlu2 %8115  ;;  %v8113_v0 = vpop.xlane.xlu1 %8112 }
 0xa7e   : > { %9532 = vlog2.f32 %v8116_v29 }
 0xa7f   : > { %v8234_v11 = vsub.f32 %v16329_v59, %v8185_v54  ;;  %9534 = vlog2.f32 %v8113_v0 }
 0xa81   : > { %8266 = vst.msk [vmem:[%s16342_s25 + $0x70] sm:$0xff] %vm7867_vm12, %v8234_v11 }
 0xa84   : > { %v9533_v44 = vpop.eup %9532 }
 0xa85   : > { %v9535_v49 = vpop.eup %9534  ;;  %v8193_v30 = vmul.f32 0.6931472, %v9533_v44  ;;  %v8119_v24 = vpop.xlane.xlu0 %8118 }
 0xa86   : > { %v8191_v1 = vmul.f32 0.6931472, %v9535_v49  ;;  %9536 = vlog2.f32 %v8119_v24 }
 0xa87   : > { %v8238_v19 = vsub.f32 %v16354_v18, %v8193_v30 }
 0xa88   : > { %v8237_v43 = vsub.f32 %v16346_v58, %v8191_v1 }
 0xa89   : > { %8270 = vst.msk [vmem:[%s16342_s25 + $0x90] sm:$0xff] %vm7867_vm12, %v8238_v19 }
 0xa8a   : > { %8269 = vst.msk [vmem:[%s16342_s25 + $0x88] sm:$0xff] %vm7867_vm12, %v8237_v43 }
 0xa8c   : > { %v9537_v59 = vpop.eup %9536 }
 0xa8d   : > { %v8195_v55 = vmul.f32 0.6931472, %v9537_v59  ;;  %v8122_v48 = vpop.xlane.xlu1 %8121 }
 0xa8e   : > { %9538 = vlog2.f32 %v8122_v48 }
 0xa8f   : > { %v8239_v32 = vsub.f32 %v16362_v42, %v8195_v55 }
 0xa91   : > { %8271 = vst.msk [vmem:[%s16342_s25 + $0x98] sm:$0xff] %vm7867_vm12, %v8239_v32 }
 0xa94   : > { %v9539_v23 = vpop.eup %9538 }
 0xa95   : > { %v8197_v2 = vmul.f32 0.6931472, %v9539_v23  ;;  %v8125_v25 = vpop.xlane.xlu2 %8124 }
 0xa96   : > { %9540 = vlog2.f32 %v8125_v25 }
 0xa97   : > { %v8240_v58 = vsub.f32 %v16371_v37, %v8197_v2 }
 0xa99   : > { %8272 = vst.msk [vmem:[%s16342_s25 + $0xa0] sm:$0xff] %vm7867_vm12, %v8240_v58 }
 0xa9c   : > { %v9541_v18 = vpop.eup %9540 }
 0xa9d   : > { %v8199_v15 = vmul.f32 0.6931472, %v9541_v18  ;;  %v8128_v26 = vpop.xlane.xlu0 %8127 }
 0xa9e   : > { %9542 = vlog2.f32 %v8128_v26 }
 0xa9f   : > { %v8241_v31 = vsub.f32 %v16379_v6, %v8199_v15 }
 0xaa1   : > { %8273 = vst.msk [vmem:[%s16342_s25 + $0xa8] sm:$0xff] %vm7867_vm12, %v8241_v31 }
 0xaa4   : > { %v9543_v42 = vpop.eup %9542 }
 0xaa5   : > { %v8201_v40 = vmul.f32 0.6931472, %v9543_v42  ;;  %v8131_v28 = vpop.xlane.xlu1 %8130 }
 0xaa6   : > { %9544 = vlog2.f32 %v8131_v28 }
 0xaa7   : > { %v8242_v53 = vsub.f32 %v16387_v63, %v8201_v40 }
 0xaa9   : > { %8274 = vst.msk [vmem:[%s16342_s25 + $0xb0] sm:$0xff] %vm7867_vm12, %v8242_v53 }
 0xaac   : > { %v9545_v37 = vpop.eup %9544 }
 0xaad   : > { %v8203_v57 = vmul.f32 0.6931472, %v9545_v37  ;;  %v8134_v35 = vpop.xlane.xlu2 %8133 }
 0xaae   : > { %9546 = vlog2.f32 %v8134_v35 }
 0xaaf   : > { %v8243_v47 = vsub.f32 %v16395_v52, %v8203_v57 }
 0xab1   : > { %8275 = vst.msk [vmem:[%s16342_s25 + $0xb8] sm:$0xff] %vm7867_vm12, %v8243_v47 }
 0xab4   : > { %v9547_v6 = vpop.eup %9546 }
 0xab5   : > { %v8205_v12 = vmul.f32 0.6931472, %v9547_v6  ;;  %v8137_v46 = vpop.xlane.xlu0 %8136 }
 0xab6   : > { %9548 = vlog2.f32 %v8137_v46 }
 0xab7   : > { %v8244_v38 = vsub.f32 %v16403_v3, %v8205_v12 }
 0xab9   : > { %8276 = vst.msk [vmem:[%s16342_s25 + $0xc0] sm:$0xff] %vm7867_vm12, %v8244_v38 }
 0xabc   : > { %v9549_v63 = vpop.eup %9548 }
 0xabd   : > { %v8207_v5 = vmul.f32 0.6931472, %v9549_v63  ;;  %v8140_v4 = vpop.xlane.xlu1 %8139 }
 0xabe   : > { %9550 = vlog2.f32 %v8140_v4 }
 0xabf   : > { %v8245_v16 = vsub.f32 %v16411_v41, %v8207_v5 }
 0xac1   : > { %8277 = vst.msk [vmem:[%s16342_s25 + $0xc8] sm:$0xff] %vm7867_vm12, %v8245_v16 }
 0xac4   : > { %v9551_v52 = vpop.eup %9550 }
 0xac5   : > { %v8209_v17 = vmul.f32 0.6931472, %v9551_v52  ;;  %v8143_v50 = vpop.xlane.xlu2 %8142 }
 0xac6   : > { %9552 = vlog2.f32 %v8143_v50 }
 0xac7   : > { %v8246_v27 = vsub.f32 %v16419_v60, %v8209_v17 }
 0xac9   : > { %8278 = vst.msk [vmem:[%s16342_s25 + $0xd0] sm:$0xff] %vm7867_vm12, %v8246_v27 }
 0xacc   : > { %v9553_v3 = vpop.eup %9552 }
 0xacd   : > { %v8211_v22 = vmul.f32 0.6931472, %v9553_v3  ;;  %v8146_v7 = vpop.xlane.xlu0 %8145 }
 0xace   : > { %9554 = vlog2.f32 %v8146_v7 }
 0xacf   : > { %v8247_v61 = vsub.f32 %v16427_v21, %v8211_v22 }
 0xad1   : > { %8279 = vst.msk [vmem:[%s16342_s25 + $0xd8] sm:$0xff] %vm7867_vm12, %v8247_v61 }
 0xad4   : > { %v9555_v41 = vpop.eup %9554 }
 0xad5   : > { %v8213_v13 = vmul.f32 0.6931472, %v9555_v41  ;;  %v8149_v14 = vpop.xlane.xlu1 %8148 }
 0xad6   : > { %9556 = vlog2.f32 %v8149_v14 }
 0xad7   : > { %v8248_v62 = vsub.f32 %v16435_v56, %v8213_v13 }
 0xad9   : > { %8280 = vst.msk [vmem:[%s16342_s25 + $0xe0] sm:$0xff] %vm7867_vm12, %v8248_v62 }
 0xadc   : > { %v9557_v60 = vpop.eup %9556 }
 0xadd   : > { %v8215_v51 = vmul.f32 0.6931472, %v9557_v60  ;;  %v8152_v34 = vpop.xlane.xlu2 %8151 }
 0xade   : > { %9558 = vlog2.f32 %v8152_v34 }
 0xadf   : > { %v8249_v45 = vsub.f32 %v16440_v10, %v8215_v51 }
 0xae1   : > { %8281 = vst.msk [vmem:[%s16342_s25 + $0xe8] sm:$0xff] %vm7867_vm12, %v8249_v45 }
 0xae4   : > { %v9559_v21 = vpop.eup %9558 }
 0xae5   : > { %v8217_v39 = vmul.f32 0.6931472, %v9559_v21  ;;  %v8155_v8 = vpop.xlane.xlu0 %8154 }
 0xae6   : > { %9560 = vlog2.f32 %v8155_v8 }
 0xae7   : > { %v8250_v36 = vsub.f32 %v16445_v9, %v8217_v39 }
 0xae9   : > { %8282 = vst.msk [vmem:[%s16342_s25 + $0xf0] sm:$0xff] %vm7867_vm12, %v8250_v36 }
 0xaec   : > { %v9561_v56 = vpop.eup %9560 }
 0xaed   : > { %v8219_v20 = vmul.f32 0.6931472, %v9561_v56 }
 0xaef   : > { %v8251_v54 = vsub.f32 %v16450_v33, %v8219_v20 }
 0xaf1   : > { %8283 = vst.msk [vmem:[%s16342_s25 + $0xf8] sm:$0xff] %vm7867_vm12, %v8251_v54 }
 0xaf2 PF: > { %s20_s13 = sadd.s32 1, %s9601_s13  }
 0xaf3   : > { %p17_p4 = scmp.ge.s32.totalorder %s20_s13, 4  }
 0xaf5   :  { %19 = sbr.rel (!%p17_p4) target bundleno = 1 (0x1), region = 101 }

</bundles_post_ra>
